<compile_context>
chip_gen: v7x
topology: tpu7x:2x2x1
jax: 0.10.0
libtpu: 0.0.40
codegen_flags: <defaults>
</compile_context>

<pallas_src>
import math
import numpy as np

import jax
import jax.numpy as jnp
from jax.experimental import pallas as pl
from jax.experimental.pallas import tpu as pltpu


# ---------------------------------------------------------------------------
# host-side helpers (numpy / plain JAX glue)
# ---------------------------------------------------------------------------

def _relative_position_index(ws):
    coords = np.stack(np.meshgrid(np.arange(ws), np.arange(ws), indexing="ij"))
    cf = coords.reshape(2, -1)
    rel = (cf[:, :, None] - cf[:, None, :]).transpose(1, 2, 0)  # (N, N, 2)
    rel[:, :, 0] += ws - 1
    rel[:, :, 1] += ws - 1
    rel[:, :, 0] *= 2 * ws - 1
    return rel.sum(-1).astype(np.int32)                          # (N, N)


def _shift_attn_mask(Hr, Wr, ws, shift):
    """Swin shifted-window attention mask, (nW, N, N) with 0 / -100."""
    img = np.zeros((1, Hr, Wr, 1), np.float32)
    slices = (slice(0, -ws), slice(-ws, -shift), slice(-shift, None))
    cnt = 0
    for hs in slices:
        for wss in slices:
            img[:, hs, wss, :] = cnt
            cnt += 1
    mw = img.reshape(1, Hr // ws, ws, Wr // ws, ws, 1)
    mw = mw.transpose(0, 1, 3, 2, 4, 5).reshape(-1, ws * ws)     # (nW, N)
    am = mw[:, None, :] - mw[:, :, None]                         # (nW, N, N)
    return np.where(am != 0, -100.0, 0.0).astype(np.float32)


def window_partition(x, ws):
    B, Hr, Wr, C = x.shape
    x = x.reshape(B, Hr // ws, ws, Wr // ws, ws, C)
    x = jnp.transpose(x, (0, 1, 3, 2, 4, 5))
    return x.reshape(-1, ws * ws, C)


def window_reverse(wins, ws, Hr, Wr):
    C = wins.shape[-1]
    B = wins.shape[0] // ((Hr // ws) * (Wr // ws))
    x = wins.reshape(B, Hr // ws, Wr // ws, ws, ws, C)
    x = jnp.transpose(x, (0, 1, 3, 2, 4, 5))
    return x.reshape(B, Hr, Wr, C)


_SQRT_2_OVER_PI = math.sqrt(2.0 / math.pi)


def _gelu_tanh(x):
    # TODO(synk): PyTorch nn.GELU default is the exact erf form; the tanh
    # approximation is used here (and in the JAX reference) to guarantee
    # Mosaic lowering.  |error| < 4e-4.
    return 0.5 * x * (1.0 + jnp.tanh(_SQRT_2_OVER_PI * (x + 0.044715 * x * x * x)))


def _pick_window_block(B_, N, nWe, max_rows):
    """WB windows per grid step: multiple of nWe, divides B_, rows mult of 8.

    Prefers choices whose grid length is even and >= 2 so that on v7x both
    TensorCores receive work under dimension_semantics=('parallel',).
    """
    cands = [w for w in range(nWe, B_ + 1, nWe)
             if B_ % w == 0 and (w * N) % 8 == 0]
    if not cands:
        return B_
    fit = [w for w in cands if w * N <= max_rows]
    even = [w for w in fit if (B_ // w) >= 2 and (B_ // w) % 2 == 0]
    if even:
        return max(even)
    if fit:
        return max(fit)
    return min(cands)


def _pick_row_block(rows, max_rows):
    cands = [r for r in range(8, rows + 1, 8) if rows % r == 0]
    if not cands:
        return rows
    fit = [r for r in cands if r <= max_rows]
    even = [r for r in fit if (rows // r) >= 2 and (rows // r) % 2 == 0]
    if even:
        return max(even)
    if fit:
        return max(fit)
    return min(cands)


# ---------------------------------------------------------------------------
# kernel 1: fused LN1 + window attention (+ rel-pos bias / shift mask) + proj
#           + residual, WB windows per grid step
# ---------------------------------------------------------------------------

def _make_attn_kernel(WB, N, C, H, hd, nWe, scale, eps, mxu_dtype):
    R = WB * N
    k_img = WB // nWe

    def kernel(x_ref, g_ref, b_ref, wqkv_ref, bqkv_ref, bias_ref,
               wproj_ref, bproj_ref, o_ref):
        x = x_ref[...].astype(jnp.float32)                       # (R, C)

        # --- LayerNorm (norm1), fused; elementwise kept f32 ---
        mu = jnp.mean(x, axis=-1, keepdims=True)
        xc = x - mu
        var = jnp.mean(xc * xc, axis=-1, keepdims=True)
        xn = xc * jax.lax.rsqrt(var + eps)
        xn = xn * g_ref[...] + b_ref[...]                        # (1,C) broadcast
        xm = xn.astype(mxu_dtype)

        # --- full-width QKV projection: (R,C)x(C,3C), f32 accumulate ---
        qkv = jnp.dot(xm, wqkv_ref[...],
                      preferred_element_type=jnp.float32) + bqkv_ref[...]  # (R,3C)

        head_outs = []
        for h in range(H):                                       # small static loop
            q = qkv[:, h * hd:(h + 1) * hd] * scale              # (R, hd)
            k = qkv[:, C + h * hd:C + (h + 1) * hd]
            v = qkv[:, 2 * C + h * hd:2 * C + (h + 1) * hd]
            qw = q.reshape(WB, N, hd).astype(mxu_dtype)
            kw = k.reshape(WB, N, hd).astype(mxu_dtype)
            vw = v.reshape(WB, N, hd).astype(mxu_dtype)

            # window-batched q @ k^T  -> (WB, N, N), f32
            s = jnp.einsum("wnd,wmd->wnm", qw, kw,
                           preferred_element_type=jnp.float32)

            # rel-pos bias (+ shift mask), resident in VMEM, per local slot
            bias_h = bias_ref[h]                                 # (nWe, N, N)
            s = (s.reshape(k_img, nWe, N, N) + bias_h[None]).reshape(WB, N, N)

            # softmax in f32; EUP approx reciprocal + one Newton step
            s = s - jnp.max(s, axis=-1, keepdims=True)
            p = jnp.exp(s)
            denom = jnp.sum(p, axis=-1, keepdims=True)
            inv = pl.reciprocal(denom, approx=True)
            inv = inv * (2.0 - denom * inv)
            p = p * inv

            o_h = jnp.einsum("wnm,wmd->wnd", p.astype(mxu_dtype), vw,
                             preferred_element_type=jnp.float32)  # (WB, N, hd)
            head_outs.append(o_h.reshape(R, hd))

        # lane-concat head outputs -> one full-width (R,C)x(C,C) projection
        attn = jnp.concatenate(head_outs, axis=-1).astype(mxu_dtype)   # (R, C)
        y = jnp.dot(attn, wproj_ref[...], preferred_element_type=jnp.float32)

        o_ref[...] = (x + y + bproj_ref[...]).astype(o_ref.dtype)

    return kernel


def _window_attention_block(xw, prep, block_rows=512):
    """xw: (B_, N, C) partitioned windows.  Returns xw + Attn(LN1(xw))."""
    B_, N, C = xw.shape
    H = prep["num_heads"]
    hd = C // H
    bias = prep["bias"]                                          # (H, nWe, N, N)
    nWe = bias.shape[1]
    mxu_dtype = prep["wqkv"].dtype

    # TODO(synk): for very large nWe (e.g. stage-1 56x56, ws=7 on v7x) relax the
    # "whole image per grid step" constraint via a scalar-prefetch window->slot
    # table in the bias index_map.
    WB = _pick_window_block(B_, N, nWe, block_rows)
    assert B_ % WB == 0 and WB % nWe == 0
    R = WB * N

    x2 = xw.reshape(B_ * N, C)
    kernel = _make_attn_kernel(WB, N, C, H, hd, nWe, prep["scale"], 1e-5, mxu_dtype)

    wbytes = jnp.dtype(mxu_dtype).itemsize
    flops = (B_ * N * 2 * C * 3 * C            # qkv projection
             + B_ * H * 4 * N * N * hd         # q@k^T and p@v
             + B_ * N * 2 * C * C)             # output projection
    cost = pl.CostEstimate(
        flops=flops,
        transcendentals=B_ * H * N * N,
        bytes_accessed=(4 * 2 * B_ * N * C                       # x in/out (f32)
                        + wbytes * (3 * C * C + C * C)           # Wqkv + Wproj
                        + 4 * (H * nWe * N * N + 3 * C + 4 * C)))  # bias + vecs

    out2 = pl.pallas_call(
        kernel,
        out_shape=jax.ShapeDtypeStruct((B_ * N, C), xw.dtype),
        grid_spec=pltpu.PrefetchScalarGridSpec(
            num_scalar_prefetch=0,
            grid=(B_ // WB,),
            in_specs=[
                pl.BlockSpec((R, C), lambda b: (b, 0)),                   # x rows
                pl.BlockSpec((1, C), lambda b: (0, 0)),                   # LN1 gamma
                pl.BlockSpec((1, C), lambda b: (0, 0)),                   # LN1 beta
                pl.BlockSpec((C, 3 * C), lambda b: (0, 0)),               # Wqkv (resident, mxu dtype)
                pl.BlockSpec((1, 3 * C), lambda b: (0, 0)),               # qkv bias (f32)
                pl.BlockSpec((H, nWe, N, N), lambda b: (0, 0, 0, 0)),     # rel bias (+mask), resident
                pl.BlockSpec((C, C), lambda b: (0, 0)),                   # Wproj (resident, mxu dtype)
                pl.BlockSpec((1, C), lambda b: (0, 0)),                   # proj bias
            ],
            out_specs=pl.BlockSpec((R, C), lambda b: (b, 0)),
        ),
        compiler_params=pltpu.CompilerParams(
            dimension_semantics=("parallel",),
            vmem_limit_bytes=48 * 1024 * 1024),
        cost_estimate=cost,
    )(x2, prep["g1"], prep["b1"], prep["wqkv"], prep["bqkv"], bias,
      prep["wproj"], prep["bproj"])

    return out2.reshape(B_, N, C)


# ---------------------------------------------------------------------------
# kernel 2: fused LN2 + MLP (fc1 -> GELU -> fc2) + residual, row-tiled
# ---------------------------------------------------------------------------

def _make_mlp_kernel(eps, mxu_dtype):
    def kernel(x_ref, g_ref, b_ref, w1_ref, b1_ref, w2_ref, b2_ref, o_ref):
        x = x_ref[...].astype(jnp.float32)                       # (TR, C)
        mu = jnp.mean(x, axis=-1, keepdims=True)
        xc = x - mu
        var = jnp.mean(xc * xc, axis=-1, keepdims=True)
        xn = (xc * jax.lax.rsqrt(var + eps)) * g_ref[...] + b_ref[...]

        h = jnp.dot(xn.astype(mxu_dtype), w1_ref[...],
                    preferred_element_type=jnp.float32) + b1_ref[...]
        h = _gelu_tanh(h)                                        # f32 elementwise
        y = jnp.dot(h.astype(mxu_dtype), w2_ref[...],
                    preferred_element_type=jnp.float32) + b2_ref[...]
        o_ref[...] = (x + y).astype(o_ref.dtype)
    return kernel


def _mlp_block(x, prep, block_rows=512):
    B, L, C = x.shape
    Ch = prep["w1"].shape[1]
    mxu_dtype = prep["w1"].dtype
    rows = B * L
    TR = _pick_row_block(rows, block_rows)
    x2 = x.reshape(rows, C)

    kernel = _make_mlp_kernel(1e-5, mxu_dtype)
    wbytes = jnp.dtype(mxu_dtype).itemsize
    cost = pl.CostEstimate(
        flops=rows * (2 * C * Ch + 2 * Ch * C),
        transcendentals=rows * Ch,
        bytes_accessed=(4 * 2 * rows * C
                        + wbytes * 2 * C * Ch
                        + 4 * (2 * C + Ch + C)))

    out2 = pl.pallas_call(
        kernel,
        out_shape=jax.ShapeDtypeStruct((rows, C), x.dtype),
        grid_spec=pltpu.PrefetchScalarGridSpec(
            num_scalar_prefetch=0,
            grid=(rows // TR,),
            in_specs=[
                pl.BlockSpec((TR, C), lambda b: (b, 0)),
                pl.BlockSpec((1, C), lambda b: (0, 0)),          # LN2 gamma
                pl.BlockSpec((1, C), lambda b: (0, 0)),          # LN2 beta
                pl.BlockSpec((C, Ch), lambda b: (0, 0)),         # fc1 W (resident, mxu dtype)
                pl.BlockSpec((1, Ch), lambda b: (0, 0)),
                pl.BlockSpec((Ch, C), lambda b: (0, 0)),         # fc2 W (resident, mxu dtype)
                pl.BlockSpec((1, C), lambda b: (0, 0)),
            ],
            out_specs=pl.BlockSpec((TR, C), lambda b: (b, 0)),
        ),
        compiler_params=pltpu.CompilerParams(
            dimension_semantics=("parallel",),
            vmem_limit_bytes=48 * 1024 * 1024),
        cost_estimate=cost,
    )(x2, prep["g2"], prep["b2"], prep["w1"], prep["b1m"], prep["w2"], prep["b2m"])
    return out2.reshape(B, L, C)


# ---------------------------------------------------------------------------
# BasicLayer forward (Pallas path)
# ---------------------------------------------------------------------------

def prepare_block_params(bp, resolution, ws, shift, num_heads, qk_scale=None,
                         mxu_dtype=jnp.bfloat16):
    """One-time, x-independent parameter prep (weight pre-cast + bias fold)."""
    C = bp["wqkv"].shape[0]
    H = num_heads
    assert C % H == 0
    hd = C // H
    N = ws * ws
    scale = qk_scale if qk_scale is not None else hd ** (-0.5)

    rpi = _relative_position_index(ws).reshape(-1)
    rel = bp["rel_pos_table"][jnp.asarray(rpi)].reshape(N, N, H)
    rel = jnp.transpose(rel, (2, 0, 1))                          # (H, N, N)
    if shift > 0:
        mask = jnp.asarray(_shift_attn_mask(resolution[0], resolution[1], ws, shift))
        bias = rel[:, None, :, :] + mask[None, :, :, :]          # (H, nW, N, N)
    else:
        bias = rel[:, None, :, :]                                # (H, 1, N, N)

    Ch = bp["w1"].shape[1]
    return {
        "g1": bp["g1"].reshape(1, C).astype(jnp.float32),
        "b1": bp["b1"].reshape(1, C).astype(jnp.float32),
        "wqkv": bp["wqkv"].astype(mxu_dtype),                    # (C, 3C) = qkv.weight.T
        "bqkv": bp["bqkv"].reshape(1, 3 * C).astype(jnp.float32),
        "bias": bias.astype(jnp.float32),
        "wproj": bp["wproj"].astype(mxu_dtype),                  # (C, C) = proj.weight.T
        "bproj": bp["bproj"].reshape(1, C).astype(jnp.float32),
        "g2": bp["g2"].reshape(1, C).astype(jnp.float32),
        "b2": bp["b2"].reshape(1, C).astype(jnp.float32),
        "w1": bp["w1"].astype(mxu_dtype),
        "b1m": bp["b1mlp"].reshape(1, Ch).astype(jnp.float32),
        "w2": bp["w2"].astype(mxu_dtype),
        "b2m": bp["b2mlp"].reshape(1, C).astype(jnp.float32),
        "num_heads": H, "scale": scale,
    }


def prepare_basic_layer_params(params, input_resolution, depth, num_heads,
                               window_size, qk_scale=None, mxu_dtype=jnp.bfloat16):
    """Hoisted per-block prep: run once at init, reuse for every forward."""
    Hr, Wr = input_resolution
    ws = window_size
    if min(Hr, Wr) <= window_size:                               # Swin clamp
        ws = min(Hr, Wr)
    preps = []
    for i in range(depth):
        shift = 0 if i % 2 == 0 else ws // 2
        if min(Hr, Wr) <= window_size:
            shift = 0
        prep = prepare_block_params(params["blocks"][i], (Hr, Wr), ws, shift,
                                    num_heads, qk_scale, mxu_dtype)
        prep["ws"] = ws
        prep["shift"] = shift
        preps.append(prep)
    return preps


def swin_block_forward(x, prep, resolution, ws, shift, block_rows=512):
    Hr, Wr = resolution
    B, L, C = x.shape
    assert L == Hr * Wr and Hr % ws == 0 and Wr % ws == 0

    xi = x.reshape(B, Hr, Wr, C)
    if shift > 0:
        xi = jnp.roll(xi, shift=(-shift, -shift), axis=(1, 2))
    # TODO(synk): fold window partition/reverse into the attention BlockSpec
    # (grid over window row-bands, image-layout in/out) to cut the two HBM
    # transpose passes per block.
    xw = window_partition(xi, ws)                                # (B_, N, C)

    # fused LN1 + W-MSA + proj + residual (LN commutes with the row permutation)
    yw = _window_attention_block(xw, prep, block_rows)

    yi = window_reverse(yw, ws, Hr, Wr)
    if shift > 0:
        yi = jnp.roll(yi, shift=(shift, shift), axis=(1, 2))
    y = yi.reshape(B, L, C)

    # fused LN2 + MLP + residual
    return _mlp_block(y, prep, block_rows)


def basic_layer_forward(x, preps, input_resolution, block_rows=512):
    for prep in preps:
        x = swin_block_forward(x, prep, input_resolution, prep["ws"], prep["shift"],
                               block_rows)
    # TODO(synk): downsample (PatchMerging) is None by default in BasicLayer; not implemented.
    return x


# ---------------------------------------------------------------------------
# pure-JAX reference (mirrors the PyTorch forward, tanh-GELU as noted)
# ---------------------------------------------------------------------------

def _layer_norm_ref(x, g, b, eps=1e-5):
    mu = jnp.mean(x, axis=-1, keepdims=True)
    var = jnp.mean((x - mu) ** 2, axis=-1, keepdims=True)
    return (x - mu) * jax.lax.rsqrt(var + eps) * g + b


def _window_attention_ref(xw, bp, ws, num_heads, mask, qk_scale=None):
    B_, N, C = xw.shape
    H = num_heads
    hd = C // H
    scale = qk_scale if qk_scale is not None else hd ** (-0.5)
    qkv = xw @ bp["wqkv"] + bp["bqkv"]
    qkv = qkv.reshape(B_, N, 3, H, hd).transpose(2, 0, 3, 1, 4)
    q, k, v = qkv[0], qkv[1], qkv[2]
    q = q * scale
    attn = jnp.einsum("bhnd,bhmd->bhnm", q, k)
    rpi = _relative_position_index(ws).reshape(-1)
    rel = bp["rel_pos_table"][jnp.asarray(rpi)].reshape(N, N, H)
    attn = attn + jnp.transpose(rel, (2, 0, 1))[None]
    if mask is not None:
        nW = mask.shape[0]
        attn = attn.reshape(B_ // nW, nW, H, N, N) + mask[None, :, None]
        attn = attn.reshape(B_, H, N, N)
    attn = jax.nn.softmax(attn, axis=-1)
    out = jnp.einsum("bhnm,bhmd->bhnd", attn, v)
    out = out.transpose(0, 2, 1, 3).reshape(B_, N, C)
    return out @ bp["wproj"] + bp["bproj"]


def _swin_block_ref(x, bp, resolution, num_heads, ws, shift, qk_scale=None):
    Hr, Wr = resolution
    B, L, C = x.shape
    shortcut = x
    xn = _layer_norm_ref(x, bp["g1"], bp["b1"])
    xi = xn.reshape(B, Hr, Wr, C)
    if shift > 0:
        xi = jnp.roll(xi, shift=(-shift, -shift), axis=(1, 2))
        mask = jnp.asarray(_shift_attn_mask(Hr, Wr, ws, shift))
    else:
        mask = None
    xw = window_partition(xi, ws)
    aw = _window_attention_ref(xw, bp, ws, num_heads, mask, qk_scale)
    ai = window_reverse(aw, ws, Hr, Wr)
    if shift > 0:
        ai = jnp.roll(ai, shift=(shift, shift), axis=(1, 2))
    x = shortcut + ai.reshape(B, L, C)
    xn2 = _layer_norm_ref(x, bp["g2"], bp["b2"])
    h = _gelu_tanh(xn2 @ bp["w1"] + bp["b1mlp"])
    return x + (h @ bp["w2"] + bp["b2mlp"])


def basic_layer_reference(x, params, input_resolution, depth, num_heads, window_size,
                          qk_scale=None):
    Hr, Wr = input_resolution
    ws = window_size
    if min(Hr, Wr) <= window_size:
        ws = min(Hr, Wr)
    for i in range(depth):
        shift = 0 if i % 2 == 0 else ws // 2
        if min(Hr, Wr) <= window_size:
            shift = 0
        x = _swin_block_ref(x, params["blocks"][i], (Hr, Wr), num_heads, ws, shift, qk_scale)
    return x


# ---------------------------------------------------------------------------
# parameter init (PyTorch-style defaults, stored with Linear weights transposed)
# ---------------------------------------------------------------------------

def init_basic_layer_params(key, dim, depth, num_heads, window_size, mlp_ratio=4.0):
    Ch = int(dim * mlp_ratio)
    table_len = (2 * window_size - 1) ** 2
    blocks = []
    keys = jax.random.split(key, depth)
    for i in range(depth):
        ks = jax.random.split(keys[i], 9)
        lim = 1.0 / math.sqrt(dim)
        limh = 1.0 / math.sqrt(Ch)
        blocks.append({
            "g1": jnp.ones((dim,), jnp.float32),
            "b1": jnp.zeros((dim,), jnp.float32),
            "rel_pos_table": 0.02 * jax.random.truncated_normal(
                ks[0], -2.0, 2.0, (table_len, num_heads), jnp.float32),
            "wqkv": jax.random.uniform(ks[1], (dim, 3 * dim), jnp.float32, -lim, lim),
            "bqkv": jax.random.uniform(ks[2], (3 * dim,), jnp.float32, -lim, lim),
            "wproj": jax.random.uniform(ks[3], (dim, dim), jnp.float32, -lim, lim),
            "bproj": jax.random.uniform(ks[4], (dim,), jnp.float32, -lim, lim),
            "g2": jnp.ones((dim,), jnp.float32),
            "b2": jnp.zeros((dim,), jnp.float32),
            "w1": jax.random.uniform(ks[5], (dim, Ch), jnp.float32, -lim, lim),
            "b1mlp": jax.random.uniform(ks[6], (Ch,), jnp.float32, -lim, lim),
            "w2": jax.random.uniform(ks[7], (Ch, dim), jnp.float32, -limh, limh),
            "b2mlp": jax.random.uniform(ks[8], (dim,), jnp.float32, -limh, limh),
        })
    return {"blocks": blocks}


# ---------------------------------------------------------------------------
# demo / correctness check
# ---------------------------------------------------------------------------

if __name__ == "__main__":
    key = jax.random.PRNGKey(0)

    dim = 128                      # C = 128 -> lane-dense stores
    num_heads = 4                  # head_dim = 32 (Swin-style)
    window_size = 4                # N = 16 tokens per window
    input_resolution = (16, 16)    # nW = 16 windows per image
    depth = 2                      # one W-MSA block + one shifted SW-MSA block
    B = 2
    L = input_resolution[0] * input_resolution[1]

    kp, kx = jax.random.split(key)
    params = init_basic_layer_params(kp, dim, depth, num_heads, window_size)
    x = jax.random.normal(kx, (B, L, dim), jnp.float32)

    ref = jax.block_until_ready(
        basic_layer_reference(x, params, input_resolution, depth, num_heads, window_size))

    # f32 MXU path (tight check)
    preps_f32 = prepare_basic_layer_params(params, input_resolution, depth, num_heads,
                                           window_size, mxu_dtype=jnp.float32)
    out = jax.block_until_ready(basic_layer_forward(x, preps_f32, input_resolution))
    np.testing.assert_allclose(np.asarray(out), np.asarray(ref), rtol=1e-3, atol=1e-3)

    # bf16 MXU-input path (default; softmax/LN/bias/accumulate stay f32)
    preps_bf16 = prepare_basic_layer_params(params, input_resolution, depth, num_heads,
                                            window_size, mxu_dtype=jnp.bfloat16)
    out_bf16 = jax.block_until_ready(basic_layer_forward(x, preps_bf16, input_resolution))
    np.testing.assert_allclose(np.asarray(out_bf16), np.asarray(ref), rtol=1e-1, atol=1e-1)

    print("KERNEL_OK")
</pallas_src>

<mosaic_0001>
module attributes {stable_mosaic.version = 11 : i64} {
  func.func @kernel(%arg0: i32, %arg1: memref<256x128xf32, #tpu.memory_space<vmem>>, %arg2: memref<1x128xf32, #tpu.memory_space<vmem>>, %arg3: memref<1x128xf32, #tpu.memory_space<vmem>>, %arg4: memref<128x384xf32, #tpu.memory_space<vmem>>, %arg5: memref<1x384xf32, #tpu.memory_space<vmem>>, %arg6: memref<4x1x16x16xf32, #tpu.memory_space<vmem>>, %arg7: memref<128x128xf32, #tpu.memory_space<vmem>>, %arg8: memref<1x128xf32, #tpu.memory_space<vmem>>, %arg9: memref<256x128xf32, #tpu.memory_space<vmem>>) attributes {dimension_semantics = [#tpu.dimension_semantics<parallel>], iteration_bounds = array<i64: 2>, scalar_prefetch = 0 : i64, scratch_operands = 0 : i64, tpu.core_type = #tpu.core_type<tc>, window_params = [{transform_indices = @transform_0, window_bounds = array<i64: 256, 128>}, {pipeline_mode = #tpu.pipeline_mode<synchronous>, transform_indices = @transform_1, window_bounds = array<i64: 1, 128>}, {pipeline_mode = #tpu.pipeline_mode<synchronous>, transform_indices = @transform_2, window_bounds = array<i64: 1, 128>}, {pipeline_mode = #tpu.pipeline_mode<synchronous>, transform_indices = @transform_3, window_bounds = array<i64: 128, 384>}, {pipeline_mode = #tpu.pipeline_mode<synchronous>, transform_indices = @transform_4, window_bounds = array<i64: 1, 384>}, {pipeline_mode = #tpu.pipeline_mode<synchronous>, transform_indices = @transform_5, window_bounds = array<i64: 4, 1, 16, 16>}, {pipeline_mode = #tpu.pipeline_mode<synchronous>, transform_indices = @transform_6, window_bounds = array<i64: 128, 128>}, {pipeline_mode = #tpu.pipeline_mode<synchronous>, transform_indices = @transform_7, window_bounds = array<i64: 1, 128>}, {transform_indices = @transform_8, window_bounds = array<i64: 256, 128>}]} {
    %c0 = arith.constant 0 : index
    %c0_0 = arith.constant 0 : index
    %0 = vector.load %arg1[%c0, %c0_0] : memref<256x128xf32, #tpu.memory_space<vmem>>, vector<256x128xf32>
    %cst = arith.constant dense<0.000000e+00> : vector<256xf32>
    %1 = vector.multi_reduction <add>, %0, %cst [1] : vector<256x128xf32> to vector<256xf32>
    %2 = vector.shape_cast %1 : vector<256xf32> to vector<256x1xf32>
    %cst_1 = arith.constant 1.280000e+02 : f32
    %3 = vector.broadcast %cst_1 : f32 to vector<256x1xf32>
    %4 = arith.divf %2, %3 : vector<256x1xf32>
    %5 = vector.broadcast %4 : vector<256x1xf32> to vector<256x128xf32>
    %6 = arith.subf %0, %5 : vector<256x128xf32>
    %7 = arith.mulf %6, %6 : vector<256x128xf32>
    %cst_2 = arith.constant dense<0.000000e+00> : vector<256xf32>
    %8 = vector.multi_reduction <add>, %7, %cst_2 [1] : vector<256x128xf32> to vector<256xf32>
    %9 = vector.shape_cast %8 : vector<256xf32> to vector<256x1xf32>
    %cst_3 = arith.constant 1.280000e+02 : f32
    %10 = vector.broadcast %cst_3 : f32 to vector<256x1xf32>
    %11 = arith.divf %9, %10 : vector<256x1xf32>
    %cst_4 = arith.constant 9.99999974E-6 : f32
    %12 = vector.broadcast %cst_4 : f32 to vector<256x1xf32>
    %13 = arith.addf %11, %12 : vector<256x1xf32>
    %14 = math.rsqrt %13 : vector<256x1xf32>
    %15 = vector.broadcast %14 : vector<256x1xf32> to vector<256x128xf32>
    %16 = arith.mulf %6, %15 : vector<256x128xf32>
    %c0_5 = arith.constant 0 : index
    %c0_6 = arith.constant 0 : index
    %17 = vector.load %arg2[%c0_5, %c0_6] : memref<1x128xf32, #tpu.memory_space<vmem>>, vector<1x128xf32>
    %18 = vector.broadcast %17 : vector<1x128xf32> to vector<256x128xf32>
    %19 = arith.mulf %16, %18 : vector<256x128xf32>
    %c0_7 = arith.constant 0 : index
    %c0_8 = arith.constant 0 : index
    %20 = vector.load %arg3[%c0_7, %c0_8] : memref<1x128xf32, #tpu.memory_space<vmem>>, vector<1x128xf32>
    %21 = vector.broadcast %20 : vector<1x128xf32> to vector<256x128xf32>
    %22 = arith.addf %19, %21 : vector<256x128xf32>
    %c0_9 = arith.constant 0 : index
    %c0_10 = arith.constant 0 : index
    %23 = vector.load %arg4[%c0_9, %c0_10] : memref<128x384xf32, #tpu.memory_space<vmem>>, vector<128x384xf32>
    %cst_11 = arith.constant dense<0.000000e+00> : vector<256x384xf32>
    %24 = tpu.matmul %22, %23, %cst_11 {dimension_numbers = #tpu.dot_dimension_numbers<[1], [0], [0], [1], [0, 0, 1, 1], [], []>} : vector<256x128xf32>, vector<128x384xf32>, vector<256x384xf32> -> vector<256x384xf32>
    %c0_12 = arith.constant 0 : index
    %c0_13 = arith.constant 0 : index
    %25 = vector.load %arg5[%c0_12, %c0_13] : memref<1x384xf32, #tpu.memory_space<vmem>>, vector<1x384xf32>
    %26 = vector.broadcast %25 : vector<1x384xf32> to vector<256x384xf32>
    %27 = arith.addf %24, %26 : vector<256x384xf32>
    %28 = vector.extract_strided_slice %27 {offsets = [0, 0], sizes = [256, 32], strides = [1, 1]} : vector<256x384xf32> to vector<256x32xf32>
    %cst_14 = arith.constant 0.176776692 : f32
    %29 = vector.broadcast %cst_14 : f32 to vector<256x32xf32>
    %30 = arith.mulf %28, %29 : vector<256x32xf32>
    %31 = vector.extract_strided_slice %27 {offsets = [0, 128], sizes = [256, 32], strides = [1, 1]} : vector<256x384xf32> to vector<256x32xf32>
    %32 = vector.extract_strided_slice %27 {offsets = [0, 256], sizes = [256, 32], strides = [1, 1]} : vector<256x384xf32> to vector<256x32xf32>
    %33 = vector.shape_cast %30 : vector<256x32xf32> to vector<16x16x32xf32>
    %34 = vector.shape_cast %31 : vector<256x32xf32> to vector<16x16x32xf32>
    %35 = vector.shape_cast %32 : vector<256x32xf32> to vector<16x16x32xf32>
    "tpu.trace_start"() <{level = 10 : i32, message = "wnd,wmd->wnm"}> : () -> ()
    %cst_15 = arith.constant dense<0.000000e+00> : vector<16x16x16xf32>
    %36 = tpu.matmul %33, %34, %cst_15 {dimension_numbers = #tpu.dot_dimension_numbers<[2], [2], [1], [1], [0, 0, 0, 1, 1, 1], [0], [0]>} : vector<16x16x32xf32>, vector<16x16x32xf32>, vector<16x16x16xf32> -> vector<16x16x16xf32>
    "tpu.trace_stop"() : () -> ()
    %c0_16 = arith.constant 0 : index
    %c0_17 = arith.constant 0 : index
    %c0_18 = arith.constant 0 : index
    %c0_19 = arith.constant 0 : index
    %37 = vector.load %arg6[%c0_16, %c0_17, %c0_18, %c0_19] : memref<4x1x16x16xf32, #tpu.memory_space<vmem>>, vector<1x1x16x16xf32>
    %38 = vector.shape_cast %37 : vector<1x1x16x16xf32> to vector<1x16x16xf32>
    %39 = vector.shape_cast %36 : vector<16x16x16xf32> to vector<16x1x16x16xf32>
    %40 = vector.shape_cast %38 : vector<1x16x16xf32> to vector<1x1x16x16xf32>
    %41 = vector.broadcast %40 : vector<1x1x16x16xf32> to vector<16x1x16x16xf32>
    %42 = arith.addf %39, %41 : vector<16x1x16x16xf32>
    %43 = vector.shape_cast %42 : vector<16x1x16x16xf32> to vector<16x16x16xf32>
    %cst_20 = arith.constant dense<0xFF800000> : vector<16x16xf32>
    %44 = vector.multi_reduction <maximumf>, %43, %cst_20 [2] : vector<16x16x16xf32> to vector<16x16xf32>
    %45 = vector.shape_cast %44 : vector<16x16xf32> to vector<16x16x1xf32>
    %46 = vector.broadcast %45 : vector<16x16x1xf32> to vector<16x16x16xf32>
    %47 = arith.subf %43, %46 : vector<16x16x16xf32>
    %48 = math.exp %47 : vector<16x16x16xf32>
    %cst_21 = arith.constant dense<0.000000e+00> : vector<16x16xf32>
    %49 = vector.multi_reduction <add>, %48, %cst_21 [2] : vector<16x16x16xf32> to vector<16x16xf32>
    %50 = vector.shape_cast %49 : vector<16x16xf32> to vector<16x16x1xf32>
    %51 = tpu.reciprocal %50 {approx = true} : vector<16x16x1xf32> -> vector<16x16x1xf32>
    %52 = arith.mulf %50, %51 : vector<16x16x1xf32>
    %cst_22 = arith.constant 2.000000e+00 : f32
    %53 = vector.broadcast %cst_22 : f32 to vector<16x16x1xf32>
    %54 = arith.subf %53, %52 : vector<16x16x1xf32>
    %55 = arith.mulf %51, %54 : vector<16x16x1xf32>
    %56 = vector.broadcast %55 : vector<16x16x1xf32> to vector<16x16x16xf32>
    %57 = arith.mulf %48, %56 : vector<16x16x16xf32>
    "tpu.trace_start"() <{level = 10 : i32, message = "wnm,wmd->wnd"}> : () -> ()
    %cst_23 = arith.constant dense<0.000000e+00> : vector<16x16x32xf32>
    %58 = tpu.matmul %57, %35, %cst_23 {dimension_numbers = #tpu.dot_dimension_numbers<[2], [1], [1], [2], [0, 0, 0, 1, 1, 2], [0], [0]>} : vector<16x16x16xf32>, vector<16x16x32xf32>, vector<16x16x32xf32> -> vector<16x16x32xf32>
    "tpu.trace_stop"() : () -> ()
    %59 = vector.shape_cast %58 : vector<16x16x32xf32> to vector<256x32xf32>
    %60 = vector.extract_strided_slice %27 {offsets = [0, 32], sizes = [256, 32], strides = [1, 1]} : vector<256x384xf32> to vector<256x32xf32>
    %cst_24 = arith.constant 0.176776692 : f32
    %61 = vector.broadcast %cst_24 : f32 to vector<256x32xf32>
    %62 = arith.mulf %60, %61 : vector<256x32xf32>
    %63 = vector.extract_strided_slice %27 {offsets = [0, 160], sizes = [256, 32], strides = [1, 1]} : vector<256x384xf32> to vector<256x32xf32>
    %64 = vector.extract_strided_slice %27 {offsets = [0, 288], sizes = [256, 32], strides = [1, 1]} : vector<256x384xf32> to vector<256x32xf32>
    %65 = vector.shape_cast %62 : vector<256x32xf32> to vector<16x16x32xf32>
    %66 = vector.shape_cast %63 : vector<256x32xf32> to vector<16x16x32xf32>
    %67 = vector.shape_cast %64 : vector<256x32xf32> to vector<16x16x32xf32>
    "tpu.trace_start"() <{level = 10 : i32, message = "wnd,wmd->wnm"}> : () -> ()
    %cst_25 = arith.constant dense<0.000000e+00> : vector<16x16x16xf32>
    %68 = tpu.matmul %65, %66, %cst_25 {dimension_numbers = #tpu.dot_dimension_numbers<[2], [2], [1], [1], [0, 0, 0, 1, 1, 1], [0], [0]>} : vector<16x16x32xf32>, vector<16x16x32xf32>, vector<16x16x16xf32> -> vector<16x16x16xf32>
    "tpu.trace_stop"() : () -> ()
    %c1 = arith.constant 1 : index
    %c0_26 = arith.constant 0 : index
    %c0_27 = arith.constant 0 : index
    %c0_28 = arith.constant 0 : index
    %69 = vector.load %arg6[%c1, %c0_26, %c0_27, %c0_28] : memref<4x1x16x16xf32, #tpu.memory_space<vmem>>, vector<1x1x16x16xf32>
    %70 = vector.shape_cast %69 : vector<1x1x16x16xf32> to vector<1x16x16xf32>
    %71 = vector.shape_cast %68 : vector<16x16x16xf32> to vector<16x1x16x16xf32>
    %72 = vector.shape_cast %70 : vector<1x16x16xf32> to vector<1x1x16x16xf32>
    %73 = vector.broadcast %72 : vector<1x1x16x16xf32> to vector<16x1x16x16xf32>
    %74 = arith.addf %71, %73 : vector<16x1x16x16xf32>
    %75 = vector.shape_cast %74 : vector<16x1x16x16xf32> to vector<16x16x16xf32>
    %cst_29 = arith.constant dense<0xFF800000> : vector<16x16xf32>
    %76 = vector.multi_reduction <maximumf>, %75, %cst_29 [2] : vector<16x16x16xf32> to vector<16x16xf32>
    %77 = vector.shape_cast %76 : vector<16x16xf32> to vector<16x16x1xf32>
    %78 = vector.broadcast %77 : vector<16x16x1xf32> to vector<16x16x16xf32>
    %79 = arith.subf %75, %78 : vector<16x16x16xf32>
    %80 = math.exp %79 : vector<16x16x16xf32>
    %cst_30 = arith.constant dense<0.000000e+00> : vector<16x16xf32>
    %81 = vector.multi_reduction <add>, %80, %cst_30 [2] : vector<16x16x16xf32> to vector<16x16xf32>
    %82 = vector.shape_cast %81 : vector<16x16xf32> to vector<16x16x1xf32>
    %83 = tpu.reciprocal %82 {approx = true} : vector<16x16x1xf32> -> vector<16x16x1xf32>
    %84 = arith.mulf %82, %83 : vector<16x16x1xf32>
    %cst_31 = arith.constant 2.000000e+00 : f32
    %85 = vector.broadcast %cst_31 : f32 to vector<16x16x1xf32>
    %86 = arith.subf %85, %84 : vector<16x16x1xf32>
    %87 = arith.mulf %83, %86 : vector<16x16x1xf32>
    %88 = vector.broadcast %87 : vector<16x16x1xf32> to vector<16x16x16xf32>
    %89 = arith.mulf %80, %88 : vector<16x16x16xf32>
    "tpu.trace_start"() <{level = 10 : i32, message = "wnm,wmd->wnd"}> : () -> ()
    %cst_32 = arith.constant dense<0.000000e+00> : vector<16x16x32xf32>
    %90 = tpu.matmul %89, %67, %cst_32 {dimension_numbers = #tpu.dot_dimension_numbers<[2], [1], [1], [2], [0, 0, 0, 1, 1, 2], [0], [0]>} : vector<16x16x16xf32>, vector<16x16x32xf32>, vector<16x16x32xf32> -> vector<16x16x32xf32>
    "tpu.trace_stop"() : () -> ()
    %91 = vector.shape_cast %90 : vector<16x16x32xf32> to vector<256x32xf32>
    %92 = vector.extract_strided_slice %27 {offsets = [0, 64], sizes = [256, 32], strides = [1, 1]} : vector<256x384xf32> to vector<256x32xf32>
    %cst_33 = arith.constant 0.176776692 : f32
    %93 = vector.broadcast %cst_33 : f32 to vector<256x32xf32>
    %94 = arith.mulf %92, %93 : vector<256x32xf32>
    %95 = vector.extract_strided_slice %27 {offsets = [0, 192], sizes = [256, 32], strides = [1, 1]} : vector<256x384xf32> to vector<256x32xf32>
    %96 = vector.extract_strided_slice %27 {offsets = [0, 320], sizes = [256, 32], strides = [1, 1]} : vector<256x384xf32> to vector<256x32xf32>
    %97 = vector.shape_cast %94 : vector<256x32xf32> to vector<16x16x32xf32>
    %98 = vector.shape_cast %95 : vector<256x32xf32> to vector<16x16x32xf32>
    %99 = vector.shape_cast %96 : vector<256x32xf32> to vector<16x16x32xf32>
    "tpu.trace_start"() <{level = 10 : i32, message = "wnd,wmd->wnm"}> : () -> ()
    %cst_34 = arith.constant dense<0.000000e+00> : vector<16x16x16xf32>
    %100 = tpu.matmul %97, %98, %cst_34 {dimension_numbers = #tpu.dot_dimension_numbers<[2], [2], [1], [1], [0, 0, 0, 1, 1, 1], [0], [0]>} : vector<16x16x32xf32>, vector<16x16x32xf32>, vector<16x16x16xf32> -> vector<16x16x16xf32>
    "tpu.trace_stop"() : () -> ()
    %c2 = arith.constant 2 : index
    %c0_35 = arith.constant 0 : index
    %c0_36 = arith.constant 0 : index
    %c0_37 = arith.constant 0 : index
    %101 = vector.load %arg6[%c2, %c0_35, %c0_36, %c0_37] : memref<4x1x16x16xf32, #tpu.memory_space<vmem>>, vector<1x1x16x16xf32>
    %102 = vector.shape_cast %101 : vector<1x1x16x16xf32> to vector<1x16x16xf32>
    %103 = vector.shape_cast %100 : vector<16x16x16xf32> to vector<16x1x16x16xf32>
    %104 = vector.shape_cast %102 : vector<1x16x16xf32> to vector<1x1x16x16xf32>
    %105 = vector.broadcast %104 : vector<1x1x16x16xf32> to vector<16x1x16x16xf32>
    %106 = arith.addf %103, %105 : vector<16x1x16x16xf32>
    %107 = vector.shape_cast %106 : vector<16x1x16x16xf32> to vector<16x16x16xf32>
    %cst_38 = arith.constant dense<0xFF800000> : vector<16x16xf32>
    %108 = vector.multi_reduction <maximumf>, %107, %cst_38 [2] : vector<16x16x16xf32> to vector<16x16xf32>
    %109 = vector.shape_cast %108 : vector<16x16xf32> to vector<16x16x1xf32>
    %110 = vector.broadcast %109 : vector<16x16x1xf32> to vector<16x16x16xf32>
    %111 = arith.subf %107, %110 : vector<16x16x16xf32>
    %112 = math.exp %111 : vector<16x16x16xf32>
    %cst_39 = arith.constant dense<0.000000e+00> : vector<16x16xf32>
    %113 = vector.multi_reduction <add>, %112, %cst_39 [2] : vector<16x16x16xf32> to vector<16x16xf32>
    %114 = vector.shape_cast %113 : vector<16x16xf32> to vector<16x16x1xf32>
    %115 = tpu.reciprocal %114 {approx = true} : vector<16x16x1xf32> -> vector<16x16x1xf32>
    %116 = arith.mulf %114, %115 : vector<16x16x1xf32>
    %cst_40 = arith.constant 2.000000e+00 : f32
    %117 = vector.broadcast %cst_40 : f32 to vector<16x16x1xf32>
    %118 = arith.subf %117, %116 : vector<16x16x1xf32>
    %119 = arith.mulf %115, %118 : vector<16x16x1xf32>
    %120 = vector.broadcast %119 : vector<16x16x1xf32> to vector<16x16x16xf32>
    %121 = arith.mulf %112, %120 : vector<16x16x16xf32>
    "tpu.trace_start"() <{level = 10 : i32, message = "wnm,wmd->wnd"}> : () -> ()
    %cst_41 = arith.constant dense<0.000000e+00> : vector<16x16x32xf32>
    %122 = tpu.matmul %121, %99, %cst_41 {dimension_numbers = #tpu.dot_dimension_numbers<[2], [1], [1], [2], [0, 0, 0, 1, 1, 2], [0], [0]>} : vector<16x16x16xf32>, vector<16x16x32xf32>, vector<16x16x32xf32> -> vector<16x16x32xf32>
    "tpu.trace_stop"() : () -> ()
    %123 = vector.shape_cast %122 : vector<16x16x32xf32> to vector<256x32xf32>
    %124 = vector.extract_strided_slice %27 {offsets = [0, 96], sizes = [256, 32], strides = [1, 1]} : vector<256x384xf32> to vector<256x32xf32>
    %cst_42 = arith.constant 0.176776692 : f32
    %125 = vector.broadcast %cst_42 : f32 to vector<256x32xf32>
    %126 = arith.mulf %124, %125 : vector<256x32xf32>
    %127 = vector.extract_strided_slice %27 {offsets = [0, 224], sizes = [256, 32], strides = [1, 1]} : vector<256x384xf32> to vector<256x32xf32>
    %128 = vector.extract_strided_slice %27 {offsets = [0, 352], sizes = [256, 32], strides = [1, 1]} : vector<256x384xf32> to vector<256x32xf32>
    %129 = vector.shape_cast %126 : vector<256x32xf32> to vector<16x16x32xf32>
    %130 = vector.shape_cast %127 : vector<256x32xf32> to vector<16x16x32xf32>
    %131 = vector.shape_cast %128 : vector<256x32xf32> to vector<16x16x32xf32>
    "tpu.trace_start"() <{level = 10 : i32, message = "wnd,wmd->wnm"}> : () -> ()
    %cst_43 = arith.constant dense<0.000000e+00> : vector<16x16x16xf32>
    %132 = tpu.matmul %129, %130, %cst_43 {dimension_numbers = #tpu.dot_dimension_numbers<[2], [2], [1], [1], [0, 0, 0, 1, 1, 1], [0], [0]>} : vector<16x16x32xf32>, vector<16x16x32xf32>, vector<16x16x16xf32> -> vector<16x16x16xf32>
    "tpu.trace_stop"() : () -> ()
    %c3 = arith.constant 3 : index
    %c0_44 = arith.constant 0 : index
    %c0_45 = arith.constant 0 : index
    %c0_46 = arith.constant 0 : index
    %133 = vector.load %arg6[%c3, %c0_44, %c0_45, %c0_46] : memref<4x1x16x16xf32, #tpu.memory_space<vmem>>, vector<1x1x16x16xf32>
    %134 = vector.shape_cast %133 : vector<1x1x16x16xf32> to vector<1x16x16xf32>
    %135 = vector.shape_cast %132 : vector<16x16x16xf32> to vector<16x1x16x16xf32>
    %136 = vector.shape_cast %134 : vector<1x16x16xf32> to vector<1x1x16x16xf32>
    %137 = vector.broadcast %136 : vector<1x1x16x16xf32> to vector<16x1x16x16xf32>
    %138 = arith.addf %135, %137 : vector<16x1x16x16xf32>
    %139 = vector.shape_cast %138 : vector<16x1x16x16xf32> to vector<16x16x16xf32>
    %cst_47 = arith.constant dense<0xFF800000> : vector<16x16xf32>
    %140 = vector.multi_reduction <maximumf>, %139, %cst_47 [2] : vector<16x16x16xf32> to vector<16x16xf32>
    %141 = vector.shape_cast %140 : vector<16x16xf32> to vector<16x16x1xf32>
    %142 = vector.broadcast %141 : vector<16x16x1xf32> to vector<16x16x16xf32>
    %143 = arith.subf %139, %142 : vector<16x16x16xf32>
    %144 = math.exp %143 : vector<16x16x16xf32>
    %cst_48 = arith.constant dense<0.000000e+00> : vector<16x16xf32>
    %145 = vector.multi_reduction <add>, %144, %cst_48 [2] : vector<16x16x16xf32> to vector<16x16xf32>
    %146 = vector.shape_cast %145 : vector<16x16xf32> to vector<16x16x1xf32>
    %147 = tpu.reciprocal %146 {approx = true} : vector<16x16x1xf32> -> vector<16x16x1xf32>
    %148 = arith.mulf %146, %147 : vector<16x16x1xf32>
    %cst_49 = arith.constant 2.000000e+00 : f32
    %149 = vector.broadcast %cst_49 : f32 to vector<16x16x1xf32>
    %150 = arith.subf %149, %148 : vector<16x16x1xf32>
    %151 = arith.mulf %147, %150 : vector<16x16x1xf32>
    %152 = vector.broadcast %151 : vector<16x16x1xf32> to vector<16x16x16xf32>
    %153 = arith.mulf %144, %152 : vector<16x16x16xf32>
    "tpu.trace_start"() <{level = 10 : i32, message = "wnm,wmd->wnd"}> : () -> ()
    %cst_50 = arith.constant dense<0.000000e+00> : vector<16x16x32xf32>
    %154 = tpu.matmul %153, %131, %cst_50 {dimension_numbers = #tpu.dot_dimension_numbers<[2], [1], [1], [2], [0, 0, 0, 1, 1, 2], [0], [0]>} : vector<16x16x16xf32>, vector<16x16x32xf32>, vector<16x16x32xf32> -> vector<16x16x32xf32>
    "tpu.trace_stop"() : () -> ()
    %155 = vector.shape_cast %154 : vector<16x16x32xf32> to vector<256x32xf32>
    %156 = tpu.concatenate %59, %91, %123, %155 in 1 : vector<256x32xf32>, vector<256x32xf32>, vector<256x32xf32>, vector<256x32xf32> -> vector<256x128xf32>
    %c0_51 = arith.constant 0 : index
    %c0_52 = arith.constant 0 : index
    %157 = vector.load %arg7[%c0_51, %c0_52] : memref<128x128xf32, #tpu.memory_space<vmem>>, vector<128x128xf32>
    %cst_53 = arith.constant dense<0.000000e+00> : vector<256x128xf32>
    %158 = tpu.matmul %156, %157, %cst_53 {dimension_numbers = #tpu.dot_dimension_numbers<[1], [0], [0], [1], [0, 0, 1, 1], [], []>} : vector<256x128xf32>, vector<128x128xf32>, vector<256x128xf32> -> vector<256x128xf32>
    %159 = arith.addf %0, %158 : vector<256x128xf32>
    %c0_54 = arith.constant 0 : index
    %c0_55 = arith.constant 0 : index
    %160 = vector.load %arg8[%c0_54, %c0_55] : memref<1x128xf32, #tpu.memory_space<vmem>>, vector<1x128xf32>
    %161 = vector.broadcast %160 : vector<1x128xf32> to vector<256x128xf32>
    %162 = arith.addf %159, %161 : vector<256x128xf32>
    %c0_56 = arith.constant 0 : index
    %c0_57 = arith.constant 0 : index
    %163 = vector.load %arg9[%c0_56, %c0_57] : memref<256x128xf32, #tpu.memory_space<vmem>>, vector<256x128xf32>
    tpu.vector_store %arg9[%c0_56, %c0_57], %162 {strides = array<i32>} : memref<256x128xf32, #tpu.memory_space<vmem>>, vector<256x128xf32>,
    return
  }
  func.func @transform_0(%arg0: i32) -> (i32, i32) {
    %c0_i32 = arith.constant 0 : i32
    %c0_i32_0 = arith.constant 0 : i32
    return %arg0, %c0_i32 : i32, i32
  }
  func.func @transform_1(%arg0: i32) -> (i32, i32) {
    %c0_i32 = arith.constant 0 : i32
    %c0_i32_0 = arith.constant 0 : i32
    %c0_i32_1 = arith.constant 0 : i32
    return %c0_i32, %c0_i32_0 : i32, i32
  }
  func.func @transform_2(%arg0: i32) -> (i32, i32) {
    %c0_i32 = arith.constant 0 : i32
    %c0_i32_0 = arith.constant 0 : i32
    %c0_i32_1 = arith.constant 0 : i32
    return %c0_i32, %c0_i32_0 : i32, i32
  }
  func.func @transform_3(%arg0: i32) -> (i32, i32) {
    %c0_i32 = arith.constant 0 : i32
    %c0_i32_0 = arith.constant 0 : i32
    %c0_i32_1 = arith.constant 0 : i32
    return %c0_i32, %c0_i32_0 : i32, i32
  }
  func.func @transform_4(%arg0: i32) -> (i32, i32) {
    %c0_i32 = arith.constant 0 : i32
    %c0_i32_0 = arith.constant 0 : i32
    %c0_i32_1 = arith.constant 0 : i32
    return %c0_i32, %c0_i32_0 : i32, i32
  }
  func.func @transform_5(%arg0: i32) -> (i32, i32, i32, i32) {
    %c0_i32 = arith.constant 0 : i32
    %c0_i32_0 = arith.constant 0 : i32
    %c0_i32_1 = arith.constant 0 : i32
    %c0_i32_2 = arith.constant 0 : i32
    %c0_i32_3 = arith.constant 0 : i32
    return %c0_i32, %c0_i32_0, %c0_i32_1, %c0_i32_2 : i32, i32, i32, i32
  }
  func.func @transform_6(%arg0: i32) -> (i32, i32) {
    %c0_i32 = arith.constant 0 : i32
    %c0_i32_0 = arith.constant 0 : i32
    %c0_i32_1 = arith.constant 0 : i32
    return %c0_i32, %c0_i32_0 : i32, i32
  }
  func.func @transform_7(%arg0: i32) -> (i32, i32) {
    %c0_i32 = arith.constant 0 : i32
    %c0_i32_0 = arith.constant 0 : i32
    %c0_i32_1 = arith.constant 0 : i32
    return %c0_i32, %c0_i32_0 : i32, i32
  }
  func.func @transform_8(%arg0: i32) -> (i32, i32) {
    %c0_i32 = arith.constant 0 : i32
    %c0_i32_0 = arith.constant 0 : i32
    return %arg0, %c0_i32 : i32, i32
  }
}

</mosaic_0001>

<bundles_post_ra>
// kernel: tpu_custom_call.1
= control target key start
LH: loop header
LB: loop body
LE: loop exit
PB: predicated region body
PF: predicated region fallthrough
CT: control target
= control target key end

     0   :  { %s24748_s0 = inlined_call_operand.hbm [shape: f32[512,128], index: 0, kind: input, shape index: {}]   ;;  %s24749_s1 = inlined_call_operand.vmem [shape: f32[1,128], index: 1, kind: input, shape index: {}]   ;;  %s24750_s2 = inlined_call_operand.vmem [shape: f32[1,128], index: 2, kind: input, shape index: {}]   ;;  %s24751_s3 = inlined_call_operand.hbm [shape: f32[128,384], index: 3, kind: input, shape index: {}]   ;;  %s24752_s4 = inlined_call_operand.vmem [shape: f32[1,384], index: 4, kind: input, shape index: {}]   ;;  %s24753_s5 = inlined_call_operand.hbm [shape: f32[4,1,16,16], index: 5, kind: input, shape index: {}]   ;;  %s24754_s6 = inlined_call_operand.hbm [shape: f32[128,128], index: 6, kind: input, shape index: {}]   ;;  %s24755_s7 = inlined_call_operand.vmem [shape: f32[1,128], index: 7, kind: input, shape index: {}]   ;;  %s24756_s8 = inlined_call_operand.hbm [shape: f32[512,128], index: 8, kind: output, shape index: {}]  }
   0x1   :  { %24982 = sst [smem:[#allocation149_spill]] %s24751_s3 }
   0x2   :  { %13 = vsyncpa [#allocation3], 0 }
   0x3   :  { %15 = vsyncpa [#allocation3 + $0x1], 0 }
   0x4   :  { %16 = vsyncpa [#allocation6], 0 }
   0x5   :  { %17 = vsyncpa [#allocation9], 0 }
   0x6   :  { %18 = vsyncpa [#allocation4], 0 }
   0x7   :  { %20 = vsyncpa [#allocation4 + $0x1], 0  ;;  %s20041_s27 = smov 0   ;;  %s20043_s28 = smov 0  }
   0x8   :  { %s20045_s29 = smov 0   ;;  %s20047_s30 = smov 0  }
   0x9 LB: > { %24983 = sst [smem:[#allocation15_spill]] %s19967_s27  ;;  %s20062_s9 = sadd.s32 4294967295, %s19979_s30   ;;  %s19979_s30 = sphi %s20047_s30, %s25580_s30   ;;  %s19975_s29 = sphi %s20045_s29, %s25579_s29   ;;  %s19971_s28 = sphi %s20043_s28, %s25578_s28   ;;  %s19967_s27 = sphi %s20041_s27, %s25577_s27  }
   0xa   : > { %s15551_s10 = sadd.s32 4294967294, %s19979_s30   ;;  %p46_p0 = scmp.ne.s32.totalorder %s19971_s28, %s19967_s27 }
   0xb   : > { %p24757_p1 = scmp.eq.s32.totalorder %s20062_s9, 0  ;;  %p223_p3 = scmp.eq.s32.totalorder %s15551_s10, 1 }
   0xc   : > { %p15552_p5 = scmp.ge.s32.totalorder %s19979_s30, 1  ;;  %p230_p7 = scmp.lt.s32.totalorder %s19979_s30, 3 }
   0xd   : > { %p20071_p4 = por %p24757_p1, %p46_p0  ;;  %p20076_p6 = por %p223_p3, %p46_p0 }
   0xe   : > { %p20081_p8 = pnand %p15552_p5, %p230_p7  ;;  %s19981_s14 = smov [#allocation5]  }
   0xf   : > { %s24984_s11 = scalar_select %p20071_p4, 1, 0 }
  0x10   : > { %s24985_s12 = scalar_select %p20076_p6, 1, 0 }
  0x11   : > { %s24987_s13 = scalar_select %p20081_p8, 1, 0 }
  0x12   : > { %24986 = sst [smem:[#allocation16_spill]] %s24985_s12  ;;  %s248_s15 = sshll.u32 %s19981_s14, 4  ;;  %s20085_s15 = int_to_ptr.vmem [resolvable:$true] %s248_s15 }
  0x13   : > { %p18392_p9 = pneg %p20081_p8  ;;  %s19982_s17 = smov [#allocation7]  }
  0x14   : > { %s264_s18 = sshll.u32 %s19982_s17, 4  ;;  %s24989_s3 = sld [smem:[#allocation149_spill]]  ;;  %s20096_s18 = int_to_ptr.vmem [resolvable:$true] %s264_s18 }
  0x15   : > { %p20092_p11 = pnand %p18392_p9, %p24757_p1 }
  0x17   : > { %p20106_p13 = pneg %p20092_p11 }
  0x1a   : > { %s19791_s21 = scalar_lea.hbm %s24989_s3, 6144 }
  0x1b   : > { %p19792_p12 = scmp.ne.s32.totalorder %s24989_s3, %s19791_s21  ;;  %p19798_p5 = scmp.lt.u32.totalorder %s19791_s21, %s24989_s3 }
  0x1d   : > { %p19794_p0 = pnand %p20106_p13, %p19792_p12 }
  0x1f   : > { %p19795_p3 = pneg %p19794_p0 }
  0x21   : > { %p19800_p7 = pnand %p19798_p5, %p19795_p3 }
  0x23   : > { %19803 = shalt.err (!%p19800_p7)
}
  0x24   : > { %s19804_s10 = scalar_lea.vmem %s20085_s15, 6144  ;;  %p19812_p2 = scmp.lt.s32.totalorder %s20085_s15, %s20085_s15 }
  0x25   : > { %p19805_p9 = scmp.ne.s32.totalorder %s20085_s15, %s19804_s10  ;;  %p19813_p6 = scmp.lt.s32.totalorder %s19804_s10, %s19804_s10 }
  0x27   : > { %p19807_p10 = pnand %p19805_p9, %p20106_p13  ;;  %p19814_p12 = por %p19813_p6, %p19812_p2 }
  0x29   : > { %p19808_p1 = pneg %p19807_p10 }
  0x2b   : > { %p19815_p0 = pnand %p19814_p12, %p19808_p1 }
  0x2d   : > { %19818 = shalt.err (!%p19815_p0)
}
  0x2e   : > { %s19983_s14 = smov 384   ;;  %s19984_s17 = smov 24  }
  0x2f   : > { %18395 = dma.hbm_to_vmem [thread:$0]  (!%p20092_p11), %s24989_s3, 6144, %s20085_s15, [#allocation6], %s19983_s14, %s19983_s14, %s19984_s17  }
  0x30   : > { %s19819_s23 = scalar_lea.hbm %s24753_s5, 1024 }
  0x31   : > { %p19820_p2 = scmp.ne.s32.totalorder %s24753_s5, %s19819_s23  ;;  %p19826_p10 = scmp.lt.u32.totalorder %s19819_s23, %s24753_s5 }
  0x33   : > { %p19822_p1 = pnand %p19820_p2, %p20106_p13 }
  0x35   : > { %p19823_p6 = pneg %p19822_p1 }
  0x37   : > { %p19828_p3 = pnand %p19826_p10, %p19823_p6 }
  0x39   : > { %19831 = shalt.err (!%p19828_p3)
}
  0x3a   : > { %s19832_s15 = scalar_lea.vmem %s20096_s18, 1024  ;;  %p19840_p12 = scmp.lt.s32.totalorder %s20096_s18, %s20096_s18 }
  0x3b   : > { %p19833_p5 = scmp.ne.s32.totalorder %s20096_s18, %s19832_s15  ;;  %p19841_p0 = scmp.lt.s32.totalorder %s19832_s15, %s19832_s15 }
  0x3d   : > { %p19835_p7 = pnand %p19833_p5, %p20106_p13  ;;  %p19842_p2 = por %p19841_p0, %p19840_p12 }
  0x3f   : > { %p19836_p9 = pneg %p19835_p7 }
  0x41   : > { %p19843_p1 = pnand %p19842_p2, %p19836_p9 }
  0x43   : > { %19846 = shalt.err (!%p19843_p1)
}
  0x44   : > { %s19985_s14 = smov 128   ;;  %s19986_s12 = smov 8  }
  0x45   : > { %18398 = dma.hbm_to_vmem [thread:$0]  (!%p20092_p11), %s24753_s5, 1024, %s20096_s18, [#allocation6], %s19985_s14, %s19985_s14, %s19986_s12  }
  0x46   : > { %s19987_s20 = smov [#allocation8]   ;;  %s20154_s22 = sadd.s32 1, %s19979_s30  }
  0x47   : > { %s277_s21 = sshll.u32 %s19987_s20, 4  ;;  %s19847_s26 = scalar_lea.hbm %s24754_s6, 2048  ;;  %s278_s21 = int_to_ptr.vmem [resolvable:$true] %s277_s21 }
  0x48   : > { %p19848_p6 = scmp.ne.s32.totalorder %s24754_s6, %s19847_s26  ;;  %p19854_p5 = scmp.lt.u32.totalorder %s19847_s26, %s24754_s6 }
  0x4a   : > { %p19850_p10 = pnand %p19848_p6, %p20106_p13 }
  0x4c   : > { %p19851_p3 = pneg %p19850_p10 }
  0x4e   : > { %p19856_p7 = pnand %p19854_p5, %p19851_p3 }
  0x50   : > { %19859 = shalt.err (!%p19856_p7)
}
  0x51   : > { %s19860_s18 = scalar_lea.vmem %s278_s21, 2048  ;;  %p19868_p2 = scmp.lt.s32.totalorder %s278_s21, %s278_s21 }
  0x52   : > { %p19861_p9 = scmp.ne.s32.totalorder %s278_s21, %s19860_s18  ;;  %p19869_p1 = scmp.lt.s32.totalorder %s19860_s18, %s19860_s18 }
  0x54   : > { %p19863_p12 = pnand %p19861_p9, %p20106_p13  ;;  %p19870_p4 = por %p19869_p1, %p19868_p2 }
  0x56   : > { %p19864_p0 = pneg %p19863_p12 }
  0x58   : > { %p19871_p8 = pnand %p19870_p4, %p19864_p0 }
  0x5a   : > { %19874 = shalt.err (!%p19871_p8)
}
  0x5b   : > { %18401 = dma.hbm_to_vmem [thread:$0]  (!%p20092_p11), %s24754_s6, 2048, %s278_s21, [#allocation9], %s19985_s14, %s19985_s14, %s19986_s12  }
  0x5c   : > { %s30_s24 = ssub.s32 %s19979_s30, %s20154_s22  ;;  %s33_s16 = sadd.s32 1, %s19975_s29 }
  0x5d   : > { %p31_p4 = scmp.eq.s32.totalorder %s30_s24, 0  ;;  %p40_p8 = scmp.ne.s32.totalorder %s19975_s29, %s19971_s28 }
  0x5e   : > { %p41_p13 = scmp.eq.s32.totalorder %s19979_s30, 0  ;;  %p18413_p6 = scmp.lt.s32.totalorder %s19979_s30, 2 }
  0x5f   : > { %s20185_s17 = scalar_select %p31_p4, %s19975_s29, %s33_s16  }
  0x60   : > { %p42_p10 = por %p41_p13, %p40_p8  ;;  %p24991_p3 = scmp.eq.s32.totalorder %s20062_s9, 1 }
  0x61   : > { %s294_s20 = sand.u32 1, %s19975_s29   ;;  %s15958_s23 = sshll.u32 %s19979_s30, 12 }
  0x62   : > { %p20189_p5 = por %p24991_p3, %p40_p8  ;;  %s15557_s25 = sshll.u32 %s294_s20, 8 }
  0x63   : > { %s20198_s21 = scalar_lea.hbm %s24748_s0, %s15958_s23  ;;  %s298_s15 = scalar_lea.vmem [#allocation2], %s15557_s25 }
  0x64   : > { %s305_s18 = sshll.u32 %s298_s15, 4  ;;  %p20200_p11 = pnand %p18413_p6, %p42_p10  ;;  %s20204_s18 = int_to_ptr.vmem [resolvable:$true] %s305_s18 }
  0x65   : > { %s20206_s27 = scalar_lea.sflag [#allocation3], %s294_s20  ;;  %s19875_s24 = scalar_lea.hbm %s20198_s21, 4096 }
  0x66   : > { %p19876_p7 = scmp.ne.s32.totalorder %s20198_s21, %s19875_s24  ;;  %p19877_p9 = pneg %p20200_p11 }
  0x67   : > { %s19880_s25 = scalar_lea.hbm %s24748_s0, 8192  ;;  %p19881_p2 = scmp.lt.u32.totalorder %s20198_s21, %s24748_s0 }
  0x68   : > { %p19878_p12 = pnand %p19877_p9, %p19876_p7  ;;  %p19882_p1 = scmp.lt.u32.totalorder %s19880_s25, %s19875_s24 }
  0x69   : > { %p19884_p8 = scmp.lt.u32.totalorder %s19875_s24, %s20198_s21 }
  0x6a   : > { %p19879_p0 = pneg %p19878_p12  ;;  %p19883_p4 = por %p19882_p1, %p19881_p2 }
  0x6c   : > { %p19885_p13 = por %p19884_p8, %p19883_p4 }
  0x6e   : > { %p19886_p6 = pnand %p19885_p13, %p19879_p0 }
  0x70   : > { %19889 = shalt.err (!%p19886_p6)
}
  0x71   : > { %s19890_s20 = scalar_lea.vmem %s20204_s18, 4096  ;;  %s19988_s15 = smov [#allocation2]  }
  0x72   : > { %p19891_p10 = scmp.ne.s32.totalorder %s20204_s18, %s19890_s20  ;;  %s19895_s16 = sshll.u32 %s19988_s15, 4  ;;  %s19896_s16 = int_to_ptr.vmem [resolvable:$false] %s19895_s16 }
  0x73   : > { %s19897_s23 = scalar_lea.vmem %s19896_s16, 8192  ;;  %p19898_p12 = scmp.lt.s32.totalorder %s20204_s18, %s19896_s16 }
  0x74   : > { %p19893_p3 = pnand %p19891_p10, %p19877_p9  ;;  %p19899_p2 = scmp.lt.s32.totalorder %s19897_s23, %s19890_s20 }
  0x76   : > { %p19894_p7 = pneg %p19893_p3  ;;  %p19900_p1 = por %p19899_p2, %p19898_p12 }
  0x78   : > { %p19901_p4 = pnand %p19900_p1, %p19894_p7 }
  0x7a   : > { %19904 = shalt.err (!%p19901_p4)
}
  0x7b   : > { %18405 = dma.hbm_to_vmem [thread:$0]  (!%p20200_p11), %s20198_s21, 4096, %s20204_s18, %s20206_s27, %s19985_s14, %s19985_s14, %s19986_s12  }
  0x7c   : > { %p24994_p9 = scmp.ne.s32.totalorder %s24987_s13, 0 }
  0x7e   : > { %317 = sbr.rel (%p24994_p9) target bundleno = 3930 (0xf5a), region = 52 }
  0x85   : > { %s20240_s24 = sand.u32 1, %s19971_s28   ;;  %p24995_p0 = scmp.ne.s32.totalorder %s24984_s11, 0 }
  0x86   : > { %s15561_s25 = sshll.u32 %s20240_s24, 8  ;;  %s320_s26 = scalar_lea.sflag [#allocation3], %s20240_s24 }
  0x87   : > { %s20246_s3 = scalar_lea.vmem [#allocation2], %s15561_s25 }
  0x88   : > { %19950 = dma.done.wait (%p24995_p0), %s320_s26, 4096  }
  0x89   : > { %19952 = vsyncadd (%p24995_p0), %s320_s26, 4294963200  ;;  %p24996_p11 = scmp.eq.s32.totalorder %s20062_s9, 0 }
  0x8b   : > { %19954 = dma.done.wait (%p24996_p11), [#allocation6], 7168   ;;  %p24997_p8 = pmov %p24996_p11 }
  0x8d   : > { %19956 = vsyncadd (%p24997_p8), [#allocation6], 4294960128  ;;  %p24998_p13 = pmov %p24997_p8 }
  0x8e   : > { %p24999_p6 = pmov %p24997_p8 }
  0x8f   : > { %19958 = dma.done.wait (%p24998_p13), [#allocation9], 2048  }
  0x90   : > { %19960 = vsyncadd (%p24999_p6), [#allocation9], 4294965248  ;;  %v20261_v0 = vld [vmem:[%s20246_s3] sm:$0xff]  ;;  %v20264_v1 = vld [vmem:[%s20246_s3 + $0x10] sm:$0xff]  ;;  %s19990_s27 = smov 96   ;;  %vm1412_vm0 = vcmask 261120  }
  0x91   : > { %402 = vadd.xlane.f32.xlu0 %v20261_v0  ;;  %406 = vadd.xlane.f32.xlu1 %v20264_v1  ;;  %v20269_v2 = vld [vmem:[%s20246_s3 + $0x8] sm:$0xff]  ;;  %v20272_v3 = vld [vmem:[%s20246_s3 + $0x18] sm:$0xff]  ;;  %v20277_v4 = vld [vmem:[%s20246_s3 + $0x20] sm:$0xff]  ;;  %vm2839_vm2 = vcmask 130048   ;;  %s19991_s10 = smov 64   ;;  %s19992_s20 = smov 32  }
  0x92   : > { %v20280_v5 = vld [vmem:[%s20246_s3 + $0x28] sm:$0xff]  ;;  %v20285_v6 = vld [vmem:[%s20246_s3 + $0x30] sm:$0xff]  ;;  %v20288_v7 = vld [vmem:[%s20246_s3 + $0x38] sm:$0xff]  ;;  %vm15025_vm3 = vcmask 523264   ;;  %vm15058_vm4 = vcmask 785408   ;;  %s24603_s23 = scalar_lea.vmem [#allocation10], %s15561_s25 }
  0x93   : > { %v20293_v8 = vld [vmem:[%s20246_s3 + $0x40] sm:$0xff]  ;;  %v20296_v9 = vld [vmem:[%s20246_s3 + $0x48] sm:$0xff]  ;;  %v20301_v10 = vld [vmem:[%s20246_s3 + $0x50] sm:$0xff]  ;;  %s15959_s25 = sshll.u32 %s20062_s9, 12  ;;  %s15449_s26 = sshll.u32 %s24603_s23, 4  ;;  %s24701_s26 = int_to_ptr.vmem [resolvable:$true] %s15449_s26 }
  0x94   : > { %v20304_v11 = vld [vmem:[%s20246_s3 + $0x58] sm:$0xff]  ;;  %v20309_v12 = vld [vmem:[%s20246_s3 + $0x60] sm:$0xff]  ;;  %v20312_v13 = vld [vmem:[%s20246_s3 + $0x68] sm:$0xff]  ;;  %s24699_s14 = scalar_lea.hbm %s24756_s8, %s15959_s25  ;;  %s15436_s9 = scalar_lea.sflag [#allocation4], %s20240_s24 }
  0x95   : > { %404 = vadd.xlane.f32.xlu0 %v20269_v2  ;;  %408 = vadd.xlane.f32.xlu1 %v20272_v3  ;;  %v20317_v14 = vld [vmem:[%s20246_s3 + $0x70] sm:$0xff]  ;;  %v20320_v15 = vld [vmem:[%s20246_s3 + $0x78] sm:$0xff]  ;;  %v20325_v16 = vld [vmem:[%s20246_s3 + $0xa8] sm:$0xff]  ;;  %s19905_s12 = scalar_lea.vmem %s24701_s26, 4096 }
  0x96   : > { %v20328_v17 = vld [vmem:[%s20246_s3 + $0x80] sm:$0xff]  ;;  %v20333_v18 = vld [vmem:[%s20246_s3 + $0xb0] sm:$0xff]  ;;  %v20336_v19 = vld [vmem:[%s20246_s3 + $0x88] sm:$0xff]  ;;  %p19906_p10 = scmp.ne.s32.totalorder %s24701_s26, %s19905_s12 }
  0x97   : > { %v20341_v20 = vld [vmem:[%s20246_s3 + $0xb8] sm:$0xff]  ;;  %v20344_v21 = vld [vmem:[%s20246_s3 + $0x90] sm:$0xff]  ;;  %v20349_v22 = vld [vmem:[%s20246_s3 + $0xc0] sm:$0xff] }
  0x98   : > { %v20352_v23 = vld [vmem:[%s20246_s3 + $0x98] sm:$0xff]  ;;  %v20357_v24 = vld [vmem:[%s20246_s3 + $0xc8] sm:$0xff]  ;;  %v20361_v25 = vld [vmem:[%s20246_s3 + $0xa0] sm:$0xff]  ;;  %p19907_p3 = pnand %p19906_p10, %p20189_p5 }
  0x99   : > { %410 = vadd.xlane.f32.xlu0 %v20277_v4  ;;  %412 = vadd.xlane.f32.xlu1 %v20280_v5  ;;  %v834_v26 = vld [vmem:[#allocation5 + $0x8] sm:$0xff]  ;;  %v837_v27 = vld [vmem:[#allocation5 + $0x20] sm:$0xff]  ;;  %v836_v30 = vld [vmem:[#allocation5 + $0x18] sm:$0xff] }
  0x9a   : > { %v833_v28 = vld [vmem:[#allocation5] sm:$0xff]  ;;  %v17624_v29 = vpack.c.bf16 %v837_v27, %v834_v26  ;;  %v840_v31 = vld [vmem:[#allocation5 + $0x38] sm:$0xff]  ;;  %v843_v32 = vld [vmem:[#allocation5 + $0x50] sm:$0xff]  ;;  %p19908_p7 = pneg %p19907_p3 }
  0x9b   : > { %v17626_v33 = vpack.c.bf16 %v836_v30, %v833_v28  ;;  %v17628_v34 = vpack.c.bf16 %v843_v32, %v840_v31  ;;  %v839_v35 = vld [vmem:[#allocation5 + $0x30] sm:$0xff]  ;;  %v842_v36 = vld [vmem:[#allocation5 + $0x48] sm:$0xff]  ;;  %v849_v38 = vld [vmem:[#allocation5 + $0x80] sm:$0xff] }
  0x9c   : > { %v846_v37 = vld [vmem:[#allocation5 + $0x68] sm:$0xff]  ;;  %17625 = vmatprep.subr.bf16.mxu0 %v17624_v29  ;;  %18360 = vmatprep.subr.bf16.mxu1 %v17624_v29  ;;  %v17630_v39 = vpack.c.bf16 %v842_v36, %v839_v35  ;;  %v845_v41 = vld [vmem:[#allocation5 + $0x60] sm:$0xff]  ;;  %v848_v42 = vld [vmem:[#allocation5 + $0x78] sm:$0xff] }
  0x9d   : > { %414 = vadd.xlane.f32.xlu0 %v20285_v6  ;;  %416 = vadd.xlane.f32.xlu1 %v20288_v7  ;;  %v17632_v40 = vpack.c.bf16 %v849_v38, %v846_v37  ;;  %v17634_v43 = vpack.c.bf16 %v848_v42, %v845_v41  ;;  %v20376_v56 = vld [vmem:[%s20246_s3 + $0xd0] sm:$0xff]  ;;  %v20387_v63 = vld [vmem:[%s20246_s3 + $0xd8] sm:$0xff]  ;;  %v20396_v28 = vld [vmem:[%s20246_s3 + $0xe0] sm:$0xff] }
  0x9e   : > { %17627 = vmatpush1.bf16.msra.mxu0 %v17626_v33  ;;  %18368 = vmatpush1.bf16.msra.mxu1 %v17626_v33  ;;  %v852_v33 = vld [vmem:[#allocation5 + $0x98] sm:$0xff]  ;;  %v20405_v35 = vld [vmem:[%s20246_s3 + $0xe8] sm:$0xff]  ;;  %v851_v38 = vld [vmem:[#allocation5 + $0x90] sm:$0xff] }
  0x9f   : > { %17629 = vmatprep.subr.bf16.mxu0 %v17628_v34  ;;  %18361 = vmatprep.subr.bf16.mxu1 %v17628_v34  ;;  %v855_v34 = vld [vmem:[#allocation5 + $0xb0] sm:$0xff]  ;;  %vm20836_vm1 = vmpackc.low %vm1412_vm0, %vm1412_vm0 }
  0xa0   : > { %v17636_v37 = vpack.c.bf16 %v855_v34, %v852_v33 }
  0xa1   : > { %418 = vadd.xlane.f32.xlu0 %v20293_v8  ;;  %420 = vadd.xlane.f32.xlu1 %v20296_v9 }
  0xa2   : > { %17631 = vmatpush1.bf16.msra.mxu0 %v17630_v39  ;;  %18369 = vmatpush1.bf16.msra.mxu1 %v17630_v39  ;;  %v854_v39 = vld [vmem:[#allocation5 + $0xa8] sm:$0xff] }
  0xa3   : > { %17633 = vmatprep.subr.bf16.mxu0 %v17632_v40  ;;  %18362 = vmatprep.subr.bf16.mxu1 %v17632_v40  ;;  %v17638_v41 = vpack.c.bf16 %v854_v39, %v851_v38  ;;  %v870_v38 = vld [vmem:[#allocation5 + $0x128] sm:$0xff]  ;;  %v873_v39 = vld [vmem:[#allocation5 + $0x140] sm:$0xff] }
  0xa5   : > { %422 = vadd.xlane.f32.xlu0 %v20301_v10  ;;  %424 = vadd.xlane.f32.xlu1 %v20304_v11 }
  0xa6   : > { %17635 = vmatpush1.bf16.msra.mxu0 %v17634_v43  ;;  %18370 = vmatpush1.bf16.msra.mxu1 %v17634_v43 }
  0xa7   : > { %17637 = vmatprep.subr.bf16.mxu0 %v17636_v37  ;;  %18363 = vmatprep.subr.bf16.mxu1 %v17636_v37 }
  0xa9   : > { %426 = vadd.xlane.f32.xlu0 %v20309_v12  ;;  %428 = vadd.xlane.f32.xlu1 %v20312_v13 }
  0xaa   : > { %17639 = vmatpush1.bf16.msra.mxu0 %v17638_v41  ;;  %18371 = vmatpush1.bf16.msra.mxu1 %v17638_v41  ;;  %v869_v41 = vld [vmem:[#allocation5 + $0x120] sm:$0xff] }
  0xad   : > { %430 = vadd.xlane.f32.xlu0 %v20317_v14  ;;  %432 = vadd.xlane.f32.xlu1 %v20320_v15 }
  0xb1   : > { %444 = vadd.xlane.f32.xlu0 %v20325_v16  ;;  %434 = vadd.xlane.f32.xlu1 %v20328_v17 }
  0xb5   : > { %446 = vadd.xlane.f32.xlu0 %v20333_v18  ;;  %436 = vadd.xlane.f32.xlu1 %v20336_v19 }
  0xb9   : > { %448 = vadd.xlane.f32.xlu0 %v20341_v20  ;;  %438 = vadd.xlane.f32.xlu1 %v20344_v21 }
  0xbd   : > { %450 = vadd.xlane.f32.xlu0 %v20349_v22  ;;  %440 = vadd.xlane.f32.xlu1 %v20352_v23 }
  0xc1   : > { %452 = vadd.xlane.f32.xlu0 %v20357_v24 }
  0xc5   : > { %442 = vadd.xlane.f32.xlu0 %v20361_v25 }
 0x11e   : > { %v403_v44 = vpop.xlane.xlu0 %402  ;;  %v407_v45 = vpop.xlane.xlu1 %406 }
 0x11f   : > { %v467_v46 = vmul.f32 0.0078125, %v403_v44  ;;  %v469_v48 = vmul.f32 0.0078125, %v407_v45  ;;  %v858_v44 = vld [vmem:[#allocation5 + $0xc8] sm:$0xff]  ;;  %v861_v45 = vld [vmem:[#allocation5 + $0xe0] sm:$0xff] }
 0x121   : > { %v20365_v47 = vsub.f32 %v20261_v0, %v467_v46  ;;  %v20373_v55 = vsub.f32 %v20264_v1, %v469_v48  ;;  %v20414_v46 = vld [vmem:[%s20246_s3 + $0xf0] sm:$0xff] }
 0x122   : > { %v405_v49 = vpop.xlane.xlu0 %404  ;;  %v409_v50 = vpop.xlane.xlu1 %408 }
 0x123   : > { %v468_v51 = vmul.f32 0.0078125, %v405_v49  ;;  %v531_v52 = vmul.f32 %v20365_v47, %v20365_v47  ;;  %v470_v54 = vmul.f32 0.0078125, %v409_v50  ;;  %v533_v60 = vmul.f32 %v20373_v55, %v20373_v55 }
 0x124   : > { %v17640_v50 = vpack.c.bf16 %v861_v45, %v858_v44 }
 0x125   : > { %563 = vadd.xlane.f32.xlu1 %v531_v52  ;;  %v20370_v53 = vsub.f32 %v20269_v2, %v468_v51  ;;  %v20384_v62 = vsub.f32 %v20272_v3, %v470_v54  ;;  %v857_v51 = vld [vmem:[#allocation5 + $0xc0] sm:$0xff]  ;;  %v860_v52 = vld [vmem:[#allocation5 + $0xd8] sm:$0xff] }
 0x126   : > { %v411_v57 = vpop.xlane.xlu0 %410  ;;  %v413_v58 = vpop.xlane.xlu1 %412  ;;  %17641 = vmatprep.subr.bf16.mxu0 %v17640_v50  ;;  %18364 = vmatprep.subr.bf16.mxu1 %v17640_v50 }
 0x127   : > { %v532_v59 = vmul.f32 %v20370_v53, %v20370_v53  ;;  %v471_v61 = vmul.f32 0.0078125, %v411_v57  ;;  %v534_v2 = vmul.f32 %v20384_v62, %v20384_v62  ;;  %v472_v26 = vmul.f32 0.0078125, %v413_v58 }
 0x128   : > { %v17642_v58 = vpack.c.bf16 %v860_v52, %v857_v51  ;;  %v876_v52 = vld [vmem:[#allocation5 + $0x158] sm:$0xff] }
 0x129   : > { %454 = vadd.xlane.f32.xlu1 %v20376_v56  ;;  %565 = vadd.xlane.f32.xlu0 %v532_v59  ;;  %v20393_v27 = vsub.f32 %v20277_v4, %v471_v61  ;;  %v20402_v32 = vsub.f32 %v20280_v5, %v472_v26  ;;  %v864_v61 = vld [vmem:[#allocation5 + $0xf8] sm:$0xff] }
 0x12a   : > { %v415_v0 = vpop.xlane.xlu0 %414  ;;  %v417_v1 = vpop.xlane.xlu1 %416  ;;  %17643 = vmatpush1.bf16.msra.mxu0 %v17642_v58  ;;  %18372 = vmatpush1.bf16.msra.mxu1 %v17642_v58 }
 0x12b   : > { %v535_v30 = vmul.f32 %v20393_v27, %v20393_v27  ;;  %v473_v31 = vmul.f32 0.0078125, %v415_v0  ;;  %v474_v40 = vmul.f32 0.0078125, %v417_v1  ;;  %v536_v5 = vmul.f32 %v20402_v32, %v20402_v32  ;;  %v867_v0 = vld [vmem:[#allocation5 + $0x110] sm:$0xff]  ;;  %v20426_v1 = vld [vmem:[%s20246_s3 + $0xf8] sm:$0xff] }
 0x12c   : > { %v17644_v26 = vpack.c.bf16 %v867_v0, %v864_v61 }
 0x12d   : > { %456 = vadd.xlane.f32.xlu1 %v20387_v63  ;;  %567 = vadd.xlane.f32.xlu0 %v533_v60  ;;  %v20411_v43 = vsub.f32 %v20285_v6, %v473_v31  ;;  %v20417_v57 = vsub.f32 %v20288_v7, %v474_v40 }
 0x12e   : > { %v419_v29 = vpop.xlane.xlu0 %418  ;;  %v421_v3 = vpop.xlane.xlu1 %420  ;;  %17645 = vmatprep.subr.bf16.mxu0 %v17644_v26  ;;  %18365 = vmatprep.subr.bf16.mxu1 %v17644_v26 }
 0x12f   : > { %v475_v42 = vmul.f32 0.0078125, %v419_v29  ;;  %v476_v54 = vmul.f32 0.0078125, %v421_v3  ;;  %v537_v6 = vmul.f32 %v20411_v43, %v20411_v43  ;;  %v863_v29 = vld [vmem:[#allocation5 + $0xf0] sm:$0xff]  ;;  %v866_v3 = vld [vmem:[#allocation5 + $0x108] sm:$0xff] }
 0x131   : > { %458 = vadd.xlane.f32.xlu1 %v20396_v28  ;;  %569 = vadd.xlane.f32.xlu0 %v534_v2  ;;  %v20423_v60 = vsub.f32 %v20293_v8, %v475_v42  ;;  %v20431_v31 = vsub.f32 %v20296_v9, %v476_v54  ;;  %v17646_v8 = vpack.c.bf16 %v866_v3, %v863_v29  ;;  %v879_v54 = vld [vmem:[#allocation5 + $0x170] sm:$0xff] }
 0x132   : > { %v423_v4 = vpop.xlane.xlu0 %422  ;;  %v425_v36 = vpop.xlane.xlu1 %424  ;;  %v17648_v9 = vpack.c.bf16 %v873_v39, %v870_v38 }
 0x133   : > { %v477_v59 = vmul.f32 0.0078125, %v423_v4  ;;  %v539_v33 = vmul.f32 %v20423_v60, %v20423_v60  ;;  %v478_v34 = vmul.f32 0.0078125, %v425_v36  ;;  %17647 = vmatpush1.bf16.msra.mxu0 %v17646_v8  ;;  %18373 = vmatpush1.bf16.msra.mxu1 %v17646_v8  ;;  %v540_v42 = vmul.f32 %v20431_v31, %v20431_v31 }
 0x134   : > { %17649 = vmatprep.subr.bf16.mxu0 %v17648_v9  ;;  %18366 = vmatprep.subr.bf16.mxu1 %v17648_v9 }
 0x135   : > { %460 = vadd.xlane.f32.xlu1 %v20405_v35  ;;  %571 = vadd.xlane.f32.xlu0 %v535_v30  ;;  %v538_v30 = vmul.f32 %v20417_v57, %v20417_v57  ;;  %v20437_v37 = vsub.f32 %v20301_v10, %v477_v59  ;;  %v878_v59 = vld [vmem:[#allocation5 + $0x168] sm:$0xff] }
 0x136   : > { %v427_v48 = vpop.xlane.xlu0 %426  ;;  %v429_v49 = vpop.xlane.xlu1 %428 }
 0x137   : > { %v479_v4 = vmul.f32 0.0078125, %v427_v48  ;;  %v480_v44 = vmul.f32 0.0078125, %v429_v49  ;;  %v541_v10 = vmul.f32 %v20437_v37, %v20437_v37  ;;  %v20444_v48 = vsub.f32 %v20304_v11, %v478_v34 }
 0x138   : > { %v17652_v49 = vpack.c.bf16 %v879_v54, %v876_v52 }
 0x139   : > { %462 = vadd.xlane.f32.xlu1 %v20414_v46  ;;  %573 = vadd.xlane.f32.xlu0 %v536_v5  ;;  %v872_v5 = vld [vmem:[#allocation5 + $0x138] sm:$0xff]  ;;  %v20447_v51 = vsub.f32 %v20309_v12, %v479_v4  ;;  %v20450_v0 = vsub.f32 %v20312_v13, %v480_v44  ;;  %v542_v11 = vmul.f32 %v20444_v48, %v20444_v48  ;;  %v19989_v13 = vmov 0.0  }
 0x13a   : > { %v431_v2 = vpop.xlane.xlu0 %430  ;;  %v433_v7 = vpop.xlane.xlu1 %432  ;;  %v17650_v50 = vpack.c.bf16 %v872_v5, %v869_v41  ;;  %962 = vmatprep.mubr.f32.mxu0 %v19989_v13  ;;  %1088 = vmatprep.mubr.f32.mxu1 %v19989_v13 }
 0x13b   : > { %v481_v36 = vmul.f32 0.0078125, %v431_v2  ;;  %v482_v61 = vmul.f32 0.0078125, %v433_v7  ;;  %v543_v12 = vmul.f32 %v20447_v51, %v20447_v51 }
 0x13c   : > { %17651 = vmatpush1.bf16.msra.mxu0 %v17650_v50  ;;  %18374 = vmatpush1.bf16.msra.mxu1 %v17650_v50 }
 0x13d   : > { %464 = vadd.xlane.f32.xlu1 %v20426_v1  ;;  %575 = vadd.xlane.f32.xlu0 %v537_v6  ;;  %v875_v6 = vld [vmem:[#allocation5 + $0x150] sm:$0xff]  ;;  %v20457_v29 = vsub.f32 %v20317_v14, %v481_v36  ;;  %v20464_v8 = vsub.f32 %v20320_v15, %v482_v61 }
 0x13e   : > { %v445_v40 = vpop.xlane.xlu0 %444  ;;  %v435_v45 = vpop.xlane.xlu1 %434  ;;  %17653 = vmatprep.subr.bf16.mxu0 %v17652_v49  ;;  %v17654_v2 = vpack.c.bf16 %v878_v59, %v875_v6  ;;  %18367 = vmatprep.subr.bf16.mxu1 %v17652_v49 }
 0x13f   : > { %v488_v26 = vmul.f32 0.0078125, %v445_v40  ;;  %v545_v14 = vmul.f32 %v20457_v29, %v20457_v29  ;;  %v546_v39 = vmul.f32 %v20464_v8, %v20464_v8 }
 0x140   : > { %17655 = vmatpush1.bf16.msra.mxu0 %v17654_v2  ;;  %18375 = vmatpush1.bf16.msra.mxu1 %v17654_v2 }
 0x141   : > { %577 = vadd.xlane.f32.xlu1 %v538_v30  ;;  %579 = vadd.xlane.f32.xlu0 %v539_v33  ;;  %v544_v30 = vmul.f32 %v20450_v0, %v20450_v0  ;;  %v483_v33 = vmul.f32 0.0078125, %v435_v45  ;;  %v20469_v4 = vsub.f32 %v20325_v16, %v488_v26 }
 0x142   : > { %v447_v58 = vpop.xlane.xlu0 %446  ;;  %v437_v3 = vpop.xlane.xlu1 %436 }
 0x143   : > { %v489_v34 = vmul.f32 0.0078125, %v447_v58  ;;  %v484_v40 = vmul.f32 0.0078125, %v437_v3  ;;  %v552_v15 = vmul.f32 %v20469_v4, %v20469_v4  ;;  %v20476_v5 = vsub.f32 %v20328_v17, %v483_v33 }
 0x145   : > { %581 = vadd.xlane.f32.xlu1 %v540_v42  ;;  %583 = vadd.xlane.f32.xlu0 %v541_v10  ;;  %v20479_v42 = vsub.f32 %v20333_v18, %v489_v34  ;;  %v20482_v44 = vsub.f32 %v20336_v19, %v484_v40  ;;  %v547_v50 = vmul.f32 %v20476_v5, %v20476_v5 }
 0x146   : > { %v449_v7 = vpop.xlane.xlu0 %448  ;;  %v439_v9 = vpop.xlane.xlu1 %438 }
 0x147   : > { %v490_v41 = vmul.f32 0.0078125, %v449_v7  ;;  %v485_v16 = vmul.f32 0.0078125, %v439_v9  ;;  %v553_v10 = vmul.f32 %v20479_v42, %v20479_v42  ;;  %v548_v18 = vmul.f32 %v20482_v44, %v20482_v44 }
 0x149   : > { %585 = vadd.xlane.f32.xlu1 %v542_v11  ;;  %587 = vadd.xlane.f32.xlu0 %v543_v12  ;;  %v20489_v17 = vsub.f32 %v20341_v20, %v490_v41  ;;  %v20494_v19 = vsub.f32 %v20344_v21, %v485_v16 }
 0x14a   : > { %v451_v38 = vpop.xlane.xlu0 %450  ;;  %v441_v52 = vpop.xlane.xlu1 %440 }
 0x14b   : > { %v491_v36 = vmul.f32 0.0078125, %v451_v38  ;;  %v554_v54 = vmul.f32 %v20489_v17, %v20489_v17  ;;  %v486_v58 = vmul.f32 0.0078125, %v441_v52  ;;  %v549_v20 = vmul.f32 %v20494_v19, %v20494_v19 }
 0x14d   : > { %589 = vadd.xlane.f32.xlu1 %v544_v30  ;;  %591 = vadd.xlane.f32.xlu0 %v545_v14  ;;  %v20499_v6 = vsub.f32 %v20349_v22, %v491_v36  ;;  %v20506_v2 = vsub.f32 %v20352_v23, %v486_v58 }
 0x14e   : > { %v453_v45 = vpop.xlane.xlu0 %452 }
 0x14f   : > { %v492_v49 = vmul.f32 0.0078125, %v453_v45  ;;  %v555_v21 = vmul.f32 %v20499_v6, %v20499_v6  ;;  %v550_v22 = vmul.f32 %v20506_v2, %v20506_v2 }
 0x151   : > { %593 = vadd.xlane.f32.xlu1 %v546_v39  ;;  %605 = vadd.xlane.f32.xlu0 %v552_v15  ;;  %v20509_v11 = vsub.f32 %v20357_v24, %v492_v49  ;;  %v20536_v49 = vld [vmem:[%s24749_s1] ss:$0 sm:$0xff] }
 0x152   : > { %v443_v59 = vpop.xlane.xlu0 %442 }
 0x153   : > { %v487_v61 = vmul.f32 0.0078125, %v443_v59  ;;  %v556_v12 = vmul.f32 %v20509_v11, %v20509_v11 }
 0x155   : > { %595 = vadd.xlane.f32.xlu1 %v547_v50  ;;  %607 = vadd.xlane.f32.xlu0 %v553_v10  ;;  %v20516_v26 = vsub.f32 %v20361_v25, %v487_v61 }
 0x157   : > { %v551_v23 = vmul.f32 %v20516_v26, %v20516_v26 }
 0x159   : > { %597 = vadd.xlane.f32.xlu1 %v548_v18  ;;  %609 = vadd.xlane.f32.xlu0 %v554_v54 }
 0x15d   : > { %599 = vadd.xlane.f32.xlu1 %v549_v20  ;;  %611 = vadd.xlane.f32.xlu0 %v555_v21 }
 0x161   : > { %601 = vadd.xlane.f32.xlu1 %v550_v22  ;;  %613 = vadd.xlane.f32.xlu0 %v556_v12 }
 0x165   : > { %603 = vadd.xlane.f32.xlu1 %v551_v23 }
 0x1b2   : > { %v564_v3 = vpop.xlane.xlu1 %563 }
 0x1b3   : > { %v627_v24 = vmul.f32 0.0078125, %v564_v3 }
 0x1b5   : > { %v659_v7 = vadd.f32 1e-05, %v627_v24 }
 0x1b6   : > { %v455_v30 = vpop.xlane.xlu1 %454  ;;  %v566_v14 = vpop.xlane.xlu0 %565 }
 0x1b7   : > { %19183 = vrsqrt.f32 %v659_v7  ;;  %v493_v33 = vmul.f32 0.0078125, %v455_v30  ;;  %v628_v34 = vmul.f32 0.0078125, %v566_v14 }
 0x1b9   : > { %v660_v38 = vadd.f32 1e-05, %v628_v34  ;;  %v20521_v39 = vsub.f32 %v20376_v56, %v493_v33 }
 0x1ba   : > { %v457_v25 = vpop.xlane.xlu1 %456  ;;  %v568_v40 = vpop.xlane.xlu0 %567 }
 0x1bb   : > { %19185 = vrsqrt.f32 %v660_v38  ;;  %v494_v9 = vmul.f32 0.0078125, %v457_v25  ;;  %v629_v15 = vmul.f32 0.0078125, %v568_v40  ;;  %v557_v41 = vmul.f32 %v20521_v39, %v20521_v39 }
 0x1bd   : > { %v661_v16 = vadd.f32 1e-05, %v629_v15  ;;  %615 = vadd.xlane.f32.xlu0 %v557_v41  ;;  %v20526_v45 = vsub.f32 %v20387_v63, %v494_v9 }
 0x1be   : > { %v459_v50 = vpop.xlane.xlu1 %458  ;;  %v570_v10 = vpop.xlane.xlu0 %569 }
 0x1bf   : > { %19187 = vrsqrt.f32 %v661_v16  ;;  %v495_v36 = vmul.f32 0.0078125, %v459_v50  ;;  %v630_v52 = vmul.f32 0.0078125, %v570_v10  ;;  %v558_v56 = vmul.f32 %v20526_v45, %v20526_v45 }
 0x1c1   : > { %v19184_v18 = vpop.eup %19183  ;;  %v662_v54 = vadd.f32 1e-05, %v630_v52  ;;  %617 = vadd.xlane.f32.xlu1 %v558_v56  ;;  %v20531_v58 = vsub.f32 %v20396_v28, %v495_v36  ;;  %v20544_v28 = vld [vmem:[%s24750_s2] ss:$0 sm:$0xff] }
 0x1c2   : > { %v461_v63 = vpop.xlane.xlu1 %460  ;;  %v572_v59 = vpop.xlane.xlu0 %571  ;;  %v723_v20 = vmul.f32 %v19184_v18, %v20365_v47 }
 0x1c3   : > { %19189 = vrsqrt.f32 %v662_v54  ;;  %v496_v21 = vmul.f32 0.0078125, %v461_v63  ;;  %v631_v61 = vmul.f32 0.0078125, %v572_v59  ;;  %v559_v22 = vmul.f32 %v20531_v58, %v20531_v58 }
 0x1c4   : > { %v762_v12 = vmul.f32 %v20536_v49, %v723_v20 }
 0x1c5   : > { %v19186_v23 = vpop.eup %19185  ;;  %v663_v3 = vadd.f32 1e-05, %v631_v61  ;;  %619 = vadd.xlane.f32.xlu0 %v559_v22  ;;  %v20548_v24 = vsub.f32 %v20405_v35, %v496_v21 }
 0x1c6   : > { %v463_v47 = vpop.xlane.xlu1 %462  ;;  %v574_v7 = vpop.xlane.xlu0 %573  ;;  %v20551_v30 = vadd.f32 %v20544_v28, %v762_v12  ;;  %v724_v14 = vmul.f32 %v19186_v23, %v20370_v53 }
 0x1c7   : > { %19191 = vrsqrt.f32 %v663_v3  ;;  %v497_v33 = vmul.f32 0.0078125, %v463_v47  ;;  %v632_v34 = vmul.f32 0.0078125, %v574_v7  ;;  %v560_v38 = vmul.f32 %v20548_v24, %v20548_v24 }
 0x1c8   : > { %963 = vmatmul.mubr.f32.vlgmr.msra.gmra.mrb[0].mxu0 %v20551_v30  ;;  %v763_v25 = vmul.f32 %v20536_v49, %v724_v14 }
 0x1c9   : > { %v19188_v40 = vpop.eup %19187  ;;  %v664_v35 = vadd.f32 1e-05, %v632_v34  ;;  %621 = vadd.xlane.f32.xlu1 %v560_v38  ;;  %968 = vmatprep.mubr.f32.mxu0 %v19989_v13  ;;  %v20560_v9 = vsub.f32 %v20414_v46, %v497_v33 }
 0x1ca   : > { %v465_v15 = vpop.xlane.xlu1 %464  ;;  %v576_v53 = vpop.xlane.xlu0 %575  ;;  %v20563_v41 = vadd.f32 %v20544_v28, %v763_v25  ;;  %v725_v16 = vmul.f32 %v19188_v40, %v20373_v55 }
 0x1cb   : > { %19193 = vrsqrt.f32 %v664_v35  ;;  %v498_v50 = vmul.f32 0.0078125, %v465_v15  ;;  %v633_v10 = vmul.f32 0.0078125, %v576_v53  ;;  %v561_v36 = vmul.f32 %v20560_v9, %v20560_v9 }
 0x1cc   : > { %969 = vmatmul.mubr.f32.gmra.mrb[2].mxu0 %v20563_v41  ;;  %v764_v52 = vmul.f32 %v20536_v49, %v725_v16 }
 0x1cd   : > { %v19190_v56 = vpop.eup %19189  ;;  %v665_v46 = vadd.f32 1e-05, %v633_v10  ;;  %623 = vadd.xlane.f32.xlu0 %v561_v36  ;;  %974 = vmatprep.mubr.f32.mxu0 %v19989_v13  ;;  %v20572_v18 = vsub.f32 %v20426_v1, %v498_v50  ;;  %v835_v50 = vld [vmem:[#allocation5 + $0x10] sm:$0xff]  ;;  %v838_v10 = vld [vmem:[#allocation5 + $0x28] sm:$0xff] }
 0x1ce   : > { %v578_v54 = vpop.xlane.xlu1 %577  ;;  %v580_v55 = vpop.xlane.xlu0 %579  ;;  %v20575_v63 = vadd.f32 %v20544_v28, %v764_v52  ;;  %v726_v59 = vmul.f32 %v19190_v56, %v20384_v62  ;;  %v20596_v52 = vpack.c.bf16 %v838_v10, %v835_v50 }
 0x1cf   : > { %19195 = vrsqrt.f32 %v665_v46  ;;  %v634_v20 = vmul.f32 0.0078125, %v578_v54  ;;  %v635_v21 = vmul.f32 0.0078125, %v580_v55  ;;  %v562_v61 = vmul.f32 %v20572_v18, %v20572_v18 }
 0x1d0   : > { %975 = vmatmul.mubr.f32.gmra.mrb[4].mxu0 %v20575_v63  ;;  %v765_v22 = vmul.f32 %v20536_v49, %v726_v59  ;;  %17657 = vmatprep.subr.bf16.mxu1 %v20596_v52 }
 0x1d1   : > { %v19192_v12 = vpop.eup %19191  ;;  %v666_v1 = vadd.f32 1e-05, %v634_v20  ;;  %v667_v23 = vadd.f32 1e-05, %v635_v21  ;;  %625 = vadd.xlane.f32.xlu1 %v562_v61  ;;  %980 = vmatprep.mubr.f32.mxu0 %v19989_v13 }
 0x1d2   : > { %v582_v3 = vpop.xlane.xlu1 %581  ;;  %v584_v47 = vpop.xlane.xlu0 %583  ;;  %v20584_v62 = vadd.f32 %v20544_v28, %v765_v22  ;;  %v727_v7 = vmul.f32 %v19192_v12, %v20393_v27 }
 0x1d3   : > { %19197 = vrsqrt.f32 %v666_v1  ;;  %v636_v14 = vmul.f32 0.0078125, %v582_v3  ;;  %v637_v33 = vmul.f32 0.0078125, %v584_v47 }
 0x1d4   : > { %19199 = vrsqrt.f32 %v667_v23  ;;  %981 = vmatmul.mubr.f32.gmra.mrb[6].mxu0 %v20584_v62  ;;  %v766_v34 = vmul.f32 %v20536_v49, %v727_v7 }
 0x1d5   : > { %v19194_v38 = vpop.eup %19193  ;;  %v668_v25 = vadd.f32 1e-05, %v636_v14  ;;  %v669_v40 = vadd.f32 1e-05, %v637_v33  ;;  %986 = vmatprep.mubr.f32.mxu0 %v19989_v13 }
 0x1d6   : > { %v586_v35 = vpop.xlane.xlu1 %585  ;;  %v588_v15 = vpop.xlane.xlu0 %587  ;;  %v20591_v53 = vadd.f32 %v20544_v28, %v766_v34  ;;  %v728_v27 = vmul.f32 %v19194_v38, %v20402_v32 }
 0x1d7   : > { %19201 = vrsqrt.f32 %v668_v25  ;;  %v638_v16 = vmul.f32 0.0078125, %v586_v35  ;;  %v639_v54 = vmul.f32 0.0078125, %v588_v15 }
 0x1d8   : > { %987 = vmatmul.mubr.f32.gmra.mrb[8].mxu0 %v20591_v53  ;;  %v767_v36 = vmul.f32 %v20536_v49, %v728_v27  ;;  %19203 = vrsqrt.f32 %v669_v40 }
 0x1d9   : > { %v19196_v56 = vpop.eup %19195  ;;  %v670_v46 = vadd.f32 1e-05, %v638_v16  ;;  %992 = vmatprep.mubr.f32.mxu0 %v19989_v13  ;;  %v671_v22 = vadd.f32 1e-05, %v639_v54 }
 0x1da   : > { %v590_v55 = vpop.xlane.xlu1 %589  ;;  %v592_v59 = vpop.xlane.xlu0 %591  ;;  %v20600_v32 = vadd.f32 %v20544_v28, %v767_v36  ;;  %v729_v20 = vmul.f32 %v19196_v56, %v20411_v43 }
 0x1db   : > { %19205 = vrsqrt.f32 %v670_v46  ;;  %v640_v12 = vmul.f32 0.0078125, %v590_v55  ;;  %v641_v25 = vmul.f32 0.0078125, %v592_v59 }
 0x1dc   : > { %993 = vmatmul.mubr.f32.gmra.mrb[10].mxu0 %v20600_v32  ;;  %v768_v21 = vmul.f32 %v20536_v49, %v729_v20  ;;  %19207 = vrsqrt.f32 %v671_v22 }
 0x1dd   : > { %v19198_v61 = vpop.eup %19197  ;;  %998 = vmatprep.mubr.f32.mxu0 %v19989_v13  ;;  %v672_v38 = vadd.f32 1e-05, %v640_v12  ;;  %v673_v10 = vadd.f32 1e-05, %v641_v25 }
 0x1de   : > { %v19200_v1 = vpop.eup %19199  ;;  %v594_v23 = vpop.xlane.xlu1 %593  ;;  %v20608_v47 = vadd.f32 %v20544_v28, %v768_v21  ;;  %v730_v43 = vmul.f32 %v19198_v61, %v20417_v57 }
 0x1df   : > { %v606_v3 = vpop.xlane.xlu0 %605  ;;  %v731_v14 = vmul.f32 %v19200_v1, %v20423_v60  ;;  %v642_v36 = vmul.f32 0.0078125, %v594_v23 }
 0x1e0   : > { %v648_v7 = vmul.f32 0.0078125, %v606_v3  ;;  %999 = vmatmul.mubr.f32.gmra.mrb[12].mxu0 %v20608_v47  ;;  %v769_v33 = vmul.f32 %v20536_v49, %v730_v43 }
 0x1e1   : > { %v19202_v34 = vpop.eup %19201  ;;  %1004 = vmatprep.mubr.f32.mxu0 %v19989_v13  ;;  %v770_v57 = vmul.f32 %v20536_v49, %v731_v14  ;;  %v674_v22 = vadd.f32 1e-05, %v642_v36  ;;  %v844_v36 = vld [vmem:[#allocation5 + $0x58] sm:$0xff] }
 0x1e2   : > { %v680_v40 = vadd.f32 1e-05, %v648_v7  ;;  %v596_v35 = vpop.xlane.xlu1 %595  ;;  %v20616_v27 = vadd.f32 %v20544_v28, %v769_v33  ;;  %v732_v60 = vmul.f32 %v19202_v34, %v20431_v31  ;;  %v19204_v16 = vpop.eup %19203 }
 0x1e3   : > { %v608_v15 = vpop.xlane.xlu0 %607  ;;  %v20623_v55 = vadd.f32 %v20544_v28, %v770_v57  ;;  %v733_v31 = vmul.f32 %v19204_v16, %v20437_v37  ;;  %v643_v21 = vmul.f32 0.0078125, %v596_v35 }
 0x1e4   : > { %v649_v50 = vmul.f32 0.0078125, %v608_v15  ;;  %19209 = vrsqrt.f32 %v680_v40  ;;  %1005 = vmatmul.mubr.f32.gmra.mrb[14].mxu0 %v20616_v27  ;;  %v771_v59 = vmul.f32 %v20536_v49, %v732_v60 }
 0x1e5   : > { %19211 = vrsqrt.f32 %v672_v38  ;;  %1010 = vmatprep.mubr.f32.mxu0 %v19989_v13  ;;  %v19206_v20 = vpop.eup %19205  ;;  %v772_v43 = vmul.f32 %v20536_v49, %v733_v31  ;;  %v675_v14 = vadd.f32 1e-05, %v643_v21 }
 0x1e6   : > { %v681_v56 = vadd.f32 1e-05, %v649_v50  ;;  %v598_v46 = vpop.xlane.xlu1 %597  ;;  %v20630_v3 = vadd.f32 %v20544_v28, %v771_v59  ;;  %v734_v37 = vmul.f32 %v19206_v20, %v20444_v48  ;;  %v19208_v7 = vpop.eup %19207 }
 0x1e7   : > { %v610_v54 = vpop.xlane.xlu0 %609  ;;  %v644_v34 = vmul.f32 0.0078125, %v598_v46  ;;  %v20637_v35 = vadd.f32 %v20544_v28, %v772_v43  ;;  %v735_v48 = vmul.f32 %v19208_v7, %v20447_v51 }
 0x1e8   : > { %v650_v61 = vmul.f32 0.0078125, %v610_v54  ;;  %19213 = vrsqrt.f32 %v681_v56  ;;  %1011 = vmatmul.mubr.f32.gmra.mrb[16].mxu0 %v20623_v55  ;;  %v773_v15 = vmul.f32 %v20536_v49, %v734_v37 }
 0x1e9   : > { %19215 = vrsqrt.f32 %v673_v10  ;;  %1016 = vmatprep.mubr.f32.mxu0 %v19989_v13  ;;  %v841_v10 = vld [vmem:[#allocation5 + $0x40] sm:$0xff]  ;;  %v676_v56 = vadd.f32 1e-05, %v644_v34  ;;  %v774_v20 = vmul.f32 %v20536_v49, %v735_v48 }
 0x1ea   : > { %v682_v12 = vadd.f32 1e-05, %v650_v61  ;;  %v600_v1 = vpop.xlane.xlu1 %599  ;;  %v20646_v51 = vadd.f32 %v20544_v28, %v773_v15  ;;  %v853_v48 = vld [vmem:[#allocation5 + $0xa0] sm:$0xff] }
 0x1eb   : > { %v612_v23 = vpop.xlane.xlu0 %611  ;;  %v645_v46 = vmul.f32 0.0078125, %v600_v1  ;;  %v847_v1 = vld [vmem:[#allocation5 + $0x70] sm:$0xff] }
 0x1ec   : > { %v651_v33 = vmul.f32 0.0078125, %v612_v23  ;;  %19217 = vrsqrt.f32 %v682_v12  ;;  %1017 = vmatmul.mubr.f32.gmra.mrb[18].mxu0 %v20630_v3  ;;  %v17660_v12 = vpack.c.bf16 %v844_v36, %v841_v10  ;;  %v850_v23 = vld [vmem:[#allocation5 + $0x88] sm:$0xff] }
 0x1ed   : > { %19219 = vrsqrt.f32 %v674_v22  ;;  %1022 = vmatprep.mubr.f32.mxu0 %v19989_v13  ;;  %v677_v43 = vadd.f32 1e-05, %v645_v46  ;;  %v17664_v15 = vpack.c.bf16 %v850_v23, %v847_v1 }
 0x1ee   : > { %v683_v38 = vadd.f32 1e-05, %v651_v33  ;;  %v19210_v25 = vpop.eup %19209  ;;  %19221 = vrsqrt.f32 %v675_v14  ;;  %v602_v50 = vpop.xlane.xlu1 %601 }
 0x1ef   : > { %v614_v40 = vpop.xlane.xlu0 %613  ;;  %v19212_v57 = vpop.eup %19211  ;;  %v744_v16 = vmul.f32 %v19210_v25, %v20469_v4  ;;  %v646_v37 = vmul.f32 0.0078125, %v602_v50 }
 0x1f0   : > { %v652_v60 = vmul.f32 0.0078125, %v614_v40  ;;  %19223 = vrsqrt.f32 %v683_v38  ;;  %1023 = vmatmul.mubr.f32.gmra.mrb[20].mxu0 %v20637_v35  ;;  %v736_v4 = vmul.f32 %v19212_v57, %v20450_v0  ;;  %v856_v57 = vld [vmem:[#allocation5 + $0xb8] sm:$0xff] }
 0x1f1   : > { %1028 = vmatprep.mubr.f32.mxu0 %v19989_v13  ;;  %v783_v59 = vmul.f32 %v20536_v49, %v744_v16  ;;  %v678_v16 = vadd.f32 1e-05, %v646_v37  ;;  %v865_v37 = vld [vmem:[#allocation5 + $0x100] sm:$0xff] }
 0x1f2   : > { %v684_v54 = vadd.f32 1e-05, %v652_v60  ;;  %v19214_v31 = vpop.eup %19213  ;;  %v604_v14 = vpop.xlane.xlu1 %603  ;;  %v775_v33 = vmul.f32 %v20536_v49, %v736_v4 }
 0x1f3   : > { %v19216_v21 = vpop.eup %19215  ;;  %v20651_v61 = vadd.f32 %v20544_v28, %v783_v59  ;;  %v745_v22 = vmul.f32 %v19214_v31, %v20479_v42  ;;  %v20660_v42 = vadd.f32 %v20544_v28, %v774_v20  ;;  %v647_v50 = vmul.f32 0.0078125, %v604_v14  ;;  %v859_v59 = vld [vmem:[#allocation5 + $0xd0] sm:$0xff]  ;;  %v862_v31 = vld [vmem:[#allocation5 + $0xe8] sm:$0xff] }
 0x1f4   : > { %19225 = vrsqrt.f32 %v684_v54  ;;  %1029 = vmatmul.mubr.f32.gmra.mrb[22].mxu0 %v20646_v51  ;;  %v737_v34 = vmul.f32 %v19216_v21, %v20457_v29  ;;  %v17668_v54 = vpack.c.bf16 %v856_v57, %v853_v48 }
 0x1f5   : > { %19227 = vrsqrt.f32 %v676_v56  ;;  %1089 = vmatmul.mubr.f32.vlgmr.msra.gmra.mrb[0].mxu1 %v20651_v61  ;;  %1034 = vmatprep.mubr.f32.mxu0 %v19989_v13  ;;  %v784_v0 = vmul.f32 %v20536_v49, %v745_v22  ;;  %v679_v20 = vadd.f32 1e-05, %v647_v50  ;;  %v877_v50 = vld [vmem:[#allocation5 + $0x160] sm:$0xff] }
 0x1f6   : > { %v19218_v7 = vpop.eup %19217  ;;  %1094 = vmatprep.mubr.f32.mxu1 %v19989_v13  ;;  %17659 = vmatpush3.bf16.msra.mxu1 %v20596_v52  ;;  %19229 = vrsqrt.f32 %v677_v43  ;;  %v776_v10 = vmul.f32 %v20536_v49, %v737_v34  ;;  %v17672_v43 = vpack.c.bf16 %v862_v31, %v859_v59 }
 0x1f7   : > { %v19220_v38 = vpop.eup %19219  ;;  %v20666_v25 = vadd.f32 %v20544_v28, %v784_v0  ;;  %v746_v40 = vmul.f32 %v19218_v7, %v20489_v17  ;;  %17661 = vmatprep.subr.bf16.mxu1 %v17660_v12  ;;  %v20675_v17 = vadd.f32 %v20544_v28, %v775_v33  ;;  %19231 = vrsqrt.f32 %v678_v16  ;;  %v868_v0 = vld [vmem:[#allocation5 + $0x118] sm:$0xff] }
 0x1f8   : > { %1035 = vmatmul.mubr.f32.gmra.mrb[24].mxu0 %v20660_v42  ;;  %v19222_v60 = vpop.eup %19221  ;;  %v738_v36 = vmul.f32 %v19220_v38, %v20464_v8  ;;  %v20689_v21 = vadd.f32 %v20544_v28, %v776_v10  ;;  %19233 = vrsqrt.f32 %v679_v20  ;;  %v17676_v38 = vpack.c.bf16 %v868_v0, %v865_v37 }
 0x1f9   : > { %1095 = vmatmul.mubr.f32.gmra.mrb[2].mxu1 %v20666_v25  ;;  %1040 = vmatprep.mubr.f32.mxu0 %v19989_v13  ;;  %v785_v29 = vmul.f32 %v20536_v49, %v746_v40  ;;  %v739_v22 = vmul.f32 %v19222_v60, %v20476_v5  ;;  %v871_v40 = vld [vmem:[#allocation5 + $0x130] sm:$0xff] }
 0x1fa   : > { %v19224_v52 = vpop.eup %19223  ;;  %1100 = vmatprep.mubr.f32.mxu1 %v19989_v13  ;;  %17663 = vmatpush3.bf16.msra.mxu1 %v17660_v12 }
 0x1fb   : > { %v20680_v56 = vadd.f32 %v20544_v28, %v785_v29  ;;  %v747_v46 = vmul.f32 %v19224_v52, %v20499_v6  ;;  %17665 = vmatprep.subr.bf16.mxu1 %v17664_v15  ;;  %v777_v6 = vmul.f32 %v20536_v49, %v738_v36  ;;  %v880_v29 = vld [vmem:[#allocation5 + $0x178] sm:$0xff] }
 0x1fc   : > { %1041 = vmatmul.mubr.f32.gmra.mrb[26].mxu0 %v20675_v17 }
 0x1fd   : > { %1101 = vmatmul.mubr.f32.gmra.mrb[4].mxu1 %v20680_v56  ;;  %1046 = vmatprep.mubr.f32.mxu0 %v19989_v13  ;;  %v786_v8 = vmul.f32 %v20536_v49, %v747_v46  ;;  %v20703_v7 = vadd.f32 %v20544_v28, %v777_v6  ;;  %v17684_v46 = vpack.c.bf16 %v880_v29, %v877_v50 }
 0x1fe   : > { %v19226_v4 = vpop.eup %19225  ;;  %1106 = vmatprep.mubr.f32.mxu1 %v19989_v13  ;;  %17667 = vmatpush3.bf16.msra.mxu1 %v17664_v15  ;;  %v874_v15 = vld [vmem:[#allocation5 + $0x148] sm:$0xff] }
 0x1ff   : > { %v19228_v12 = vpop.eup %19227  ;;  %v20694_v1 = vadd.f32 %v20544_v28, %v786_v8  ;;  %v748_v23 = vmul.f32 %v19226_v4, %v20509_v11  ;;  %17669 = vmatprep.subr.bf16.mxu1 %v17668_v54  ;;  %v778_v11 = vmul.f32 %v20536_v49, %v739_v22  ;;  %v17680_v16 = vpack.c.bf16 %v874_v15, %v871_v40 }
 0x200   : > { %1047 = vmatmul.mubr.f32.gmra.mrb[28].mxu0 %v20689_v21  ;;  %v740_v14 = vmul.f32 %v19228_v12, %v20482_v44  ;;  %v19230_v33 = vpop.eup %19229 }
 0x201   : > { %1107 = vmatmul.mubr.f32.gmra.mrb[6].mxu1 %v20694_v1  ;;  %1052 = vmatprep.mubr.f32.mxu0 %v19989_v13  ;;  %v787_v5 = vmul.f32 %v20536_v49, %v748_v23  ;;  %v20714_v48 = vadd.f32 %v20544_v28, %v778_v11  ;;  %v741_v57 = vmul.f32 %v19230_v33, %v20494_v19  ;;  %v19232_v60 = vpop.eup %19231 }
 0x202   : > { %1112 = vmatprep.mubr.f32.mxu1 %v19989_v13  ;;  %17671 = vmatpush3.bf16.msra.mxu1 %v17668_v54  ;;  %v779_v44 = vmul.f32 %v20536_v49, %v740_v14  ;;  %v742_v36 = vmul.f32 %v19232_v60, %v20506_v2  ;;  %v19234_v19 = vpop.eup %19233 }
 0x203   : > { %v20708_v34 = vadd.f32 %v20544_v28, %v787_v5  ;;  %17673 = vmatprep.subr.bf16.mxu1 %v17672_v43  ;;  %v780_v10 = vmul.f32 %v20536_v49, %v741_v57  ;;  %v743_v31 = vmul.f32 %v19234_v19, %v20516_v26 }
 0x204   : > { %1053 = vmatmul.mubr.f32.gmra.mrb[30].mxu0 %v20703_v7  ;;  %v20722_v52 = vadd.f32 %v20544_v28, %v779_v44  ;;  %v781_v59 = vmul.f32 %v20536_v49, %v742_v36 }
 0x205   : > { %1113 = vmatmul.mubr.f32.gmra.mrb[8].mxu1 %v20708_v34  ;;  %1058 = vmatprep.mubr.f32.mxu0 %v19989_v13  ;;  %v20729_v54 = vadd.f32 %v20544_v28, %v780_v10  ;;  %v782_v20 = vmul.f32 %v20536_v49, %v743_v31 }
 0x206   : > { %1118 = vmatprep.mubr.f32.mxu1 %v19989_v13  ;;  %17675 = vmatpush3.bf16.msra.mxu1 %v17672_v43  ;;  %v20736_v2 = vadd.f32 %v20544_v28, %v781_v59 }
 0x207   : > { %17677 = vmatprep.subr.bf16.mxu1 %v17676_v38  ;;  %v20742_v8 = vadd.f32 %v20544_v28, %v782_v20 }
 0x208   : > { %1059 = vmatmul.mubr.f32.gmra.mrb[32].mxu0 %v20714_v48 }
 0x209   : > { %1064 = vmatprep.mubr.f32.mxu0 %v19989_v13 }
 0x20a   : > { %17679 = vmatpush3.bf16.msra.mxu1 %v17676_v38 }
 0x20b   : > { %17681 = vmatprep.subr.bf16.mxu1 %v17680_v16 }
 0x20c   : > { %1065 = vmatmul.mubr.f32.gmra.mrb[34].mxu0 %v20722_v52 }
 0x20d   : > { %1070 = vmatprep.mubr.f32.mxu0 %v19989_v13 }
 0x20e   : > { %17683 = vmatpush3.bf16.msra.mxu1 %v17680_v16 }
 0x20f   : > { %17685 = vmatprep.subr.bf16.mxu1 %v17684_v46 }
 0x210   : > { %1071 = vmatmul.mubr.f32.gmra.mrb[36].mxu0 %v20729_v54 }
 0x211   : > { %1076 = vmatprep.mubr.f32.mxu0 %v19989_v13 }
 0x212   : > { %17687 = vmatpush3.bf16.msra.mxu1 %v17684_v46 }
 0x214   : > { %1077 = vmatmul.mubr.f32.gmra.mrb[38].mxu0 %v20736_v2 }
 0x215   : > { %1082 = vmatprep.mubr.f32.mxu0 %v19989_v13 }
 0x218   : > { %1083 = vmatmul.mubr.f32.gmra.mrb[40].mxu0 %v20742_v8 }
 0x24a   : > { %v616_v26 = vpop.xlane.xlu0 %615 }
 0x24b   : > { %v653_v4 = vmul.f32 0.0078125, %v616_v26 }
 0x24d   : > { %v685_v6 = vadd.f32 1e-05, %v653_v4 }
 0x24e   : > { %v618_v22 = vpop.xlane.xlu1 %617 }
 0x24f   : > { %19235 = vrsqrt.f32 %v685_v6  ;;  %v654_v12 = vmul.f32 0.0078125, %v618_v22 }
 0x251   : > { %v686_v23 = vadd.f32 1e-05, %v654_v12 }
 0x252   : > { %v620_v43 = vpop.xlane.xlu0 %619 }
 0x253   : > { %19237 = vrsqrt.f32 %v686_v23  ;;  %v655_v37 = vmul.f32 0.0078125, %v620_v43 }
 0x255   : > { %v687_v0 = vadd.f32 1e-05, %v655_v37 }
 0x256   : > { %v622_v5 = vpop.xlane.xlu1 %621 }
 0x257   : > { %19239 = vrsqrt.f32 %v687_v0  ;;  %v656_v11 = vmul.f32 0.0078125, %v622_v5 }
 0x259   : > { %v19236_v14 = vpop.eup %19235  ;;  %v688_v33 = vadd.f32 1e-05, %v656_v11 }
 0x25a   : > { %v624_v38 = vpop.xlane.xlu0 %623  ;;  %v749_v40 = vmul.f32 %v19236_v14, %v20521_v39 }
 0x25b   : > { %19241 = vrsqrt.f32 %v688_v33  ;;  %v657_v15 = vmul.f32 0.0078125, %v624_v38 }
 0x25c   : > { %v788_v44 = vmul.f32 %v20536_v49, %v749_v40 }
 0x25d   : > { %v19238_v57 = vpop.eup %19237  ;;  %v689_v60 = vadd.f32 1e-05, %v657_v15 }
 0x25e   : > { %v626_v16 = vpop.xlane.xlu1 %625  ;;  %v20748_v50 = vadd.f32 %v20544_v28, %v788_v44  ;;  %v750_v29 = vmul.f32 %v19238_v57, %v20526_v45 }
 0x25f   : > { %19243 = vrsqrt.f32 %v689_v60  ;;  %v658_v10 = vmul.f32 0.0078125, %v626_v16 }
 0x260   : > { %1119 = vmatmul.mubr.f32.gmra.mrb[10].mxu1 %v20748_v50  ;;  %v789_v36 = vmul.f32 %v20536_v49, %v750_v29 }
 0x261   : > { %v19240_v19 = vpop.eup %19239  ;;  %v690_v39 = vadd.f32 1e-05, %v658_v10  ;;  %1124 = vmatprep.mubr.f32.mxu1 %v19989_v13 }
 0x262   : > { %v20755_v46 = vadd.f32 %v20544_v28, %v789_v36  ;;  %v751_v59 = vmul.f32 %v19240_v19, %v20531_v58 }
 0x263   : > { %19245 = vrsqrt.f32 %v690_v39 }
 0x264   : > { %1125 = vmatmul.mubr.f32.gmra.mrb[12].mxu1 %v20755_v46  ;;  %v790_v45 = vmul.f32 %v20536_v49, %v751_v59 }
 0x265   : > { %v19242_v31 = vpop.eup %19241  ;;  %1130 = vmatprep.mubr.f32.mxu1 %v19989_v13 }
 0x266   : > { %v20762_v20 = vadd.f32 %v20544_v28, %v790_v45  ;;  %v752_v26 = vmul.f32 %v19242_v31, %v20548_v24 }
 0x268   : > { %1131 = vmatmul.mubr.f32.gmra.mrb[14].mxu1 %v20762_v20  ;;  %v791_v4 = vmul.f32 %v20536_v49, %v752_v26 }
 0x269   : > { %v19244_v6 = vpop.eup %19243  ;;  %1136 = vmatprep.mubr.f32.mxu1 %v19989_v13 }
 0x26a   : > { %v20769_v58 = vadd.f32 %v20544_v28, %v791_v4  ;;  %v753_v22 = vmul.f32 %v19244_v6, %v20560_v9 }
 0x26c   : > { %1137 = vmatmul.mubr.f32.gmra.mrb[16].mxu1 %v20769_v58  ;;  %v792_v12 = vmul.f32 %v20536_v49, %v753_v22 }
 0x26d   : > { %v19246_v23 = vpop.eup %19245  ;;  %1142 = vmatprep.mubr.f32.mxu1 %v19989_v13 }
 0x26e   : > { %v20776_v24 = vadd.f32 %v20544_v28, %v792_v12  ;;  %v754_v43 = vmul.f32 %v19246_v23, %v20572_v18 }
 0x270   : > { %1143 = vmatmul.mubr.f32.gmra.mrb[18].mxu1 %v20776_v24  ;;  %v793_v37 = vmul.f32 %v20536_v49, %v754_v43 }
 0x271   : > { %1148 = vmatprep.mubr.f32.mxu1 %v19989_v13  ;;  %v883_v13 = vlaneseq }
 0x272   : > { %v20783_v9 = vadd.f32 %v20544_v28, %v793_v37 }
 0x273   : > { %v20800_v49 = vshrl.u32 %v883_v13, 7 }
 0x274   : > { %1149 = vmatmul.mubr.f32.gmra.mrb[20].mxu1 %v20783_v9 }
 0x275   : > { %16600 = vmatprep.mubr.f32.mxu1 %v20551_v30  ;;  %v885_v28 = vsub.s32 0, %v20800_v49  ;;  %v20809_v30 = vld [vmem:[%s24752_s4] sm:$0x7]  ;;  %v889_v18 = vsub.s32 1, %v20800_v49 }
 0x278   : > { %16601 = vmatmul.mubr.f32.vlgmr.msra.gmra.mrb[22].mxu1 %v20563_v41  ;;  %v20813_v41 = vrot.slane %v20809_v30, %v885_v28 }
 0x279   : > { %16603 = vmatprep.mubr.f32.mxu1 %v20575_v63 }
 0x27c   : > { %16604 = vmatmul.mubr.f32.gmra.mrb[24].mxu1 %v20584_v62 }
 0x27d   : > { %16606 = vmatprep.mubr.f32.mxu1 %v20591_v53 }
 0x280   : > { %16607 = vmatmul.mubr.f32.gmra.mrb[26].mxu1 %v20600_v32  ;;  %v20820_v32 = vrot.slane %v20809_v30, %v889_v18 }
 0x281   : > { %16609 = vmatprep.mubr.f32.mxu1 %v20608_v47 }
 0x284   : > { %16610 = vmatmul.mubr.f32.gmra.mrb[28].mxu1 %v20616_v27 }
 0x285   : > { %16612 = vmatprep.mubr.f32.mxu1 %v20623_v55 }
 0x288   : > { %16613 = vmatmul.mubr.f32.gmra.mrb[30].mxu1 %v20630_v3 }
 0x289   : > { %16615 = vmatprep.mubr.f32.mxu1 %v20637_v35 }
 0x28c   : > { %16616 = vmatmul.mubr.f32.gmra.mrb[32].mxu1 %v20646_v51 }
 0x28d   : > { %16618 = vmatprep.mubr.f32.mxu1 %v20660_v42 }
 0x290   : > { %16619 = vmatmul.mubr.f32.gmra.mrb[34].mxu1 %v20675_v17 }
 0x291   : > { %16621 = vmatprep.mubr.f32.mxu1 %v20689_v21 }
 0x294   : > { %16622 = vmatmul.mubr.f32.gmra.mrb[36].mxu1 %v20703_v7  ;;  %v25002_v7 = vmov 0 }
 0x295   : > { %16624 = vmatprep.mubr.f32.mxu1 %v20714_v48  ;;  %v25003_v7 = vsel %vm20836_vm1, 4294967295, %v25002_v7 }
 0x296   : > { %25004 = vst [vmem:[#allocation19_spill] sm:$0xff] %v25003_v7 }
 0x298   : > { %16625 = vmatmul.mubr.f32.gmra.mrb[38].mxu1 %v20722_v52 }
 0x299   : > { %16627 = vmatprep.mubr.f32.mxu1 %v20729_v54 }
 0x29b   : > { %v964_v63 = vpop.f32.mrb[0].mxu0 }
 0x29c   : > { %v965_v62 = vadd.f32 %v964_v63, %v20813_v41  ;;  %v966_v53 = vpop.f32.mrb[1].mxu0  ;;  %16628 = vmatmul.mubr.f32.gmra.mrb[40].mxu1 %v20736_v2 }
 0x29d   : > { %16630 = vmatprep.mubr.f32.mxu1 %v20742_v8  ;;  %v967_v3 = vadd.f32 %v966_v53, %v20820_v32 }
 0x29e   : > { %v20823_v47 = vmul.f32 0.17677669, %v965_v62 }
 0x29f   : > { %v970_v27 = vpop.f32.mrb[2].mxu0 }
 0x2a0   : > { %25000 = vst [vmem:[#allocation17_spill] sm:$0xff] %v20823_v47  ;;  %4584 = vrot.lane.b32.xlu1 %v20823_v47, %s19990_s27  ;;  %v972_v55 = vpop.f32.mrb[3].mxu0  ;;  %16631 = vmatmul.mubr.f32.gmra.mrb[42].mxu1 %v20651_v61  ;;  %v971_v51 = vadd.f32 %v970_v27, %v20813_v41 }
 0x2a1   : > { %v973_v35 = vadd.f32 %v972_v55, %v20820_v32  ;;  %16633 = vmatprep.mubr.f32.mxu1 %v20666_v25 }
 0x2a2   : > { %v20847_v48 = vmul.f32 0.17677669, %v971_v51 }
 0x2a3   : > { %v976_v42 = vpop.f32.mrb[4].mxu0  ;;  %v20832_v17 = vpack.i.bf16 %v973_v35, %v967_v3  ;;  %v17688_v21 = vpack.c.bf16 %v973_v35, %v967_v3 }
 0x2a4   : > { %v978_v61 = vpop.f32.mrb[5].mxu0  ;;  %16634 = vmatmul.mubr.f32.gmra.mrb[44].mxu1 %v20680_v56  ;;  %v977_v25 = vadd.f32 %v976_v42, %v20813_v41  ;;  %25005 = vst [vmem:[#allocation20_spill] sm:$0xff] %v20847_v48 }
 0x2a5   : > { %25001 = vst [vmem:[#allocation18_spill] sm:$0xff] %v20832_v17  ;;  %18464 = vrot.lane.b32.xlu0 %v20832_v17, %s19990_s27  ;;  %16636 = vmatprep.mubr.f32.mxu1 %v20694_v1  ;;  %v979_v56 = vadd.f32 %v978_v61, %v20820_v32 }
 0x2a6   : > { %17690 = vmatprep.subr.msk.bf16.mxu1 %vm20836_vm1, %v17688_v21  ;;  %v20857_v1 = vmul.f32 0.17677669, %v977_v25 }
 0x2a7   : > { %17693 = vmatpush3.bf16.xpose.msk.msra.mxu1 %vm20836_vm1, %v17688_v21  ;;  %v982_v52 = vpop.f32.mrb[6].mxu0 }
 0x2a8   : > { %v984_v54 = vpop.f32.mrb[7].mxu0  ;;  %16637 = vmatmul.mubr.f32.gmra.mrb[46].mxu1 %v20708_v34  ;;  %25006 = vst [vmem:[#allocation21_spill] sm:$0xff] %v20857_v1  ;;  %v983_v8 = vadd.f32 %v982_v52, %v20813_v41 }
 0x2a9   : > { %v985_v2 = vadd.f32 %v984_v54, %v20820_v32  ;;  %4586 = vrot.lane.b32.xlu0 %v20847_v48, %s19990_s27  ;;  %16639 = vmatprep.mubr.f32.mxu1 %v20748_v50 }
 0x2aa   : > { %v20871_v33 = vmul.f32 0.17677669, %v983_v8 }
 0x2ab   : > { %v988_v0 = vpop.f32.mrb[8].mxu0  ;;  %v20860_v5 = vpack.i.bf16 %v985_v2, %v979_v56  ;;  %v17694_v11 = vpack.c.bf16 %v985_v2, %v979_v56 }
 0x2ac   : > { %v990_v14 = vpop.f32.mrb[9].mxu0  ;;  %16640 = vmatmul.mubr.f32.gmra.mrb[48].mxu1 %v20755_v46  ;;  %v989_v34 = vadd.f32 %v988_v0, %v20813_v41  ;;  %25008 = vst [vmem:[#allocation23_spill] sm:$0xff] %v20871_v33 }
 0x2ad   : > { %25007 = vst [vmem:[#allocation22_spill] sm:$0xff] %v20860_v5  ;;  %4675 = vrot.lane.b32.xlu0 %v20857_v1, %s19990_s27  ;;  %18469 = vrot.lane.b32.xlu1 %v20860_v5, %s19990_s27  ;;  %v991_v15 = vadd.f32 %v990_v14, %v20820_v32 }
 0x2ae   : > { %16642 = vmatprep.mubr.f32.mxu1 %v20762_v20  ;;  %17696 = vmatprep.subr.msk.bf16.mxu1 %vm20836_vm1, %v17694_v11  ;;  %v20879_v57 = vmul.f32 0.17677669, %v989_v34 }
 0x2af   : > { %v994_v38 = vpop.f32.mrb[10].mxu0 }
 0x2b0   : > { %v996_v40 = vpop.f32.mrb[11].mxu0  ;;  %16643 = vmatmul.mubr.f32.gmra.mrb[50].mxu1 %v20769_v58  ;;  %25009 = vst [vmem:[#allocation24_spill] sm:$0xff] %v20879_v57  ;;  %v995_v58 = vadd.f32 %v994_v38, %v20813_v41 }
 0x2b1   : > { %v997_v44 = vadd.f32 %v996_v40, %v20820_v32  ;;  %4677 = vrot.lane.b32.xlu1 %v20871_v33, %s19990_s27  ;;  %16645 = vmatprep.mubr.f32.mxu1 %v20776_v24 }
 0x2b2   : > { %v20920_v37 = vmul.f32 0.17677669, %v995_v58 }
 0x2b3   : > { %v1000_v60 = vpop.f32.mrb[12].mxu0  ;;  %v20881_v16 = vpack.i.bf16 %v997_v44, %v991_v15  ;;  %v17700_v50 = vpack.c.bf16 %v997_v44, %v991_v15 }
 0x2b4   : > { %v1002_v29 = vpop.f32.mrb[13].mxu0  ;;  %16646 = vmatmul.mubr.f32.gmra.mrb[52].mxu1 %v20783_v9  ;;  %v1001_v22 = vadd.f32 %v1000_v60, %v20813_v41  ;;  %25013 = vst [vmem:[#allocation28_spill] sm:$0xff] %v20920_v37 }
 0x2b5   : > { %25010 = vst [vmem:[#allocation25_spill] sm:$0xff] %v20881_v16  ;;  %4766 = vrot.lane.b32.xlu1 %v20879_v57, %s19990_s27  ;;  %16652 = vmatprep.mubr.msk.f32.mxu1 %vm1412_vm0, %v20823_v47  ;;  %v1003_v19 = vadd.f32 %v1002_v29, %v20820_v32 }
 0x2b6   : > { %v20922_v9 = vmul.f32 0.17677669, %v1001_v22 }
 0x2b7   : > { %v1006_v10 = vpop.f32.mrb[14].mxu0 }
 0x2b8   : > { %v1008_v36 = vpop.f32.mrb[15].mxu0  ;;  %16653 = vmatmul.mubr.msk.f32.vlgmr.msra.gmra.mrb[54].mxu1 %vm1412_vm0, %v20847_v48  ;;  %25014 = vst [vmem:[#allocation29_spill] sm:$0xff] %v20922_v9  ;;  %v1007_v27 = vadd.f32 %v1006_v10, %v20813_v41 }
 0x2b9   : > { %v1009_v39 = vadd.f32 %v1008_v36, %v20820_v32  ;;  %17699 = vmatpush3.bf16.xpose.msk.msra.mxu1 %vm20836_vm1, %v17694_v11  ;;  %18474 = vrot.lane.b32.xlu1 %v20881_v16, %s19990_s27 }
 0x2ba   : > { %16659 = vmatprep.mubr.msk.f32.mxu1 %vm1412_vm0, %v20857_v1  ;;  %17702 = vmatprep.subr.msk.bf16.mxu1 %vm20836_vm1, %v17700_v50  ;;  %v20944_v25 = vmul.f32 0.17677669, %v1007_v27 }
 0x2bb   : > { %v1012_v46 = vpop.f32.mrb[16].mxu0  ;;  %v20900_v59 = vpack.i.bf16 %v1009_v39, %v1003_v19  ;;  %v17706_v45 = vpack.c.bf16 %v1009_v39, %v1003_v19 }
 0x2bc   : > { %v1014_v31 = vpop.f32.mrb[17].mxu0  ;;  %v1013_v55 = vadd.f32 %v1012_v46, %v20813_v41  ;;  %25016 = vst [vmem:[#allocation31_spill] sm:$0xff] %v20944_v25 }
 0x2bd   : > { %25011 = vst [vmem:[#allocation26_spill] sm:$0xff] %v20900_v59  ;;  %18479 = vrot.lane.b32.xlu1 %v20900_v59, %s19990_s27  ;;  %v1015_v4 = vadd.f32 %v1014_v31, %v20820_v32 }
 0x2be   : > { %v20946_v52 = vmul.f32 0.17677669, %v1013_v55 }
 0x2bf   : > { %v1018_v20 = vpop.f32.mrb[18].mxu0 }
 0x2c0   : > { %16660 = vmatmul.mubr.msk.f32.vlgmr.msra.gmra.mrb[56].mxu1 %vm1412_vm0, %v20871_v33  ;;  %v1020_v26 = vpop.f32.mrb[19].mxu0  ;;  %25017 = vst [vmem:[#allocation32_spill] sm:$0xff] %v20946_v52  ;;  %v1019_v14 = vadd.f32 %v1018_v20, %v20813_v41 }
 0x2c1   : > { %v1021_v6 = vadd.f32 %v1020_v26, %v20820_v32  ;;  %17705 = vmatpush3.bf16.xpose.msk.msra.mxu1 %vm20836_vm1, %v17700_v50  ;;  %16666 = vmatprep.mubr.msk.f32.mxu1 %vm1412_vm0, %v20879_v57 }
 0x2c2   : > { %17708 = vmatprep.subr.msk.bf16.mxu1 %vm20836_vm1, %v17706_v45  ;;  %v20972_v39 = vmul.f32 0.17677669, %v1019_v14 }
 0x2c3   : > { %v1024_v12 = vpop.f32.mrb[20].mxu0  ;;  %v20916_v23 = vpack.i.bf16 %v1021_v6, %v1015_v4  ;;  %v17712_v24 = vpack.c.bf16 %v1021_v6, %v1015_v4 }
 0x2c4   : > { %v1026_v43 = vpop.f32.mrb[21].mxu0  ;;  %v1025_v40 = vadd.f32 %v1024_v12, %v20813_v41  ;;  %25020 = vst [vmem:[#allocation35_spill] sm:$0xff] %v20972_v39 }
 0x2c5   : > { %25012 = vst [vmem:[#allocation27_spill] sm:$0xff] %v20916_v23  ;;  %18484 = vrot.lane.b32.xlu0 %v20916_v23, %s19990_s27  ;;  %v1027_v63 = vadd.f32 %v1026_v43, %v20820_v32 }
 0x2c6   : > { %v20974_v46 = vmul.f32 0.17677669, %v1025_v40 }
 0x2c7   : > { %v1030_v13 = vpop.f32.mrb[22].mxu0 }
 0x2c8   : > { %v20924_v28 = vpop.f32.mrb[0].mxu1  ;;  %16667 = vmatmul.mubr.msk.f32.vlgmr.msra.gmra.mrb[58].mxu1 %vm1412_vm0, %v20920_v37  ;;  %v1032_v18 = vpop.f32.mrb[23].mxu0  ;;  %25021 = vst [vmem:[#allocation36_spill] sm:$0xff] %v20974_v46  ;;  %v1031_v58 = vadd.f32 %v1030_v13, %v20813_v41 }
 0x2c9   : > { %v1033_v62 = vadd.f32 %v1032_v18, %v20820_v32  ;;  %v20930_v53 = vpop.f32.mrb[1].mxu1  ;;  %17711 = vmatpush3.bf16.xpose.msk.msra.mxu1 %vm20836_vm1, %v17706_v45  ;;  %16673 = vmatprep.mubr.msk.f32.mxu1 %vm1412_vm0, %v20922_v9 }
 0x2ca   : > { %17714 = vmatprep.subr.msk.bf16.mxu1 %vm20836_vm1, %v17712_v24  ;;  %v20999_v13 = vmul.f32 0.17677669, %v1031_v58 }
 0x2cb   : > { %v1036_v3 = vpop.f32.mrb[24].mxu0  ;;  %v17718_v35 = vpack.c.bf16 %v1033_v62, %v1027_v63  ;;  %v20940_v51 = vpack.i.bf16 %v1033_v62, %v1027_v63 }
 0x2cc   : > { %v20942_v42 = vpop.f32.mrb[2].mxu1  ;;  %v1038_v21 = vpop.f32.mrb[25].mxu0  ;;  %25024 = vst [vmem:[#allocation39_spill] sm:$0xff] %v20999_v13 }
 0x2cd   : > { %25015 = vst [vmem:[#allocation30_spill] sm:$0xff] %v20940_v51  ;;  %v1098_v61 = vpop.f32.mrb[3].mxu1  ;;  %v1039_v8 = vadd.f32 %v1038_v21, %v20820_v32 }
 0x2ce   : > { %v1099_v34 = vadd.f32 %v1098_v61, %v20820_v32 }
 0x2cf   : > { %v1042_v54 = vpop.f32.mrb[26].mxu0 }
 0x2d0   : > { %v20948_v56 = vpop.f32.mrb[4].mxu1  ;;  %16674 = vmatmul.mubr.msk.f32.vlgmr.msra.gmra.mrb[60].mxu1 %vm1412_vm0, %v20944_v25  ;;  %v1044_v2 = vpop.f32.mrb[27].mxu0 }
 0x2d1   : > { %v1045_v0 = vadd.f32 %v1044_v2, %v20820_v32  ;;  %v1104_v11 = vpop.f32.mrb[5].mxu1  ;;  %17717 = vmatpush3.bf16.xpose.msk.msra.mxu1 %vm20836_vm1, %v17712_v24  ;;  %16680 = vmatprep.mubr.msk.f32.mxu1 %vm1412_vm0, %v20946_v52  ;;  %v1037_v24 = vadd.f32 %v1036_v3, %v20813_v41 }
 0x2d2   : > { %v1105_v38 = vadd.f32 %v1104_v11, %v20820_v32  ;;  %17720 = vmatprep.subr.msk.bf16.mxu1 %vm20836_vm1, %v17718_v35  ;;  %v1043_v11 = vadd.f32 %v1042_v54, %v20813_v41 }
 0x2d3   : > { %v1048_v15 = vpop.f32.mrb[28].mxu0  ;;  %v17724_v44 = vpack.c.bf16 %v1045_v0, %v1039_v8  ;;  %v20964_v60 = vpack.i.bf16 %v1045_v0, %v1039_v8  ;;  %v21003_v61 = vmul.f32 0.17677669, %v1037_v24 }
 0x2d4   : > { %v20966_v50 = vpop.f32.mrb[6].mxu1  ;;  %v1050_v29 = vpop.f32.mrb[29].mxu0  ;;  %v20968_v10 = vpack.c.bf16 %v1105_v38, %v1099_v34  ;;  %v20970_v36 = vpack.i.bf16 %v1105_v38, %v1099_v34  ;;  %v1049_v14 = vadd.f32 %v1048_v15, %v20813_v41 }
 0x2d5   : > { %25018 = vst [vmem:[#allocation33_spill] sm:$0xff] %v20964_v60  ;;  %v1110_v19 = vpop.f32.mrb[7].mxu1  ;;  %v1051_v26 = vadd.f32 %v1050_v29, %v20820_v32  ;;  %25026 = vst [vmem:[#allocation41_spill] sm:$0xff] %v21003_v61 }
 0x2d6   : > { %25019 = vst [vmem:[#allocation34_spill] sm:$0xff] %v20970_v36  ;;  %v1111_v22 = vadd.f32 %v1110_v19, %v20820_v32  ;;  %v21023_v19 = vmul.f32 0.17677669, %v1043_v11  ;;  %v21028_v54 = vmul.f32 0.17677669, %v1049_v14  ;;  %v1097_v14 = vadd.f32 %v20942_v42, %v20813_v41 }
 0x2d7   : > { %v1054_v45 = vpop.f32.mrb[30].mxu0 }
 0x2d8   : > { %v20976_v31 = vpop.f32.mrb[8].mxu1  ;;  %16681 = vmatmul.mubr.msk.f32.vlgmr.msra.gmra.mrb[62].mxu1 %vm1412_vm0, %v20972_v39  ;;  %v1056_v20 = vpop.f32.mrb[31].mxu0  ;;  %25028 = vst [vmem:[#allocation43_spill] sm:$0xff] %v21023_v19  ;;  %25029 = vst [vmem:[#allocation44_spill] sm:$0xff] %v21028_v54 }
 0x2d9   : > { %v1057_v4 = vadd.f32 %v1056_v20, %v20820_v32  ;;  %v1116_v6 = vpop.f32.mrb[9].mxu1  ;;  %17723 = vmatpush3.bf16.xpose.msk.msra.mxu1 %vm20836_vm1, %v17718_v35  ;;  %16687 = vmatprep.mubr.msk.f32.mxu1 %vm1412_vm0, %v20974_v46 }
 0x2da   : > { %v1117_v12 = vadd.f32 %v1116_v6, %v20820_v32  ;;  %17726 = vmatprep.subr.msk.bf16.mxu1 %vm20836_vm1, %v17724_v44  ;;  %v1055_v6 = vadd.f32 %v1054_v45, %v20813_v41 }
 0x2db   : > { %v1060_v43 = vpop.f32.mrb[32].mxu0  ;;  %v17730_v18 = vpack.c.bf16 %v1057_v4, %v1051_v26  ;;  %v20992_v63 = vpack.i.bf16 %v1057_v4, %v1051_v26 }
 0x2dc   : > { %v1061_v62 = vadd.f32 %v1060_v43, %v20813_v41  ;;  %v1062_v27 = vpop.f32.mrb[33].mxu0  ;;  %v20995_v55 = vpack.c.bf16 %v1117_v12, %v1111_v22  ;;  %v20997_v35 = vpack.i.bf16 %v1117_v12, %v1111_v22  ;;  %v21052_v45 = vmul.f32 0.17677669, %v1055_v6 }
 0x2dd   : > { %25022 = vst [vmem:[#allocation37_spill] sm:$0xff] %v20992_v63  ;;  %v1063_v8 = vadd.f32 %v1062_v27, %v20820_v32 }
 0x2de   : > { %25023 = vst [vmem:[#allocation38_spill] sm:$0xff] %v20997_v35  ;;  %v21001_v21 = vmul.f32 0.17677669, %v1061_v62  ;;  %25032 = vst [vmem:[#allocation47_spill] sm:$0xff] %v21052_v45 }
 0x2df   : > { %v1066_v2 = vpop.f32.mrb[34].mxu0 }
 0x2e0   : > { %25025 = vst [vmem:[#allocation40_spill] sm:$0xff] %v21001_v21  ;;  %16688 = vmatmul.mubr.msk.f32.vlgmr.msra.gmra.mrb[64].mxu1 %vm1412_vm0, %v20999_v13  ;;  %v1068_v3 = vpop.f32.mrb[35].mxu0  ;;  %16708 = vmatprep.mubr.msk.f32.mxu0 %vm1412_vm0, %v21001_v21 }
 0x2e1   : > { %v1069_v0 = vadd.f32 %v1068_v3, %v20820_v32  ;;  %17729 = vmatpush3.bf16.xpose.msk.msra.mxu1 %vm20836_vm1, %v17724_v44  ;;  %16694 = vmatprep.mubr.msk.f32.mxu1 %vm1412_vm0, %v21003_v61  ;;  %v1067_v44 = vadd.f32 %v1066_v2, %v20813_v41  ;;  %v1093_v2 = vadd.f32 %v20930_v53, %v20820_v32 }
 0x2e2   : > { %17732 = vmatprep.subr.msk.bf16.mxu1 %vm20836_vm1, %v17730_v18 }
 0x2e3   : > { %v1072_v34 = vpop.f32.mrb[36].mxu0  ;;  %v17736_v38 = vpack.c.bf16 %v1069_v0, %v1063_v8  ;;  %v21019_v40 = vpack.i.bf16 %v1069_v0, %v1063_v8  ;;  %v21039_v58 = vmul.f32 0.17677669, %v1067_v44  ;;  %v21087_v44 = vmul.f32 0.17677669, %v1097_v14 }
 0x2e4   : > { %v1074_v29 = vpop.f32.mrb[37].mxu0  ;;  %v1073_v22 = vadd.f32 %v1072_v34, %v20813_v41  ;;  %v1091_v34 = vadd.f32 %v20924_v28, %v20813_v41  ;;  %v1103_v28 = vadd.f32 %v20948_v56, %v20813_v41 }
 0x2e5   : > { %25027 = vst [vmem:[#allocation42_spill] sm:$0xff] %v21019_v40  ;;  %17738 = vmatprep.subr.msk.bf16.mxu0 %vm20836_vm1, %v17736_v38  ;;  %v1075_v26 = vadd.f32 %v1074_v29, %v20820_v32  ;;  %25030 = vst [vmem:[#allocation45_spill] sm:$0xff] %v21039_v58 }
 0x2e6   : > { %17741 = vmatpush3.bf16.xpose.msk.msra.mxu0 %vm20836_vm1, %v17736_v38  ;;  %v21054_v3 = vmul.f32 0.17677669, %v1073_v22  ;;  %v1109_v38 = vadd.f32 %v20966_v50, %v20813_v41  ;;  %25037 = vst [vmem:[#allocation52_spill] sm:$0xff] %v21087_v44  ;;  %v1115_v50 = vadd.f32 %v20976_v31, %v20813_v41 }
 0x2e7   : > { %v1078_v15 = vpop.f32.mrb[38].mxu0 }
 0x2e8   : > { %16695 = vmatmul.mubr.msk.f32.vlgmr.msra.gmra.mrb[66].mxu1 %vm1412_vm0, %v21023_v19  ;;  %v1080_v20 = vpop.f32.mrb[39].mxu0  ;;  %25033 = vst [vmem:[#allocation48_spill] sm:$0xff] %v21054_v3  ;;  %v1079_v53 = vadd.f32 %v1078_v15, %v20813_v41  ;;  %v21089_v15 = vmul.f32 0.17677669, %v1091_v34  ;;  %v21093_v42 = vmul.f32 0.17677669, %v1109_v38 }
 0x2e9   : > { %v1081_v4 = vadd.f32 %v1080_v20, %v20820_v32  ;;  %17735 = vmatpush3.bf16.xpose.msk.msra.mxu1 %vm20836_vm1, %v17730_v18  ;;  %16701 = vmatprep.mubr.msk.f32.mxu1 %vm1412_vm0, %v21028_v54  ;;  %v21113_v20 = vmul.f32 0.17677669, %v1115_v50 }
 0x2ea   : > { %v21085_v29 = vmul.f32 0.17677669, %v1079_v53  ;;  %25038 = vst [vmem:[#allocation53_spill] sm:$0xff] %v21089_v15  ;;  %25039 = vst [vmem:[#allocation54_spill] sm:$0xff] %v21093_v42 }
 0x2eb   : > { %v1084_v12 = vpop.f32.mrb[40].mxu0  ;;  %v17742_v24 = vpack.c.bf16 %v1081_v4, %v1075_v26  ;;  %v21042_v43 = vpack.i.bf16 %v1081_v4, %v1075_v26  ;;  %25041 = vst [vmem:[#allocation56_spill] sm:$0xff] %v21113_v20 }
 0x2ec   : > { %v1085_v62 = vadd.f32 %v1084_v12, %v20813_v41  ;;  %v1086_v27 = vpop.f32.mrb[41].mxu0  ;;  %25036 = vst [vmem:[#allocation51_spill] sm:$0xff] %v21085_v29 }
 0x2ed   : > { %25031 = vst [vmem:[#allocation46_spill] sm:$0xff] %v21042_v43  ;;  %v1087_v18 = vadd.f32 %v1086_v27, %v20820_v32  ;;  %16709 = vmatmul.mubr.msk.f32.vlgmr.msra.gmra.mrb[42].mxu0 %vm1412_vm0, %v21039_v58  ;;  %17744 = vmatprep.subr.msk.bf16.mxu1 %vm20836_vm1, %v17742_v24 }
 0x2ee   : > { %v21056_v8 = vmul.f32 0.17677669, %v1085_v62 }
 0x2ef   : > { %v17748_v0 = vpack.c.bf16 %v1093_v2, %v1087_v18  ;;  %v21058_v11 = vpack.i.bf16 %v1093_v2, %v1087_v18 }
 0x2f0   : > { %25034 = vst [vmem:[#allocation49_spill] sm:$0xff] %v21056_v8  ;;  %16702 = vmatmul.mubr.msk.f32.vlgmr.msra.gmra.mrb[68].mxu1 %vm1412_vm0, %v21052_v45  ;;  %16722 = vmatprep.mubr.msk.f32.mxu0 %vm1412_vm0, %v21056_v8 }
 0x2f1   : > { %25035 = vst [vmem:[#allocation50_spill] sm:$0xff] %v21058_v11  ;;  %17747 = vmatpush3.bf16.xpose.msk.msra.mxu1 %vm20836_vm1, %v17742_v24  ;;  %16715 = vmatprep.mubr.msk.f32.mxu1 %vm1412_vm0, %v21054_v3 }
 0x2f2   : > { %17750 = vmatprep.subr.msk.bf16.mxu0 %vm20836_vm1, %v17748_v0  ;;  %17756 = vmatprep.subr.msk.bf16.mxu1 %vm20836_vm1, %v20968_v10 }
 0x2f3   : > { %17753 = vmatpush3.bf16.xpose.msk.msra.mxu0 %vm20836_vm1, %v17748_v0 }
 0x2f4   : > { %17762 = vmatprep.subr.msk.bf16.mxu0 %vm20836_vm1, %v20995_v55 }
 0x2f8   : > { %16716 = vmatmul.mubr.msk.f32.vlgmr.msra.gmra.mrb[70].mxu1 %vm1412_vm0, %v21085_v29 }
 0x2f9   : > { %17759 = vmatpush3.bf16.xpose.msk.msra.mxu1 %vm20836_vm1, %v20968_v10  ;;  %16729 = vmatprep.mubr.msk.f32.mxu1 %vm1412_vm0, %v21087_v44  ;;  %v21111_v10 = vmul.f32 0.17677669, %v1103_v28 }
 0x2fa   : > { %16723 = vmatmul.mubr.msk.f32.vlgmr.msra.gmra.mrb[44].mxu0 %vm1412_vm0, %v21089_v15 }
 0x2fb   : > { %17765 = vmatpush3.bf16.xpose.msk.msra.mxu0 %vm20836_vm1, %v20995_v55  ;;  %16736 = vmatprep.mubr.msk.f32.mxu0 %vm1412_vm0, %v21093_v42  ;;  %25040 = vst [vmem:[#allocation55_spill] sm:$0xff] %v21111_v10 }
 0x300   : > { %16730 = vmatmul.mubr.msk.f32.vlgmr.msra.gmra.mrb[72].mxu1 %vm1412_vm0, %v21111_v10 }
 0x302   : > { %16737 = vmatmul.mubr.msk.f32.vlgmr.msra.gmra.mrb[46].mxu0 %vm1412_vm0, %v21113_v20 }
 0x333   : > { %v1120_v56 = vpop.f32.mrb[10].mxu1 }
 0x334   : > { %v1121_v26 = vadd.f32 %v1120_v56, %v20813_v41  ;;  %v1122_v55 = vpop.f32.mrb[11].mxu1 }
 0x335   : > { %v1123_v31 = vadd.f32 %v1122_v55, %v20820_v32 }
 0x336   : > { %v21120_v4 = vmul.f32 0.17677669, %v1121_v26 }
 0x337   : > { %v1126_v6 = vpop.f32.mrb[12].mxu1 }
 0x338   : > { %25042 = vst [vmem:[#allocation57_spill] sm:$0xff] %v21120_v4  ;;  %v1128_v22 = vpop.f32.mrb[13].mxu1  ;;  %16743 = vmatprep.mubr.msk.f32.mxu1 %vm1412_vm0, %v21120_v4  ;;  %v1127_v0 = vadd.f32 %v1126_v6, %v20813_v41 }
 0x339   : > { %v1129_v12 = vadd.f32 %v1128_v22, %v20820_v32 }
 0x33a   : > { %v21140_v50 = vmul.f32 0.17677669, %v1127_v0 }
 0x33b   : > { %v1132_v24 = vpop.f32.mrb[14].mxu1  ;;  %v17766_v62 = vpack.c.bf16 %v1129_v12, %v1123_v31  ;;  %v21126_v27 = vpack.i.bf16 %v1129_v12, %v1123_v31  ;;  %v893_v31 = vsub.s32 2, %v20800_v49 }
 0x33c   : > { %v1133_v2 = vadd.f32 %v1132_v24, %v20813_v41  ;;  %v1134_v18 = vpop.f32.mrb[15].mxu1  ;;  %25045 = vst [vmem:[#allocation60_spill] sm:$0xff] %v21140_v50 }
 0x33d   : > { %25043 = vst [vmem:[#allocation58_spill] sm:$0xff] %v21126_v27  ;;  %17768 = vmatprep.subr.msk.bf16.mxu1 %vm20836_vm1, %v17766_v62  ;;  %v1135_v38 = vadd.f32 %v1134_v18, %v20820_v32  ;;  %v21158_v49 = vrot.slane %v20809_v30, %v893_v31 }
 0x33e   : > { %v21132_v53 = vmul.f32 0.17677669, %v1133_v2  ;;  %17771 = vmatpush3.bf16.xpose.msk.msra.mxu1 %vm20836_vm1, %v17766_v62 }
 0x33f   : > { %v1138_v14 = vpop.f32.mrb[16].mxu1 }
 0x340   : > { %25044 = vst [vmem:[#allocation59_spill] sm:$0xff] %v21132_v53  ;;  %v1140_v34 = vpop.f32.mrb[17].mxu1  ;;  %16750 = vmatprep.mubr.msk.f32.mxu0 %vm1412_vm0, %v21132_v53  ;;  %v1139_v12 = vadd.f32 %v1138_v14, %v20813_v41 }
 0x341   : > { %v1141_v28 = vadd.f32 %v1140_v34, %v20820_v32 }
 0x342   : > { %v21162_v34 = vmul.f32 0.17677669, %v1139_v12 }
 0x343   : > { %v1144_v56 = vpop.f32.mrb[18].mxu1  ;;  %v17772_v26 = vpack.c.bf16 %v1141_v28, %v1135_v38  ;;  %v21142_v55 = vpack.i.bf16 %v1141_v28, %v1135_v38 }
 0x344   : > { %v1145_v6 = vadd.f32 %v1144_v56, %v20813_v41  ;;  %v1146_v22 = vpop.f32.mrb[19].mxu1  ;;  %25048 = vst [vmem:[#allocation63_spill] sm:$0xff] %v21162_v34 }
 0x345   : > { %25046 = vst [vmem:[#allocation61_spill] sm:$0xff] %v21142_v55  ;;  %16744 = vmatmul.mubr.msk.f32.vlgmr.msra.gmra.mrb[74].mxu1 %vm1412_vm0, %v21140_v50  ;;  %17774 = vmatprep.subr.msk.bf16.mxu0 %vm20836_vm1, %v17772_v26  ;;  %v1147_v18 = vadd.f32 %v1146_v22, %v20820_v32 }
 0x346   : > { %v21151_v24 = vmul.f32 0.17677669, %v1145_v6  ;;  %17777 = vmatpush3.bf16.xpose.msk.msra.mxu0 %vm20836_vm1, %v17772_v26 }
 0x347   : > { %v1150_v62 = vpop.f32.mrb[20].mxu1 }
 0x348   : > { %25047 = vst [vmem:[#allocation62_spill] sm:$0xff] %v21151_v24  ;;  %v1152_v2 = vpop.f32.mrb[21].mxu1  ;;  %16757 = vmatprep.mubr.msk.f32.mxu1 %vm1412_vm0, %v21151_v24  ;;  %v1151_v30 = vadd.f32 %v1150_v62, %v20813_v41 }
 0x349   : > { %v1153_v0 = vadd.f32 %v1152_v2, %v20820_v32 }
 0x34b   : > { %v16602_v14 = vpop.f32.mrb[22].mxu1  ;;  %v17778_v38 = vpack.c.bf16 %v1153_v0, %v1147_v18  ;;  %v21164_v28 = vpack.i.bf16 %v1153_v0, %v1147_v18  ;;  %v21179_v0 = vmul.f32 0.17677669, %v1151_v30 }
 0x34c   : > { %v1227_v56 = vadd.f32 %v16602_v14, %v21158_v49  ;;  %v1221_v26 = vpop.f32.mrb[23].mxu1 }
 0x34d   : > { %25049 = vst [vmem:[#allocation64_spill] sm:$0xff] %v21164_v28  ;;  %v1222_v6 = vadd.f32 %v1221_v26, %v21158_v49  ;;  %16751 = vmatmul.mubr.msk.f32.vlgmr.msra.gmra.mrb[48].mxu0 %vm1412_vm0, %v21162_v34  ;;  %17780 = vmatprep.subr.msk.bf16.mxu1 %vm20836_vm1, %v17778_v38  ;;  %25051 = vst [vmem:[#allocation66_spill] sm:$0xff] %v21179_v0 }
 0x34e   : > { %17783 = vmatpush3.bf16.xpose.msk.msra.mxu1 %vm20836_vm1, %v17778_v38 }
 0x34f   : > { %v16605_v32 = vpop.f32.mrb[24].mxu1  ;;  %v17784_v22 = vpack.c.bf16 %v1227_v56, %v1222_v6  ;;  %v21175_v31 = vpack.i.bf16 %v1227_v56, %v1222_v6 }
 0x350   : > { %v1237_v12 = vadd.f32 %v16605_v32, %v21158_v49  ;;  %v1231_v2 = vpop.f32.mrb[25].mxu1 }
 0x351   : > { %25050 = vst [vmem:[#allocation65_spill] sm:$0xff] %v21175_v31  ;;  %v1232_v18 = vadd.f32 %v1231_v2, %v21158_v49  ;;  %17785 = vmatprep.subr.bf16.mxu0 %v17784_v22 }
 0x352   : > { %17787 = vmatpush3.bf16.msra.mxu0 %v17784_v22 }
 0x353   : > { %v16608_v14 = vpop.f32.mrb[26].mxu1  ;;  %v17788_v26 = vpack.c.bf16 %v1237_v12, %v1232_v18  ;;  %v21181_v23 = vpack.i.bf16 %v1237_v12, %v1232_v18 }
 0x354   : > { %v1247_v41 = vadd.f32 %v16608_v14, %v21158_v49  ;;  %v1241_v62 = vpop.f32.mrb[27].mxu1 }
 0x355   : > { %25052 = vst [vmem:[#allocation67_spill] sm:$0xff] %v21181_v23  ;;  %v1242_v38 = vadd.f32 %v1241_v62, %v21158_v49  ;;  %16758 = vmatmul.mubr.msk.f32.vlgmr.msra.gmra.mrb[76].mxu1 %vm1412_vm0, %v21179_v0  ;;  %17789 = vmatprep.subr.bf16.mxu1 %v17788_v26 }
 0x356   : > { %17791 = vmatpush3.bf16.msra.mxu1 %v17788_v26 }
 0x357   : > { %v16611_v56 = vpop.f32.mrb[28].mxu1  ;;  %v21187_v6 = vpack.c.bf16 %v1247_v41, %v1242_v38  ;;  %v21189_v30 = vpack.i.bf16 %v1247_v41, %v1242_v38 }
 0x358   : > { %v1257_v32 = vadd.f32 %v16611_v56, %v21158_v49  ;;  %v1251_v22 = vpop.f32.mrb[29].mxu1 }
 0x359   : > { %25053 = vst [vmem:[#allocation68_spill] sm:$0xff] %v21187_v6  ;;  %25054 = vst [vmem:[#allocation69_spill] sm:$0xff] %v21189_v30  ;;  %v1252_v12 = vadd.f32 %v1251_v22, %v21158_v49  ;;  %17793 = vmatprep.subr.bf16.mxu0 %v21187_v6 }
 0x35b   : > { %v16614_v2 = vpop.f32.mrb[30].mxu1  ;;  %v21194_v18 = vpack.c.bf16 %v1257_v32, %v1252_v12  ;;  %v21196_v14 = vpack.i.bf16 %v1257_v32, %v1252_v12 }
 0x35c   : > { %v1267_v62 = vadd.f32 %v16614_v2, %v21158_v49  ;;  %v1261_v26 = vpop.f32.mrb[31].mxu1 }
 0x35d   : > { %25055 = vst [vmem:[#allocation70_spill] sm:$0xff] %v21194_v18  ;;  %25056 = vst [vmem:[#allocation71_spill] sm:$0xff] %v21196_v14  ;;  %v1262_v1 = vadd.f32 %v1261_v26, %v21158_v49  ;;  %17797 = vmatprep.subr.bf16.mxu1 %v21194_v18 }
 0x35f   : > { %v16617_v41 = vpop.f32.mrb[32].mxu1  ;;  %v21201_v38 = vpack.c.bf16 %v1267_v62, %v1262_v1  ;;  %v21203_v56 = vpack.i.bf16 %v1267_v62, %v1262_v1 }
 0x360   : > { %v1277_v22 = vadd.f32 %v16617_v41, %v21158_v49  ;;  %v1271_v57 = vpop.f32.mrb[33].mxu1 }
 0x361   : > { %25057 = vst [vmem:[#allocation72_spill] sm:$0xff] %v21201_v38  ;;  %25058 = vst [vmem:[#allocation73_spill] sm:$0xff] %v21203_v56  ;;  %v1272_v48 = vadd.f32 %v1271_v57, %v21158_v49 }
 0x363   : > { %v16620_v33 = vpop.f32.mrb[34].mxu1  ;;  %v21207_v32 = vpack.c.bf16 %v1277_v22, %v1272_v48  ;;  %v21209_v12 = vpack.i.bf16 %v1277_v22, %v1272_v48 }
 0x364   : > { %v1287_v2 = vadd.f32 %v16620_v33, %v21158_v49  ;;  %v1281_v26 = vpop.f32.mrb[35].mxu1 }
 0x365   : > { %25059 = vst [vmem:[#allocation74_spill] sm:$0xff] %v21207_v32  ;;  %25060 = vst [vmem:[#allocation75_spill] sm:$0xff] %v21209_v12  ;;  %v1282_v16 = vadd.f32 %v1281_v26, %v21158_v49 }
 0x367   : > { %v16623_v59 = vpop.f32.mrb[36].mxu1  ;;  %v21213_v17 = vpack.c.bf16 %v1287_v2, %v1282_v16  ;;  %v21215_v1 = vpack.i.bf16 %v1287_v2, %v1282_v16 }
 0x368   : > { %v1297_v62 = vadd.f32 %v16623_v59, %v21158_v49  ;;  %v1291_v41 = vpop.f32.mrb[37].mxu1 }
 0x369   : > { %25061 = vst [vmem:[#allocation76_spill] sm:$0xff] %v21213_v17  ;;  %25062 = vst [vmem:[#allocation77_spill] sm:$0xff] %v21215_v1  ;;  %v1292_v57 = vadd.f32 %v1291_v41, %v21158_v49 }
 0x36b   : > { %v16626_v47 = vpop.f32.mrb[38].mxu1  ;;  %v21219_v5 = vpack.c.bf16 %v1297_v62, %v1292_v57  ;;  %v21221_v48 = vpack.i.bf16 %v1297_v62, %v1292_v57 }
 0x36c   : > { %v1307_v33 = vadd.f32 %v16626_v47, %v21158_v49  ;;  %v1301_v22 = vpop.f32.mrb[39].mxu1 }
 0x36d   : > { %25063 = vst [vmem:[#allocation78_spill] sm:$0xff] %v21219_v5  ;;  %25064 = vst [vmem:[#allocation79_spill] sm:$0xff] %v21221_v48  ;;  %v1302_v26 = vadd.f32 %v1301_v22, %v21158_v49 }
 0x36f   : > { %v16629_v12 = vpop.f32.mrb[40].mxu1  ;;  %v21225_v7 = vpack.c.bf16 %v1307_v33, %v1302_v26  ;;  %v21227_v16 = vpack.i.bf16 %v1307_v33, %v1302_v26 }
 0x370   : > { %v1317_v59 = vadd.f32 %v16629_v12, %v21158_v49  ;;  %v1311_v2 = vpop.f32.mrb[41].mxu1 }
 0x371   : > { %25065 = vst [vmem:[#allocation80_spill] sm:$0xff] %v21225_v7  ;;  %25066 = vst [vmem:[#allocation81_spill] sm:$0xff] %v21227_v16  ;;  %v1312_v41 = vadd.f32 %v1311_v2, %v21158_v49 }
 0x373   : > { %v16632_v14 = vpop.f32.mrb[42].mxu1  ;;  %v21231_v30 = vpack.c.bf16 %v1317_v59, %v1312_v41  ;;  %v21233_v62 = vpack.i.bf16 %v1317_v59, %v1312_v41 }
 0x374   : > { %v1327_v47 = vadd.f32 %v16632_v14, %v21158_v49  ;;  %v1321_v57 = vpop.f32.mrb[43].mxu1 }
 0x375   : > { %25067 = vst [vmem:[#allocation82_spill] sm:$0xff] %v21231_v30  ;;  %25068 = vst [vmem:[#allocation83_spill] sm:$0xff] %v21233_v62  ;;  %v1322_v22 = vadd.f32 %v1321_v57, %v21158_v49 }
 0x377   : > { %v16635_v48 = vpop.f32.mrb[44].mxu1  ;;  %v21237_v1 = vpack.c.bf16 %v1327_v47, %v1322_v22  ;;  %v21239_v33 = vpack.i.bf16 %v1327_v47, %v1322_v22 }
 0x378   : > { %v1337_v12 = vadd.f32 %v16635_v48, %v21158_v49  ;;  %v1331_v26 = vpop.f32.mrb[45].mxu1 }
 0x379   : > { %25069 = vst [vmem:[#allocation84_spill] sm:$0xff] %v21237_v1  ;;  %25070 = vst [vmem:[#allocation85_spill] sm:$0xff] %v21239_v33  ;;  %v1332_v2 = vadd.f32 %v1331_v26, %v21158_v49 }
 0x37b   : > { %v16638_v16 = vpop.f32.mrb[46].mxu1  ;;  %v21243_v31 = vpack.c.bf16 %v1337_v12, %v1332_v2  ;;  %v21245_v59 = vpack.i.bf16 %v1337_v12, %v1332_v2 }
 0x37c   : > { %v1347_v14 = vadd.f32 %v16638_v16, %v21158_v49  ;;  %v1341_v41 = vpop.f32.mrb[47].mxu1 }
 0x37d   : > { %25071 = vst [vmem:[#allocation86_spill] sm:$0xff] %v21243_v31  ;;  %25072 = vst [vmem:[#allocation87_spill] sm:$0xff] %v21245_v59  ;;  %v1342_v57 = vadd.f32 %v1341_v41, %v21158_v49 }
 0x37f   : > { %v16641_v62 = vpop.f32.mrb[48].mxu1  ;;  %v21249_v56 = vpack.c.bf16 %v1347_v14, %v1342_v57  ;;  %v21251_v47 = vpack.i.bf16 %v1347_v14, %v1342_v57 }
 0x380   : > { %v1357_v48 = vadd.f32 %v16641_v62, %v21158_v49  ;;  %v1351_v22 = vpop.f32.mrb[49].mxu1 }
 0x381   : > { %25073 = vst [vmem:[#allocation88_spill] sm:$0xff] %v21249_v56  ;;  %25074 = vst [vmem:[#allocation89_spill] sm:$0xff] %v21251_v47  ;;  %v1352_v26 = vadd.f32 %v1351_v22, %v21158_v49  ;;  %v21267_v47 = vld [vmem:[#allocation7 + $0x8] sm:$0xff] }
 0x383   : > { %v16644_v33 = vpop.f32.mrb[50].mxu1  ;;  %v21255_v24 = vpack.c.bf16 %v1357_v48, %v1352_v26  ;;  %v21257_v12 = vpack.i.bf16 %v1357_v48, %v1352_v26 }
 0x384   : > { %v1367_v16 = vadd.f32 %v16644_v33, %v21158_v49  ;;  %v1361_v2 = vpop.f32.mrb[51].mxu1 }
 0x385   : > { %25075 = vst [vmem:[#allocation90_spill] sm:$0xff] %v21255_v24  ;;  %25076 = vst [vmem:[#allocation91_spill] sm:$0xff] %v21257_v12  ;;  %v1362_v41 = vadd.f32 %v1361_v2, %v21158_v49  ;;  %v21269_v24 = vld [vmem:[#allocation7] sm:$0xff] }
 0x387   : > { %v16647_v59 = vpop.f32.mrb[52].mxu1  ;;  %v21261_v31 = vpack.c.bf16 %v1367_v16, %v1362_v41  ;;  %v21263_v14 = vpack.i.bf16 %v1367_v16, %v1362_v41 }
 0x388   : > { %v1377_v62 = vadd.f32 %v16647_v59, %v21158_v49  ;;  %v1371_v57 = vpop.f32.mrb[53].mxu1 }
 0x389   : > { %25077 = vst [vmem:[#allocation92_spill] sm:$0xff] %v21261_v31  ;;  %25078 = vst [vmem:[#allocation93_spill] sm:$0xff] %v21263_v14  ;;  %v1372_v22 = vadd.f32 %v1371_v57, %v21158_v49 }
 0x38b   : > { %v16654_v48 = vpop.f32.mrb[54].mxu1  ;;  %v21271_v33 = vpack.c.bf16 %v1377_v62, %v1372_v22  ;;  %v21273_v26 = vpack.i.bf16 %v1377_v62, %v1372_v22 }
 0x38c   : > { %v21276_v2 = vadd.f32 %v16654_v48, %v21267_v47  ;;  %v1491_v16 = vpop.f32.mrb[55].mxu1 }
 0x38d   : > { %25079 = vst [vmem:[#allocation94_spill] sm:$0xff] %v21271_v33  ;;  %25080 = vst [vmem:[#allocation95_spill] sm:$0xff] %v21273_v26  ;;  %v21279_v41 = vadd.f32 %v21269_v24, %v1491_v16 }
 0x38e   : > { %v2843_v49 = vsel %vm2839_vm2, %v21276_v2, -inf }
 0x38f   : > { %2844 = vmax.xlane.f32.xlu1 %v2843_v49  ;;  %v2840_v59 = vsel %vm2839_vm2, %v21279_v41, -inf }
 0x390   : > { %2841 = vmax.xlane.f32.xlu0 %v2840_v59 }
 0x393   : > { %v16661_v57 = vpop.f32.mrb[56].mxu1 }
 0x394   : > { %v21286_v14 = vadd.f32 %v16661_v57, %v21267_v47  ;;  %v1578_v62 = vpop.f32.mrb[57].mxu1 }
 0x395   : > { %v21289_v22 = vadd.f32 %v21269_v24, %v1578_v62 }
 0x396   : > { %v2849_v48 = vsel %vm2839_vm2, %v21286_v14, -inf }
 0x397   : > { %2850 = vmax.xlane.f32.xlu0 %v2849_v48  ;;  %v2846_v16 = vsel %vm2839_vm2, %v21289_v22, -inf }
 0x39b   : > { %2847 = vmax.xlane.f32.xlu0 %v2846_v16  ;;  %v16668_v49 = vpop.f32.mrb[58].mxu1 }
 0x39c   : > { %v21296_v26 = vadd.f32 %v16668_v49, %v21267_v47  ;;  %v1665_v59 = vpop.f32.mrb[59].mxu1 }
 0x39d   : > { %v21299_v57 = vadd.f32 %v21269_v24, %v1665_v59 }
 0x39e   : > { %v2855_v62 = vsel %vm2839_vm2, %v21296_v26, -inf }
 0x39f   : > { %2856 = vmax.xlane.f32.xlu1 %v2855_v62  ;;  %v2852_v12 = vsel %vm2839_vm2, %v21299_v57, -inf }
 0x3a3   : > { %2853 = vmax.xlane.f32.xlu1 %v2852_v12  ;;  %v16675_v48 = vpop.f32.mrb[60].mxu1 }
 0x3a4   : > { %v21306_v33 = vadd.f32 %v16675_v48, %v21267_v47  ;;  %v1752_v16 = vpop.f32.mrb[61].mxu1 }
 0x3a5   : > { %v21309_v49 = vadd.f32 %v21269_v24, %v1752_v16 }
 0x3a6   : > { %v2861_v59 = vsel %vm2839_vm2, %v21306_v33, -inf }
 0x3a7   : > { %2862 = vmax.xlane.f32.xlu0 %v2861_v59  ;;  %v2858_v31 = vsel %vm2839_vm2, %v21309_v49, -inf }
 0x3ab   : > { %2859 = vmax.xlane.f32.xlu0 %v2858_v31  ;;  %v16682_v62 = vpop.f32.mrb[62].mxu1 }
 0x3ac   : > { %v21316_v56 = vadd.f32 %v16682_v62, %v21267_v47  ;;  %v1839_v12 = vpop.f32.mrb[63].mxu1 }
 0x3ad   : > { %v21319_v48 = vadd.f32 %v21269_v24, %v1839_v12 }
 0x3ae   : > { %v2867_v16 = vsel %vm2839_vm2, %v21316_v56, -inf }
 0x3af   : > { %2868 = vmax.xlane.f32.xlu1 %v2867_v16  ;;  %v2864_v23 = vsel %vm2839_vm2, %v21319_v48, -inf }
 0x3b3   : > { %2865 = vmax.xlane.f32.xlu1 %v2864_v23  ;;  %v16689_v59 = vpop.f32.mrb[64].mxu1 }
 0x3b4   : > { %v21326_v53 = vadd.f32 %v16689_v59, %v21267_v47  ;;  %v1926_v31 = vpop.f32.mrb[65].mxu1 }
 0x3b5   : > { %v21329_v62 = vadd.f32 %v21269_v24, %v1926_v31 }
 0x3b6   : > { %v2873_v12 = vsel %vm2839_vm2, %v21326_v53, -inf }
 0x3b7   : > { %2874 = vmax.xlane.f32.xlu0 %v2873_v12  ;;  %v2870_v0 = vsel %vm2839_vm2, %v21329_v62, -inf }
 0x3bb   : > { %2871 = vmax.xlane.f32.xlu0 %v2870_v0  ;;  %v16696_v16 = vpop.f32.mrb[66].mxu1 }
 0x3bc   : > { %v21336_v30 = vadd.f32 %v16696_v16, %v21267_v47  ;;  %v2013_v23 = vpop.f32.mrb[67].mxu1 }
 0x3bd   : > { %v21339_v59 = vadd.f32 %v21269_v24, %v2013_v23 }
 0x3be   : > { %v2879_v31 = vsel %vm2839_vm2, %v21336_v30, -inf }
 0x3bf   : > { %2880 = vmax.xlane.f32.xlu1 %v2879_v31  ;;  %v2876_v0 = vsel %vm2839_vm2, %v21339_v59, -inf }
 0x3c0   : > { %v16710_v28 = vpop.f32.mrb[42].mxu0 }
 0x3c1   : > { %v2187_v1 = vpop.f32.mrb[43].mxu0  ;;  %v21344_v12 = vadd.f32 %v16710_v28, %v21267_v47 }
 0x3c2   : > { %v21352_v23 = vadd.f32 %v21269_v24, %v2187_v1 }
 0x3c3   : > { %2877 = vmax.xlane.f32.xlu1 %v2876_v0  ;;  %v16703_v34 = vpop.f32.mrb[68].mxu1  ;;  %v2891_v31 = vsel %vm2839_vm2, %v21344_v12, -inf }
 0x3c4   : > { %v21349_v16 = vadd.f32 %v16703_v34, %v21267_v47  ;;  %v2100_v20 = vpop.f32.mrb[69].mxu1  ;;  %v2888_v0 = vsel %vm2839_vm2, %v21352_v23, -inf }
 0x3c5   : > { %v21355_v50 = vadd.f32 %v21269_v24, %v2100_v20 }
 0x3c6   : > { %v2885_v28 = vsel %vm2839_vm2, %v21349_v16, -inf }
 0x3c7   : > { %2892 = vmax.xlane.f32.xlu1 %v2891_v31  ;;  %2886 = vmax.xlane.f32.xlu0 %v2885_v28  ;;  %v2882_v34 = vsel %vm2839_vm2, %v21355_v50, -inf }
 0x3cb   : > { %2889 = vmax.xlane.f32.xlu1 %v2888_v0  ;;  %2883 = vmax.xlane.f32.xlu0 %v2882_v34  ;;  %v16717_v1 = vpop.f32.mrb[70].mxu1 }
 0x3cc   : > { %v21366_v20 = vadd.f32 %v16717_v1, %v21267_v47  ;;  %v2274_v5 = vpop.f32.mrb[71].mxu1 }
 0x3cd   : > { %v16724_v42 = vpop.f32.mrb[44].mxu0  ;;  %v21369_v7 = vadd.f32 %v21269_v24, %v2274_v5 }
 0x3ce   : > { %v21372_v31 = vadd.f32 %v16724_v42, %v21267_v47  ;;  %v2361_v28 = vpop.f32.mrb[45].mxu0  ;;  %v2897_v4 = vsel %vm2839_vm2, %v21366_v20, -inf }
 0x3cf   : > { %2898 = vmax.xlane.f32.xlu0 %v2897_v4  ;;  %v21377_v0 = vadd.f32 %v21269_v24, %v2361_v28  ;;  %v2894_v1 = vsel %vm2839_vm2, %v21369_v7, -inf }
 0x3d0   : > { %v2903_v34 = vsel %vm2839_vm2, %v21372_v31, -inf }
 0x3d1   : > { %2904 = vmax.xlane.f32.xlu1 %v2903_v34  ;;  %v2900_v55 = vsel %vm2839_vm2, %v21377_v0, -inf }
 0x3d3   : > { %2895 = vmax.xlane.f32.xlu0 %v2894_v1  ;;  %v16731_v5 = vpop.f32.mrb[72].mxu1 }
 0x3d4   : > { %v21384_v42 = vadd.f32 %v16731_v5, %v21267_v47  ;;  %v2448_v44 = vpop.f32.mrb[73].mxu1 }
 0x3d5   : > { %v16738_v4 = vpop.f32.mrb[46].mxu0  ;;  %2901 = vmax.xlane.f32.xlu1 %v2900_v55  ;;  %v21389_v28 = vadd.f32 %v21269_v24, %v2448_v44 }
 0x3d6   : > { %v21392_v32 = vadd.f32 %v16738_v4, %v21267_v47  ;;  %v2535_v34 = vpop.f32.mrb[47].mxu0  ;;  %v2909_v1 = vsel %vm2839_vm2, %v21384_v42, -inf  ;;  %v21405_v4 = vpop.permute.xlu1 %4584 }
 0x3d7   : > { %2910 = vmax.xlane.f32.xlu0 %v2909_v1  ;;  %v21397_v5 = vadd.f32 %v21269_v24, %v2535_v34  ;;  %v2906_v55 = vsel %vm2839_vm2, %v21389_v28, -inf  ;;  %25081 = vst [vmem:[#allocation96_spill] sm:$0xff] %v21405_v4 }
 0x3d8   : > { %v2915_v15 = vsel %vm2839_vm2, %v21392_v32, -inf }
 0x3d9   : > { %2916 = vmax.xlane.f32.xlu1 %v2915_v15  ;;  %v2912_v44 = vsel %vm2839_vm2, %v21397_v5, -inf }
 0x3da   : > { %v21415_v10 = vpop.permute.xlu1 %18469 }
 0x3db   : > { %2907 = vmax.xlane.f32.xlu0 %v2906_v55  ;;  %25082 = vst [vmem:[#allocation97_spill] sm:$0xff] %v21415_v10  ;;  %v21431_v10 = vpop.permute.xlu0 %18464 }
 0x3dc   : > { %25084 = vst [vmem:[#allocation99_spill] sm:$0xff] %v21431_v10 }
 0x3dd   : > { %2913 = vmax.xlane.f32.xlu1 %v2912_v44 }
 0x3de   : > { %v21422_v35 = vpop.permute.xlu1 %4677 }
 0x3df   : > { %25083 = vst [vmem:[#allocation98_spill] sm:$0xff] %v21422_v35  ;;  %v21441_v3 = vpop.permute.xlu0 %4586 }
 0x3e0   : > { %25086 = vst [vmem:[#allocation101_spill] sm:$0xff] %v21441_v3 }
 0x418   : > { %v16745_v17 = vpop.f32.mrb[74].mxu1 }
 0x419   : > { %v21408_v1 = vadd.f32 %v16745_v17, %v21267_v47  ;;  %v2622_v34 = vpop.f32.mrb[75].mxu1 }
 0x41a   : > { %v21411_v18 = vadd.f32 %v21269_v24, %v2622_v34 }
 0x41b   : > { %v2921_v15 = vsel %vm2839_vm2, %v21408_v1, -inf }
 0x41c   : > { %2922 = vmax.xlane.f32.xlu1 %v2921_v15  ;;  %v2918_v55 = vsel %vm2839_vm2, %v21411_v18, -inf }
 0x41d   : > { %2919 = vmax.xlane.f32.xlu0 %v2918_v55  ;;  %v21433_v55 = vpop.permute.xlu1 %4766 }
 0x41e   : > { %25085 = vst [vmem:[#allocation100_spill] sm:$0xff] %v21433_v55  ;;  %v21449_v55 = vpop.permute.xlu0 %4675 }
 0x41f   : > { %25088 = vst [vmem:[#allocation103_spill] sm:$0xff] %v21449_v55 }
 0x420   : > { %v16752_v44 = vpop.f32.mrb[48].mxu0 }
 0x421   : > { %v21420_v4 = vadd.f32 %v16752_v44, %v21267_v47  ;;  %v2709_v17 = vpop.f32.mrb[49].mxu0 }
 0x422   : > { %v21425_v34 = vadd.f32 %v21269_v24, %v2709_v17 }
 0x423   : > { %v2927_v27 = vsel %vm2839_vm2, %v21420_v4, -inf }
 0x424   : > { %2928 = vmax.xlane.f32.xlu1 %v2927_v27  ;;  %v2924_v15 = vsel %vm2839_vm2, %v21425_v34, -inf }
 0x425   : > { %2925 = vmax.xlane.f32.xlu0 %v2924_v15  ;;  %v21447_v15 = vpop.permute.xlu1 %18474 }
 0x426   : > { %25087 = vst [vmem:[#allocation102_spill] sm:$0xff] %v21447_v15 }
 0x428   : > { %v16759_v44 = vpop.f32.mrb[76].mxu1 }
 0x429   : > { %v21436_v38 = vadd.f32 %v16759_v44, %v21267_v47  ;;  %v2796_v35 = vpop.f32.mrb[77].mxu1  ;;  %v21451_v47 = vpop.permute.xlu1 %18479 }
 0x42a   : > { %v21439_v17 = vadd.f32 %v21269_v24, %v2796_v35  ;;  %25089 = vst [vmem:[#allocation104_spill] sm:$0xff] %v21451_v47  ;;  %v21453_v44 = vpop.permute.xlu0 %18484 }
 0x42b   : > { %v2933_v27 = vsel %vm2839_vm2, %v21436_v38, -inf  ;;  %25090 = vst [vmem:[#allocation105_spill] sm:$0xff] %v21453_v44 }
 0x42c   : > { %2934 = vmax.xlane.f32.xlu1 %v2933_v27  ;;  %v2930_v10 = vsel %vm2839_vm2, %v21439_v17, -inf }
 0x42d   : > { %2931 = vmax.xlane.f32.xlu0 %v2930_v10  ;;  %v2845_v35 = vpop.xlane.xlu1 %2844 }
 0x42e   : > { %v2842_v24 = vpop.xlane.xlu0 %2841  ;;  %v2937_v55 = vsub.f32 %v21276_v2, %v2845_v35 }
 0x42f   : > { %v2936_v47 = vsub.f32 %v21279_v41, %v2842_v24 }
 0x430   : > { %v2970_v29 = vmul.f32 1.442695, %v2937_v55 }
 0x431   : > { %v2857_v6 = vpop.xlane.xlu1 %2856  ;;  %v2968_v36 = vmul.f32 1.442695, %v2936_v47 }
 0x432   : > { %v2851_v3 = vpop.xlane.xlu0 %2850  ;;  %v2941_v11 = vsub.f32 %v21296_v26, %v2857_v6  ;;  %19247 = vpow2.f32 %v2970_v29 }
 0x433   : > { %v2939_v54 = vsub.f32 %v21286_v14, %v2851_v3  ;;  %19249 = vpow2.f32 %v2968_v36 }
 0x434   : > { %v2978_v19 = vmul.f32 1.442695, %v2941_v11 }
 0x435   : > { %v2854_v27 = vpop.xlane.xlu1 %2853  ;;  %v2974_v45 = vmul.f32 1.442695, %v2939_v54 }
 0x436   : > { %v2848_v8 = vpop.xlane.xlu0 %2847  ;;  %19251 = vpow2.f32 %v2978_v19 }
 0x437   : > { %v2938_v2 = vsub.f32 %v21289_v22, %v2848_v8  ;;  %19253 = vpow2.f32 %v2974_v45 }
 0x439   : > { %v2972_v6 = vmul.f32 1.442695, %v2938_v2 }
 0x43a   : > { %v2863_v15 = vpop.xlane.xlu0 %2862 }
 0x43b   : > { %v2943_v3 = vsub.f32 %v21306_v33, %v2863_v15 }
 0x43c   : > { %v2869_v10 = vpop.xlane.xlu1 %2868  ;;  %v21469_v26 = vpop.eup %19247 }
 0x43d   : > { %18489 = vrot.lane.b32.xlu1 %v20940_v51, %s19990_s27  ;;  %v2945_v55 = vsub.f32 %v21316_v56, %v2869_v10  ;;  %v2982_v36 = vmul.f32 1.442695, %v2943_v3 }
 0x43e   : > { %v2860_v44 = vpop.xlane.xlu0 %2859 }
 0x43f   : > { %v2986_v14 = vmul.f32 1.442695, %v2945_v55  ;;  %v2942_v54 = vsub.f32 %v21309_v49, %v2860_v44 }
 0x440   : > { %v2866_v58 = vpop.xlane.xlu1 %2865 }
 0x441   : > { %v2944_v11 = vsub.f32 %v21319_v48, %v2866_v58  ;;  %v2980_v56 = vmul.f32 1.442695, %v2942_v54  ;;  %v3035_v58 = vsel %vm2839_vm2, %v21469_v26, 0.0 }
 0x443   : > { %4768 = vrot.lane.b32.xlu0 %v20920_v37, %s19990_s27  ;;  %v2940_v37 = vsub.f32 %v21299_v57, %v2854_v27  ;;  %v2984_v19 = vmul.f32 1.442695, %v2944_v11 }
 0x444   : > { %v2875_v21 = vpop.xlane.xlu0 %2874 }
 0x445   : > { %v2976_v41 = vmul.f32 1.442695, %v2940_v37  ;;  %v21471_v37 = vpop.eup %19249  ;;  %v2947_v33 = vsub.f32 %v21326_v53, %v2875_v21 }
 0x446   : > { %v21477_v22 = vpop.eup %19251  ;;  %v3032_v49 = vsel %vm2839_vm2, %v21471_v37, 0.0 }
 0x447   : > { %19255 = vpow2.f32 %v2976_v41  ;;  %v21481_v48 = vpop.eup %19253  ;;  %v2990_v21 = vmul.f32 1.442695, %v2947_v33  ;;  %v3047_v47 = vsel %vm2839_vm2, %v21477_v22, 0.0 }
 0x448   : > { %v2872_v24 = vpop.xlane.xlu0 %2871  ;;  %19257 = vpow2.f32 %v2972_v6  ;;  %v3041_v27 = vsel %vm2839_vm2, %v21481_v48, 0.0 }
 0x449   : > { %19259 = vpow2.f32 %v2986_v14  ;;  %v2946_v53 = vsub.f32 %v21329_v62, %v2872_v24 }
 0x44a   : > { %19261 = vpow2.f32 %v2982_v36 }
 0x44b   : > { %19263 = vpow2.f32 %v2984_v19  ;;  %v2988_v62 = vmul.f32 1.442695, %v2946_v53 }
 0x44c   : > { %v2881_v51 = vpop.xlane.xlu1 %2880  ;;  %19265 = vpow2.f32 %v2980_v56 }
 0x44d   : > { %v2949_v45 = vsub.f32 %v21336_v30, %v2881_v51 }
 0x44f   : > { %v2994_v51 = vmul.f32 1.442695, %v2949_v45 }
 0x450   : > { %v2878_v35 = vpop.xlane.xlu1 %2877 }
 0x451   : > { %v2948_v30 = vsub.f32 %v21339_v59, %v2878_v35  ;;  %v21487_v44 = vpop.eup %19255  ;;  %19267 = vpow2.f32 %v2994_v51 }
 0x452   : > { %v21491_v10 = vpop.eup %19257  ;;  %19269 = vpow2.f32 %v2990_v21  ;;  %v3044_v24 = vsel %vm2839_vm2, %v21487_v44, 0.0 }
 0x453   : > { %v2992_v41 = vmul.f32 1.442695, %v2948_v30  ;;  %v21497_v6 = vpop.eup %19259  ;;  %v3038_v3 = vsel %vm2839_vm2, %v21491_v10, 0.0 }
 0x454   : > { %v2887_v29 = vpop.xlane.xlu0 %2886  ;;  %v2893_v8 = vpop.xlane.xlu1 %2892  ;;  %v3059_v54 = vsel %vm2839_vm2, %v21497_v6, 0.0 }
 0x455   : > { %v2953_v59 = vsub.f32 %v21344_v12, %v2893_v8  ;;  %v2951_v55 = vsub.f32 %v21349_v16, %v2887_v29  ;;  %v21501_v14 = vpop.eup %19261  ;;  %19271 = vpow2.f32 %v2992_v41 }
 0x456   : > { %19273 = vpow2.f32 %v2988_v62  ;;  %v21507_v8 = vpop.eup %19263  ;;  %v3053_v45 = vsel %vm2839_vm2, %v21501_v14, 0.0 }
 0x457   : > { %v3002_v11 = vmul.f32 1.442695, %v2953_v59  ;;  %v2998_v36 = vmul.f32 1.442695, %v2951_v55  ;;  %v21511_v56 = vpop.eup %19265 }
 0x458   : > { %v2884_v57 = vpop.xlane.xlu0 %2883  ;;  %v2890_v15 = vpop.xlane.xlu1 %2889 }
 0x459   : > { %v2952_v12 = vsub.f32 %v21352_v23, %v2890_v15  ;;  %v2950_v16 = vsub.f32 %v21355_v50, %v2884_v57  ;;  %19275 = vpow2.f32 %v3002_v11  ;;  %v3056_v57 = vsel %vm2839_vm2, %v21507_v8, 0.0 }
 0x45a   : > { %19277 = vpow2.f32 %v2998_v36  ;;  %v3050_v15 = vsel %vm2839_vm2, %v21511_v56, 0.0 }
 0x45b   : > { %v3000_v23 = vmul.f32 1.442695, %v2952_v12  ;;  %v2996_v50 = vmul.f32 1.442695, %v2950_v16 }
 0x45c   : > { %v2899_v35 = vpop.xlane.xlu0 %2898 }
 0x45d   : > { %19279 = vpow2.f32 %v3000_v23 }
 0x45e   : > { %v2905_v2 = vpop.xlane.xlu1 %2904  ;;  %19281 = vpow2.f32 %v2996_v50 }
 0x45f   : > { %v2957_v33 = vsub.f32 %v21372_v31, %v2905_v2 }
 0x460   : > { %v2896_v19 = vpop.xlane.xlu0 %2895 }
 0x461   : > { %3036 = vadd.xlane.f32.xlu1 %v3035_v58  ;;  %v2955_v58 = vsub.f32 %v21366_v20, %v2899_v35  ;;  %v3010_v21 = vmul.f32 1.442695, %v2957_v33 }
 0x462   : > { %3033 = vadd.xlane.f32.xlu0 %v3032_v49  ;;  %v2902_v29 = vpop.xlane.xlu1 %2901  ;;  %v21517_v49 = vpop.eup %19267 }
 0x463   : > { %v21521_v51 = vpop.eup %19269  ;;  %v2956_v31 = vsub.f32 %v21377_v0, %v2902_v29  ;;  %v3006_v20 = vmul.f32 1.442695, %v2955_v58  ;;  %19283 = vpow2.f32 %v3010_v21 }
 0x464   : > { %v2911_v53 = vpop.xlane.xlu0 %2910  ;;  %v21527_v2 = vpop.eup %19271  ;;  %v3065_v41 = vsel %vm2839_vm2, %v21521_v51, 0.0 }
 0x465   : > { %3048 = vadd.xlane.f32.xlu1 %v3047_v47  ;;  %v2954_v47 = vsub.f32 %v21369_v7, %v2896_v19  ;;  %v21531_v59 = vpop.eup %19273  ;;  %v3008_v35 = vmul.f32 1.442695, %v2956_v31  ;;  %19285 = vpow2.f32 %v3006_v20  ;;  %v2959_v7 = vsub.f32 %v21384_v42, %v2911_v53 }
 0x466   : > { %3042 = vadd.xlane.f32.xlu0 %v3041_v27  ;;  %v2917_v30 = vpop.xlane.xlu1 %2916  ;;  %v3071_v27 = vsel %vm2839_vm2, %v21517_v49, 0.0  ;;  %v3062_v12 = vsel %vm2839_vm2, %v21531_v59, 0.0 }
 0x467   : > { %v2961_v0 = vsub.f32 %v21392_v32, %v2917_v30  ;;  %v3004_v62 = vmul.f32 1.442695, %v2954_v47  ;;  %19287 = vpow2.f32 %v3008_v35  ;;  %v3014_v42 = vmul.f32 1.442695, %v2959_v7 }
 0x468   : > { %v2908_v11 = vpop.xlane.xlu0 %2907 }
 0x469   : > { %3045 = vadd.xlane.f32.xlu1 %v3044_v24  ;;  %v3068_v24 = vsel %vm2839_vm2, %v21527_v2, 0.0  ;;  %v3018_v32 = vmul.f32 1.442695, %v2961_v0  ;;  %19289 = vpow2.f32 %v3004_v62  ;;  %v2958_v29 = vsub.f32 %v21389_v28, %v2908_v11 }
 0x46a   : > { %3039 = vadd.xlane.f32.xlu0 %v3038_v3  ;;  %v2914_v55 = vpop.xlane.xlu1 %2913  ;;  %v21537_v3 = vpop.eup %19275 }
 0x46b   : > { %v21541_v36 = vpop.eup %19277  ;;  %v2960_v16 = vsub.f32 %v21397_v5, %v2914_v55  ;;  %19291 = vpow2.f32 %v3018_v32  ;;  %v3012_v5 = vmul.f32 1.442695, %v2958_v29 }
 0x46c   : > { %v21547_v19 = vpop.eup %19279  ;;  %19293 = vpow2.f32 %v3014_v42 }
 0x46d   : > { %3060 = vadd.xlane.f32.xlu1 %v3059_v54  ;;  %v3083_v54 = vsel %vm2839_vm2, %v21537_v3, 0.0  ;;  %v21551_v23 = vpop.eup %19281  ;;  %v3016_v33 = vmul.f32 1.442695, %v2960_v16  ;;  %v3080_v50 = vsel %vm2839_vm2, %v21547_v19, 0.0 }
 0x46e   : > { %3054 = vadd.xlane.f32.xlu0 %v3053_v45  ;;  %v3077_v45 = vsel %vm2839_vm2, %v21541_v36, 0.0  ;;  %v21555_v28 = vpop.eup %19283  ;;  %v3074_v58 = vsel %vm2839_vm2, %v21551_v23, 0.0 }
 0x46f   : > { %19295 = vpow2.f32 %v3016_v33 }
 0x470   : > { %19297 = vpow2.f32 %v3012_v5 }
 0x471   : > { %3057 = vadd.xlane.f32.xlu1 %v3056_v57  ;;  %v21559_v57 = vpop.eup %19285 }
 0x472   : > { %3051 = vadd.xlane.f32.xlu0 %v3050_v15  ;;  %v3095_v15 = vsel %vm2839_vm2, %v21555_v28, 0.0  ;;  %v21563_v30 = vpop.eup %19287  ;;  %v3089_v21 = vsel %vm2839_vm2, %v21559_v57, 0.0 }
 0x473   : > { %v21567_v31 = vpop.eup %19289  ;;  %v3092_v53 = vsel %vm2839_vm2, %v21563_v30, 0.0 }
 0x474   : > { %v3086_v47 = vsel %vm2839_vm2, %v21567_v31, 0.0 }
 0x475   : > { %3072 = vadd.xlane.f32.xlu1 %v3071_v27  ;;  %v21571_v20 = vpop.eup %19291 }
 0x476   : > { %3066 = vadd.xlane.f32.xlu0 %v3065_v41  ;;  %v21575_v27 = vpop.eup %19293  ;;  %v3107_v41 = vsel %vm2839_vm2, %v21571_v20, 0.0 }
 0x477   : > { %v3101_v0 = vsel %vm2839_vm2, %v21575_v27, 0.0 }
 0x479   : > { %3069 = vadd.xlane.f32.xlu1 %v3068_v24  ;;  %v21579_v35 = vpop.eup %19295 }
 0x47a   : > { %3063 = vadd.xlane.f32.xlu0 %v3062_v12  ;;  %v21583_v62 = vpop.eup %19297  ;;  %v3104_v7 = vsel %vm2839_vm2, %v21579_v35, 0.0 }
 0x47b   : > { %v3098_v55 = vsel %vm2839_vm2, %v21583_v62, 0.0 }
 0x47d   : > { %3084 = vadd.xlane.f32.xlu1 %v3083_v54 }
 0x47e   : > { %3078 = vadd.xlane.f32.xlu0 %v3077_v45 }
 0x481   : > { %3081 = vadd.xlane.f32.xlu1 %v3080_v50 }
 0x482   : > { %3075 = vadd.xlane.f32.xlu0 %v3074_v58 }
 0x485   : > { %3096 = vadd.xlane.f32.xlu1 %v3095_v15 }
 0x486   : > { %3090 = vadd.xlane.f32.xlu0 %v3089_v21 }
 0x489   : > { %3093 = vadd.xlane.f32.xlu1 %v3092_v53 }
 0x48a   : > { %3087 = vadd.xlane.f32.xlu0 %v3086_v47 }
 0x48d   : > { %3108 = vadd.xlane.f32.xlu1 %v3107_v41 }
 0x48e   : > { %3102 = vadd.xlane.f32.xlu0 %v3101_v0 }
 0x491   : > { %3105 = vadd.xlane.f32.xlu1 %v3104_v7 }
 0x492   : > { %3099 = vadd.xlane.f32.xlu0 %v3098_v55 }
 0x4a9   : > { %v2923_v24 = vpop.xlane.xlu1 %2922 }
 0x4aa   : > { %v2963_v11 = vsub.f32 %v21408_v1, %v2923_v24  ;;  %v2920_v12 = vpop.xlane.xlu0 %2919 }
 0x4ab   : > { %v2962_v32 = vsub.f32 %v21411_v18, %v2920_v12 }
 0x4ac   : > { %v3022_v16 = vmul.f32 1.442695, %v2963_v11 }
 0x4ad   : > { %v3020_v42 = vmul.f32 1.442695, %v2962_v32 }
 0x4ae   : > { %19299 = vpow2.f32 %v3022_v16 }
 0x4af   : > { %19301 = vpow2.f32 %v3020_v42 }
 0x4b1   : > { %v2929_v29 = vpop.xlane.xlu1 %2928 }
 0x4b2   : > { %v2965_v54 = vsub.f32 %v21420_v4, %v2929_v29  ;;  %v2926_v45 = vpop.xlane.xlu0 %2925 }
 0x4b3   : > { %v2964_v33 = vsub.f32 %v21425_v34, %v2926_v45  ;;  %v25091_v45 = vld [vmem:[#allocation47_spill] sm:$0xff] }
 0x4b4   : > { %v3026_v5 = vmul.f32 1.442695, %v2965_v54 }
 0x4b5   : > { %v3024_v50 = vmul.f32 1.442695, %v2964_v33 }
 0x4b6   : > { %19303 = vpow2.f32 %v3026_v5  ;;  %v25092_v5 = vld [vmem:[#allocation43_spill] sm:$0xff] }
 0x4b7   : > { %19305 = vpow2.f32 %v3024_v50 }
 0x4b8   : > { %v21593_v58 = vpop.eup %19299 }
 0x4b9   : > { %v21595_v1 = vpop.eup %19301  ;;  %v2935_v15 = vpop.xlane.xlu1 %2934  ;;  %v3113_v18 = vsel %vm2839_vm2, %v21593_v58, 0.0 }
 0x4ba   : > { %v2967_v21 = vsub.f32 %v21436_v38, %v2935_v15  ;;  %3114 = vadd.xlane.f32.xlu1 %v3113_v18  ;;  %v2932_v53 = vpop.xlane.xlu0 %2931  ;;  %v3110_v4 = vsel %vm2839_vm2, %v21595_v1, 0.0  ;;  %v25093_v15 = vld [vmem:[#allocation40_spill] sm:$0xff] }
 0x4bb   : > { %v2966_v34 = vsub.f32 %v21439_v17, %v2932_v53  ;;  %3111 = vadd.xlane.f32.xlu0 %v3110_v4  ;;  %v25094_v53 = vld [vmem:[#allocation44_spill] sm:$0xff] }
 0x4bc   : > { %v3030_v47 = vmul.f32 1.442695, %v2967_v21 }
 0x4bd   : > { %v3028_v41 = vmul.f32 1.442695, %v2966_v34  ;;  %v21633_v32 = vpop.permute.xlu1 %18489 }
 0x4be   : > { %19307 = vpow2.f32 %v3030_v47  ;;  %v21635_v16 = vpop.permute.xlu0 %4768 }
 0x4bf   : > { %19309 = vpow2.f32 %v3028_v41 }
 0x4c0   : > { %v21603_v0 = vpop.eup %19303 }
 0x4c1   : > { %v21605_v7 = vpop.eup %19305  ;;  %v3119_v55 = vsel %vm2839_vm2, %v21603_v0, 0.0 }
 0x4c2   : > { %3120 = vadd.xlane.f32.xlu1 %v3119_v55  ;;  %v3116_v38 = vsel %vm2839_vm2, %v21605_v7, 0.0  ;;  %v25095_v55 = vld [vmem:[#allocation34_spill] sm:$0xff] }
 0x4c3   : > { %3117 = vadd.xlane.f32.xlu0 %v3116_v38 }
 0x4c8   : > { %v21611_v24 = vpop.eup %19307 }
 0x4c9   : > { %v21613_v17 = vpop.eup %19309  ;;  %v3125_v11 = vsel %vm2839_vm2, %v21611_v24, 0.0 }
 0x4ca   : > { %3126 = vadd.xlane.f32.xlu1 %v3125_v11  ;;  %v3122_v12 = vsel %vm2839_vm2, %v21613_v17, 0.0 }
 0x4cb   : > { %3123 = vadd.xlane.f32.xlu0 %v3122_v12 }
 0x4db   : > { %4859 = vrot.lane.b32.xlu1 %v20944_v25, %s19990_s27 }
 0x4df   : > { %4948 = vrot.lane.b32.xlu1 %v20946_v52, %s19990_s27 }
 0x4e1   : > { %4857 = vrot.lane.b32.xlu0 %v20922_v9, %s19990_s27 }
 0x4e3   : > { %18499 = vrot.lane.b32.xlu1 %v20992_v63, %s19990_s27 }
 0x4e5   : > { %18494 = vrot.lane.b32.xlu0 %v20964_v60, %s19990_s27 }
 0x4e7   : > { %5041 = vrot.lane.b32.xlu1 %v20999_v13, %s19990_s27 }
 0x4e9   : > { %4950 = vrot.lane.b32.xlu0 %v20972_v39, %s19990_s27 }
 0x4eb   : > { %5130 = vrot.lane.b32.xlu1 %v21003_v61, %s19990_s27 }
 0x4ed   : > { %5039 = vrot.lane.b32.xlu0 %v20974_v46, %s19990_s27 }
 0x4ee   : > { %v3037_v42 = vpop.xlane.xlu1 %3036 }
 0x4ef   : > { %19311 = vrcp.f32 %v3037_v42  ;;  %18509 = vrot.lane.b32.xlu1 %v21042_v43, %s19990_s27  ;;  %v3034_v29 = vpop.xlane.xlu0 %3033 }
 0x4f0   : > { %19313 = vrcp.f32 %v3034_v29 }
 0x4f1   : > { %18504 = vrot.lane.b32.xlu0 %v21019_v40, %s19990_s27 }
 0x4f2   : > { %v3049_v54 = vpop.xlane.xlu1 %3048 }
 0x4f3   : > { %19315 = vrcp.f32 %v3049_v54  ;;  %5223 = vrot.lane.b32.xlu1 %v25091_v45, %s19990_s27  ;;  %v3043_v33 = vpop.xlane.xlu0 %3042 }
 0x4f4   : > { %19317 = vrcp.f32 %v3043_v33 }
 0x4f5   : > { %5132 = vrot.lane.b32.xlu0 %v25092_v5, %s19990_s27 }
 0x4f6   : > { %v3046_v50 = vpop.xlane.xlu1 %3045 }
 0x4f7   : > { %19319 = vrcp.f32 %v3046_v50  ;;  %5312 = vrot.lane.b32.xlu1 %v25093_v15, %s19990_s27  ;;  %v3040_v18 = vpop.xlane.xlu0 %3039  ;;  %v25096_v15 = vld [vmem:[#allocation50_spill] sm:$0xff] }
 0x4f8   : > { %19321 = vrcp.f32 %v3040_v18 }
 0x4f9   : > { %v19312_v21 = vpop.eup %19311  ;;  %5221 = vrot.lane.b32.xlu0 %v25094_v53, %s19990_s27 }
 0x4fa   : > { %v19314_v4 = vpop.eup %19313  ;;  %v3161_v34 = vmul.f32 %v19312_v21, %v3037_v42  ;;  %v3061_v47 = vpop.xlane.xlu1 %3060 }
 0x4fb   : > { %v3160_v41 = vmul.f32 %v19314_v4, %v3034_v29  ;;  %19323 = vrcp.f32 %v3061_v47  ;;  %18519 = vrot.lane.b32.xlu1 %v25095_v55, %s19990_s27  ;;  %v3055_v38 = vpop.xlane.xlu0 %3054  ;;  %v25097_v29 = vld [vmem:[#allocation51_spill] sm:$0xff] }
 0x4fc   : > { %v3193_v11 = vsub.f32 2.0, %v3161_v34  ;;  %19325 = vrcp.f32 %v3055_v38  ;;  %v25098_v34 = vld [vmem:[#allocation45_spill] sm:$0xff] }
 0x4fd   : > { %v19316_v12 = vpop.eup %19315  ;;  %v3192_v45 = vsub.f32 2.0, %v3160_v41  ;;  %18514 = vrot.lane.b32.xlu0 %v25096_v15, %s19990_s27 }
 0x4fe   : > { %v19318_v43 = vpop.eup %19317  ;;  %v3225_v5 = vmul.f32 %v19312_v21, %v3193_v11  ;;  %v3165_v61 = vmul.f32 %v19316_v12, %v3049_v54  ;;  %v3058_v53 = vpop.xlane.xlu1 %3057 }
 0x4ff   : > { %v3224_v40 = vmul.f32 %v19314_v4, %v3192_v45  ;;  %v3163_v42 = vmul.f32 %v19318_v43, %v3043_v33  ;;  %19327 = vrcp.f32 %v3058_v53  ;;  %5405 = vrot.lane.b32.xlu1 %v25097_v29, %s19990_s27  ;;  %v3052_v13 = vpop.xlane.xlu0 %3051  ;;  %v25099_v4 = vld [vmem:[#allocation49_spill] sm:$0xff] }
 0x500   : > { %19329 = vrcp.f32 %v3052_v13  ;;  %v3257_v15 = vmul.f32 %v21469_v26, %v3225_v5  ;;  %v3197_v21 = vsub.f32 2.0, %v3165_v61  ;;  %v25101_v61 = vld [vmem:[#allocation48_spill] sm:$0xff] }
 0x501   : > { %v19320_v55 = vpop.eup %19319  ;;  %5314 = vrot.lane.b32.xlu0 %v25098_v34, %s19990_s27  ;;  %v3256_v41 = vmul.f32 %v21471_v37, %v3224_v40  ;;  %v3195_v54 = vsub.f32 2.0, %v3163_v42  ;;  %v25100_v34 = vld [vmem:[#allocation68_spill] sm:$0xff] }
 0x502   : > { %v19322_v46 = vpop.eup %19321  ;;  %v3164_v11 = vmul.f32 %v19320_v55, %v3046_v50  ;;  %v3073_v45 = vpop.xlane.xlu1 %3072  ;;  %v3229_v5 = vmul.f32 %v19316_v12, %v3197_v21  ;;  %v25104_v12 = vld [vmem:[#allocation38_spill] sm:$0xff] }
 0x503   : > { %v3162_v33 = vmul.f32 %v19322_v46, %v3040_v18  ;;  %19331 = vrcp.f32 %v3073_v45  ;;  %5494 = vrot.lane.b32.xlu1 %v25099_v4, %s19990_s27  ;;  %16764 = vmatprep.mubr.msk.f32.mxu0 %vm2839_vm2, %v3256_v41  ;;  %v3067_v29 = vpop.xlane.xlu0 %3066  ;;  %v3227_v50 = vmul.f32 %v19318_v43, %v3195_v54  ;;  %v25102_v4 = vld [vmem:[#allocation72_spill] sm:$0xff] }
 0x504   : > { %v3196_v63 = vsub.f32 2.0, %v3164_v11  ;;  %19333 = vrcp.f32 %v3067_v29  ;;  %16765 = vmatmul.mubr.msk.f32.vlgmr.msra.gmra.mrb[50].mxu0 %vm2839_vm2, %v3257_v15  ;;  %v25103_v15 = vld [vmem:[#allocation58_spill] sm:$0xff] }
 0x505   : > { %v19324_v40 = vpop.eup %19323  ;;  %v3194_v37 = vsub.f32 2.0, %v3162_v33  ;;  %17795 = vmatpush3.bf16.msra.mxu0 %v25100_v34  ;;  %5403 = vrot.lane.b32.xlu0 %v25101_v61, %s19990_s27 }
 0x506   : > { %v19326_v26 = vpop.eup %19325  ;;  %v3228_v18 = vmul.f32 %v19320_v55, %v3196_v63  ;;  %v3169_v42 = vmul.f32 %v19324_v40, %v3061_v47  ;;  %17801 = vmatprep.subr.bf16.mxu0 %v25102_v4  ;;  %v3070_v41 = vpop.xlane.xlu1 %3069  ;;  %v3261_v47 = vmul.f32 %v21477_v22, %v3229_v5 }
 0x507   : > { %v3226_v39 = vmul.f32 %v19322_v46, %v3194_v37  ;;  %v3167_v11 = vmul.f32 %v19326_v26, %v3055_v38  ;;  %19335 = vrcp.f32 %v3070_v41  ;;  %18529 = vrot.lane.b32.xlu1 %v25103_v15, %s19990_s27  ;;  %v3064_v33 = vpop.xlane.xlu0 %3063  ;;  %v3259_v46 = vmul.f32 %v21481_v48, %v3227_v50 }
 0x508   : > { %19337 = vrcp.f32 %v3064_v33  ;;  %v3260_v34 = vmul.f32 %v21487_v44, %v3228_v18  ;;  %v3201_v61 = vsub.f32 2.0, %v3169_v42  ;;  %v25105_v44 = vld [vmem:[#allocation55_spill] sm:$0xff]  ;;  %v25107_v42 = vld [vmem:[#allocation76_spill] sm:$0xff] }
 0x509   : > { %v19328_v52 = vpop.eup %19327  ;;  %18524 = vrot.lane.b32.xlu0 %v25104_v12, %s19990_s27  ;;  %v3258_v63 = vmul.f32 %v21491_v10, %v3226_v39  ;;  %v3199_v55 = vsub.f32 2.0, %v3167_v11  ;;  %v25106_v10 = vld [vmem:[#allocation70_spill] sm:$0xff]  ;;  %v25108_v11 = vld [vmem:[#allocation53_spill] sm:$0xff] }
 0x50a   : > { %v19330_v43 = vpop.eup %19329  ;;  %v3168_v38 = vmul.f32 %v19328_v52, %v3058_v53  ;;  %v3085_v21 = vpop.xlane.xlu1 %3084  ;;  %16778 = vmatprep.mubr.msk.f32.mxu0 %vm2839_vm2, %v3260_v34  ;;  %v3233_v22 = vmul.f32 %v19324_v40, %v3201_v61  ;;  %v25110_v40 = vld [vmem:[#allocation61_spill] sm:$0xff] }
 0x50b   : > { %v3166_v54 = vmul.f32 %v19330_v43, %v3052_v13  ;;  %19339 = vrcp.f32 %v3085_v21  ;;  %5587 = vrot.lane.b32.xlu1 %v25105_v44, %s19990_s27  ;;  %16771 = vmatprep.mubr.msk.f32.mxu1 %vm2839_vm2, %v3258_v63  ;;  %v3079_v37 = vpop.xlane.xlu0 %3078  ;;  %v3231_v53 = vmul.f32 %v19326_v26, %v3199_v55 }
 0x50c   : > { %v3200_v18 = vsub.f32 2.0, %v3168_v38  ;;  %16779 = vmatmul.mubr.msk.f32.vlgmr.msra.gmra.mrb[52].mxu0 %vm2839_vm2, %v3261_v47  ;;  %19341 = vrcp.f32 %v3079_v37  ;;  %16772 = vmatmul.mubr.msk.f32.vlgmr.msra.gmra.mrb[78].mxu1 %vm2839_vm2, %v3259_v46  ;;  %v25109_v46 = vld [vmem:[#allocation74_spill] sm:$0xff]  ;;  %v3265_v38 = vmul.f32 %v21497_v6, %v3233_v22 }
 0x50d   : > { %v19332_v39 = vpop.eup %19331  ;;  %v3198_v48 = vsub.f32 2.0, %v3166_v54  ;;  %17803 = vmatpush3.bf16.msra.mxu0 %v25102_v4  ;;  %17799 = vmatpush3.bf16.msra.mxu1 %v25106_v10 }
 0x50e   : > { %v19334_v13 = vpop.eup %19333  ;;  %v3232_v5 = vmul.f32 %v19328_v52, %v3200_v18  ;;  %v3173_v50 = vmul.f32 %v19332_v39, %v3073_v45  ;;  %17809 = vmatprep.subr.bf16.mxu0 %v25107_v42  ;;  %5496 = vrot.lane.b32.xlu0 %v25108_v11, %s19990_s27  ;;  %v3082_v34 = vpop.xlane.xlu1 %3081  ;;  %v25111_v18 = vld [vmem:[#allocation52_spill] sm:$0xff] }
 0x50f   : > { %v3230_v63 = vmul.f32 %v19330_v43, %v3198_v48  ;;  %v3171_v47 = vmul.f32 %v19334_v13, %v3067_v29  ;;  %17805 = vmatprep.subr.bf16.mxu1 %v25109_v46  ;;  %19343 = vrcp.f32 %v3082_v34  ;;  %18534 = vrot.lane.b32.xlu1 %v25110_v40, %s19990_s27  ;;  %v3076_v4 = vpop.xlane.xlu0 %3075  ;;  %v3263_v43 = vmul.f32 %v21501_v14, %v3231_v53 }
 0x510   : > { %19345 = vrcp.f32 %v3076_v4  ;;  %v3264_v61 = vmul.f32 %v21507_v8, %v3232_v5  ;;  %v3205_v45 = vsub.f32 2.0, %v3173_v50  ;;  %v25112_v8 = vld [vmem:[#allocation57_spill] sm:$0xff] }
 0x511   : > { %v19336_v52 = vpop.eup %19335  ;;  %v3262_v26 = vmul.f32 %v21511_v56, %v3230_v63  ;;  %v3203_v29 = vsub.f32 2.0, %v3171_v47  ;;  %v25113_v63 = vld [vmem:[#allocation80_spill] sm:$0xff]  ;;  %v25114_v47 = vld [vmem:[#allocation54_spill] sm:$0xff] }
 0x512   : > { %v19338_v55 = vpop.eup %19337  ;;  %v3172_v54 = vmul.f32 %v19336_v52, %v3070_v41  ;;  %5585 = vrot.lane.b32.xlu0 %v25111_v18, %s19990_s27  ;;  %v3097_v48 = vpop.xlane.xlu1 %3096  ;;  %16792 = vmatprep.mubr.msk.f32.mxu0 %vm2839_vm2, %v3264_v61  ;;  %v3237_v14 = vmul.f32 %v19332_v39, %v3205_v45  ;;  %v25116_v39 = vld [vmem:[#allocation60_spill] sm:$0xff] }
 0x513   : > { %v3170_v10 = vmul.f32 %v19338_v55, %v3064_v33  ;;  %19347 = vrcp.f32 %v3097_v48  ;;  %5767 = vrot.lane.b32.xlu1 %v25112_v8, %s19990_s27  ;;  %16785 = vmatprep.mubr.msk.f32.mxu1 %vm2839_vm2, %v3262_v26  ;;  %v3091_v56 = vpop.xlane.xlu0 %3090  ;;  %v3235_v22 = vmul.f32 %v19334_v13, %v3203_v29 }
 0x514   : > { %v3204_v5 = vsub.f32 2.0, %v3172_v54  ;;  %16793 = vmatmul.mubr.msk.f32.vlgmr.msra.gmra.mrb[54].mxu0 %vm2839_vm2, %v3265_v38  ;;  %19349 = vrcp.f32 %v3091_v56  ;;  %16786 = vmatmul.mubr.msk.f32.vlgmr.msra.gmra.mrb[80].mxu1 %vm2839_vm2, %v3263_v43  ;;  %v25115_v43 = vld [vmem:[#allocation78_spill] sm:$0xff]  ;;  %v3269_v29 = vmul.f32 %v21517_v49, %v3237_v14 }
 0x515   : > { %v19340_v6 = vpop.eup %19339  ;;  %v3202_v41 = vsub.f32 2.0, %v3170_v10  ;;  %17811 = vmatpush3.bf16.msra.mxu0 %v25107_v42  ;;  %17807 = vmatpush3.bf16.msra.mxu1 %v25109_v46  ;;  %v25117_v10 = vld [vmem:[#allocation56_spill] sm:$0xff] }
 0x516   : > { %v19342_v33 = vpop.eup %19341  ;;  %v3236_v53 = vmul.f32 %v19336_v52, %v3204_v5  ;;  %v3177_v50 = vmul.f32 %v19340_v6, %v3085_v21  ;;  %17817 = vmatprep.subr.bf16.mxu0 %v25113_v63  ;;  %5676 = vrot.lane.b32.xlu0 %v25114_v47, %s19990_s27  ;;  %v3094_v61 = vpop.xlane.xlu1 %3093 }
 0x517   : > { %v3234_v26 = vmul.f32 %v19338_v55, %v3202_v41  ;;  %v3175_v38 = vmul.f32 %v19342_v33, %v3079_v37  ;;  %17813 = vmatprep.subr.bf16.mxu1 %v25115_v43  ;;  %19351 = vrcp.f32 %v3094_v61  ;;  %5769 = vrot.lane.b32.xlu1 %v25116_v39, %s19990_s27  ;;  %v3088_v42 = vpop.xlane.xlu0 %3087  ;;  %v3267_v55 = vmul.f32 %v21521_v51, %v3235_v22 }
 0x518   : > { %19353 = vrcp.f32 %v3088_v42  ;;  %v3268_v13 = vmul.f32 %v21527_v2, %v3236_v53  ;;  %v3209_v21 = vsub.f32 2.0, %v3177_v50  ;;  %v25118_v2 = vld [vmem:[#allocation63_spill] sm:$0xff] }
 0x519   : > { %v19344_v46 = vpop.eup %19343  ;;  %v3266_v52 = vmul.f32 %v21531_v59, %v3234_v26  ;;  %v3207_v37 = vsub.f32 2.0, %v3175_v38  ;;  %v25119_v26 = vld [vmem:[#allocation84_spill] sm:$0xff] }
 0x51a   : > { %v19346_v45 = vpop.eup %19345  ;;  %v3176_v54 = vmul.f32 %v19344_v46, %v3082_v34  ;;  %5678 = vrot.lane.b32.xlu0 %v25117_v10, %s19990_s27  ;;  %v3109_v5 = vpop.xlane.xlu1 %3108  ;;  %16806 = vmatprep.mubr.msk.f32.mxu0 %vm2839_vm2, %v3268_v13  ;;  %v3241_v51 = vmul.f32 %v19340_v6, %v3209_v21  ;;  %v25120_v38 = vld [vmem:[#allocation64_spill] sm:$0xff]  ;;  %v25122_v6 = vld [vmem:[#allocation66_spill] sm:$0xff] }
 0x51b   : > { %v3174_v41 = vmul.f32 %v19346_v45, %v3076_v4  ;;  %19355 = vrcp.f32 %v3109_v5  ;;  %5860 = vrot.lane.b32.xlu1 %v25118_v2, %s19990_s27  ;;  %16799 = vmatprep.mubr.msk.f32.mxu1 %vm2839_vm2, %v3266_v52  ;;  %v3103_v59 = vpop.xlane.xlu0 %3102  ;;  %v3239_v14 = vmul.f32 %v19342_v33, %v3207_v37 }
 0x51c   : > { %v3208_v53 = vsub.f32 2.0, %v3176_v54  ;;  %16807 = vmatmul.mubr.msk.f32.vlgmr.msra.gmra.mrb[56].mxu0 %vm2839_vm2, %v3269_v29  ;;  %19357 = vrcp.f32 %v3103_v59  ;;  %16800 = vmatmul.mubr.msk.f32.vlgmr.msra.gmra.mrb[82].mxu1 %vm2839_vm2, %v3267_v55  ;;  %v25121_v55 = vld [vmem:[#allocation82_spill] sm:$0xff]  ;;  %v3273_v37 = vmul.f32 %v21537_v3, %v3241_v51 }
 0x51d   : > { %v19348_v49 = vpop.eup %19347  ;;  %v3206_v34 = vsub.f32 2.0, %v3174_v41  ;;  %17819 = vmatpush3.bf16.msra.mxu0 %v25113_v63  ;;  %17815 = vmatpush3.bf16.msra.mxu1 %v25115_v43  ;;  %v25123_v41 = vld [vmem:[#allocation59_spill] sm:$0xff] }
 0x51e   : > { %v19350_v4 = vpop.eup %19349  ;;  %v3240_v22 = vmul.f32 %v19344_v46, %v3208_v53  ;;  %v3181_v50 = vmul.f32 %v19348_v49, %v3097_v48  ;;  %17825 = vmatprep.subr.bf16.mxu0 %v25119_v26  ;;  %18539 = vrot.lane.b32.xlu0 %v25120_v38, %s19990_s27  ;;  %v3106_v13 = vpop.xlane.xlu1 %3105 }
 0x51f   : > { %v3238_v52 = vmul.f32 %v19346_v45, %v3206_v34  ;;  %v3179_v29 = vmul.f32 %v19350_v4, %v3091_v56  ;;  %17821 = vmatprep.subr.bf16.mxu1 %v25121_v55  ;;  %19359 = vrcp.f32 %v3106_v13  ;;  %5951 = vrot.lane.b32.xlu1 %v25122_v6, %s19990_s27  ;;  %v3100_v63 = vpop.xlane.xlu0 %3099  ;;  %v3271_v45 = vmul.f32 %v21541_v36, %v3239_v14  ;;  %v25124_v34 = vld [vmem:[#allocation67_spill] sm:$0xff] }
 0x520   : > { %19361 = vrcp.f32 %v3100_v63  ;;  %v3272_v33 = vmul.f32 %v21547_v19, %v3240_v22  ;;  %v3213_v48 = vsub.f32 2.0, %v3181_v50  ;;  %v25125_v22 = vld [vmem:[#allocation88_spill] sm:$0xff]  ;;  %v25126_v50 = vld [vmem:[#allocation62_spill] sm:$0xff] }
 0x521   : > { %v19352_v43 = vpop.eup %19351  ;;  %v3270_v46 = vmul.f32 %v21551_v23, %v3238_v52  ;;  %v3211_v56 = vsub.f32 2.0, %v3179_v29 }
 0x522   : > { %v19354_v21 = vpop.eup %19353  ;;  %v3180_v54 = vmul.f32 %v19352_v43, %v3094_v61  ;;  %5858 = vrot.lane.b32.xlu0 %v25123_v41, %s19990_s27  ;;  %16820 = vmatprep.mubr.msk.f32.mxu0 %vm2839_vm2, %v3272_v33  ;;  %v3245_v36 = vmul.f32 %v19348_v49, %v3213_v48  ;;  %v25127_v33 = vld [vmem:[#allocation86_spill] sm:$0xff]  ;;  %v25128_v49 = vld [vmem:[#allocation73_spill] sm:$0xff] }
 0x523   : > { %v3178_v53 = vmul.f32 %v19354_v21, %v3088_v42  ;;  %18549 = vrot.lane.b32.xlu1 %v25124_v34, %s19990_s27  ;;  %16813 = vmatprep.mubr.msk.f32.mxu1 %vm2839_vm2, %v3270_v46  ;;  %v3243_v51 = vmul.f32 %v19350_v4, %v3211_v56  ;;  %v25130_v56 = vld [vmem:[#allocation77_spill] sm:$0xff] }
 0x524   : > { %v3212_v19 = vsub.f32 2.0, %v3180_v54  ;;  %16821 = vmatmul.mubr.msk.f32.vlgmr.msra.gmra.mrb[58].mxu0 %vm2839_vm2, %v3273_v37  ;;  %16814 = vmatmul.mubr.msk.f32.vlgmr.msra.gmra.mrb[84].mxu1 %vm2839_vm2, %v3271_v45  ;;  %v25131_v54 = vld [vmem:[#allocation92_spill] sm:$0xff] }
 0x525   : > { %v19356_v3 = vpop.eup %19355  ;;  %v3210_v23 = vsub.f32 2.0, %v3178_v53  ;;  %17827 = vmatpush3.bf16.msra.mxu0 %v25119_v26  ;;  %17823 = vmatpush3.bf16.msra.mxu1 %v25121_v55  ;;  %v3277_v55 = vmul.f32 %v21555_v28, %v3245_v36  ;;  %v25134_v36 = vld [vmem:[#allocation79_spill] sm:$0xff] }
 0x526   : > { %v19358_v61 = vpop.eup %19357  ;;  %v3244_v42 = vmul.f32 %v19352_v43, %v3212_v19  ;;  %v3185_v14 = vmul.f32 %v19356_v3, %v3109_v5  ;;  %17833 = vmatprep.subr.bf16.mxu0 %v25125_v22  ;;  %5949 = vrot.lane.b32.xlu0 %v25126_v50, %s19990_s27  ;;  %v3275_v43 = vmul.f32 %v21559_v57, %v3243_v51  ;;  %v25133_v19 = vld [vmem:[#allocation90_spill] sm:$0xff] }
 0x527   : > { %v3242_v52 = vmul.f32 %v19354_v21, %v3210_v23  ;;  %v3183_v29 = vmul.f32 %v19358_v61, %v3103_v59  ;;  %17829 = vmatprep.subr.bf16.mxu1 %v25127_v33  ;;  %18564 = vrot.lane.b32.xlu1 %v25128_v49, %s19990_s27  ;;  %v25129_v59 = vld [vmem:[#allocation65_spill] sm:$0xff]  ;;  %v25135_v23 = vld [vmem:[#allocation99_spill] sm:$0xff] }
 0x528   : > { %v3276_v26 = vmul.f32 %v21563_v30, %v3244_v42  ;;  %v3217_v46 = vsub.f32 2.0, %v3185_v14  ;;  %v18467_v51 = vunpack.i.h.bf16 %v25135_v23  ;;  %v18466_v42 = vunpack.i.l.bf16 %v25135_v23 }
 0x529   : > { %v19360_v48 = vpop.eup %19359  ;;  %v3274_v4 = vmul.f32 %v21567_v31, %v3242_v52  ;;  %v3215_v37 = vsub.f32 2.0, %v3183_v29  ;;  %v25136_v52 = vld [vmem:[#allocation71_spill] sm:$0xff] }
 0x52a   : > { %v19362_v5 = vpop.eup %19361  ;;  %v3184_v45 = vmul.f32 %v19360_v48, %v3106_v13  ;;  %18544 = vrot.lane.b32.xlu0 %v25129_v59, %s19990_s27  ;;  %16834 = vmatprep.mubr.msk.f32.mxu0 %vm2839_vm2, %v3276_v26  ;;  %v3249_v30 = vmul.f32 %v19356_v3, %v3217_v46  ;;  %v25137_v29 = vld [vmem:[#allocation83_spill] sm:$0xff]  ;;  %v25142_v26 = vld [vmem:[#allocation81_spill] sm:$0xff] }
 0x52b   : > { %v3182_v21 = vmul.f32 %v19362_v5, %v3100_v63  ;;  %18574 = vrot.lane.b32.xlu1 %v25130_v56, %s19990_s27  ;;  %16827 = vmatprep.mubr.msk.f32.mxu1 %vm2839_vm2, %v3274_v4  ;;  %v3247_v31 = vmul.f32 %v19358_v61, %v3215_v37  ;;  %v25132_v63 = vld [vmem:[#allocation69_spill] sm:$0xff]  ;;  %v25145_v4 = vld [vmem:[#allocation95_spill] sm:$0xff] }
 0x52c   : > { %v3216_v28 = vsub.f32 2.0, %v3184_v45  ;;  %16835 = vmatmul.mubr.msk.f32.vlgmr.msra.gmra.mrb[60].mxu0 %vm2839_vm2, %v3277_v55  ;;  %16828 = vmatmul.mubr.msk.f32.vlgmr.msra.gmra.mrb[86].mxu1 %vm2839_vm2, %v3275_v43  ;;  %v3281_v61 = vmul.f32 %v21571_v20, %v3249_v30  ;;  %v25144_v55 = vld [vmem:[#allocation85_spill] sm:$0xff]  ;;  %v25147_v43 = vld [vmem:[#allocation22_spill] sm:$0xff] }
 0x52d   : > { %v3214_v57 = vsub.f32 2.0, %v3182_v21  ;;  %17835 = vmatpush3.bf16.msra.mxu0 %v25125_v22  ;;  %17831 = vmatpush3.bf16.msra.mxu1 %v25127_v33  ;;  %v3279_v22 = vmul.f32 %v21575_v27, %v3247_v31  ;;  %v21785_v33 = vpack.c.bf16 %v18467_v51, %v18466_v42  ;;  %v25139_v27 = vld [vmem:[#allocation75_spill] sm:$0xff]  ;;  %v25148_v46 = vld [vmem:[#allocation93_spill] sm:$0xff]  ;;  %v25155_v42 = vld [vmem:[#allocation24_spill] sm:$0xff] }
 0x52e   : > { %v3248_v13 = vmul.f32 %v19360_v48, %v3216_v28  ;;  %17841 = vmatprep.subr.bf16.mxu0 %v25131_v54  ;;  %18554 = vrot.lane.b32.xlu0 %v25132_v63, %s19990_s27  ;;  %v25143_v48 = vld [vmem:[#allocation91_spill] sm:$0xff]  ;;  %v25149_v37 = vld [vmem:[#allocation17_spill] sm:$0xff]  ;;  %v25150_v28 = vld [vmem:[#allocation18_spill] sm:$0xff] }
 0x52f   : > { %v3246_v53 = vmul.f32 %v19362_v5, %v3214_v57  ;;  %17837 = vmatprep.subr.bf16.mxu1 %v25133_v19  ;;  %18579 = vrot.lane.b32.xlu1 %v25134_v36, %s19990_s27  ;;  %v25146_v5 = vld [vmem:[#allocation89_spill] sm:$0xff]  ;;  %v25151_v57 = vld [vmem:[#allocation26_spill] sm:$0xff]  ;;  %v25153_v31 = vld [vmem:[#allocation23_spill] sm:$0xff] }
 0x530   : > { %v3280_v14 = vmul.f32 %v21579_v35, %v3248_v13  ;;  %v25140_v35 = vld [vmem:[#allocation94_spill] sm:$0xff]  ;;  %v25152_v30 = vld [vmem:[#allocation25_spill] sm:$0xff] }
 0x531   : > { %v3278_v3 = vmul.f32 %v21583_v62, %v3246_v53  ;;  %v25141_v62 = vld [vmem:[#allocation87_spill] sm:$0xff] }
 0x532   : > { %18559 = vrot.lane.b32.xlu0 %v25136_v52, %s19990_s27  ;;  %16848 = vmatprep.mubr.msk.f32.mxu0 %vm2839_vm2, %v3280_v14 }
 0x533   : > { %18589 = vrot.lane.b32.xlu1 %v25137_v29, %s19990_s27  ;;  %16841 = vmatprep.mubr.msk.f32.mxu1 %vm2839_vm2, %v3278_v3 }
 0x534   : > { %16849 = vmatmul.mubr.msk.f32.vlgmr.msra.gmra.mrb[62].mxu0 %vm2839_vm2, %v3281_v61  ;;  %16842 = vmatmul.mubr.msk.f32.vlgmr.msra.gmra.mrb[88].mxu1 %vm2839_vm2, %v3279_v22  ;;  %v25156_v22 = vld [vmem:[#allocation21_spill] sm:$0xff] }
 0x535   : > { %17843 = vmatpush3.bf16.msra.mxu0 %v25131_v54  ;;  %17839 = vmatpush3.bf16.msra.mxu1 %v25133_v19  ;;  %v25154_v19 = vld [vmem:[#allocation20_spill] sm:$0xff] }
 0x536   : > { %17850 = vmatprep.subr.msk.bf16.mxu0 %vm20836_vm1, %v21785_v33  ;;  %18569 = vrot.lane.b32.xlu0 %v25139_v27, %s19990_s27 }
 0x537   : > { %17845 = vmatprep.subr.bf16.mxu1 %v25140_v35  ;;  %18599 = vrot.lane.b32.xlu1 %v25141_v62, %s19990_s27 }
 0x53a   : > { %18584 = vrot.lane.b32.xlu0 %v25142_v26, %s19990_s27 }
 0x53b   : > { %18609 = vrot.lane.b32.xlu1 %v25143_v48, %s19990_s27 }
 0x53e   : > { %18594 = vrot.lane.b32.xlu0 %v25144_v55, %s19990_s27 }
 0x53f   : > { %18619 = vrot.lane.b32.xlu1 %v25145_v4, %s19990_s27 }
 0x542   : > { %18604 = vrot.lane.b32.xlu0 %v25146_v5, %s19990_s27 }
 0x543   : > { %18629 = vrot.lane.b32.xlu1 %v25147_v43, %s19991_s10 }
 0x546   : > { %18614 = vrot.lane.b32.xlu0 %v25148_v46, %s19990_s27 }
 0x547   : > { %7947 = vrot.lane.b32.xlu1 %v25149_v37, %s19991_s10  ;;  %v3115_v45 = vpop.xlane.xlu1 %3114 }
 0x548   : > { %19363 = vrcp.f32 %v3115_v45  ;;  %v3112_v21 = vpop.xlane.xlu0 %3111 }
 0x549   : > { %19365 = vrcp.f32 %v3112_v21 }
 0x54a   : > { %18624 = vrot.lane.b32.xlu0 %v25150_v28, %s19991_s10 }
 0x54b   : > { %18639 = vrot.lane.b32.xlu1 %v25151_v57, %s19991_s10  ;;  %v25157_v57 = vld [vmem:[#allocation30_spill] sm:$0xff] }
 0x54e   : > { %18634 = vrot.lane.b32.xlu0 %v25152_v30, %s19991_s10 }
 0x54f   : > { %8040 = vrot.lane.b32.xlu1 %v25153_v31, %s19991_s10  ;;  %v3121_v13 = vpop.xlane.xlu1 %3120 }
 0x550   : > { %19367 = vrcp.f32 %v3121_v13  ;;  %v3118_v54 = vpop.xlane.xlu0 %3117 }
 0x551   : > { %19369 = vrcp.f32 %v3118_v54 }
 0x552   : > { %v19364_v53 = vpop.eup %19363  ;;  %7949 = vrot.lane.b32.xlu0 %v25154_v19, %s19991_s10  ;;  %v25158_v19 = vld [vmem:[#allocation97_spill] sm:$0xff] }
 0x553   : > { %v19366_v23 = vpop.eup %19365  ;;  %v3187_v51 = vmul.f32 %v19364_v53, %v3115_v45  ;;  %8129 = vrot.lane.b32.xlu1 %v25155_v42, %s19991_s10  ;;  %v18472_v28 = vunpack.i.h.bf16 %v25158_v19  ;;  %v18471_v45 = vunpack.i.l.bf16 %v25158_v19 }
 0x554   : > { %v3186_v14 = vmul.f32 %v19366_v23, %v3112_v21  ;;  %v25159_v21 = vld [vmem:[#allocation27_spill] sm:$0xff] }
 0x555   : > { %v3219_v3 = vsub.f32 2.0, %v3187_v51 }
 0x556   : > { %v3218_v61 = vsub.f32 2.0, %v3186_v14  ;;  %8038 = vrot.lane.b32.xlu0 %v25156_v22, %s19991_s10  ;;  %v17854_v22 = vpack.c.bf16 %v18472_v28, %v18471_v45 }
 0x557   : > { %v3251_v31 = vmul.f32 %v19364_v53, %v3219_v3  ;;  %18649 = vrot.lane.b32.xlu1 %v25157_v57, %s19991_s10  ;;  %v3127_v37 = vpop.xlane.xlu1 %3126 }
 0x558   : > { %v3250_v30 = vmul.f32 %v19366_v23, %v3218_v61  ;;  %19371 = vrcp.f32 %v3127_v37  ;;  %v3124_v43 = vpop.xlane.xlu0 %3123 }
 0x559   : > { %19373 = vrcp.f32 %v3124_v43  ;;  %v3283_v53 = vmul.f32 %v21593_v58, %v3251_v31 }
 0x55a   : > { %v19368_v42 = vpop.eup %19367  ;;  %18644 = vrot.lane.b32.xlu0 %v25159_v21, %s19991_s10  ;;  %v3282_v51 = vmul.f32 %v21595_v1, %v3250_v30  ;;  %v25160_v21 = vld [vmem:[#allocation28_spill] sm:$0xff] }
 0x55b   : > { %v19370_v14 = vpop.eup %19369  ;;  %v3189_v3 = vmul.f32 %v19368_v42, %v3121_v13  ;;  %v21837_v57 = vpop.permute.xlu1 %4859  ;;  %v25161_v13 = vld [vmem:[#allocation102_spill] sm:$0xff] }
 0x55c   : > { %v3188_v23 = vmul.f32 %v19370_v14, %v3118_v54  ;;  %16855 = vmatprep.mubr.msk.f32.mxu1 %vm2839_vm2, %v3282_v51  ;;  %v21840_v61 = vpop.permute.xlu0 %4857  ;;  %v18477_v54 = vunpack.i.h.bf16 %v25161_v13  ;;  %v18476_v28 = vunpack.i.l.bf16 %v25161_v13 }
 0x55d   : > { %v3221_v19 = vsub.f32 2.0, %v3189_v3  ;;  %16856 = vmatmul.mubr.msk.f32.vlgmr.msra.gmra.mrb[90].mxu1 %vm2839_vm2, %v3283_v53 }
 0x55e   : > { %v3220_v4 = vsub.f32 2.0, %v3188_v23  ;;  %8131 = vrot.lane.b32.xlu0 %v25160_v21, %s19991_s10  ;;  %17847 = vmatpush3.bf16.msra.mxu1 %v25140_v35 }
 0x55f   : > { %v3253_v1 = vmul.f32 %v19368_v42, %v3221_v19  ;;  %17856 = vmatprep.subr.msk.bf16.mxu1 %vm20836_vm1, %v17854_v22  ;;  %v4949_v58 = vpop.permute.xlu1 %4948  ;;  %v17860_v19 = vpack.c.bf16 %v18477_v54, %v18476_v28  ;;  %v25164_v54 = vld [vmem:[#allocation105_spill] sm:$0xff] }
 0x560   : > { %v3252_v30 = vmul.f32 %v19370_v14, %v3220_v4  ;;  %v18495_v31 = vpop.permute.xlu0 %18494  ;;  %v25162_v14 = vld [vmem:[#allocation96_spill] sm:$0xff]  ;;  %v18487_v28 = vunpack.i.h.bf16 %v25164_v54 }
 0x561   : > { %v3285_v3 = vmul.f32 %v21603_v0, %v3253_v1  ;;  %v25163_v1 = vld [vmem:[#allocation104_spill] sm:$0xff] }
 0x562   : > { %v19372_v45 = vpop.eup %19371  ;;  %v3284_v51 = vmul.f32 %v21605_v7, %v3252_v30  ;;  %v18482_v30 = vunpack.i.h.bf16 %v25163_v1  ;;  %v18481_v13 = vunpack.i.l.bf16 %v25163_v1 }
 0x563   : > { %v19374_v53 = vpop.eup %19373  ;;  %v3191_v23 = vmul.f32 %v19372_v45, %v3127_v37  ;;  %v18500_v21 = vpop.permute.xlu1 %18499 }
 0x564   : > { %v3190_v35 = vmul.f32 %v19374_v53, %v3124_v43  ;;  %16862 = vmatprep.mubr.msk.f32.mxu0 %vm2839_vm2, %v3284_v51  ;;  %v4951_v42 = vpop.permute.xlu0 %4950  ;;  %v18486_v51 = vunpack.i.l.bf16 %v25164_v54 }
 0x565   : > { %v3223_v46 = vsub.f32 2.0, %v3191_v23  ;;  %16863 = vmatmul.mubr.msk.f32.vlgmr.msra.gmra.mrb[64].mxu0 %vm2839_vm2, %v3285_v3  ;;  %v25165_v23 = vld [vmem:[#allocation101_spill] sm:$0xff] }
 0x566   : > { %v3222_v4 = vsub.f32 2.0, %v3190_v35  ;;  %17853 = vmatpush3.bf16.xpose.msk.msra.mxu0 %vm20836_vm1, %v21785_v33  ;;  %16876 = vmatprep.mubr.msk.f32.mxu0 %vm1412_vm0, %v25162_v14  ;;  %v17872_v35 = vpack.c.bf16 %v18487_v28, %v18486_v51  ;;  %v18501_v51 = vunpack.i.l.bf16 %v18500_v21 }
 0x567   : > { %v3255_v7 = vmul.f32 %v19372_v45, %v3223_v46  ;;  %17862 = vmatprep.subr.msk.bf16.mxu0 %vm20836_vm1, %v17860_v19  ;;  %v21861_v0 = vpop.permute.xlu1 %5041 }
 0x568   : > { %v3254_v43 = vmul.f32 %v19374_v53, %v3222_v4  ;;  %v5040_v37 = vpop.permute.xlu0 %5039  ;;  %v17866_v53 = vpack.c.bf16 %v18482_v30, %v18481_v13  ;;  %v25168_v13 = vld [vmem:[#allocation98_spill] sm:$0xff] }
 0x569   : > { %v3287_v3 = vmul.f32 %v21611_v24, %v3255_v7  ;;  %v25167_v24 = vld [vmem:[#allocation103_spill] sm:$0xff]  ;;  %v18492_v7 = vunpack.i.h.bf16 %v21633_v32 }
 0x56a   : > { %v3286_v33 = vmul.f32 %v21613_v17, %v3254_v43  ;;  %v25166_v17 = vld [vmem:[#allocation100_spill] sm:$0xff]  ;;  %v18497_v43 = vunpack.i.h.bf16 %v18495_v31 }
 0x56b   : > { %v5131_v46 = vpop.permute.xlu1 %5130 }
 0x56c   : > { %16869 = vmatprep.mubr.msk.f32.mxu1 %vm2839_vm2, %v3286_v33  ;;  %v18505_v45 = vpop.permute.xlu0 %18504 }
 0x56d   : > { %16877 = vmatmul.mubr.msk.f32.vlgmr.msra.gmra.mrb[66].mxu0 %vm1412_vm0, %v25165_v23  ;;  %16870 = vmatmul.mubr.msk.f32.vlgmr.msra.gmra.mrb[92].mxu1 %vm2839_vm2, %v3287_v3  ;;  %v18507_v33 = vunpack.i.h.bf16 %v18505_v45  ;;  %v18506_v3 = vunpack.i.l.bf16 %v18505_v45 }
 0x56e   : > { %17859 = vmatpush3.bf16.xpose.msk.msra.mxu1 %vm20836_vm1, %v17854_v22  ;;  %17865 = vmatpush3.bf16.xpose.msk.msra.mxu0 %vm20836_vm1, %v17860_v19  ;;  %v18491_v22 = vunpack.i.l.bf16 %v21633_v32  ;;  %v18496_v19 = vunpack.i.l.bf16 %v18495_v31  ;;  %v18502_v31 = vunpack.i.h.bf16 %v18500_v21 }
 0x56f   : > { %16890 = vmatprep.mubr.msk.f32.mxu0 %vm1412_vm0, %v25166_v17  ;;  %16883 = vmatprep.mubr.msk.f32.mxu1 %vm1412_vm0, %v25167_v24  ;;  %v18510_v4 = vpop.permute.xlu1 %18509 }
 0x570   : > { %17868 = vmatprep.subr.msk.bf16.mxu1 %vm20836_vm1, %v17866_v53  ;;  %17874 = vmatprep.subr.msk.bf16.mxu0 %vm20836_vm1, %v17872_v35  ;;  %v5133_v14 = vpop.permute.xlu0 %5132  ;;  %v17878_v54 = vpack.c.bf16 %v18492_v7, %v18491_v22  ;;  %v17884_v28 = vpack.c.bf16 %v18497_v43, %v18496_v19 }
 0x573   : > { %v5224_v1 = vpop.permute.xlu1 %5223 }
 0x574   : > { %v5222_v30 = vpop.permute.xlu0 %5221 }
 0x575   : > { %16884 = vmatmul.mubr.msk.f32.vlgmr.msra.gmra.mrb[94].mxu1 %vm1412_vm0, %v25168_v13  ;;  %16891 = vmatmul.mubr.msk.f32.vlgmr.msra.gmra.mrb[68].mxu0 %vm1412_vm0, %v21635_v16 }
 0x576   : > { %17871 = vmatpush3.bf16.xpose.msk.msra.mxu1 %vm20836_vm1, %v17866_v53  ;;  %16897 = vmatprep.mubr.msk.f32.mxu1 %vm1412_vm0, %v21840_v61  ;;  %v17890_v61 = vpack.c.bf16 %v18502_v31, %v18501_v51 }
 0x577   : > { %17877 = vmatpush3.bf16.xpose.msk.msra.mxu0 %vm20836_vm1, %v17872_v35  ;;  %16904 = vmatprep.mubr.msk.f32.mxu0 %vm1412_vm0, %v4949_v58  ;;  %v5313_v32 = vpop.permute.xlu1 %5312  ;;  %v17896_v58 = vpack.c.bf16 %v18507_v33, %v18506_v3 }
 0x578   : > { %17880 = vmatprep.subr.msk.bf16.mxu1 %vm20836_vm1, %v17878_v54  ;;  %17886 = vmatprep.subr.msk.bf16.mxu0 %vm20836_vm1, %v17884_v28  ;;  %v18515_v16 = vpop.permute.xlu0 %18514 }
 0x579   : > { %v18517_v35 = vunpack.i.h.bf16 %v18515_v16  ;;  %v18516_v17 = vunpack.i.l.bf16 %v18515_v16 }
 0x57b   : > { %v18520_v23 = vpop.permute.xlu1 %18519 }
 0x57c   : > { %v5315_v53 = vpop.permute.xlu0 %5314 }
 0x57d   : > { %16898 = vmatmul.mubr.msk.f32.vlgmr.msra.gmra.mrb[96].mxu1 %vm1412_vm0, %v21837_v57  ;;  %v18512_v57 = vunpack.i.h.bf16 %v18510_v4 }
 0x57e   : > { %16905 = vmatmul.mubr.msk.f32.vlgmr.msra.gmra.mrb[70].mxu0 %vm1412_vm0, %v4951_v42  ;;  %17883 = vmatpush3.bf16.xpose.msk.msra.mxu1 %vm20836_vm1, %v17878_v54  ;;  %v18511_v42 = vunpack.i.l.bf16 %v18510_v4 }
 0x57f   : > { %16911 = vmatprep.mubr.msk.f32.mxu1 %vm1412_vm0, %v5040_v37  ;;  %17889 = vmatpush3.bf16.xpose.msk.msra.mxu0 %vm20836_vm1, %v17884_v28  ;;  %v5406_v21 = vpop.permute.xlu1 %5405 }
 0x580   : > { %16918 = vmatprep.mubr.msk.f32.mxu0 %vm1412_vm0, %v5131_v46  ;;  %17892 = vmatprep.subr.msk.bf16.mxu1 %vm20836_vm1, %v17890_v61  ;;  %v5404_v45 = vpop.permute.xlu0 %5403  ;;  %v17902_v37 = vpack.c.bf16 %v18512_v57, %v18511_v42  ;;  %v17908_v46 = vpack.c.bf16 %v18517_v35, %v18516_v17 }
 0x581   : > { %17898 = vmatprep.subr.msk.bf16.mxu0 %vm20836_vm1, %v17896_v58 }
 0x583   : > { %v5495_v24 = vpop.permute.xlu1 %5494 }
 0x584   : > { %v18525_v7 = vpop.permute.xlu0 %18524 }
 0x585   : > { %16912 = vmatmul.mubr.msk.f32.vlgmr.msra.gmra.mrb[98].mxu1 %vm1412_vm0, %v21861_v0  ;;  %v18522_v0 = vunpack.i.h.bf16 %v18520_v23  ;;  %v18527_v43 = vunpack.i.h.bf16 %v18525_v7  ;;  %v18526_v19 = vunpack.i.l.bf16 %v18525_v7 }
 0x586   : > { %16919 = vmatmul.mubr.msk.f32.vlgmr.msra.gmra.mrb[72].mxu0 %vm1412_vm0, %v5133_v14  ;;  %17895 = vmatpush3.bf16.xpose.msk.msra.mxu1 %vm20836_vm1, %v17890_v61  ;;  %v18521_v14 = vunpack.i.l.bf16 %v18520_v23 }
 0x587   : > { %16925 = vmatprep.mubr.msk.f32.mxu1 %vm1412_vm0, %v5222_v30  ;;  %17901 = vmatpush3.bf16.xpose.msk.msra.mxu0 %vm20836_vm1, %v17896_v58  ;;  %v18530_v4 = vpop.permute.xlu1 %18529  ;;  %v17920_v28 = vpack.c.bf16 %v18527_v43, %v18526_v19 }
 0x588   : > { %16932 = vmatprep.mubr.msk.f32.mxu0 %vm1412_vm0, %v5313_v32  ;;  %17904 = vmatprep.subr.msk.bf16.mxu1 %vm20836_vm1, %v17902_v37  ;;  %v5497_v22 = vpop.permute.xlu0 %5496  ;;  %v17914_v30 = vpack.c.bf16 %v18522_v0, %v18521_v14  ;;  %v18531_v31 = vunpack.i.l.bf16 %v18530_v4 }
 0x589   : > { %17910 = vmatprep.subr.msk.bf16.mxu0 %vm20836_vm1, %v17908_v46 }
 0x58b   : > { %v5588_v13 = vpop.permute.xlu1 %5587 }
 0x58c   : > { %v5586_v54 = vpop.permute.xlu0 %5585 }
 0x58d   : > { %16926 = vmatmul.mubr.msk.f32.vlgmr.msra.gmra.mrb[100].mxu1 %vm1412_vm0, %v5224_v1  ;;  %v18532_v1 = vunpack.i.h.bf16 %v18530_v4 }
 0x58e   : > { %16933 = vmatmul.mubr.msk.f32.vlgmr.msra.gmra.mrb[74].mxu0 %vm1412_vm0, %v5315_v53  ;;  %17907 = vmatpush3.bf16.xpose.msk.msra.mxu1 %vm20836_vm1, %v17902_v37 }
 0x58f   : > { %16939 = vmatprep.mubr.msk.f32.mxu1 %vm1412_vm0, %v5404_v45  ;;  %17913 = vmatpush3.bf16.xpose.msk.msra.mxu0 %vm20836_vm1, %v17908_v46  ;;  %v18535_v32 = vpop.permute.xlu1 %18534  ;;  %v17926_v53 = vpack.c.bf16 %v18532_v1, %v18531_v31 }
 0x590   : > { %16946 = vmatprep.mubr.msk.f32.mxu0 %vm1412_vm0, %v5495_v24  ;;  %17916 = vmatprep.subr.msk.bf16.mxu1 %vm20836_vm1, %v17914_v30  ;;  %v5677_v16 = vpop.permute.xlu0 %5676  ;;  %v18537_v51 = vunpack.i.h.bf16 %v18535_v32  ;;  %v18536_v33 = vunpack.i.l.bf16 %v18535_v32 }
 0x591   : > { %17922 = vmatprep.subr.msk.bf16.mxu0 %vm20836_vm1, %v17920_v28 }
 0x592   : > { %v17932_v61 = vpack.c.bf16 %v18537_v51, %v18536_v33 }
 0x593   : > { %v5768_v3 = vpop.permute.xlu1 %5767 }
 0x594   : > { %v5679_v23 = vpop.permute.xlu0 %5678 }
 0x595   : > { %16940 = vmatmul.mubr.msk.f32.vlgmr.msra.gmra.mrb[102].mxu1 %vm1412_vm0, %v5406_v21 }
 0x596   : > { %16947 = vmatmul.mubr.msk.f32.vlgmr.msra.gmra.mrb[76].mxu0 %vm1412_vm0, %v5497_v22  ;;  %17919 = vmatpush3.bf16.xpose.msk.msra.mxu1 %vm20836_vm1, %v17914_v30 }
 0x597   : > { %16953 = vmatprep.mubr.msk.f32.mxu1 %vm1412_vm0, %v5586_v54  ;;  %17925 = vmatpush3.bf16.xpose.msk.msra.mxu0 %vm20836_vm1, %v17920_v28  ;;  %v5770_v58 = vpop.permute.xlu1 %5769 }
 0x598   : > { %16960 = vmatprep.mubr.msk.f32.mxu0 %vm1412_vm0, %v5677_v16  ;;  %17928 = vmatprep.subr.msk.bf16.mxu1 %vm20836_vm1, %v17926_v53  ;;  %v18540_v45 = vpop.permute.xlu0 %18539 }
 0x599   : > { %17934 = vmatprep.subr.msk.bf16.mxu0 %vm20836_vm1, %v17932_v61  ;;  %v18542_v21 = vunpack.i.h.bf16 %v18540_v45  ;;  %v18541_v57 = vunpack.i.l.bf16 %v18540_v45 }
 0x59b   : > { %v5861_v42 = vpop.permute.xlu1 %5860  ;;  %v17938_v35 = vpack.c.bf16 %v18542_v21, %v18541_v57 }
 0x59c   : > { %v5859_v17 = vpop.permute.xlu0 %5858 }
 0x59d   : > { %16954 = vmatmul.mubr.msk.f32.vlgmr.msra.gmra.mrb[104].mxu1 %vm1412_vm0, %v5588_v13 }
 0x59e   : > { %16961 = vmatmul.mubr.msk.f32.vlgmr.msra.gmra.mrb[78].mxu0 %vm1412_vm0, %v5679_v23  ;;  %17931 = vmatpush3.bf16.xpose.msk.msra.mxu1 %vm20836_vm1, %v17926_v53 }
 0x59f   : > { %16967 = vmatprep.mubr.msk.f32.mxu1 %vm1412_vm0, %v5768_v3  ;;  %17937 = vmatpush3.bf16.xpose.msk.msra.mxu0 %vm20836_vm1, %v17932_v61  ;;  %v5952_v24 = vpop.permute.xlu1 %5951 }
 0x5a0   : > { %16974 = vmatprep.mubr.msk.f32.mxu0 %vm1412_vm0, %v5859_v17  ;;  %17940 = vmatprep.subr.msk.bf16.mxu1 %vm20836_vm1, %v17938_v35  ;;  %v5950_v7 = vpop.permute.xlu0 %5949 }
 0x5a3   : > { %v18550_v37 = vpop.permute.xlu1 %18549 }
 0x5a4   : > { %v18552_v46 = vunpack.i.h.bf16 %v18550_v37  ;;  %v18551_v4 = vunpack.i.l.bf16 %v18550_v37  ;;  %v18545_v22 = vpop.permute.xlu0 %18544 }
 0x5a5   : > { %16968 = vmatmul.mubr.msk.f32.vlgmr.msra.gmra.mrb[106].mxu1 %vm1412_vm0, %v5770_v58  ;;  %v18547_v0 = vunpack.i.h.bf16 %v18545_v22  ;;  %v18546_v14 = vunpack.i.l.bf16 %v18545_v22 }
 0x5a6   : > { %16975 = vmatmul.mubr.msk.f32.vlgmr.msra.gmra.mrb[80].mxu0 %vm1412_vm0, %v5861_v42  ;;  %17943 = vmatpush3.bf16.xpose.msk.msra.mxu1 %vm20836_vm1, %v17938_v35  ;;  %v17948_v43 = vpack.c.bf16 %v18552_v46, %v18551_v4 }
 0x5a7   : > { %16981 = vmatprep.mubr.msk.f32.mxu1 %vm1412_vm0, %v5950_v7  ;;  %v17944_v19 = vpack.c.bf16 %v18547_v0, %v18546_v14 }
 0x5a8   : > { %v18555_v13 = vpop.permute.xlu0 %18554  ;;  %17949 = vmatprep.subr.bf16.mxu1 %v17948_v43 }
 0x5a9   : > { %v18557_v54 = vunpack.i.h.bf16 %v18555_v13  ;;  %v18556_v30 = vunpack.i.l.bf16 %v18555_v13  ;;  %17945 = vmatprep.subr.bf16.mxu0 %v17944_v19 }
 0x5aa   : > { %17947 = vmatpush3.bf16.msra.mxu0 %v17944_v19 }
 0x5ab   : > { %v21967_v28 = vpack.c.bf16 %v18557_v54, %v18556_v30 }
 0x5ac   : > { %v18560_v32 = vpop.permute.xlu0 %18559 }
 0x5ad   : > { %v18562_v16 = vunpack.i.h.bf16 %v18560_v32  ;;  %v18561_v1 = vunpack.i.l.bf16 %v18560_v32  ;;  %16982 = vmatmul.mubr.msk.f32.vlgmr.msra.gmra.mrb[108].mxu1 %vm1412_vm0, %v5952_v24  ;;  %17953 = vmatprep.subr.bf16.mxu0 %v21967_v28 }
 0x5ae   : > { %17951 = vmatpush3.bf16.msra.mxu1 %v17948_v43 }
 0x5af   : > { %v21971_v31 = vpack.c.bf16 %v18562_v16, %v18561_v1 }
 0x5b1   : > { %17957 = vmatprep.subr.bf16.mxu1 %v21971_v31 }
 0x5d7   : > { %v21974_v51 = vpop.f32.mrb[50].mxu0 }
 0x5d8   : > { %25169 = vst [vmem:[#allocation68_spill] sm:$0xff] %v21974_v51  ;;  %v21976_v33 = vpop.f32.mrb[51].mxu0 }
 0x5d9   : > { %25170 = vst [vmem:[#allocation72_spill] sm:$0xff] %v21976_v33 }
 0x5df   : > { %v21978_v3 = vpop.f32.mrb[52].mxu0  ;;  %v21980_v23 = vpop.f32.mrb[78].mxu1 }
 0x5e0   : > { %25171 = vst [vmem:[#allocation58_spill] sm:$0xff] %v21978_v3  ;;  %25172 = vst [vmem:[#allocation55_spill] sm:$0xff] %v21980_v23  ;;  %v21982_v53 = vpop.f32.mrb[53].mxu0  ;;  %v21984_v61 = vpop.f32.mrb[79].mxu1 }
 0x5e1   : > { %25173 = vst [vmem:[#allocation70_spill] sm:$0xff] %v21982_v53  ;;  %25174 = vst [vmem:[#allocation76_spill] sm:$0xff] %v21984_v61 }
 0x5e7   : > { %v21986_v58 = vpop.f32.mrb[54].mxu0  ;;  %v21988_v45 = vpop.f32.mrb[80].mxu1 }
 0x5e8   : > { %25175 = vst [vmem:[#allocation53_spill] sm:$0xff] %v21986_v58  ;;  %25176 = vst [vmem:[#allocation74_spill] sm:$0xff] %v21988_v45  ;;  %v21990_v21 = vpop.f32.mrb[55].mxu0  ;;  %v21992_v57 = vpop.f32.mrb[81].mxu1 }
 0x5e9   : > { %25177 = vst [vmem:[#allocation61_spill] sm:$0xff] %v21990_v21  ;;  %25178 = vst [vmem:[#allocation52_spill] sm:$0xff] %v21992_v57 }
 0x5ef   : > { %v21994_v42 = vpop.f32.mrb[56].mxu0  ;;  %v21996_v35 = vpop.f32.mrb[82].mxu1 }
 0x5f0   : > { %25179 = vst [vmem:[#allocation80_spill] sm:$0xff] %v21994_v42  ;;  %25180 = vst [vmem:[#allocation54_spill] sm:$0xff] %v21996_v35  ;;  %v21998_v17 = vpop.f32.mrb[57].mxu0  ;;  %v22000_v24 = vpop.f32.mrb[83].mxu1 }
 0x5f1   : > { %25181 = vst [vmem:[#allocation78_spill] sm:$0xff] %v21998_v17  ;;  %25182 = vst [vmem:[#allocation56_spill] sm:$0xff] %v22000_v24 }
 0x5f7   : > { %v22002_v7 = vpop.f32.mrb[58].mxu0  ;;  %v22004_v37 = vpop.f32.mrb[84].mxu1 }
 0x5f8   : > { %25183 = vst [vmem:[#allocation84_spill] sm:$0xff] %v22002_v7  ;;  %25184 = vst [vmem:[#allocation82_spill] sm:$0xff] %v22004_v37  ;;  %v22006_v46 = vpop.f32.mrb[59].mxu0  ;;  %v22008_v4 = vpop.f32.mrb[85].mxu1 }
 0x5f9   : > { %25185 = vst [vmem:[#allocation88_spill] sm:$0xff] %v22006_v46  ;;  %25186 = vst [vmem:[#allocation86_spill] sm:$0xff] %v22008_v4 }
 0x5ff   : > { %v22010_v22 = vpop.f32.mrb[60].mxu0  ;;  %v22012_v0 = vpop.f32.mrb[86].mxu1 }
 0x600   : > { %25187 = vst [vmem:[#allocation92_spill] sm:$0xff] %v22010_v22  ;;  %25188 = vst [vmem:[#allocation90_spill] sm:$0xff] %v22012_v0  ;;  %v22014_v14 = vpop.f32.mrb[61].mxu0  ;;  %v22016_v43 = vpop.f32.mrb[87].mxu1  ;;  %v22034_v0 = vld [vmem:[#allocation7 + $0x18] sm:$0xff] }
 0x601   : > { %25189 = vst [vmem:[#allocation99_spill] sm:$0xff] %v22014_v14  ;;  %25190 = vst [vmem:[#allocation94_spill] sm:$0xff] %v22016_v43  ;;  %v22036_v14 = vld [vmem:[#allocation7 + $0x10] sm:$0xff] }
 0x607   : > { %v22018_v19 = vpop.f32.mrb[62].mxu0  ;;  %v22020_v13 = vpop.f32.mrb[88].mxu1 }
 0x608   : > { %25191 = vst [vmem:[#allocation97_spill] sm:$0xff] %v22018_v19  ;;  %25192 = vst [vmem:[#allocation102_spill] sm:$0xff] %v22020_v13  ;;  %v22022_v54 = vpop.f32.mrb[63].mxu0  ;;  %v22024_v30 = vpop.f32.mrb[89].mxu1 }
 0x609   : > { %25193 = vst [vmem:[#allocation96_spill] sm:$0xff] %v22022_v54  ;;  %25194 = vst [vmem:[#allocation104_spill] sm:$0xff] %v22024_v30 }
 0x630   : > { %v22026_v32 = vpop.f32.mrb[90].mxu1 }
 0x631   : > { %25195 = vst [vmem:[#allocation105_spill] sm:$0xff] %v22026_v32  ;;  %v22028_v16 = vpop.f32.mrb[91].mxu1 }
 0x632   : > { %25196 = vst [vmem:[#allocation101_spill] sm:$0xff] %v22028_v16 }
 0x638   : > { %v22030_v1 = vpop.f32.mrb[64].mxu0 }
 0x639   : > { %25197 = vst [vmem:[#allocation100_spill] sm:$0xff] %v22030_v1  ;;  %v22032_v22 = vpop.f32.mrb[65].mxu0 }
 0x63a   : > { %25198 = vst [vmem:[#allocation103_spill] sm:$0xff] %v22032_v22 }
 0x640   : > { %v16878_v43 = vpop.f32.mrb[66].mxu0  ;;  %v22038_v19 = vpop.f32.mrb[92].mxu1 }
 0x641   : > { %25199 = vst [vmem:[#allocation98_spill] sm:$0xff] %v22038_v19  ;;  %v22041_v13 = vadd.f32 %v16878_v43, %v22034_v0  ;;  %v4666_v54 = vpop.f32.mrb[67].mxu0  ;;  %v22043_v30 = vpop.f32.mrb[93].mxu1 }
 0x642   : > { %25200 = vst [vmem:[#allocation106_spill] sm:$0xff] %v22043_v30  ;;  %v22046_v32 = vadd.f32 %v22036_v14, %v4666_v54 }
 0x643   : > { %v6078_v1 = vsel %vm2839_vm2, %v22041_v13, -inf }
 0x644   : > { %6079 = vmax.xlane.f32.xlu1 %v6078_v1  ;;  %v6075_v22 = vsel %vm2839_vm2, %v22046_v32, -inf }
 0x645   : > { %6076 = vmax.xlane.f32.xlu0 %v6075_v22 }
 0x648   : > { %v16885_v16 = vpop.f32.mrb[94].mxu1  ;;  %v16892_v7 = vpop.f32.mrb[68].mxu0 }
 0x649   : > { %v22053_v19 = vadd.f32 %v16885_v16, %v22034_v0  ;;  %v22056_v43 = vadd.f32 %v16892_v7, %v22034_v0  ;;  %v4757_v30 = vpop.f32.mrb[95].mxu1  ;;  %v4848_v46 = vpop.f32.mrb[69].mxu0 }
 0x64a   : > { %v22059_v54 = vadd.f32 %v22036_v14, %v4757_v30  ;;  %v22066_v22 = vadd.f32 %v22036_v14, %v4848_v46 }
 0x64b   : > { %v6084_v1 = vsel %vm2839_vm2, %v22053_v19, -inf  ;;  %v6090_v37 = vsel %vm2839_vm2, %v22056_v43, -inf }
 0x64c   : > { %6085 = vmax.xlane.f32.xlu0 %v6084_v1  ;;  %6091 = vmax.xlane.f32.xlu1 %v6090_v37  ;;  %v6081_v7 = vsel %vm2839_vm2, %v22059_v54, -inf  ;;  %v6087_v37 = vsel %vm2839_vm2, %v22066_v22, -inf }
 0x650   : > { %v16899_v16 = vpop.f32.mrb[96].mxu1  ;;  %6082 = vmax.xlane.f32.xlu0 %v6081_v7 }
 0x651   : > { %v16906_v4 = vpop.f32.mrb[70].mxu0  ;;  %v4939_v42 = vpop.f32.mrb[97].mxu1  ;;  %v22074_v35 = vadd.f32 %v16899_v16, %v22034_v0 }
 0x652   : > { %v22071_v30 = vadd.f32 %v16906_v4, %v22034_v0  ;;  %v5030_v17 = vpop.f32.mrb[71].mxu0  ;;  %v22084_v7 = vadd.f32 %v22036_v14, %v4939_v42 }
 0x653   : > { %v22079_v46 = vadd.f32 %v22036_v14, %v5030_v17  ;;  %v6096_v4 = vsel %vm2839_vm2, %v22074_v35, -inf }
 0x654   : > { %6088 = vmax.xlane.f32.xlu0 %v6087_v37  ;;  %v6102_v1 = vsel %vm2839_vm2, %v22071_v30, -inf  ;;  %v6093_v42 = vsel %vm2839_vm2, %v22084_v7, -inf }
 0x655   : > { %6103 = vmax.xlane.f32.xlu1 %v6102_v1  ;;  %v6099_v16 = vsel %vm2839_vm2, %v22079_v46, -inf }
 0x658   : > { %v16913_v24 = vpop.f32.mrb[98].mxu1  ;;  %6097 = vmax.xlane.f32.xlu0 %v6096_v4 }
 0x659   : > { %6100 = vmax.xlane.f32.xlu1 %v6099_v16  ;;  %v16920_v58 = vpop.f32.mrb[72].mxu0  ;;  %v5121_v17 = vpop.f32.mrb[99].mxu1  ;;  %v22094_v1 = vadd.f32 %v16913_v24, %v22034_v0 }
 0x65a   : > { %v22091_v37 = vadd.f32 %v16920_v58, %v22034_v0  ;;  %v5212_v21 = vpop.f32.mrb[73].mxu0  ;;  %v22104_v16 = vadd.f32 %v22036_v14, %v5121_v17 }
 0x65b   : > { %v22099_v45 = vadd.f32 %v22036_v14, %v5212_v21  ;;  %v6108_v58 = vsel %vm2839_vm2, %v22094_v1, -inf }
 0x65c   : > { %6094 = vmax.xlane.f32.xlu0 %v6093_v42  ;;  %v6114_v4 = vsel %vm2839_vm2, %v22091_v37, -inf  ;;  %v6105_v17 = vsel %vm2839_vm2, %v22104_v16, -inf }
 0x65d   : > { %6115 = vmax.xlane.f32.xlu1 %v6114_v4  ;;  %v6111_v24 = vsel %vm2839_vm2, %v22099_v45, -inf }
 0x660   : > { %v16927_v57 = vpop.f32.mrb[100].mxu1  ;;  %6109 = vmax.xlane.f32.xlu0 %v6108_v58 }
 0x661   : > { %6112 = vmax.xlane.f32.xlu1 %v6111_v24  ;;  %v16934_v3 = vpop.f32.mrb[74].mxu0  ;;  %v5303_v21 = vpop.f32.mrb[101].mxu1  ;;  %v22114_v4 = vadd.f32 %v16927_v57, %v22034_v0 }
 0x662   : > { %v22111_v42 = vadd.f32 %v16934_v3, %v22034_v0  ;;  %v5394_v53 = vpop.f32.mrb[75].mxu0  ;;  %v22124_v24 = vadd.f32 %v22036_v14, %v5303_v21 }
 0x663   : > { %v22119_v23 = vadd.f32 %v22036_v14, %v5394_v53  ;;  %v6120_v3 = vsel %vm2839_vm2, %v22114_v4, -inf }
 0x664   : > { %6106 = vmax.xlane.f32.xlu0 %v6105_v17  ;;  %v6126_v58 = vsel %vm2839_vm2, %v22111_v42, -inf  ;;  %v6117_v21 = vsel %vm2839_vm2, %v22124_v24, -inf }
 0x665   : > { %6127 = vmax.xlane.f32.xlu1 %v6126_v58  ;;  %v6123_v57 = vsel %vm2839_vm2, %v22119_v23, -inf }
 0x668   : > { %v16941_v61 = vpop.f32.mrb[102].mxu1  ;;  %6121 = vmax.xlane.f32.xlu0 %v6120_v3 }
 0x669   : > { %6124 = vmax.xlane.f32.xlu1 %v6123_v57  ;;  %v16948_v33 = vpop.f32.mrb[76].mxu0  ;;  %v5485_v53 = vpop.f32.mrb[103].mxu1  ;;  %v22134_v58 = vadd.f32 %v16941_v61, %v22034_v0 }
 0x66a   : > { %v22131_v17 = vadd.f32 %v16948_v33, %v22034_v0  ;;  %v5576_v51 = vpop.f32.mrb[77].mxu0  ;;  %v22144_v57 = vadd.f32 %v22036_v14, %v5485_v53 }
 0x66b   : > { %v22139_v20 = vadd.f32 %v22036_v14, %v5576_v51  ;;  %v6132_v33 = vsel %vm2839_vm2, %v22134_v58, -inf }
 0x66c   : > { %6118 = vmax.xlane.f32.xlu0 %v6117_v21  ;;  %v6138_v3 = vsel %vm2839_vm2, %v22131_v17, -inf  ;;  %v6129_v53 = vsel %vm2839_vm2, %v22144_v57, -inf }
 0x66d   : > { %6139 = vmax.xlane.f32.xlu1 %v6138_v3  ;;  %v6135_v61 = vsel %vm2839_vm2, %v22139_v20, -inf }
 0x670   : > { %v16955_v48 = vpop.f32.mrb[104].mxu1  ;;  %6133 = vmax.xlane.f32.xlu0 %v6132_v33 }
 0x671   : > { %6136 = vmax.xlane.f32.xlu1 %v6135_v61  ;;  %v16962_v5 = vpop.f32.mrb[78].mxu0  ;;  %v5667_v51 = vpop.f32.mrb[105].mxu1  ;;  %v22154_v3 = vadd.f32 %v16955_v48, %v22034_v0 }
 0x672   : > { %v22151_v21 = vadd.f32 %v16962_v5, %v22034_v0  ;;  %v5758_v62 = vpop.f32.mrb[79].mxu0  ;;  %v22164_v61 = vadd.f32 %v22036_v14, %v5667_v51 }
 0x673   : > { %v22159_v55 = vadd.f32 %v22036_v14, %v5758_v62  ;;  %v6144_v5 = vsel %vm2839_vm2, %v22154_v3, -inf }
 0x674   : > { %6130 = vmax.xlane.f32.xlu0 %v6129_v53  ;;  %v6150_v33 = vsel %vm2839_vm2, %v22151_v21, -inf  ;;  %v6141_v51 = vsel %vm2839_vm2, %v22164_v61, -inf }
 0x675   : > { %6151 = vmax.xlane.f32.xlu1 %v6150_v33  ;;  %v6147_v48 = vsel %vm2839_vm2, %v22159_v55, -inf }
 0x678   : > { %v16969_v29 = vpop.f32.mrb[106].mxu1  ;;  %6145 = vmax.xlane.f32.xlu0 %v6144_v5 }
 0x679   : > { %v22171_v26 = vadd.f32 %v16969_v29, %v22034_v0  ;;  %6148 = vmax.xlane.f32.xlu1 %v6147_v48  ;;  %v16976_v62 = vpop.f32.mrb[80].mxu0  ;;  %v5849_v53 = vpop.f32.mrb[107].mxu1 }
 0x67a   : > { %v5940_v36 = vpop.f32.mrb[81].mxu0  ;;  %v22174_v33 = vadd.f32 %v22036_v14, %v5849_v53  ;;  %v22181_v5 = vadd.f32 %v16976_v62, %v22034_v0 }
 0x67b   : > { %v6156_v27 = vsel %vm2839_vm2, %v22171_v26, -inf  ;;  %v22184_v29 = vadd.f32 %v22036_v14, %v5940_v36 }
 0x67c   : > { %6142 = vmax.xlane.f32.xlu0 %v6141_v51  ;;  %v6153_v48 = vsel %vm2839_vm2, %v22174_v33, -inf  ;;  %v6162_v53 = vsel %vm2839_vm2, %v22181_v5, -inf  ;;  %v22200_v51 = vpop.permute.xlu1 %18564 }
 0x67d   : > { %6157 = vmax.xlane.f32.xlu1 %v6156_v27  ;;  %v6159_v27 = vsel %vm2839_vm2, %v22184_v29, -inf }
 0x680   : > { %v16983_v56 = vpop.f32.mrb[108].mxu1  ;;  %6154 = vmax.xlane.f32.xlu0 %v6153_v48 }
 0x681   : > { %v22191_v52 = vadd.f32 %v16983_v56, %v22034_v0  ;;  %6163 = vmax.xlane.f32.xlu1 %v6162_v53  ;;  %v6031_v49 = vpop.f32.mrb[109].mxu1  ;;  %v22204_v56 = vpop.permute.xlu1 %18574 }
 0x682   : > { %v22194_v62 = vadd.f32 %v22036_v14, %v6031_v49  ;;  %v22208_v49 = vpop.permute.xlu0 %18569 }
 0x683   : > { %v6168_v36 = vsel %vm2839_vm2, %v22191_v52, -inf }
 0x684   : > { %6160 = vmax.xlane.f32.xlu0 %v6159_v27  ;;  %v6165_v48 = vsel %vm2839_vm2, %v22194_v62, -inf }
 0x685   : > { %6169 = vmax.xlane.f32.xlu1 %v6168_v36  ;;  %v22206_v0 = vpop.permute.xlu1 %18579 }
 0x686   : > { %v22212_v53 = vpop.permute.xlu0 %18584 }
 0x688   : > { %6166 = vmax.xlane.f32.xlu0 %v6165_v48 }
 0x689   : > { %v22210_v14 = vpop.permute.xlu1 %18589 }
 0x68a   : > { %25201 = vst [vmem:[#allocation107_spill] sm:$0xff] %v22210_v14  ;;  %v22216_v27 = vpop.permute.xlu0 %18594 }
 0x68b   : > { %25203 = vst [vmem:[#allocation109_spill] sm:$0xff] %v22216_v27 }
 0x68d   : > { %v22214_v63 = vpop.permute.xlu1 %18599 }
 0x68e   : > { %25202 = vst [vmem:[#allocation108_spill] sm:$0xff] %v22214_v63  ;;  %v22220_v36 = vpop.permute.xlu0 %18604 }
 0x68f   : > { %25205 = vst [vmem:[#allocation111_spill] sm:$0xff] %v22220_v36 }
 0x691   : > { %v22218_v34 = vpop.permute.xlu1 %18609 }
 0x692   : > { %25204 = vst [vmem:[#allocation110_spill] sm:$0xff] %v22218_v34  ;;  %v22224_v48 = vpop.permute.xlu0 %18614 }
 0x693   : > { %25207 = vst [vmem:[#allocation113_spill] sm:$0xff] %v22224_v48 }
 0x695   : > { %v22222_v59 = vpop.permute.xlu1 %18619 }
 0x696   : > { %25206 = vst [vmem:[#allocation112_spill] sm:$0xff] %v22222_v59  ;;  %v22228_v50 = vpop.permute.xlu0 %18624 }
 0x697   : > { %25209 = vst [vmem:[#allocation115_spill] sm:$0xff] %v22228_v50 }
 0x699   : > { %v22226_v6 = vpop.permute.xlu1 %18629 }
 0x69a   : > { %25208 = vst [vmem:[#allocation114_spill] sm:$0xff] %v22226_v6  ;;  %v22232_v41 = vpop.permute.xlu0 %18634 }
 0x69b   : > { %25211 = vst [vmem:[#allocation117_spill] sm:$0xff] %v22232_v41 }
 0x69d   : > { %v22230_v2 = vpop.permute.xlu1 %7947 }
 0x69e   : > { %25210 = vst [vmem:[#allocation116_spill] sm:$0xff] %v22230_v2  ;;  %v22236_v63 = vpop.permute.xlu0 %7949 }
 0x69f   : > { %25213 = vst [vmem:[#allocation119_spill] sm:$0xff] %v22236_v63 }
 0x6a1   : > { %v22234_v39 = vpop.permute.xlu1 %18639 }
 0x6a2   : > { %25212 = vst [vmem:[#allocation118_spill] sm:$0xff] %v22234_v39  ;;  %v22240_v34 = vpop.permute.xlu0 %8038 }
 0x6a3   : > { %25215 = vst [vmem:[#allocation121_spill] sm:$0xff] %v22240_v34 }
 0x6a5   : > { %v22238_v38 = vpop.permute.xlu1 %8040 }
 0x6a6   : > { %25214 = vst [vmem:[#allocation120_spill] sm:$0xff] %v22238_v38  ;;  %v22244_v59 = vpop.permute.xlu0 %18644 }
 0x6a7   : > { %25217 = vst [vmem:[#allocation123_spill] sm:$0xff] %v22244_v59 }
 0x6a9   : > { %v22242_v36 = vpop.permute.xlu1 %8129 }
 0x6aa   : > { %25216 = vst [vmem:[#allocation122_spill] sm:$0xff] %v22242_v36  ;;  %v22248_v6 = vpop.permute.xlu0 %8131 }
 0x6ab   : > { %25219 = vst [vmem:[#allocation125_spill] sm:$0xff] %v22248_v6 }
 0x6ad   : > { %v22246_v48 = vpop.permute.xlu1 %18649 }
 0x6ae   : > { %25218 = vst [vmem:[#allocation124_spill] sm:$0xff] %v22246_v48 }
 0x6d1   : > { %v6080_v50 = vpop.xlane.xlu1 %6079 }
 0x6d2   : > { %v6172_v2 = vsub.f32 %v22041_v13, %v6080_v50  ;;  %v6077_v41 = vpop.xlane.xlu0 %6076 }
 0x6d3   : > { %v6171_v39 = vsub.f32 %v22046_v32, %v6077_v41 }
 0x6d4   : > { %v6205_v27 = vmul.f32 1.442695, %v6172_v2 }
 0x6d5   : > { %v6203_v63 = vmul.f32 1.442695, %v6171_v39 }
 0x6d6   : > { %19375 = vpow2.f32 %v6205_v27 }
 0x6d7   : > { %19377 = vpow2.f32 %v6203_v63 }
 0x6d9   : > { %v6086_v38 = vpop.xlane.xlu0 %6085  ;;  %v6092_v34 = vpop.xlane.xlu1 %6091 }
 0x6da   : > { %v6174_v36 = vsub.f32 %v22053_v19, %v6086_v38  ;;  %v6176_v59 = vsub.f32 %v22056_v43, %v6092_v34 }
 0x6dc   : > { %v6209_v14 = vmul.f32 1.442695, %v6174_v36  ;;  %v6213_v48 = vmul.f32 1.442695, %v6176_v59 }
 0x6dd   : > { %v6083_v8 = vpop.xlane.xlu0 %6082 }
 0x6de   : > { %19379 = vpow2.f32 %v6209_v14  ;;  %v6173_v6 = vsub.f32 %v22059_v54, %v6083_v8 }
 0x6df   : > { %19381 = vpow2.f32 %v6213_v48 }
 0x6e0   : > { %v22255_v50 = vpop.eup %19375  ;;  %v6207_v41 = vmul.f32 1.442695, %v6173_v6 }
 0x6e1   : > { %v22257_v2 = vpop.eup %19377  ;;  %v6089_v39 = vpop.xlane.xlu0 %6088  ;;  %v6270_v63 = vsel %vm2839_vm2, %v22255_v50, 0.0 }
 0x6e2   : > { %19383 = vpow2.f32 %v6207_v41  ;;  %v6175_v38 = vsub.f32 %v22066_v22, %v6089_v39  ;;  %v6104_v34 = vpop.xlane.xlu1 %6103  ;;  %6271 = vadd.xlane.f32.xlu1 %v6270_v63  ;;  %v6267_v59 = vsel %vm2839_vm2, %v22257_v2, 0.0 }
 0x6e3   : > { %v6180_v8 = vsub.f32 %v22071_v30, %v6104_v34  ;;  %6268 = vadd.xlane.f32.xlu0 %v6267_v59 }
 0x6e4   : > { %v6211_v19 = vmul.f32 1.442695, %v6175_v38 }
 0x6e5   : > { %v6221_v13 = vmul.f32 1.442695, %v6180_v8  ;;  %v6098_v6 = vpop.xlane.xlu0 %6097 }
 0x6e6   : > { %19385 = vpow2.f32 %v6211_v19  ;;  %v6178_v32 = vsub.f32 %v22074_v35, %v6098_v6  ;;  %v6101_v43 = vpop.xlane.xlu1 %6100 }
 0x6e7   : > { %v6179_v54 = vsub.f32 %v22079_v46, %v6101_v43  ;;  %19387 = vpow2.f32 %v6221_v13 }
 0x6e8   : > { %v22267_v14 = vpop.eup %19379  ;;  %v6217_v22 = vmul.f32 1.442695, %v6178_v32 }
 0x6e9   : > { %v22269_v27 = vpop.eup %19381  ;;  %v6219_v36 = vmul.f32 1.442695, %v6179_v54  ;;  %v6095_v48 = vpop.xlane.xlu0 %6094  ;;  %v6276_v30 = vsel %vm2839_vm2, %v22267_v14, 0.0 }
 0x6ea   : > { %19389 = vpow2.f32 %v6217_v22  ;;  %v6177_v41 = vsub.f32 %v22084_v7, %v6095_v48  ;;  %v6116_v39 = vpop.xlane.xlu1 %6115  ;;  %v6282_v35 = vsel %vm2839_vm2, %v22269_v27, 0.0  ;;  %6277 = vadd.xlane.f32.xlu0 %v6276_v30 }
 0x6eb   : > { %v6184_v46 = vsub.f32 %v22091_v37, %v6116_v39  ;;  %6283 = vadd.xlane.f32.xlu1 %v6282_v35  ;;  %19391 = vpow2.f32 %v6219_v36 }
 0x6ec   : > { %v22277_v63 = vpop.eup %19383  ;;  %v6215_v38 = vmul.f32 1.442695, %v6177_v41 }
 0x6ed   : > { %v6229_v34 = vmul.f32 1.442695, %v6184_v46  ;;  %v6110_v59 = vpop.xlane.xlu0 %6109  ;;  %v6273_v8 = vsel %vm2839_vm2, %v22277_v63, 0.0 }
 0x6ee   : > { %19393 = vpow2.f32 %v6215_v38  ;;  %v6182_v7 = vsub.f32 %v22094_v1, %v6110_v59  ;;  %v6113_v19 = vpop.xlane.xlu1 %6112  ;;  %6274 = vadd.xlane.f32.xlu0 %v6273_v8 }
 0x6ef   : > { %v6183_v13 = vsub.f32 %v22099_v45, %v6113_v19  ;;  %19395 = vpow2.f32 %v6229_v34 }
 0x6f0   : > { %v22283_v6 = vpop.eup %19385  ;;  %v6225_v37 = vmul.f32 1.442695, %v6182_v7 }
 0x6f1   : > { %v6227_v32 = vmul.f32 1.442695, %v6183_v13  ;;  %v6107_v43 = vpop.xlane.xlu0 %6106  ;;  %v6279_v54 = vsel %vm2839_vm2, %v22283_v6, 0.0  ;;  %v22287_v22 = vpop.eup %19387 }
 0x6f2   : > { %19397 = vpow2.f32 %v6225_v37  ;;  %v6181_v36 = vsub.f32 %v22104_v16, %v6107_v43  ;;  %v6128_v48 = vpop.xlane.xlu1 %6127  ;;  %6280 = vadd.xlane.f32.xlu1 %v6279_v54  ;;  %v6294_v35 = vsel %vm2839_vm2, %v22287_v22, 0.0 }
 0x6f3   : > { %v6188_v1 = vsub.f32 %v22111_v42, %v6128_v48  ;;  %19399 = vpow2.f32 %v6227_v32 }
 0x6f4   : > { %v22291_v30 = vpop.eup %19389  ;;  %v6223_v45 = vmul.f32 1.442695, %v6181_v36 }
 0x6f5   : > { %v6237_v41 = vmul.f32 1.442695, %v6188_v1  ;;  %v6122_v39 = vpop.xlane.xlu0 %6121  ;;  %v6288_v46 = vsel %vm2839_vm2, %v22291_v30, 0.0  ;;  %v22297_v38 = vpop.eup %19391 }
 0x6f6   : > { %19401 = vpow2.f32 %v6223_v45  ;;  %v6186_v16 = vsub.f32 %v22114_v4, %v6122_v39  ;;  %v6125_v34 = vpop.xlane.xlu1 %6124  ;;  %6295 = vadd.xlane.f32.xlu1 %v6294_v35  ;;  %6289 = vadd.xlane.f32.xlu0 %v6288_v46  ;;  %v6291_v13 = vsel %vm2839_vm2, %v22297_v38, 0.0 }
 0x6f7   : > { %v6187_v42 = vsub.f32 %v22119_v23, %v6125_v34  ;;  %19403 = vpow2.f32 %v6237_v41 }
 0x6f8   : > { %v22301_v59 = vpop.eup %19393  ;;  %v6233_v8 = vmul.f32 1.442695, %v6186_v16 }
 0x6f9   : > { %v6235_v7 = vmul.f32 1.442695, %v6187_v42  ;;  %v6119_v19 = vpop.xlane.xlu0 %6118  ;;  %v6285_v37 = vsel %vm2839_vm2, %v22301_v59, 0.0  ;;  %v22307_v32 = vpop.eup %19395 }
 0x6fa   : > { %19405 = vpow2.f32 %v6233_v8  ;;  %v6185_v4 = vsub.f32 %v22124_v24, %v6119_v19  ;;  %v6140_v43 = vpop.xlane.xlu1 %6139  ;;  %6292 = vadd.xlane.f32.xlu1 %v6291_v13  ;;  %6286 = vadd.xlane.f32.xlu0 %v6285_v37  ;;  %v6306_v45 = vsel %vm2839_vm2, %v22307_v32, 0.0 }
 0x6fb   : > { %v6192_v23 = vsub.f32 %v22131_v17, %v6140_v43  ;;  %19407 = vpow2.f32 %v6235_v7 }
 0x6fc   : > { %v22311_v54 = vpop.eup %19397  ;;  %v6231_v36 = vmul.f32 1.442695, %v6185_v4 }
 0x6fd   : > { %v6245_v48 = vmul.f32 1.442695, %v6192_v23  ;;  %v6134_v1 = vpop.xlane.xlu0 %6133  ;;  %v6300_v41 = vsel %vm2839_vm2, %v22311_v54, 0.0  ;;  %v22317_v39 = vpop.eup %19399 }
 0x6fe   : > { %19409 = vpow2.f32 %v6231_v36  ;;  %v6190_v24 = vsub.f32 %v22134_v58, %v6134_v1  ;;  %v6137_v35 = vpop.xlane.xlu1 %6136  ;;  %6307 = vadd.xlane.f32.xlu1 %v6306_v45  ;;  %6301 = vadd.xlane.f32.xlu0 %v6300_v41  ;;  %v6303_v8 = vsel %vm2839_vm2, %v22317_v39, 0.0 }
 0x6ff   : > { %v6191_v17 = vsub.f32 %v22139_v20, %v6137_v35  ;;  %19411 = vpow2.f32 %v6245_v48 }
 0x700   : > { %v22321_v46 = vpop.eup %19401  ;;  %v6241_v16 = vmul.f32 1.442695, %v6190_v24 }
 0x701   : > { %v6243_v34 = vmul.f32 1.442695, %v6191_v17  ;;  %v6131_v42 = vpop.xlane.xlu0 %6130  ;;  %v6297_v7 = vsel %vm2839_vm2, %v22321_v46, 0.0  ;;  %v22327_v19 = vpop.eup %19403 }
 0x702   : > { %19413 = vpow2.f32 %v6241_v16  ;;  %v6189_v58 = vsub.f32 %v22144_v57, %v6131_v42  ;;  %6304 = vadd.xlane.f32.xlu1 %v6303_v8  ;;  %6298 = vadd.xlane.f32.xlu0 %v6297_v7  ;;  %v6318_v4 = vsel %vm2839_vm2, %v22327_v19, 0.0 }
 0x703   : > { %19415 = vpow2.f32 %v6243_v34 }
 0x704   : > { %v22330_v20 = vpop.eup %19405  ;;  %v6239_v13 = vmul.f32 1.442695, %v6189_v58 }
 0x705   : > { %v6146_v37 = vpop.xlane.xlu0 %6145  ;;  %v6312_v43 = vsel %vm2839_vm2, %v22330_v20, 0.0  ;;  %v22336_v23 = vpop.eup %19407 }
 0x706   : > { %19417 = vpow2.f32 %v6239_v13  ;;  %v6194_v36 = vsub.f32 %v22154_v3, %v6146_v37  ;;  %6319 = vadd.xlane.f32.xlu1 %v6318_v4  ;;  %6313 = vadd.xlane.f32.xlu0 %v6312_v43  ;;  %v6315_v45 = vsel %vm2839_vm2, %v22336_v23, 0.0  ;;  %v6152_v43 = vpop.xlane.xlu1 %6151 }
 0x708   : > { %v22339_v57 = vpop.eup %19409  ;;  %v6249_v48 = vmul.f32 1.442695, %v6194_v36 }
 0x709   : > { %v6143_v1 = vpop.xlane.xlu0 %6142  ;;  %v6309_v41 = vsel %vm2839_vm2, %v22339_v57, 0.0  ;;  %v22345_v24 = vpop.eup %19411 }
 0x70a   : > { %19419 = vpow2.f32 %v6249_v48  ;;  %v6193_v35 = vsub.f32 %v22164_v61, %v6143_v1  ;;  %6316 = vadd.xlane.f32.xlu1 %v6315_v45  ;;  %6310 = vadd.xlane.f32.xlu0 %v6309_v41  ;;  %v6330_v16 = vsel %vm2839_vm2, %v22345_v24, 0.0  ;;  %v6149_v36 = vpop.xlane.xlu1 %6148  ;;  %v6196_v1 = vsub.f32 %v22151_v21, %v6152_v43 }
 0x70c   : > { %v22348_v3 = vpop.eup %19413  ;;  %v6247_v17 = vmul.f32 1.442695, %v6193_v35  ;;  %v6253_v41 = vmul.f32 1.442695, %v6196_v1  ;;  %v6195_v35 = vsub.f32 %v22159_v55, %v6149_v36 }
 0x70d   : > { %v6324_v34 = vsel %vm2839_vm2, %v22348_v3, 0.0  ;;  %v22354_v42 = vpop.eup %19415 }
 0x70e   : > { %19421 = vpow2.f32 %v6247_v17  ;;  %6331 = vadd.xlane.f32.xlu1 %v6330_v16  ;;  %6325 = vadd.xlane.f32.xlu0 %v6324_v34  ;;  %v6327_v61 = vsel %vm2839_vm2, %v22354_v42, 0.0  ;;  %v6158_v48 = vpop.xlane.xlu1 %6157  ;;  %v6155_v17 = vpop.xlane.xlu0 %6154  ;;  %v6251_v34 = vmul.f32 1.442695, %v6195_v35 }
 0x70f   : > { %v6198_v16 = vsub.f32 %v22171_v26, %v6158_v48  ;;  %19423 = vpow2.f32 %v6253_v41 }
 0x710   : > { %v22356_v8 = vpop.eup %19417  ;;  %19425 = vpow2.f32 %v6251_v34 }
 0x711   : > { %v6321_v7 = vsel %vm2839_vm2, %v22356_v8, 0.0 }
 0x712   : > { %6328 = vadd.xlane.f32.xlu1 %v6327_v61  ;;  %6322 = vadd.xlane.f32.xlu0 %v6321_v7  ;;  %v6164_v45 = vpop.xlane.xlu1 %6163 }
 0x713   : > { %v6200_v61 = vsub.f32 %v22181_v5, %v6164_v45 }
 0x714   : > { %v22362_v58 = vpop.eup %19419 }
 0x715   : > { %v6336_v13 = vsel %vm2839_vm2, %v22362_v58, 0.0 }
 0x716   : > { %6337 = vadd.xlane.f32.xlu0 %v6336_v13  ;;  %v6170_v7 = vpop.xlane.xlu1 %6169  ;;  %v6257_v13 = vmul.f32 1.442695, %v6198_v16 }
 0x717   : > { %v6202_v21 = vsub.f32 %v22191_v52, %v6170_v7 }
 0x718   : > { %v22366_v37 = vpop.eup %19421  ;;  %19427 = vpow2.f32 %v6257_v13 }
 0x719   : > { %v6333_v4 = vsel %vm2839_vm2, %v22366_v37, 0.0  ;;  %v6265_v55 = vmul.f32 1.442695, %v6202_v21  ;;  %v22381_v48 = vpop.eup %19423  ;;  %v25225_v21 = vld [vmem:[#allocation32_spill] sm:$0xff] }
 0x71a   : > { %6334 = vadd.xlane.f32.xlu0 %v6333_v4  ;;  %v6197_v4 = vsub.f32 %v22174_v33, %v6155_v17  ;;  %v6342_v33 = vsel %vm2839_vm2, %v22381_v48, 0.0  ;;  %v22386_v45 = vpop.eup %19425 }
 0x71c   : > { %v6255_v43 = vmul.f32 1.442695, %v6197_v4 }
 0x723   : > { %8222 = vrot.lane.b32.xlu1 %v20944_v25, %s19991_s10  ;;  %v6161_v25 = vpop.xlane.xlu0 %6160 }
 0x724   : > { %v6199_v36 = vsub.f32 %v22184_v29, %v6161_v25  ;;  %v6339_v25 = vsel %vm2839_vm2, %v22386_v45, 0.0 }
 0x726   : > { %v6259_v5 = vmul.f32 1.442695, %v6199_v36  ;;  %v25227_v36 = vld [vmem:[#allocation37_spill] sm:$0xff] }
 0x727   : > { %v6167_v26 = vpop.xlane.xlu0 %6166 }
 0x728   : > { %v6201_v1 = vsub.f32 %v22194_v62, %v6167_v26 }
 0x72a   : > { %v6263_v52 = vmul.f32 1.442695, %v6201_v1  ;;  %v25229_v1 = vld [vmem:[#allocation39_spill] sm:$0xff] }
 0x730   : > { %8220 = vrot.lane.b32.xlu0 %v20922_v9, %s19991_s10  ;;  %v6261_v9 = vmul.f32 1.442695, %v6200_v61 }
 0x732   : > { %19429 = vpow2.f32 %v6261_v9  ;;  %v22388_v9 = vpop.eup %19427 }
 0x733   : > { %19431 = vpow2.f32 %v6255_v43  ;;  %25220 = vst [vmem:[#allocation126_spill] sm:$0xff] %v22388_v9  ;;  %v6348_v62 = vsel %vm2839_vm2, %v22388_v9, 0.0  ;;  %v25226_v43 = vld [vmem:[#allocation35_spill] sm:$0xff] }
 0x734   : > { %19433 = vpow2.f32 %v6265_v55 }
 0x735   : > { %19435 = vpow2.f32 %v6259_v5  ;;  %v25228_v5 = vld [vmem:[#allocation36_spill] sm:$0xff] }
 0x736   : > { %19437 = vpow2.f32 %v6263_v52 }
 0x73c   : > { %v22392_v29 = vpop.eup %19429 }
 0x73d   : > { %25221 = vst [vmem:[#allocation127_spill] sm:$0xff] %v22392_v29  ;;  %v22394_v41 = vpop.eup %19431  ;;  %v6354_v35 = vsel %vm2839_vm2, %v22392_v29, 0.0  ;;  %v18571_v29 = vunpack.i.l.bf16 %v22208_v49 }
 0x73e   : > { %v22400_v17 = vpop.eup %19433  ;;  %v6345_v16 = vsel %vm2839_vm2, %v22394_v41, 0.0 }
 0x73f   : > { %25222 = vst [vmem:[#allocation128_spill] sm:$0xff] %v22400_v17  ;;  %v6360_v34 = vsel %vm2839_vm2, %v22400_v17, 0.0  ;;  %v22406_v61 = vpop.eup %19435  ;;  %v25236_v17 = vld [vmem:[#allocation50_spill] sm:$0xff] }
 0x740   : > { %25223 = vst [vmem:[#allocation129_spill] sm:$0xff] %v22406_v61  ;;  %v6351_v7 = vsel %vm2839_vm2, %v22406_v61, 0.0  ;;  %v22410_v13 = vpop.eup %19437  ;;  %v25241_v61 = vld [vmem:[#allocation51_spill] sm:$0xff] }
 0x741   : > { %25224 = vst [vmem:[#allocation130_spill] sm:$0xff] %v22410_v13  ;;  %v6357_v4 = vsel %vm2839_vm2, %v22410_v13, 0.0 }
 0x747   : > { %6343 = vadd.xlane.f32.xlu1 %v6342_v33  ;;  %v25230_v33 = vld [vmem:[#allocation42_spill] sm:$0xff] }
 0x74b   : > { %6340 = vadd.xlane.f32.xlu1 %v6339_v25 }
 0x74f   : > { %6349 = vadd.xlane.f32.xlu1 %v6348_v62  ;;  %6355 = vadd.xlane.f32.xlu0 %v6354_v35  ;;  %v25231_v62 = vld [vmem:[#allocation41_spill] sm:$0xff]  ;;  %v25232_v35 = vld [vmem:[#allocation43_spill] sm:$0xff] }
 0x753   : > { %6346 = vadd.xlane.f32.xlu1 %v6345_v16  ;;  %6361 = vadd.xlane.f32.xlu0 %v6360_v34 }
 0x757   : > { %6352 = vadd.xlane.f32.xlu1 %v6351_v7 }
 0x75b   : > { %6358 = vadd.xlane.f32.xlu1 %v6357_v4 }
 0x769   : > { %18654 = vrot.lane.b32.xlu0 %v20964_v60, %s19991_s10 }
 0x76c   : > { %8311 = vrot.lane.b32.xlu1 %v25225_v21, %s19991_s10 }
 0x76d   : > { %8313 = vrot.lane.b32.xlu0 %v25226_v43, %s19991_s10 }
 0x76f   : > { %v6272_v55 = vpop.xlane.xlu1 %6271 }
 0x770   : > { %19439 = vrcp.f32 %v6272_v55  ;;  %18659 = vrot.lane.b32.xlu1 %v25227_v36, %s19991_s10  ;;  %v6269_v26 = vpop.xlane.xlu0 %6268  ;;  %v25234_v36 = vld [vmem:[#allocation44_spill] sm:$0xff] }
 0x771   : > { %19441 = vrcp.f32 %v6269_v26  ;;  %8402 = vrot.lane.b32.xlu0 %v25228_v5, %s19991_s10 }
 0x774   : > { %8404 = vrot.lane.b32.xlu1 %v25229_v1, %s19991_s10  ;;  %v25233_v1 = vld [vmem:[#allocation46_spill] sm:$0xff] }
 0x775   : > { %18664 = vrot.lane.b32.xlu0 %v25230_v33, %s19991_s10 }
 0x777   : > { %v6278_v52 = vpop.xlane.xlu0 %6277 }
 0x778   : > { %v6284_v25 = vpop.xlane.xlu1 %6283  ;;  %19443 = vrcp.f32 %v6278_v52  ;;  %8493 = vrot.lane.b32.xlu1 %v25231_v62, %s19991_s10 }
 0x779   : > { %19445 = vrcp.f32 %v6284_v25  ;;  %8495 = vrot.lane.b32.xlu0 %v25232_v35, %s19991_s10  ;;  %v25235_v35 = vld [vmem:[#allocation47_spill] sm:$0xff] }
 0x77a   : > { %v19440_v16 = vpop.eup %19439 }
 0x77b   : > { %v19442_v34 = vpop.eup %19441  ;;  %v6396_v7 = vmul.f32 %v19440_v16, %v6272_v55  ;;  %v6275_v4 = vpop.xlane.xlu0 %6274  ;;  %v18567_v55 = vunpack.i.h.bf16 %v22200_v51 }
 0x77c   : > { %v6395_v5 = vmul.f32 %v19442_v34, %v6269_v26  ;;  %19447 = vrcp.f32 %v6275_v4  ;;  %18669 = vrot.lane.b32.xlu1 %v25233_v1, %s19991_s10  ;;  %v18566_v26 = vunpack.i.l.bf16 %v22200_v51  ;;  %v25238_v51 = vld [vmem:[#allocation45_spill] sm:$0xff] }
 0x77d   : > { %v6428_v33 = vsub.f32 2.0, %v6396_v7  ;;  %8584 = vrot.lane.b32.xlu0 %v25234_v36, %s19991_s10  ;;  %v18572_v36 = vunpack.i.h.bf16 %v22208_v49 }
 0x77e   : > { %v6427_v43 = vsub.f32 2.0, %v6395_v5 }
 0x77f   : > { %v6460_v21 = vmul.f32 %v19440_v16, %v6428_v33  ;;  %v6281_v62 = vpop.xlane.xlu1 %6280 }
 0x780   : > { %v6459_v60 = vmul.f32 %v19442_v34, %v6427_v43  ;;  %19449 = vrcp.f32 %v6281_v62  ;;  %8586 = vrot.lane.b32.xlu1 %v25235_v35, %s19991_s10  ;;  %v25237_v34 = vld [vmem:[#allocation40_spill] sm:$0xff] }
 0x781   : > { %18674 = vrot.lane.b32.xlu0 %v25236_v17, %s19991_s10  ;;  %v6492_v5 = vmul.f32 %v22255_v50, %v6460_v21  ;;  %v22450_v17 = vpack.c.bf16 %v18567_v55, %v18566_v26 }
 0x782   : > { %v19444_v1 = vpop.eup %19443  ;;  %v6491_v7 = vmul.f32 %v22257_v2, %v6459_v60 }
 0x783   : > { %v19446_v13 = vpop.eup %19445  ;;  %v6398_v33 = vmul.f32 %v19444_v1, %v6278_v52  ;;  %v6296_v16 = vpop.xlane.xlu1 %6295 }
 0x784   : > { %v6290_v43 = vpop.xlane.xlu0 %6289  ;;  %19451 = vrcp.f32 %v6296_v16  ;;  %8675 = vrot.lane.b32.xlu1 %v25237_v34, %s19991_s10  ;;  %16988 = vmatprep.mubr.msk.f32.mxu0 %vm2839_vm2, %v6491_v7  ;;  %v6400_v2 = vmul.f32 %v19446_v13, %v6284_v25  ;;  %v25239_v7 = vld [vmem:[#allocation34_spill] sm:$0xff] }
 0x785   : > { %19453 = vrcp.f32 %v6290_v43  ;;  %8677 = vrot.lane.b32.xlu0 %v25238_v51, %s19991_s10  ;;  %16989 = vmatmul.mubr.msk.f32.vlgmr.msra.gmra.mrb[82].mxu0 %vm2839_vm2, %v6492_v5  ;;  %v6430_v50 = vsub.f32 2.0, %v6398_v33  ;;  %v25240_v5 = vld [vmem:[#allocation48_spill] sm:$0xff] }
 0x786   : > { %v19448_v60 = vpop.eup %19447  ;;  %17955 = vmatpush3.bf16.msra.mxu0 %v21967_v28  ;;  %v6432_v26 = vsub.f32 2.0, %v6400_v2 }
 0x787   : > { %v6397_v21 = vmul.f32 %v19448_v60, %v6275_v4  ;;  %17961 = vmatprep.subr.bf16.mxu0 %v22450_v17  ;;  %v6293_v52 = vpop.xlane.xlu1 %6292  ;;  %v6462_v25 = vmul.f32 %v19444_v1, %v6430_v50  ;;  %v18577_v50 = vunpack.i.h.bf16 %v22204_v56 }
 0x788   : > { %v6287_v34 = vpop.xlane.xlu0 %6286  ;;  %19455 = vrcp.f32 %v6293_v52  ;;  %18679 = vrot.lane.b32.xlu1 %v25239_v7, %s19991_s10 }
 0x789   : > { %v6429_v35 = vsub.f32 2.0, %v6397_v21  ;;  %19457 = vrcp.f32 %v6287_v34  ;;  %8766 = vrot.lane.b32.xlu0 %v25240_v5, %s19991_s10 }
 0x78a   : > { %v19450_v55 = vpop.eup %19449 }
 0x78b   : > { %v6461_v33 = vmul.f32 %v19448_v60, %v6429_v35  ;;  %v6399_v51 = vmul.f32 %v19450_v55, %v6281_v62  ;;  %v6308_v28 = vpop.xlane.xlu1 %6307  ;;  %v6464_v35 = vmul.f32 %v19446_v13, %v6432_v26  ;;  %v6494_v62 = vmul.f32 %v22267_v14, %v6462_v25 }
 0x78c   : > { %v6302_v4 = vpop.xlane.xlu0 %6301  ;;  %19459 = vrcp.f32 %v6308_v28  ;;  %8768 = vrot.lane.b32.xlu1 %v25241_v61, %s19991_s10 }
 0x78d   : > { %v6431_v21 = vsub.f32 2.0, %v6399_v51  ;;  %19461 = vrcp.f32 %v6302_v4  ;;  %18684 = vrot.lane.b32.xlu0 %v25104_v12, %s19991_s10  ;;  %v6493_v2 = vmul.f32 %v22277_v63, %v6461_v33  ;;  %v18576_v51 = vunpack.i.l.bf16 %v22204_v56  ;;  %v25242_v12 = vld [vmem:[#allocation49_spill] sm:$0xff] }
 0x78e   : > { %v19452_v1 = vpop.eup %19451  ;;  %v22472_v63 = vpack.c.bf16 %v18572_v36, %v18571_v29  ;;  %v6496_v56 = vmul.f32 %v22269_v27, %v6464_v35 }
 0x78f   : > { %v19454_v60 = vpop.eup %19453  ;;  %v6463_v5 = vmul.f32 %v19450_v55, %v6431_v21  ;;  %v6404_v49 = vmul.f32 %v19452_v1, %v6296_v16  ;;  %v6305_v7 = vpop.xlane.xlu1 %6304  ;;  %16995 = vmatprep.mubr.msk.f32.mxu1 %vm2839_vm2, %v6493_v2 }
 0x790   : > { %v6299_v61 = vpop.xlane.xlu0 %6298  ;;  %v6402_v9 = vmul.f32 %v19454_v60, %v6290_v43  ;;  %19463 = vrcp.f32 %v6305_v7  ;;  %8857 = vrot.lane.b32.xlu1 %v25242_v12, %s19991_s10  ;;  %16996 = vmatmul.mubr.msk.f32.vlgmr.msra.gmra.mrb[110].mxu1 %vm2839_vm2, %v6494_v62 }
 0x791   : > { %19465 = vrcp.f32 %v6299_v61  ;;  %17959 = vmatpush3.bf16.msra.mxu1 %v21971_v31  ;;  %8859 = vrot.lane.b32.xlu0 %v25108_v11, %s19991_s10  ;;  %v6495_v14 = vmul.f32 %v22283_v6, %v6463_v5  ;;  %v6436_v43 = vsub.f32 2.0, %v6404_v49  ;;  %v17968_v6 = vpack.c.bf16 %v18577_v50, %v18576_v51 }
 0x792   : > { %v19456_v13 = vpop.eup %19455  ;;  %17965 = vmatprep.subr.bf16.mxu1 %v22472_v63  ;;  %v6434_v55 = vsub.f32 2.0, %v6402_v9  ;;  %v18581_v49 = vunpack.i.l.bf16 %v22206_v0 }
 0x793   : > { %v19458_v16 = vpop.eup %19457  ;;  %v6403_v26 = vmul.f32 %v19456_v13, %v6293_v52  ;;  %v6320_v25 = vpop.xlane.xlu1 %6319  ;;  %17002 = vmatprep.mubr.msk.f32.mxu0 %vm2839_vm2, %v6495_v14 }
 0x794   : > { %v22481_v29 = vpop.xlane.xlu0 %6313  ;;  %v6401_v31 = vmul.f32 %v19458_v16, %v6287_v34  ;;  %19467 = vrcp.f32 %v6320_v25  ;;  %18689 = vrot.lane.b32.xlu1 %v25103_v15, %s19991_s10  ;;  %17003 = vmatmul.mubr.msk.f32.vlgmr.msra.gmra.mrb[84].mxu0 %vm2839_vm2, %v6496_v56  ;;  %v6468_v34 = vmul.f32 %v19452_v1, %v6436_v43  ;;  %v6466_v5 = vmul.f32 %v19454_v60, %v6434_v55 }
 0x795   : > { %v6435_v27 = vsub.f32 2.0, %v6403_v26  ;;  %19469 = vrcp.f32 %v22481_v29  ;;  %17963 = vmatpush3.bf16.msra.mxu0 %v22450_v17  ;;  %8948 = vrot.lane.b32.xlu0 %v25111_v18, %s19991_s10  ;;  %v18582_v17 = vunpack.i.h.bf16 %v22206_v0  ;;  %v18587_v60 = vunpack.i.h.bf16 %v22212_v53 }
 0x796   : > { %v19460_v9 = vpop.eup %19459  ;;  %v6433_v36 = vsub.f32 2.0, %v6401_v31  ;;  %17969 = vmatprep.subr.bf16.mxu0 %v17968_v6  ;;  %v6500_v56 = vmul.f32 %v22287_v22, %v6468_v34  ;;  %v6498_v0 = vmul.f32 %v22291_v30, %v6466_v5 }
 0x797   : > { %v19462_v52 = vpop.eup %19461  ;;  %v6467_v33 = vmul.f32 %v19456_v13, %v6435_v27  ;;  %v6408_v21 = vmul.f32 %v19460_v9, %v6308_v28  ;;  %v22490_v2 = vpop.xlane.xlu1 %6316  ;;  %v17972_v22 = vpack.c.bf16 %v18582_v17, %v18581_v49  ;;  %v25245_v17 = vld [vmem:[#allocation109_spill] sm:$0xff] }
 0x798   : > { %v22492_v35 = vpop.xlane.xlu0 %6310  ;;  %v6465_v62 = vmul.f32 %v19458_v16, %v6433_v36  ;;  %v6406_v50 = vmul.f32 %v19462_v52, %v6302_v4  ;;  %19471 = vrcp.f32 %v22490_v2  ;;  %8950 = vrot.lane.b32.xlu1 %v25105_v44, %s19991_s10  ;;  %v18586_v4 = vunpack.i.l.bf16 %v22212_v53 }
 0x799   : > { %19473 = vrcp.f32 %v22492_v35  ;;  %9039 = vrot.lane.b32.xlu0 %v25114_v47, %s19991_s10  ;;  %v6499_v28 = vmul.f32 %v22297_v38, %v6467_v33  ;;  %v6440_v51 = vsub.f32 2.0, %v6408_v21  ;;  %v18597_v49 = vunpack.i.h.bf16 %v25245_v17 }
 0x79a   : > { %v19464_v1 = vpop.eup %19463  ;;  %v6497_v14 = vmul.f32 %v22301_v59, %v6465_v62  ;;  %v6438_v16 = vsub.f32 2.0, %v6406_v50 }
 0x79b   : > { %v19466_v13 = vpop.eup %19465  ;;  %v6407_v43 = vmul.f32 %v19464_v1, %v6305_v7  ;;  %v22508_v55 = vpop.xlane.xlu1 %6331  ;;  %17016 = vmatprep.mubr.msk.f32.mxu0 %vm2839_vm2, %v6499_v28  ;;  %v6472_v59 = vmul.f32 %v19460_v9, %v6440_v51  ;;  %v18596_v28 = vunpack.i.l.bf16 %v25245_v17 }
 0x79c   : > { %v22511_v38 = vpop.xlane.xlu0 %6325  ;;  %v6405_v26 = vmul.f32 %v19466_v13, %v6299_v61  ;;  %19475 = vrcp.f32 %v22508_v55  ;;  %17009 = vmatprep.mubr.msk.f32.mxu1 %vm2839_vm2, %v6497_v14  ;;  %18694 = vrot.lane.b32.xlu1 %v25110_v40, %s19991_s10  ;;  %v17976_v61 = vpack.c.bf16 %v18587_v60, %v18586_v4  ;;  %v6470_v27 = vmul.f32 %v19462_v52, %v6438_v16 }
 0x79d   : > { %v6439_v53 = vsub.f32 2.0, %v6407_v43  ;;  %19477 = vrcp.f32 %v22511_v38  ;;  %17010 = vmatmul.mubr.msk.f32.vlgmr.msra.gmra.mrb[112].mxu1 %vm2839_vm2, %v6498_v0  ;;  %17017 = vmatmul.mubr.msk.f32.vlgmr.msra.gmra.mrb[86].mxu0 %vm2839_vm2, %v6500_v56  ;;  %v6504_v4 = vmul.f32 %v22307_v32, %v6472_v59  ;;  %v25246_v56 = vld [vmem:[#allocation64_spill] sm:$0xff] }
 0x79e   : > { %v19468_v30 = vpop.eup %19467  ;;  %v6437_v7 = vsub.f32 2.0, %v6405_v26  ;;  %17967 = vmatpush3.bf16.msra.mxu1 %v22472_v63  ;;  %17971 = vmatpush3.bf16.msra.mxu0 %v17968_v6  ;;  %v25243_v63 = vld [vmem:[#allocation57_spill] sm:$0xff]  ;;  %v25244_v6 = vld [vmem:[#allocation107_spill] sm:$0xff]  ;;  %v6502_v51 = vmul.f32 %v22311_v54, %v6470_v27  ;;  %v17984_v26 = vpack.c.bf16 %v18597_v49, %v18596_v28 }
 0x79f   : > { %v19470_v31 = vpop.eup %19469  ;;  %v6471_v36 = vmul.f32 %v19464_v1, %v6439_v53  ;;  %v6412_v34 = vmul.f32 %v19468_v30, %v6320_v25  ;;  %9041 = vrot.lane.b32.xlu0 %v25117_v10, %s19991_s10  ;;  %17973 = vmatprep.subr.bf16.mxu1 %v17972_v22  ;;  %v6329_v5 = vpop.xlane.xlu1 %6328  ;;  %v18592_v9 = vunpack.i.h.bf16 %v25244_v6  ;;  %v18591_v52 = vunpack.i.l.bf16 %v25244_v6  ;;  %v25248_v27 = vld [vmem:[#allocation59_spill] sm:$0xff] }
 0x7a0   : > { %v22523_v33 = vpop.xlane.xlu0 %6322  ;;  %v6469_v21 = vmul.f32 %v19466_v13, %v6437_v7  ;;  %v6410_v62 = vmul.f32 %v19470_v31, %v22481_v29  ;;  %17977 = vmatprep.subr.bf16.mxu0 %v17976_v61  ;;  %19479 = vrcp.f32 %v6329_v5  ;;  %9130 = vrot.lane.b32.xlu1 %v25243_v63, %s19991_s10  ;;  %v25251_v6 = vld [vmem:[#allocation111_spill] sm:$0xff] }
 0x7a1   : > { %19481 = vrcp.f32 %v22523_v33  ;;  %v6503_v25 = vmul.f32 %v22317_v39, %v6471_v36  ;;  %v6444_v1 = vsub.f32 2.0, %v6412_v34  ;;  %v17980_v54 = vpack.c.bf16 %v18592_v9, %v18591_v52 }
 0x7a2   : > { %v19472_v50 = vpop.eup %19471  ;;  %v6501_v29 = vmul.f32 %v22321_v46, %v6469_v21  ;;  %v6442_v14 = vsub.f32 2.0, %v6410_v62  ;;  %v25247_v46 = vld [vmem:[#allocation60_spill] sm:$0xff]  ;;  %v18607_v9 = vunpack.i.h.bf16 %v25251_v6  ;;  %v18606_v52 = vunpack.i.l.bf16 %v25251_v6 }
 0x7a3   : > { %v19474_v60 = vpop.eup %19473  ;;  %v6411_v13 = vmul.f32 %v19472_v50, %v22490_v2  ;;  %18699 = vrot.lane.b32.xlu0 %v25246_v56, %s19991_s10  ;;  %17030 = vmatprep.mubr.msk.f32.mxu0 %vm2839_vm2, %v6503_v25  ;;  %v6476_v16 = vmul.f32 %v19468_v30, %v6444_v1  ;;  %v25249_v30 = vld [vmem:[#allocation63_spill] sm:$0xff]  ;;  %v25261_v6 = vld [vmem:[#allocation112_spill] sm:$0xff] }
 0x7a4   : > { %v6338_v39 = vpop.xlane.xlu0 %6337  ;;  %v6409_v0 = vmul.f32 %v19474_v60, %v22492_v35  ;;  %17023 = vmatprep.mubr.msk.f32.mxu1 %vm2839_vm2, %v6501_v29  ;;  %9132 = vrot.lane.b32.xlu1 %v25247_v46, %s19991_s10  ;;  %v6474_v35 = vmul.f32 %v19470_v31, %v6442_v14  ;;  %v25252_v29 = vld [vmem:[#allocation62_spill] sm:$0xff] }
 0x7a5   : > { %19483 = vrcp.f32 %v6338_v39  ;;  %v6443_v32 = vsub.f32 2.0, %v6411_v13  ;;  %17024 = vmatmul.mubr.msk.f32.vlgmr.msra.gmra.mrb[114].mxu1 %vm2839_vm2, %v6502_v51  ;;  %17031 = vmatmul.mubr.msk.f32.vlgmr.msra.gmra.mrb[88].mxu0 %vm2839_vm2, %v6504_v4  ;;  %v6508_v17 = vmul.f32 %v22327_v19, %v6476_v16  ;;  %v17992_v51 = vpack.c.bf16 %v18607_v9, %v18606_v52  ;;  %v25255_v16 = vld [vmem:[#allocation67_spill] sm:$0xff] }
 0x7a6   : > { %v19476_v2 = vpop.eup %19475  ;;  %v6441_v43 = vsub.f32 2.0, %v6409_v0  ;;  %17975 = vmatpush3.bf16.msra.mxu1 %v17972_v22  ;;  %17979 = vmatpush3.bf16.msra.mxu0 %v17976_v61  ;;  %v25250_v22 = vld [vmem:[#allocation108_spill] sm:$0xff]  ;;  %v6506_v49 = vmul.f32 %v22330_v20, %v6474_v35  ;;  %v25254_v0 = vld [vmem:[#allocation65_spill] sm:$0xff]  ;;  %v18622_v9 = vunpack.i.h.bf16 %v25261_v6  ;;  %v18621_v52 = vunpack.i.l.bf16 %v25261_v6 }
 0x7a7   : > { %v19478_v53 = vpop.eup %19477  ;;  %v6475_v59 = vmul.f32 %v19472_v50, %v6443_v32  ;;  %v6416_v7 = vmul.f32 %v19476_v2, %v22508_v55  ;;  %9221 = vrot.lane.b32.xlu0 %v25248_v27, %s19991_s10  ;;  %17981 = vmatprep.subr.bf16.mxu1 %v17980_v54  ;;  %v18602_v61 = vunpack.i.h.bf16 %v25250_v22  ;;  %v18601_v31 = vunpack.i.l.bf16 %v25250_v22 }
 0x7a8   : > { %v6335_v36 = vpop.xlane.xlu0 %6334  ;;  %v6473_v34 = vmul.f32 %v19474_v60, %v6441_v43  ;;  %v6414_v21 = vmul.f32 %v19478_v53, %v22511_v38  ;;  %17985 = vmatprep.subr.bf16.mxu0 %v17984_v26  ;;  %9223 = vrot.lane.b32.xlu1 %v25249_v30, %s19991_s10  ;;  %v25253_v60 = vld [vmem:[#allocation66_spill] sm:$0xff] }
 0x7a9   : > { %19485 = vrcp.f32 %v6335_v36  ;;  %v6507_v62 = vmul.f32 %v22336_v23, %v6475_v59  ;;  %v6448_v25 = vsub.f32 2.0, %v6416_v7  ;;  %v17988_v19 = vpack.c.bf16 %v18602_v61, %v18601_v31  ;;  %v25256_v43 = vld [vmem:[#allocation110_spill] sm:$0xff]  ;;  %v25257_v59 = vld [vmem:[#allocation113_spill] sm:$0xff] }
 0x7aa   : > { %v19480_v55 = vpop.eup %19479  ;;  %v6505_v50 = vmul.f32 %v22339_v57, %v6473_v34  ;;  %v6446_v28 = vsub.f32 2.0, %v6414_v21  ;;  %v18612_v35 = vunpack.i.h.bf16 %v25256_v43  ;;  %v25258_v31 = vld [vmem:[#allocation69_spill] sm:$0xff] }
 0x7ab   : > { %v19482_v38 = vpop.eup %19481  ;;  %v6415_v1 = vmul.f32 %v19480_v55, %v6329_v5  ;;  %9312 = vrot.lane.b32.xlu0 %v25252_v29, %s19991_s10  ;;  %17044 = vmatprep.mubr.msk.f32.mxu0 %vm2839_vm2, %v6507_v62  ;;  %v6480_v5 = vmul.f32 %v19476_v2, %v6448_v25  ;;  %v18611_v2 = vunpack.i.l.bf16 %v25256_v43  ;;  %v25262_v25 = vld [vmem:[#allocation77_spill] sm:$0xff]  ;;  %v25277_v43 = vld [vmem:[#allocation20_spill] sm:$0xff] }
 0x7ac   : > { %v6413_v23 = vmul.f32 %v19482_v38, %v22523_v33  ;;  %17037 = vmatprep.mubr.msk.f32.mxu1 %vm2839_vm2, %v6505_v50  ;;  %9314 = vrot.lane.b32.xlu1 %v25253_v60, %s19991_s10  ;;  %v6478_v14 = vmul.f32 %v19478_v53, %v6446_v28  ;;  %v18617_v53 = vunpack.i.h.bf16 %v25257_v59  ;;  %v22607_v28 = vpack.c.bf16 %v18622_v9, %v18621_v52  ;;  %v25284_v52 = vld [vmem:[#allocation30_spill] sm:$0xff] }
 0x7ad   : > { %v6447_v57 = vsub.f32 2.0, %v6415_v1  ;;  %17038 = vmatmul.mubr.msk.f32.vlgmr.msra.gmra.mrb[116].mxu1 %vm2839_vm2, %v6506_v49  ;;  %17045 = vmatmul.mubr.msk.f32.vlgmr.msra.gmra.mrb[90].mxu0 %vm2839_vm2, %v6508_v17  ;;  %v6512_v21 = vmul.f32 %v22345_v24, %v6480_v5  ;;  %v25263_v17 = vld [vmem:[#allocation75_spill] sm:$0xff]  ;;  %v25265_v1 = vld [vmem:[#allocation81_spill] sm:$0xff] }
 0x7ae   : > { %v6445_v4 = vsub.f32 2.0, %v6413_v23  ;;  %17983 = vmatpush3.bf16.msra.mxu1 %v17980_v54  ;;  %17987 = vmatpush3.bf16.msra.mxu0 %v17984_v26  ;;  %v6510_v22 = vmul.f32 %v22348_v3, %v6478_v14  ;;  %v25264_v49 = vld [vmem:[#allocation79_spill] sm:$0xff]  ;;  %v25274_v14 = vld [vmem:[#allocation22_spill] sm:$0xff] }
 0x7af   : > { %v19484_v20 = vpop.eup %19483  ;;  %v6479_v13 = vmul.f32 %v19480_v55, %v6447_v57  ;;  %18704 = vrot.lane.b32.xlu0 %v25254_v0, %s19991_s10  ;;  %17989 = vmatprep.subr.bf16.mxu1 %v17988_v19  ;;  %v25260_v55 = vld [vmem:[#allocation71_spill] sm:$0xff]  ;;  %v25269_v57 = vld [vmem:[#allocation89_spill] sm:$0xff] }
 0x7b0   : > { %v6418_v33 = vmul.f32 %v19484_v20, %v6338_v39  ;;  %v6477_v32 = vmul.f32 %v19482_v38, %v6445_v4  ;;  %17993 = vmatprep.subr.bf16.mxu0 %v17992_v51  ;;  %18709 = vrot.lane.b32.xlu1 %v25255_v16, %s19991_s10  ;;  %v18616_v39 = vunpack.i.l.bf16 %v25257_v59  ;;  %v25268_v23 = vld [vmem:[#allocation87_spill] sm:$0xff]  ;;  %v25273_v4 = vld [vmem:[#allocation18_spill] sm:$0xff] }
 0x7b1   : > { %v6511_v54 = vmul.f32 %v22354_v42, %v6479_v13  ;;  %v25259_v42 = vld [vmem:[#allocation73_spill] sm:$0xff]  ;;  %v25272_v5 = vld [vmem:[#allocation95_spill] sm:$0xff] }
 0x7b2   : > { %v6450_v7 = vsub.f32 2.0, %v6418_v33  ;;  %v6509_v34 = vmul.f32 %v22356_v8, %v6477_v32  ;;  %v17996_v8 = vpack.c.bf16 %v18612_v35, %v18611_v2  ;;  %v22590_v3 = vpack.c.bf16 %v18617_v53, %v18616_v39  ;;  %v25275_v13 = vld [vmem:[#allocation25_spill] sm:$0xff]  ;;  %v22638_v35 = vpop.permute.xlu0 %8220  ;;  %v25280_v53 = vld [vmem:[#allocation23_spill] sm:$0xff] }
 0x7b3   : > { %v19486_v26 = vpop.eup %19485  ;;  %18714 = vrot.lane.b32.xlu0 %v25258_v31, %s19991_s10  ;;  %17058 = vmatprep.mubr.msk.f32.mxu0 %vm2839_vm2, %v6511_v54  ;;  %v25276_v32 = vld [vmem:[#allocation17_spill] sm:$0xff]  ;;  %v25278_v54 = vld [vmem:[#allocation26_spill] sm:$0xff] }
 0x7b4   : > { %v6417_v61 = vmul.f32 %v19486_v26, %v6335_v36  ;;  %17051 = vmatprep.mubr.msk.f32.mxu1 %vm2839_vm2, %v6509_v34  ;;  %18724 = vrot.lane.b32.xlu1 %v25259_v42, %s19991_s10  ;;  %v6482_v24 = vmul.f32 %v19484_v20, %v6450_v7  ;;  %v25271_v20 = vld [vmem:[#allocation93_spill] sm:$0xff]  ;;  %v25281_v34 = vld [vmem:[#allocation27_spill] sm:$0xff] }
 0x7b5   : > { %17052 = vmatmul.mubr.msk.f32.vlgmr.msra.gmra.mrb[118].mxu1 %vm2839_vm2, %v6510_v22  ;;  %17059 = vmatmul.mubr.msk.f32.vlgmr.msra.gmra.mrb[92].mxu0 %vm2839_vm2, %v6512_v21 }
 0x7b6   : > { %v6449_v62 = vsub.f32 2.0, %v6417_v61  ;;  %17991 = vmatpush3.bf16.msra.mxu1 %v17988_v19  ;;  %17995 = vmatpush3.bf16.msra.mxu0 %v17992_v51  ;;  %v6514_v38 = vmul.f32 %v22362_v58, %v6482_v24  ;;  %v25266_v58 = vld [vmem:[#allocation83_spill] sm:$0xff]  ;;  %v22628_v51 = vpop.permute.xlu1 %8222  ;;  %v25282_v61 = vld [vmem:[#allocation24_spill] sm:$0xff] }
 0x7b7   : > { %18719 = vrot.lane.b32.xlu0 %v25260_v55, %s19991_s10  ;;  %17997 = vmatprep.subr.bf16.mxu1 %v17996_v8  ;;  %v25270_v19 = vld [vmem:[#allocation91_spill] sm:$0xff] }
 0x7b8   : > { %v6481_v36 = vmul.f32 %v19486_v26, %v6449_v62  ;;  %18001 = vmatprep.subr.bf16.mxu0 %v22590_v3  ;;  %18734 = vrot.lane.b32.xlu1 %v25262_v25, %s19991_s10  ;;  %v25279_v26 = vld [vmem:[#allocation21_spill] sm:$0xff] }
 0x7ba   : > { %v6513_v50 = vmul.f32 %v22366_v37, %v6481_v36  ;;  %v25267_v37 = vld [vmem:[#allocation85_spill] sm:$0xff]  ;;  %v25283_v36 = vld [vmem:[#allocation28_spill] sm:$0xff] }
 0x7bb   : > { %18729 = vrot.lane.b32.xlu0 %v25263_v17, %s19991_s10 }
 0x7bc   : > { %17065 = vmatprep.mubr.msk.f32.mxu1 %vm2839_vm2, %v6513_v50  ;;  %18739 = vrot.lane.b32.xlu1 %v25264_v49, %s19991_s10 }
 0x7bd   : > { %17066 = vmatmul.mubr.msk.f32.vlgmr.msra.gmra.mrb[120].mxu1 %vm2839_vm2, %v6514_v38 }
 0x7be   : > { %17999 = vmatpush3.bf16.msra.mxu1 %v17996_v8 }
 0x7bf   : > { %18005 = vmatprep.subr.bf16.mxu1 %v22607_v28  ;;  %18744 = vrot.lane.b32.xlu0 %v25265_v1, %s19991_s10 }
 0x7c0   : > { %18749 = vrot.lane.b32.xlu1 %v25266_v58, %s19991_s10 }
 0x7c3   : > { %18754 = vrot.lane.b32.xlu0 %v25267_v37, %s19991_s10 }
 0x7c4   : > { %18759 = vrot.lane.b32.xlu1 %v25268_v23, %s19991_s10 }
 0x7c7   : > { %18764 = vrot.lane.b32.xlu0 %v25269_v57, %s19991_s10 }
 0x7c8   : > { %18769 = vrot.lane.b32.xlu1 %v25270_v19, %s19991_s10  ;;  %v25289_v19 = vld [vmem:[#allocation117_spill] sm:$0xff] }
 0x7c9   : > { %v18637_v57 = vunpack.i.h.bf16 %v25289_v19 }
 0x7cb   : > { %18774 = vrot.lane.b32.xlu0 %v25271_v20, %s19991_s10 }
 0x7cc   : > { %18779 = vrot.lane.b32.xlu1 %v25272_v5, %s19991_s10  ;;  %v25287_v5 = vld [vmem:[#allocation114_spill] sm:$0xff] }
 0x7cf   : > { %18784 = vrot.lane.b32.xlu0 %v25273_v4, %s19992_s20 }
 0x7d0   : > { %18789 = vrot.lane.b32.xlu1 %v25274_v14, %s19992_s20 }
 0x7d3   : > { %18794 = vrot.lane.b32.xlu0 %v25275_v13, %s19992_s20 }
 0x7d4   : > { %v6344_v33 = vpop.xlane.xlu1 %6343  ;;  %11278 = vrot.lane.b32.xlu1 %v25276_v32, %s19992_s20 }
 0x7d5   : > { %19487 = vrcp.f32 %v6344_v33 }
 0x7d7   : > { %11280 = vrot.lane.b32.xlu0 %v25277_v43, %s19992_s20 }
 0x7d8   : > { %v6341_v2 = vpop.xlane.xlu1 %6340  ;;  %18799 = vrot.lane.b32.xlu1 %v25278_v54, %s19992_s20 }
 0x7d9   : > { %19489 = vrcp.f32 %v6341_v2 }
 0x7db   : > { %11369 = vrot.lane.b32.xlu0 %v25279_v26, %s19992_s20  ;;  %v25285_v26 = vld [vmem:[#allocation115_spill] sm:$0xff] }
 0x7dc   : > { %v6350_v59 = vpop.xlane.xlu1 %6349  ;;  %11371 = vrot.lane.b32.xlu1 %v25280_v53, %s19992_s20  ;;  %v6356_v39 = vpop.xlane.xlu0 %6355  ;;  %v18627_v53 = vunpack.i.h.bf16 %v25285_v26 }
 0x7dd   : > { %19491 = vrcp.f32 %v6350_v59 }
 0x7de   : > { %19493 = vrcp.f32 %v6356_v39 }
 0x7df   : > { %v19488_v7 = vpop.eup %19487  ;;  %18804 = vrot.lane.b32.xlu0 %v25281_v34, %s19992_s20 }
 0x7e0   : > { %v6420_v21 = vmul.f32 %v19488_v7, %v6344_v33  ;;  %v6347_v22 = vpop.xlane.xlu1 %6346  ;;  %11460 = vrot.lane.b32.xlu1 %v25282_v61, %s19992_s20  ;;  %v6362_v62 = vpop.xlane.xlu0 %6361 }
 0x7e1   : > { %19495 = vrcp.f32 %v6347_v22 }
 0x7e2   : > { %19497 = vrcp.f32 %v6362_v62  ;;  %v6452_v24 = vsub.f32 2.0, %v6420_v21 }
 0x7e3   : > { %v19490_v8 = vpop.eup %19489  ;;  %11462 = vrot.lane.b32.xlu0 %v25283_v36, %s19992_s20 }
 0x7e4   : > { %v6419_v6 = vmul.f32 %v19490_v8, %v6341_v2  ;;  %v6353_v9 = vpop.xlane.xlu1 %6352  ;;  %18809 = vrot.lane.b32.xlu1 %v25284_v52, %s19992_s20  ;;  %v22654_v50 = vpop.permute.xlu0 %18654  ;;  %v6484_v14 = vmul.f32 %v19488_v7, %v6452_v24  ;;  %v18626_v2 = vunpack.i.l.bf16 %v25285_v26 }
 0x7e5   : > { %19499 = vrcp.f32 %v6353_v9 }
 0x7e6   : > { %v6451_v38 = vsub.f32 2.0, %v6419_v6  ;;  %v6516_v61 = vmul.f32 %v22381_v48, %v6484_v14 }
 0x7e7   : > { %v19492_v4 = vpop.eup %19491 }
 0x7e8   : > { %v19494_v13 = vpop.eup %19493  ;;  %v6483_v33 = vmul.f32 %v19490_v8, %v6451_v38  ;;  %v6422_v32 = vmul.f32 %v19492_v4, %v6350_v59  ;;  %v6359_v43 = vpop.xlane.xlu1 %6358  ;;  %v18008_v8 = vpack.c.bf16 %v18627_v53, %v18626_v2  ;;  %v18632_v53 = vunpack.i.h.bf16 %v25287_v5 }
 0x7e9   : > { %v22656_v54 = vpop.permute.xlu0 %8313  ;;  %19501 = vrcp.f32 %v6359_v43  ;;  %v6424_v6 = vmul.f32 %v19494_v13, %v6356_v39  ;;  %v18631_v2 = vunpack.i.l.bf16 %v25287_v5  ;;  %v18636_v5 = vunpack.i.l.bf16 %v25289_v19 }
 0x7ea   : > { %v6515_v34 = vmul.f32 %v22386_v45, %v6483_v33  ;;  %v6454_v36 = vsub.f32 2.0, %v6422_v32 }
 0x7eb   : > { %v19496_v21 = vpop.eup %19495  ;;  %v6456_v26 = vsub.f32 2.0, %v6424_v6  ;;  %v18020_v19 = vpack.c.bf16 %v18637_v57, %v18636_v5 }
 0x7ec   : > { %v19498_v52 = vpop.eup %19497  ;;  %v6421_v7 = vmul.f32 %v19496_v21, %v6347_v22  ;;  %v22662_v24 = vpop.permute.xlu1 %8311  ;;  %17072 = vmatprep.mubr.msk.f32.mxu0 %vm2839_vm2, %v6515_v34  ;;  %v6486_v33 = vmul.f32 %v19492_v4, %v6454_v36  ;;  %v25288_v4 = vld [vmem:[#allocation126_spill] sm:$0xff] }
 0x7ed   : > { %v22665_v59 = vpop.permute.xlu0 %8402  ;;  %17073 = vmatmul.mubr.msk.f32.vlgmr.msra.gmra.mrb[94].mxu0 %vm2839_vm2, %v6516_v61  ;;  %v6426_v48 = vmul.f32 %v19498_v52, %v6362_v62  ;;  %v6488_v62 = vmul.f32 %v19494_v13, %v6456_v26  ;;  %v25290_v13 = vld [vmem:[#allocation129_spill] sm:$0xff] }
 0x7ee   : > { %v6453_v38 = vsub.f32 2.0, %v6421_v7  ;;  %18003 = vmatpush3.bf16.msra.mxu0 %v22590_v3  ;;  %v6518_v36 = vmul.f32 %v25288_v4, %v6486_v33  ;;  %v25296_v4 = vld [vmem:[#allocation123_spill] sm:$0xff] }
 0x7ef   : > { %v19500_v45 = vpop.eup %19499  ;;  %18010 = vmatprep.subr.msk.bf16.mxu0 %vm20836_vm1, %v18008_v8  ;;  %v6458_v6 = vsub.f32 2.0, %v6426_v48 }
 0x7f0   : > { %v6485_v39 = vmul.f32 %v19496_v21, %v6453_v38  ;;  %v6423_v22 = vmul.f32 %v19500_v45, %v6353_v9  ;;  %v22671_v32 = vpop.permute.xlu1 %18659  ;;  %v18014_v38 = vpack.c.bf16 %v18632_v53, %v18631_v2  ;;  %v25294_v53 = vld [vmem:[#allocation130_spill] sm:$0xff] }
 0x7f1   : > { %v22673_v34 = vpop.permute.xlu0 %18664  ;;  %v6490_v26 = vmul.f32 %v19498_v52, %v6458_v6  ;;  %v25293_v52 = vld [vmem:[#allocation116_spill] sm:$0xff]  ;;  %v25297_v6 = vld [vmem:[#allocation121_spill] sm:$0xff] }
 0x7f2   : > { %v6455_v61 = vsub.f32 2.0, %v6423_v22  ;;  %v6517_v3 = vmul.f32 %v22394_v41, %v6485_v39 }
 0x7f3   : > { %v19502_v7 = vpop.eup %19501 }
 0x7f4   : > { %v6487_v23 = vmul.f32 %v19500_v45, %v6455_v61  ;;  %v6425_v20 = vmul.f32 %v19502_v7, %v6359_v43  ;;  %v22679_v21 = vpop.permute.xlu1 %8404  ;;  %17079 = vmatprep.mubr.msk.f32.mxu1 %vm2839_vm2, %v6517_v3  ;;  %v25291_v45 = vld [vmem:[#allocation127_spill] sm:$0xff]  ;;  %v25295_v61 = vld [vmem:[#allocation128_spill] sm:$0xff] }
 0x7f5   : > { %v22682_v9 = vpop.permute.xlu0 %8495  ;;  %17080 = vmatmul.mubr.msk.f32.vlgmr.msra.gmra.mrb[122].mxu1 %vm2839_vm2, %v6518_v36  ;;  %v6520_v43 = vmul.f32 %v25291_v45, %v6488_v62  ;;  %v6522_v3 = vmul.f32 %v25295_v61, %v6490_v26  ;;  %v18647_v36 = vunpack.i.h.bf16 %v25296_v4  ;;  %v18646_v62 = vunpack.i.l.bf16 %v25296_v4  ;;  %v25299_v45 = vld [vmem:[#allocation124_spill] sm:$0xff] }
 0x7f6   : > { %v6457_v41 = vsub.f32 2.0, %v6425_v20  ;;  %18007 = vmatpush3.bf16.msra.mxu1 %v22607_v28  ;;  %v6519_v33 = vmul.f32 %v25290_v13, %v6487_v23  ;;  %v25292_v20 = vld [vmem:[#allocation118_spill] sm:$0xff]  ;;  %v18651_v26 = vunpack.i.l.bf16 %v25299_v45  ;;  %v18661_v4 = vunpack.i.l.bf16 %v22671_v32 }
 0x7f7   : > { %18016 = vmatprep.subr.msk.bf16.mxu1 %vm20836_vm1, %v18014_v38  ;;  %v18642_v28 = vunpack.i.h.bf16 %v25292_v20  ;;  %v18641_v23 = vunpack.i.l.bf16 %v25292_v20  ;;  %v18032_v13 = vpack.c.bf16 %v18647_v36, %v18646_v62  ;;  %v18667_v62 = vunpack.i.h.bf16 %v22673_v34 }
 0x7f8   : > { %v6489_v48 = vmul.f32 %v19502_v7, %v6457_v41  ;;  %v22692_v39 = vpop.permute.xlu1 %8493  ;;  %17086 = vmatprep.mubr.msk.f32.mxu0 %vm2839_vm2, %v6519_v33  ;;  %v25298_v33 = vld [vmem:[#allocation119_spill] sm:$0xff] }
 0x7f9   : > { %v22695_v22 = vpop.permute.xlu0 %8584  ;;  %17087 = vmatmul.mubr.msk.f32.vlgmr.msra.gmra.mrb[96].mxu0 %vm2839_vm2, %v6520_v43  ;;  %v18652_v43 = vunpack.i.h.bf16 %v25299_v45 }
 0x7fa   : > { %18013 = vmatpush3.bf16.xpose.msk.msra.mxu0 %vm20836_vm1, %v18008_v8  ;;  %17100 = vmatprep.mubr.msk.f32.mxu0 %vm1412_vm0, %v25293_v52  ;;  %v6521_v2 = vmul.f32 %v25294_v53, %v6489_v48  ;;  %v18026_v8 = vpack.c.bf16 %v18642_v28, %v18641_v23  ;;  %v25300_v48 = vld [vmem:[#allocation122_spill] sm:$0xff]  ;;  %v18657_v28 = vunpack.i.h.bf16 %v22654_v50  ;;  %v18656_v23 = vunpack.i.l.bf16 %v22654_v50  ;;  %v25301_v53 = vld [vmem:[#allocation120_spill] sm:$0xff] }
 0x7fb   : > { %18022 = vmatprep.subr.msk.bf16.mxu0 %vm20836_vm1, %v18020_v19  ;;  %v18038_v52 = vpack.c.bf16 %v18652_v43, %v18651_v26  ;;  %v18662_v50 = vunpack.i.h.bf16 %v22671_v32 }
 0x7fc   : > { %v18670_v57 = vpop.permute.xlu1 %18669  ;;  %17093 = vmatprep.mubr.msk.f32.mxu1 %vm2839_vm2, %v6521_v2  ;;  %v18044_v61 = vpack.c.bf16 %v18657_v28, %v18656_v23 }
 0x7fd   : > { %v22709_v7 = vpop.permute.xlu0 %18674  ;;  %17094 = vmatmul.mubr.msk.f32.vlgmr.msra.gmra.mrb[124].mxu1 %vm2839_vm2, %v6522_v3  ;;  %v25302_v3 = vld [vmem:[#allocation125_spill] sm:$0xff] }
 0x7fe   : > { %17107 = vmatprep.mubr.msk.f32.mxu1 %vm1412_vm0, %v25297_v6  ;;  %v18050_v6 = vpack.c.bf16 %v18662_v50, %v18661_v4  ;;  %v18677_v45 = vunpack.i.h.bf16 %v22709_v7  ;;  %v18676_v43 = vunpack.i.l.bf16 %v22709_v7 }
 0x7ff   : > { %18019 = vmatpush3.bf16.xpose.msk.msra.mxu1 %vm20836_vm1, %v18014_v38 }
 0x800   : > { %18028 = vmatprep.subr.msk.bf16.mxu1 %vm20836_vm1, %v18026_v8  ;;  %v22720_v5 = vpop.permute.xlu1 %8586 }
 0x801   : > { %v22722_v41 = vpop.permute.xlu0 %8677  ;;  %17101 = vmatmul.mubr.msk.f32.vlgmr.msra.gmra.mrb[98].mxu0 %vm1412_vm0, %v25298_v33  ;;  %v18671_v33 = vunpack.i.l.bf16 %v18670_v57 }
 0x802   : > { %18025 = vmatpush3.bf16.xpose.msk.msra.mxu0 %vm20836_vm1, %v18020_v19  ;;  %17114 = vmatprep.mubr.msk.f32.mxu0 %vm1412_vm0, %v25300_v48 }
 0x803   : > { %18034 = vmatprep.subr.msk.bf16.mxu0 %vm20836_vm1, %v18032_v13 }
 0x804   : > { %v8676_v38 = vpop.permute.xlu1 %8675 }
 0x805   : > { %v8767_v20 = vpop.permute.xlu0 %8766 }
 0x806   : > { %17108 = vmatmul.mubr.msk.f32.vlgmr.msra.gmra.mrb[126].mxu1 %vm1412_vm0, %v25301_v53 }
 0x807   : > { %18031 = vmatpush3.bf16.xpose.msk.msra.mxu1 %vm20836_vm1, %v18026_v8  ;;  %17121 = vmatprep.mubr.msk.f32.mxu1 %vm1412_vm0, %v22638_v35  ;;  %v18666_v8 = vunpack.i.l.bf16 %v22673_v34  ;;  %v18672_v34 = vunpack.i.h.bf16 %v18670_v57  ;;  %v18068_v57 = vpack.c.bf16 %v18677_v45, %v18676_v43 }
 0x808   : > { %18040 = vmatprep.subr.msk.bf16.mxu1 %vm20836_vm1, %v18038_v52  ;;  %v18680_v19 = vpop.permute.xlu1 %18679 }
 0x809   : > { %v18685_v2 = vpop.permute.xlu0 %18684  ;;  %17115 = vmatmul.mubr.msk.f32.vlgmr.msra.gmra.mrb[100].mxu0 %vm1412_vm0, %v25302_v3  ;;  %v18062_v26 = vpack.c.bf16 %v18672_v34, %v18671_v33  ;;  %v18682_v7 = vunpack.i.h.bf16 %v18680_v19  ;;  %v18681_v48 = vunpack.i.l.bf16 %v18680_v19 }
 0x80a   : > { %18037 = vmatpush3.bf16.xpose.msk.msra.mxu0 %vm20836_vm1, %v18032_v13  ;;  %17128 = vmatprep.mubr.msk.f32.mxu0 %vm1412_vm0, %v22662_v24  ;;  %v18056_v13 = vpack.c.bf16 %v18667_v62, %v18666_v8  ;;  %v18687_v28 = vunpack.i.h.bf16 %v18685_v2  ;;  %v18686_v23 = vunpack.i.l.bf16 %v18685_v2 }
 0x80b   : > { %18046 = vmatprep.subr.msk.bf16.mxu0 %vm20836_vm1, %v18044_v61 }
 0x80c   : > { %v8769_v35 = vpop.permute.xlu1 %8768  ;;  %v18080_v53 = vpack.c.bf16 %v18687_v28, %v18686_v23 }
 0x80d   : > { %v22754_v36 = vpop.permute.xlu0 %8859 }
 0x80e   : > { %17122 = vmatmul.mubr.msk.f32.vlgmr.msra.gmra.mrb[128].mxu1 %vm1412_vm0, %v22628_v51 }
 0x80f   : > { %18043 = vmatpush3.bf16.xpose.msk.msra.mxu1 %vm20836_vm1, %v18038_v52  ;;  %17135 = vmatprep.mubr.msk.f32.mxu1 %vm1412_vm0, %v22665_v59  ;;  %v18074_v52 = vpack.c.bf16 %v18682_v7, %v18681_v48 }
 0x810   : > { %18052 = vmatprep.subr.msk.bf16.mxu1 %vm20836_vm1, %v18050_v6  ;;  %v8858_v24 = vpop.permute.xlu1 %8857 }
 0x811   : > { %v8949_v32 = vpop.permute.xlu0 %8948  ;;  %17129 = vmatmul.mubr.msk.f32.vlgmr.msra.gmra.mrb[102].mxu0 %vm1412_vm0, %v22656_v54 }
 0x812   : > { %18049 = vmatpush3.bf16.xpose.msk.msra.mxu0 %vm20836_vm1, %v18044_v61  ;;  %17142 = vmatprep.mubr.msk.f32.mxu0 %vm1412_vm0, %v22692_v39 }
 0x813   : > { %18058 = vmatprep.subr.msk.bf16.mxu0 %vm20836_vm1, %v18056_v13 }
 0x814   : > { %v18690_v51 = vpop.permute.xlu1 %18689 }
 0x815   : > { %v9040_v59 = vpop.permute.xlu0 %9039  ;;  %v18692_v19 = vunpack.i.h.bf16 %v18690_v51  ;;  %v18691_v2 = vunpack.i.l.bf16 %v18690_v51 }
 0x816   : > { %17136 = vmatmul.mubr.msk.f32.vlgmr.msra.gmra.mrb[130].mxu1 %vm1412_vm0, %v22679_v21 }
 0x817   : > { %18055 = vmatpush3.bf16.xpose.msk.msra.mxu1 %vm20836_vm1, %v18050_v6  ;;  %17149 = vmatprep.mubr.msk.f32.mxu1 %vm1412_vm0, %v22695_v22  ;;  %v18086_v50 = vpack.c.bf16 %v18692_v19, %v18691_v2 }
 0x818   : > { %18064 = vmatprep.subr.msk.bf16.mxu1 %vm20836_vm1, %v18062_v26  ;;  %v8951_v54 = vpop.permute.xlu1 %8950 }
 0x819   : > { %v9042_v39 = vpop.permute.xlu0 %9041  ;;  %17143 = vmatmul.mubr.msk.f32.vlgmr.msra.gmra.mrb[104].mxu0 %vm1412_vm0, %v22682_v9 }
 0x81a   : > { %18061 = vmatpush3.bf16.xpose.msk.msra.mxu0 %vm20836_vm1, %v18056_v13  ;;  %17156 = vmatprep.mubr.msk.f32.mxu0 %vm1412_vm0, %v8676_v38 }
 0x81b   : > { %18070 = vmatprep.subr.msk.bf16.mxu0 %vm20836_vm1, %v18068_v57 }
 0x81c   : > { %v18695_v21 = vpop.permute.xlu1 %18694 }
 0x81d   : > { %v18700_v22 = vpop.permute.xlu0 %18699  ;;  %v18697_v61 = vunpack.i.h.bf16 %v18695_v21  ;;  %v18696_v3 = vunpack.i.l.bf16 %v18695_v21 }
 0x81e   : > { %17150 = vmatmul.mubr.msk.f32.vlgmr.msra.gmra.mrb[132].mxu1 %vm1412_vm0, %v22720_v5  ;;  %v18702_v62 = vunpack.i.h.bf16 %v18700_v22  ;;  %v18701_v8 = vunpack.i.l.bf16 %v18700_v22 }
 0x81f   : > { %18067 = vmatpush3.bf16.xpose.msk.msra.mxu1 %vm20836_vm1, %v18062_v26  ;;  %17163 = vmatprep.mubr.msk.f32.mxu1 %vm1412_vm0, %v8767_v20  ;;  %v18092_v4 = vpack.c.bf16 %v18697_v61, %v18696_v3 }
 0x820   : > { %18076 = vmatprep.subr.msk.bf16.mxu1 %vm20836_vm1, %v18074_v52  ;;  %v9131_v9 = vpop.permute.xlu1 %9130  ;;  %v18098_v13 = vpack.c.bf16 %v18702_v62, %v18701_v8 }
 0x821   : > { %v9222_v38 = vpop.permute.xlu0 %9221  ;;  %17157 = vmatmul.mubr.msk.f32.vlgmr.msra.gmra.mrb[106].mxu0 %vm1412_vm0, %v22722_v41 }
 0x822   : > { %18073 = vmatpush3.bf16.xpose.msk.msra.mxu0 %vm20836_vm1, %v18068_v57  ;;  %17170 = vmatprep.mubr.msk.f32.mxu0 %vm1412_vm0, %v8858_v24 }
 0x823   : > { %18082 = vmatprep.subr.msk.bf16.mxu0 %vm20836_vm1, %v18080_v53 }
 0x824   : > { %v9133_v5 = vpop.permute.xlu1 %9132 }
 0x825   : > { %v9313_v20 = vpop.permute.xlu0 %9312 }
 0x826   : > { %17164 = vmatmul.mubr.msk.f32.vlgmr.msra.gmra.mrb[134].mxu1 %vm1412_vm0, %v8769_v35 }
 0x827   : > { %18079 = vmatpush3.bf16.xpose.msk.msra.mxu1 %vm20836_vm1, %v18074_v52  ;;  %17177 = vmatprep.mubr.msk.f32.mxu1 %vm1412_vm0, %v8949_v32 }
 0x828   : > { %18088 = vmatprep.subr.msk.bf16.mxu1 %vm20836_vm1, %v18086_v50  ;;  %v9224_v41 = vpop.permute.xlu1 %9223 }
 0x829   : > { %17171 = vmatmul.mubr.msk.f32.vlgmr.msra.gmra.mrb[108].mxu0 %vm1412_vm0, %v22754_v36  ;;  %v18705_v6 = vpop.permute.xlu0 %18704 }
 0x82a   : > { %18085 = vmatpush3.bf16.xpose.msk.msra.mxu0 %vm20836_vm1, %v18080_v53  ;;  %17184 = vmatprep.mubr.msk.f32.mxu0 %vm1412_vm0, %v9040_v59  ;;  %v18707_v24 = vunpack.i.h.bf16 %v18705_v6  ;;  %v18706_v32 = vunpack.i.l.bf16 %v18705_v6 }
 0x82b   : > { %18094 = vmatprep.subr.msk.bf16.mxu0 %vm20836_vm1, %v18092_v4 }
 0x82c   : > { %v9315_v35 = vpop.permute.xlu1 %9314  ;;  %v18104_v33 = vpack.c.bf16 %v18707_v24, %v18706_v32 }
 0x82d   : > { %v18715_v34 = vpop.permute.xlu0 %18714 }
 0x82e   : > { %17178 = vmatmul.mubr.msk.f32.vlgmr.msra.gmra.mrb[136].mxu1 %vm1412_vm0, %v8951_v54  ;;  %v18717_v45 = vunpack.i.h.bf16 %v18715_v34  ;;  %v18716_v43 = vunpack.i.l.bf16 %v18715_v34 }
 0x82f   : > { %18091 = vmatpush3.bf16.xpose.msk.msra.mxu1 %vm20836_vm1, %v18086_v50  ;;  %17191 = vmatprep.mubr.msk.f32.mxu1 %vm1412_vm0, %v9131_v9 }
 0x830   : > { %18100 = vmatprep.subr.msk.bf16.mxu1 %vm20836_vm1, %v18098_v13  ;;  %v18710_v36 = vpop.permute.xlu1 %18709 }
 0x831   : > { %17185 = vmatmul.mubr.msk.f32.vlgmr.msra.gmra.mrb[110].mxu0 %vm1412_vm0, %v9042_v39  ;;  %v18712_v51 = vunpack.i.h.bf16 %v18710_v36  ;;  %v18711_v59 = vunpack.i.l.bf16 %v18710_v36  ;;  %v18720_v54 = vpop.permute.xlu0 %18719  ;;  %v22833_v39 = vpack.c.bf16 %v18717_v45, %v18716_v43 }
 0x832   : > { %18097 = vmatpush3.bf16.xpose.msk.msra.mxu0 %vm20836_vm1, %v18092_v4  ;;  %17198 = vmatprep.mubr.msk.f32.mxu0 %vm1412_vm0, %v9222_v38  ;;  %v18722_v57 = vunpack.i.h.bf16 %v18720_v54  ;;  %v18721_v7 = vunpack.i.l.bf16 %v18720_v54 }
 0x833   : > { %18105 = vmatprep.subr.bf16.mxu0 %v18104_v33  ;;  %v18108_v26 = vpack.c.bf16 %v18712_v51, %v18711_v59 }
 0x834   : > { %v22837_v48 = vpack.c.bf16 %v18722_v57, %v18721_v7 }
 0x836   : > { %17192 = vmatmul.mubr.msk.f32.vlgmr.msra.gmra.mrb[138].mxu1 %vm1412_vm0, %v9133_v5 }
 0x837   : > { %18103 = vmatpush3.bf16.xpose.msk.msra.mxu1 %vm20836_vm1, %v18098_v13  ;;  %17205 = vmatprep.mubr.msk.f32.mxu1 %vm1412_vm0, %v9313_v20 }
 0x838   : > { %18109 = vmatprep.subr.bf16.mxu1 %v18108_v26 }
 0x839   : > { %17199 = vmatmul.mubr.msk.f32.vlgmr.msra.gmra.mrb[112].mxu0 %vm1412_vm0, %v9224_v41 }
 0x83a   : > { %18107 = vmatpush3.bf16.msra.mxu0 %v18104_v33 }
 0x83b   : > { %18113 = vmatprep.subr.bf16.mxu0 %v22833_v39 }
 0x83e   : > { %17206 = vmatmul.mubr.msk.f32.vlgmr.msra.gmra.mrb[140].mxu1 %vm1412_vm0, %v9315_v35 }
 0x83f   : > { %18111 = vmatpush3.bf16.msra.mxu1 %v18108_v26 }
 0x840   : > { %18117 = vmatprep.subr.bf16.mxu1 %v22837_v48 }
 0x858   : > { %v22840_v21 = vpop.f32.mrb[82].mxu0 }
 0x859   : > { %25303 = vst [vmem:[#allocation49_spill] sm:$0xff] %v22840_v21  ;;  %v22842_v22 = vpop.f32.mrb[83].mxu0 }
 0x85a   : > { %25304 = vst [vmem:[#allocation107_spill] sm:$0xff] %v22842_v22 }
 0x863   : > { %v22846_v23 = vpop.f32.mrb[110].mxu1 }
 0x864   : > { %25305 = vst [vmem:[#allocation109_spill] sm:$0xff] %v22846_v23  ;;  %v22848_v52 = vpop.f32.mrb[111].mxu1 }
 0x865   : > { %25306 = vst [vmem:[#allocation64_spill] sm:$0xff] %v22848_v52 }
 0x867   : > { %v22852_v38 = vpop.f32.mrb[84].mxu0 }
 0x868   : > { %25307 = vst [vmem:[#allocation108_spill] sm:$0xff] %v22852_v38  ;;  %v22854_v53 = vpop.f32.mrb[85].mxu0 }
 0x869   : > { %25308 = vst [vmem:[#allocation111_spill] sm:$0xff] %v22854_v53 }
 0x870   : > { %v22858_v2 = vpop.f32.mrb[112].mxu1  ;;  %v22860_v5 = vpop.f32.mrb[86].mxu0 }
 0x871   : > { %25309 = vst [vmem:[#allocation110_spill] sm:$0xff] %v22858_v2  ;;  %25310 = vst [vmem:[#allocation113_spill] sm:$0xff] %v22860_v5  ;;  %v22862_v20 = vpop.f32.mrb[113].mxu1  ;;  %v22864_v61 = vpop.f32.mrb[87].mxu0 }
 0x872   : > { %25311 = vst [vmem:[#allocation112_spill] sm:$0xff] %v22862_v20  ;;  %25312 = vst [vmem:[#allocation18_spill] sm:$0xff] %v22864_v61 }
 0x878   : > { %v22870_v41 = vpop.f32.mrb[114].mxu1  ;;  %v22872_v4 = vpop.f32.mrb[88].mxu0 }
 0x879   : > { %25313 = vst [vmem:[#allocation22_spill] sm:$0xff] %v22870_v41  ;;  %25314 = vst [vmem:[#allocation25_spill] sm:$0xff] %v22872_v4  ;;  %v22874_v62 = vpop.f32.mrb[115].mxu1  ;;  %v22876_v8 = vpop.f32.mrb[89].mxu0 }
 0x87a   : > { %25315 = vst [vmem:[#allocation17_spill] sm:$0xff] %v22874_v62  ;;  %25316 = vst [vmem:[#allocation20_spill] sm:$0xff] %v22876_v8 }
 0x880   : > { %v22882_v24 = vpop.f32.mrb[116].mxu1  ;;  %v22884_v32 = vpop.f32.mrb[90].mxu0 }
 0x881   : > { %25317 = vst [vmem:[#allocation26_spill] sm:$0xff] %v22882_v24  ;;  %25318 = vst [vmem:[#allocation21_spill] sm:$0xff] %v22884_v32  ;;  %v22886_v13 = vpop.f32.mrb[117].mxu1  ;;  %v22888_v36 = vpop.f32.mrb[91].mxu0 }
 0x882   : > { %25319 = vst [vmem:[#allocation23_spill] sm:$0xff] %v22886_v13  ;;  %25320 = vst [vmem:[#allocation27_spill] sm:$0xff] %v22888_v36 }
 0x888   : > { %v22894_v51 = vpop.f32.mrb[118].mxu1  ;;  %v22896_v59 = vpop.f32.mrb[92].mxu0 }
 0x889   : > { %25321 = vst [vmem:[#allocation24_spill] sm:$0xff] %v22894_v51  ;;  %25322 = vst [vmem:[#allocation28_spill] sm:$0xff] %v22896_v59  ;;  %v22898_v45 = vpop.f32.mrb[119].mxu1  ;;  %v22900_v43 = vpop.f32.mrb[93].mxu0 }
 0x88a   : > { %25323 = vst [vmem:[#allocation30_spill] sm:$0xff] %v22898_v45  ;;  %25324 = vst [vmem:[#allocation115_spill] sm:$0xff] %v22900_v43 }
 0x890   : > { %v22906_v57 = vpop.f32.mrb[120].mxu1 }
 0x891   : > { %25325 = vst [vmem:[#allocation114_spill] sm:$0xff] %v22906_v57  ;;  %v22908_v7 = vpop.f32.mrb[121].mxu1 }
 0x892   : > { %25326 = vst [vmem:[#allocation126_spill] sm:$0xff] %v22908_v7 }
 0x8c0   : > { %v22912_v34 = vpop.f32.mrb[94].mxu0 }
 0x8c1   : > { %25327 = vst [vmem:[#allocation117_spill] sm:$0xff] %v22912_v34  ;;  %v22914_v6 = vpop.f32.mrb[95].mxu0  ;;  %v22938_v34 = vld [vmem:[#allocation7 + $0x20] sm:$0xff] }
 0x8c2   : > { %25328 = vst [vmem:[#allocation129_spill] sm:$0xff] %v22914_v6  ;;  %v22936_v6 = vld [vmem:[#allocation7 + $0x28] sm:$0xff] }
 0x8c8   : > { %v22918_v9 = vpop.f32.mrb[122].mxu1 }
 0x8c9   : > { %25329 = vst [vmem:[#allocation127_spill] sm:$0xff] %v22918_v9  ;;  %v22920_v26 = vpop.f32.mrb[123].mxu1 }
 0x8ca   : > { %25330 = vst [vmem:[#allocation118_spill] sm:$0xff] %v22920_v26 }
 0x8cc   : > { %v22924_v28 = vpop.f32.mrb[96].mxu0 }
 0x8cd   : > { %25331 = vst [vmem:[#allocation116_spill] sm:$0xff] %v22924_v28  ;;  %v22926_v35 = vpop.f32.mrb[97].mxu0 }
 0x8ce   : > { %25332 = vst [vmem:[#allocation130_spill] sm:$0xff] %v22926_v35 }
 0x8d0   : > { %v22930_v50 = vpop.f32.mrb[124].mxu1 }
 0x8d1   : > { %25333 = vst [vmem:[#allocation128_spill] sm:$0xff] %v22930_v50  ;;  %v22932_v19 = vpop.f32.mrb[125].mxu1 }
 0x8d2   : > { %25334 = vst [vmem:[#allocation123_spill] sm:$0xff] %v22932_v19 }
 0x8d4   : > { %v17102_v7 = vpop.f32.mrb[98].mxu0 }
 0x8d5   : > { %v22941_v54 = vadd.f32 %v17102_v7, %v22936_v6  ;;  %v8029_v26 = vpop.f32.mrb[99].mxu0 }
 0x8d6   : > { %v22944_v9 = vadd.f32 %v22938_v34, %v8029_v26 }
 0x8d7   : > { %v9441_v33 = vsel %vm2839_vm2, %v22941_v54, -inf }
 0x8d8   : > { %9442 = vmax.xlane.f32.xlu1 %v9441_v33  ;;  %v9438_v35 = vsel %vm2839_vm2, %v22944_v9, -inf }
 0x8d9   : > { %9439 = vmax.xlane.f32.xlu0 %v9438_v35  ;;  %v17109_v3 = vpop.f32.mrb[126].mxu1 }
 0x8da   : > { %v22951_v19 = vadd.f32 %v17109_v3, %v22936_v6  ;;  %v8120_v50 = vpop.f32.mrb[127].mxu1 }
 0x8db   : > { %v22954_v7 = vadd.f32 %v22938_v34, %v8120_v50 }
 0x8dc   : > { %v17116_v28 = vpop.f32.mrb[100].mxu0  ;;  %v9447_v26 = vsel %vm2839_vm2, %v22951_v19, -inf }
 0x8dd   : > { %v22959_v57 = vadd.f32 %v17116_v28, %v22936_v6  ;;  %v8211_v33 = vpop.f32.mrb[101].mxu0  ;;  %9448 = vmax.xlane.f32.xlu0 %v9447_v26  ;;  %v9444_v3 = vsel %vm2839_vm2, %v22954_v7, -inf }
 0x8de   : > { %v22964_v43 = vadd.f32 %v22938_v34, %v8211_v33 }
 0x8df   : > { %v9453_v35 = vsel %vm2839_vm2, %v22959_v57, -inf }
 0x8e0   : > { %9454 = vmax.xlane.f32.xlu1 %v9453_v35  ;;  %v9450_v26 = vsel %vm2839_vm2, %v22964_v43, -inf }
 0x8e1   : > { %9445 = vmax.xlane.f32.xlu0 %v9444_v3  ;;  %v17123_v50 = vpop.f32.mrb[128].mxu1 }
 0x8e2   : > { %v8302_v59 = vpop.f32.mrb[129].mxu1  ;;  %v22969_v45 = vadd.f32 %v17123_v50, %v22936_v6 }
 0x8e3   : > { %v22982_v36 = vadd.f32 %v22938_v34, %v8302_v59 }
 0x8e4   : > { %v17130_v28 = vpop.f32.mrb[102].mxu0  ;;  %v9459_v50 = vsel %vm2839_vm2, %v22969_v45, -inf }
 0x8e5   : > { %v22974_v51 = vadd.f32 %v17130_v28, %v22936_v6  ;;  %9451 = vmax.xlane.f32.xlu0 %v9450_v26  ;;  %v8393_v33 = vpop.f32.mrb[103].mxu0  ;;  %v9456_v24 = vsel %vm2839_vm2, %v22982_v36, -inf }
 0x8e6   : > { %v22977_v35 = vadd.f32 %v22938_v34, %v8393_v33 }
 0x8e7   : > { %v9465_v3 = vsel %vm2839_vm2, %v22974_v51, -inf }
 0x8e8   : > { %9466 = vmax.xlane.f32.xlu1 %v9465_v3  ;;  %v9462_v28 = vsel %vm2839_vm2, %v22977_v35, -inf }
 0x8e9   : > { %9460 = vmax.xlane.f32.xlu0 %v9459_v50  ;;  %v17137_v32 = vpop.f32.mrb[130].mxu1 }
 0x8ea   : > { %v8484_v13 = vpop.f32.mrb[131].mxu1  ;;  %v22989_v26 = vadd.f32 %v17137_v32, %v22936_v6 }
 0x8eb   : > { %v23002_v41 = vadd.f32 %v22938_v34, %v8484_v13 }
 0x8ec   : > { %9463 = vmax.xlane.f32.xlu1 %v9462_v28  ;;  %v17144_v33 = vpop.f32.mrb[104].mxu0  ;;  %v9471_v32 = vsel %vm2839_vm2, %v22989_v26, -inf }
 0x8ed   : > { %v22994_v59 = vadd.f32 %v17144_v33, %v22936_v6  ;;  %9457 = vmax.xlane.f32.xlu0 %v9456_v24  ;;  %v8575_v3 = vpop.f32.mrb[105].mxu0  ;;  %v9468_v2 = vsel %vm2839_vm2, %v23002_v41, -inf }
 0x8ee   : > { %v22997_v50 = vadd.f32 %v22938_v34, %v8575_v3 }
 0x8ef   : > { %v9477_v62 = vsel %vm2839_vm2, %v22994_v59, -inf }
 0x8f0   : > { %9478 = vmax.xlane.f32.xlu1 %v9477_v62  ;;  %v9474_v24 = vsel %vm2839_vm2, %v22997_v50, -inf }
 0x8f1   : > { %9472 = vmax.xlane.f32.xlu0 %v9471_v32  ;;  %v17151_v28 = vpop.f32.mrb[132].mxu1 }
 0x8f2   : > { %v8666_v20 = vpop.f32.mrb[133].mxu1  ;;  %v23009_v33 = vadd.f32 %v17151_v28, %v22936_v6 }
 0x8f3   : > { %v23022_v23 = vadd.f32 %v22938_v34, %v8666_v20 }
 0x8f4   : > { %9475 = vmax.xlane.f32.xlu1 %v9474_v24  ;;  %v17158_v3 = vpop.f32.mrb[106].mxu0  ;;  %v9483_v28 = vsel %vm2839_vm2, %v23009_v33, -inf }
 0x8f5   : > { %v23014_v13 = vadd.f32 %v17158_v3, %v22936_v6  ;;  %9469 = vmax.xlane.f32.xlu0 %v9468_v2  ;;  %v8757_v62 = vpop.f32.mrb[107].mxu0  ;;  %v9480_v21 = vsel %vm2839_vm2, %v23022_v23, -inf }
 0x8f6   : > { %v23017_v32 = vadd.f32 %v22938_v34, %v8757_v62 }
 0x8f7   : > { %v9489_v52 = vsel %vm2839_vm2, %v23014_v13, -inf }
 0x8f8   : > { %9490 = vmax.xlane.f32.xlu1 %v9489_v52  ;;  %v9486_v2 = vsel %vm2839_vm2, %v23017_v32, -inf }
 0x8f9   : > { %9484 = vmax.xlane.f32.xlu0 %v9483_v28  ;;  %v17165_v24 = vpop.f32.mrb[134].mxu1 }
 0x8fa   : > { %v8848_v22 = vpop.f32.mrb[135].mxu1  ;;  %v23029_v3 = vadd.f32 %v17165_v24, %v22936_v6 }
 0x8fb   : > { %v23042_v4 = vadd.f32 %v22938_v34, %v8848_v22 }
 0x8fc   : > { %9487 = vmax.xlane.f32.xlu1 %v9486_v2  ;;  %v17172_v62 = vpop.f32.mrb[108].mxu0  ;;  %v9495_v24 = vsel %vm2839_vm2, %v23029_v3, -inf }
 0x8fd   : > { %v23034_v20 = vadd.f32 %v17172_v62, %v22936_v6  ;;  %9481 = vmax.xlane.f32.xlu0 %v9480_v21  ;;  %v8939_v52 = vpop.f32.mrb[109].mxu0  ;;  %v9492_v5 = vsel %vm2839_vm2, %v23042_v4, -inf }
 0x8fe   : > { %v23037_v28 = vadd.f32 %v22938_v34, %v8939_v52 }
 0x8ff   : > { %v9501_v8 = vsel %vm2839_vm2, %v23034_v20, -inf }
 0x900   : > { %9502 = vmax.xlane.f32.xlu1 %v9501_v8  ;;  %v9498_v21 = vsel %vm2839_vm2, %v23037_v28, -inf }
 0x901   : > { %9496 = vmax.xlane.f32.xlu0 %v9495_v24  ;;  %v17179_v2 = vpop.f32.mrb[136].mxu1 }
 0x902   : > { %v9030_v61 = vpop.f32.mrb[137].mxu1  ;;  %v23049_v62 = vadd.f32 %v17179_v2, %v22936_v6 }
 0x903   : > { %v23062_v38 = vadd.f32 %v22938_v34, %v9030_v61 }
 0x904   : > { %9499 = vmax.xlane.f32.xlu1 %v9498_v21  ;;  %v17186_v52 = vpop.f32.mrb[110].mxu0  ;;  %v9507_v2 = vsel %vm2839_vm2, %v23049_v62, -inf }
 0x905   : > { %v23054_v22 = vadd.f32 %v17186_v52, %v22936_v6  ;;  %9493 = vmax.xlane.f32.xlu0 %v9492_v5  ;;  %v9121_v8 = vpop.f32.mrb[111].mxu0 }
 0x906   : > { %v23057_v24 = vadd.f32 %v22938_v34, %v9121_v8 }
 0x907   : > { %v9513_v53 = vsel %vm2839_vm2, %v23054_v22, -inf }
 0x908   : > { %9514 = vmax.xlane.f32.xlu1 %v9513_v53  ;;  %v9510_v5 = vsel %vm2839_vm2, %v23057_v24, -inf  ;;  %v9504_v53 = vsel %vm2839_vm2, %v23062_v38, -inf }
 0x909   : > { %9508 = vmax.xlane.f32.xlu0 %v9507_v2  ;;  %v17193_v21 = vpop.f32.mrb[138].mxu1 }
 0x90a   : > { %v9212_v14 = vpop.f32.mrb[139].mxu1  ;;  %v23067_v52 = vadd.f32 %v17193_v21, %v22936_v6 }
 0x90b   : > { %v23072_v8 = vadd.f32 %v22938_v34, %v9212_v14 }
 0x90c   : > { %9511 = vmax.xlane.f32.xlu1 %v9510_v5  ;;  %v17200_v37 = vpop.f32.mrb[112].mxu0  ;;  %v9519_v21 = vsel %vm2839_vm2, %v23067_v52, -inf }
 0x90d   : > { %9505 = vmax.xlane.f32.xlu0 %v9504_v53  ;;  %v9303_v61 = vpop.f32.mrb[113].mxu0  ;;  %v23077_v2 = vadd.f32 %v17200_v37, %v22936_v6  ;;  %v9516_v14 = vsel %vm2839_vm2, %v23072_v8, -inf }
 0x90e   : > { %v23082_v58 = vadd.f32 %v22938_v34, %v9303_v61 }
 0x90f   : > { %v9525_v37 = vsel %vm2839_vm2, %v23077_v2, -inf }
 0x910   : > { %9520 = vmax.xlane.f32.xlu1 %v9519_v21  ;;  %v9522_v61 = vsel %vm2839_vm2, %v23082_v58, -inf }
 0x911   : > { %9517 = vmax.xlane.f32.xlu0 %v9516_v14  ;;  %v17207_v5 = vpop.f32.mrb[140].mxu1  ;;  %v23100_v14 = vpop.permute.xlu1 %18724 }
 0x912   : > { %v23087_v49 = vadd.f32 %v17207_v5, %v22936_v6  ;;  %v9394_v53 = vpop.f32.mrb[141].mxu1 }
 0x913   : > { %v23090_v17 = vadd.f32 %v22938_v34, %v9394_v53  ;;  %v23106_v53 = vpop.permute.xlu0 %18729 }
 0x914   : > { %9526 = vmax.xlane.f32.xlu1 %v9525_v37  ;;  %v9531_v21 = vsel %vm2839_vm2, %v23087_v49, -inf }
 0x915   : > { %9523 = vmax.xlane.f32.xlu0 %v9522_v61  ;;  %v9528_v6 = vsel %vm2839_vm2, %v23090_v17, -inf  ;;  %v23102_v34 = vpop.permute.xlu1 %18734 }
 0x917   : > { %v23110_v1 = vpop.permute.xlu0 %18744 }
 0x918   : > { %9532 = vmax.xlane.f32.xlu1 %v9531_v21 }
 0x919   : > { %9529 = vmax.xlane.f32.xlu0 %v9528_v6  ;;  %v23104_v5 = vpop.permute.xlu1 %18739 }
 0x91b   : > { %v23114_v55 = vpop.permute.xlu0 %18754 }
 0x91d   : > { %v23108_v37 = vpop.permute.xlu1 %18749 }
 0x91f   : > { %v23118_v25 = vpop.permute.xlu0 %18764 }
 0x920   : > { %25337 = vst [vmem:[#allocation124_spill] sm:$0xff] %v23118_v25 }
 0x921   : > { %v23112_v61 = vpop.permute.xlu1 %18759 }
 0x922   : > { %25335 = vst [vmem:[#allocation121_spill] sm:$0xff] %v23112_v61 }
 0x923   : > { %v23122_v6 = vpop.permute.xlu0 %18774 }
 0x924   : > { %25339 = vst [vmem:[#allocation120_spill] sm:$0xff] %v23122_v6 }
 0x925   : > { %v23116_v21 = vpop.permute.xlu1 %18769 }
 0x926   : > { %25336 = vst [vmem:[#allocation119_spill] sm:$0xff] %v23116_v21 }
 0x927   : > { %v23126_v0 = vpop.permute.xlu0 %18784 }
 0x928   : > { %25341 = vst [vmem:[#allocation131_spill] sm:$0xff] %v23126_v0 }
 0x929   : > { %v23120_v31 = vpop.permute.xlu1 %18779 }
 0x92a   : > { %25338 = vst [vmem:[#allocation122_spill] sm:$0xff] %v23120_v31 }
 0x92b   : > { %v23130_v60 = vpop.permute.xlu0 %18794 }
 0x92c   : > { %25343 = vst [vmem:[#allocation133_spill] sm:$0xff] %v23130_v60 }
 0x92d   : > { %v23124_v42 = vpop.permute.xlu1 %18789 }
 0x92e   : > { %25340 = vst [vmem:[#allocation125_spill] sm:$0xff] %v23124_v42 }
 0x92f   : > { %v23134_v61 = vpop.permute.xlu0 %11280 }
 0x930   : > { %25345 = vst [vmem:[#allocation135_spill] sm:$0xff] %v23134_v61 }
 0x931   : > { %v23128_v16 = vpop.permute.xlu1 %11278 }
 0x932   : > { %25342 = vst [vmem:[#allocation132_spill] sm:$0xff] %v23128_v16 }
 0x933   : > { %v23138_v21 = vpop.permute.xlu0 %11369 }
 0x934   : > { %25347 = vst [vmem:[#allocation137_spill] sm:$0xff] %v23138_v21 }
 0x935   : > { %v23132_v29 = vpop.permute.xlu1 %18799 }
 0x936   : > { %25344 = vst [vmem:[#allocation134_spill] sm:$0xff] %v23132_v29 }
 0x937   : > { %v23142_v31 = vpop.permute.xlu0 %18804 }
 0x938   : > { %25349 = vst [vmem:[#allocation139_spill] sm:$0xff] %v23142_v31 }
 0x939   : > { %v23136_v30 = vpop.permute.xlu1 %11371 }
 0x93a   : > { %25346 = vst [vmem:[#allocation136_spill] sm:$0xff] %v23136_v30 }
 0x93b   : > { %v23146_v42 = vpop.permute.xlu0 %11462 }
 0x93c   : > { %25351 = vst [vmem:[#allocation141_spill] sm:$0xff] %v23146_v42 }
 0x93d   : > { %v23140_v25 = vpop.permute.xlu1 %11460 }
 0x93e   : > { %25348 = vst [vmem:[#allocation138_spill] sm:$0xff] %v23140_v25 }
 0x941   : > { %v23144_v6 = vpop.permute.xlu1 %18809 }
 0x942   : > { %25350 = vst [vmem:[#allocation140_spill] sm:$0xff] %v23144_v6 }
 0x965   : > { %v9443_v0 = vpop.xlane.xlu1 %9442 }
 0x966   : > { %v9535_v16 = vsub.f32 %v22941_v54, %v9443_v0  ;;  %v9440_v60 = vpop.xlane.xlu0 %9439 }
 0x967   : > { %v9534_v29 = vsub.f32 %v22944_v9, %v9440_v60 }
 0x968   : > { %v9568_v27 = vmul.f32 1.442695, %v9535_v16 }
 0x969   : > { %v9566_v61 = vmul.f32 1.442695, %v9534_v29 }
 0x96a   : > { %19503 = vpow2.f32 %v9568_v27  ;;  %v9449_v30 = vpop.xlane.xlu0 %9448 }
 0x96b   : > { %19505 = vpow2.f32 %v9566_v61  ;;  %v9537_v21 = vsub.f32 %v22951_v19, %v9449_v30 }
 0x96d   : > { %v9572_v25 = vmul.f32 1.442695, %v9537_v21  ;;  %v9455_v46 = vpop.xlane.xlu1 %9454 }
 0x96e   : > { %v9539_v31 = vsub.f32 %v22959_v57, %v9455_v46  ;;  %v9446_v6 = vpop.xlane.xlu0 %9445 }
 0x96f   : > { %19507 = vpow2.f32 %v9572_v25  ;;  %v9536_v42 = vsub.f32 %v22954_v7, %v9446_v6 }
 0x970   : > { %v9576_v63 = vmul.f32 1.442695, %v9539_v31 }
 0x971   : > { %v9570_v0 = vmul.f32 1.442695, %v9536_v42 }
 0x972   : > { %19509 = vpow2.f32 %v9576_v63  ;;  %v9452_v54 = vpop.xlane.xlu0 %9451 }
 0x973   : > { %19511 = vpow2.f32 %v9570_v0  ;;  %v9538_v29 = vsub.f32 %v22964_v43, %v9452_v54 }
 0x974   : > { %v23154_v27 = vpop.eup %19503 }
 0x975   : > { %v23156_v60 = vpop.eup %19505  ;;  %v9574_v30 = vmul.f32 1.442695, %v9538_v29  ;;  %v9467_v16 = vpop.xlane.xlu1 %9466  ;;  %v9633_v46 = vsel %vm2839_vm2, %v23154_v27, 0.0 }
 0x976   : > { %v9543_v25 = vsub.f32 %v22974_v51, %v9467_v16  ;;  %v9461_v9 = vpop.xlane.xlu0 %9460  ;;  %9634 = vadd.xlane.f32.xlu1 %v9633_v46  ;;  %v9630_v63 = vsel %vm2839_vm2, %v23156_v60, 0.0 }
 0x977   : > { %19513 = vpow2.f32 %v9574_v30  ;;  %v9541_v31 = vsub.f32 %v22969_v45, %v9461_v9  ;;  %9631 = vadd.xlane.f32.xlu0 %v9630_v63 }
 0x978   : > { %v9584_v42 = vmul.f32 1.442695, %v9543_v25 }
 0x979   : > { %v23164_v19 = vpop.eup %19507  ;;  %v9580_v43 = vmul.f32 1.442695, %v9541_v31  ;;  %v9464_v57 = vpop.xlane.xlu1 %9463 }
 0x97a   : > { %19515 = vpow2.f32 %v9584_v42  ;;  %v9542_v7 = vsub.f32 %v22977_v35, %v9464_v57  ;;  %v9458_v61 = vpop.xlane.xlu0 %9457  ;;  %v9639_v51 = vsel %vm2839_vm2, %v23164_v19, 0.0 }
 0x97b   : > { %19517 = vpow2.f32 %v9580_v43  ;;  %v9540_v21 = vsub.f32 %v22982_v36, %v9458_v61  ;;  %9640 = vadd.xlane.f32.xlu0 %v9639_v51 }
 0x97c   : > { %v23170_v6 = vpop.eup %19509  ;;  %v9582_v45 = vmul.f32 1.442695, %v9542_v7 }
 0x97d   : > { %v23172_v0 = vpop.eup %19511  ;;  %v9578_v54 = vmul.f32 1.442695, %v9540_v21  ;;  %v9479_v29 = vpop.xlane.xlu1 %9478  ;;  %v9645_v30 = vsel %vm2839_vm2, %v23170_v6, 0.0 }
 0x97e   : > { %19519 = vpow2.f32 %v9582_v45  ;;  %v9547_v35 = vsub.f32 %v22994_v59, %v9479_v29  ;;  %v9473_v16 = vpop.xlane.xlu0 %9472  ;;  %9646 = vadd.xlane.f32.xlu1 %v9645_v30  ;;  %v9636_v46 = vsel %vm2839_vm2, %v23172_v0, 0.0 }
 0x97f   : > { %19521 = vpow2.f32 %v9578_v54  ;;  %v9545_v36 = vsub.f32 %v22989_v26, %v9473_v16  ;;  %9637 = vadd.xlane.f32.xlu0 %v9636_v46 }
 0x980   : > { %v9592_v25 = vmul.f32 1.442695, %v9547_v35 }
 0x981   : > { %v23180_v9 = vpop.eup %19513  ;;  %v9588_v63 = vmul.f32 1.442695, %v9545_v36  ;;  %v9476_v31 = vpop.xlane.xlu1 %9475 }
 0x982   : > { %19523 = vpow2.f32 %v9592_v25  ;;  %v9546_v42 = vsub.f32 %v22997_v50, %v9476_v31  ;;  %v9470_v43 = vpop.xlane.xlu0 %9469  ;;  %v9642_v59 = vsel %vm2839_vm2, %v23180_v9, 0.0 }
 0x983   : > { %19525 = vpow2.f32 %v9588_v63  ;;  %v9544_v57 = vsub.f32 %v23002_v41, %v9470_v43  ;;  %9643 = vadd.xlane.f32.xlu1 %v9642_v59 }
 0x984   : > { %v23186_v7 = vpop.eup %19515  ;;  %v9590_v26 = vmul.f32 1.442695, %v9546_v42 }
 0x985   : > { %v23188_v61 = vpop.eup %19517  ;;  %v9586_v51 = vmul.f32 1.442695, %v9544_v57  ;;  %v9491_v21 = vpop.xlane.xlu1 %9490  ;;  %v9657_v45 = vsel %vm2839_vm2, %v23186_v7, 0.0 }
 0x986   : > { %19527 = vpow2.f32 %v9590_v26  ;;  %v9551_v50 = vsub.f32 %v23014_v13, %v9491_v21  ;;  %v9485_v54 = vpop.xlane.xlu0 %9484  ;;  %v9651_v29 = vsel %vm2839_vm2, %v23188_v61, 0.0 }
 0x987   : > { %19529 = vpow2.f32 %v9586_v51  ;;  %v9549_v41 = vsub.f32 %v23009_v33, %v9485_v54  ;;  %9658 = vadd.xlane.f32.xlu1 %v9657_v45  ;;  %9652 = vadd.xlane.f32.xlu0 %v9651_v29 }
 0x988   : > { %v23196_v30 = vpop.eup %19519  ;;  %v9600_v35 = vmul.f32 1.442695, %v9551_v50 }
 0x989   : > { %v23198_v16 = vpop.eup %19521  ;;  %v9596_v46 = vmul.f32 1.442695, %v9549_v41  ;;  %v9488_v36 = vpop.xlane.xlu1 %9487  ;;  %v9654_v25 = vsel %vm2839_vm2, %v23196_v30, 0.0 }
 0x98a   : > { %19531 = vpow2.f32 %v9600_v35  ;;  %v9550_v13 = vsub.f32 %v23017_v32, %v9488_v36  ;;  %v9482_v63 = vpop.xlane.xlu0 %9481  ;;  %v9648_v31 = vsel %vm2839_vm2, %v23198_v16, 0.0 }
 0x98b   : > { %19533 = vpow2.f32 %v9596_v46  ;;  %v9548_v33 = vsub.f32 %v23022_v23, %v9482_v63  ;;  %9655 = vadd.xlane.f32.xlu1 %v9654_v25  ;;  %9649 = vadd.xlane.f32.xlu0 %v9648_v31 }
 0x98c   : > { %v23206_v42 = vpop.eup %19523  ;;  %v9598_v43 = vmul.f32 1.442695, %v9550_v13 }
 0x98d   : > { %v23208_v59 = vpop.eup %19525  ;;  %v9594_v57 = vmul.f32 1.442695, %v9548_v33  ;;  %v9503_v26 = vpop.xlane.xlu1 %9502  ;;  %v9669_v51 = vsel %vm2839_vm2, %v23206_v42, 0.0 }
 0x98e   : > { %19535 = vpow2.f32 %v9598_v43  ;;  %v9555_v32 = vsub.f32 %v23034_v20, %v9503_v26  ;;  %v9497_v21 = vpop.xlane.xlu0 %9496  ;;  %v9663_v45 = vsel %vm2839_vm2, %v23208_v59, 0.0 }
 0x98f   : > { %19537 = vpow2.f32 %v9594_v57  ;;  %v9553_v23 = vsub.f32 %v23029_v3, %v9497_v21  ;;  %9670 = vadd.xlane.f32.xlu1 %v9669_v51  ;;  %9664 = vadd.xlane.f32.xlu0 %v9663_v45 }
 0x990   : > { %v23216_v50 = vpop.eup %19527  ;;  %v9608_v54 = vmul.f32 1.442695, %v9555_v32 }
 0x991   : > { %v23218_v29 = vpop.eup %19529  ;;  %v9604_v41 = vmul.f32 1.442695, %v9553_v23  ;;  %v9500_v35 = vpop.xlane.xlu1 %9499  ;;  %v9666_v46 = vsel %vm2839_vm2, %v23216_v50, 0.0 }
 0x992   : > { %19539 = vpow2.f32 %v9608_v54  ;;  %v9554_v20 = vsub.f32 %v23037_v28, %v9500_v35  ;;  %v9494_v36 = vpop.xlane.xlu0 %9493  ;;  %v9660_v25 = vsel %vm2839_vm2, %v23218_v29, 0.0 }
 0x993   : > { %19541 = vpow2.f32 %v9604_v41  ;;  %v9552_v3 = vsub.f32 %v23042_v4, %v9494_v36  ;;  %9667 = vadd.xlane.f32.xlu1 %v9666_v46  ;;  %9661 = vadd.xlane.f32.xlu0 %v9660_v25 }
 0x994   : > { %v23226_v13 = vpop.eup %19531  ;;  %v9606_v63 = vmul.f32 1.442695, %v9554_v20 }
 0x995   : > { %v23228_v31 = vpop.eup %19533  ;;  %v9602_v33 = vmul.f32 1.442695, %v9552_v3  ;;  %v9681_v43 = vsel %vm2839_vm2, %v23226_v13, 0.0 }
 0x996   : > { %19543 = vpow2.f32 %v9606_v63  ;;  %v9509_v28 = vpop.xlane.xlu0 %9508  ;;  %v9675_v57 = vsel %vm2839_vm2, %v23228_v31, 0.0 }
 0x997   : > { %19545 = vpow2.f32 %v9602_v33  ;;  %v9557_v26 = vsub.f32 %v23049_v62, %v9509_v28  ;;  %9682 = vadd.xlane.f32.xlu1 %v9681_v43  ;;  %9676 = vadd.xlane.f32.xlu0 %v9675_v57  ;;  %v9515_v57 = vpop.xlane.xlu1 %9514 }
 0x998   : > { %v23235_v4 = vpop.eup %19535 }
 0x999   : > { %v23237_v51 = vpop.eup %19537  ;;  %v9612_v32 = vmul.f32 1.442695, %v9557_v26  ;;  %v9678_v21 = vsel %vm2839_vm2, %v23235_v4, 0.0  ;;  %v25354_v26 = vld [vmem:[#allocation31_spill] sm:$0xff] }
 0x99a   : > { %v9506_v45 = vpop.xlane.xlu0 %9505  ;;  %v9672_v23 = vsel %vm2839_vm2, %v23237_v51, 0.0 }
 0x99b   : > { %19547 = vpow2.f32 %v9612_v32  ;;  %v9556_v54 = vsub.f32 %v23062_v38, %v9506_v45  ;;  %9679 = vadd.xlane.f32.xlu1 %v9678_v21  ;;  %9673 = vadd.xlane.f32.xlu0 %v9672_v23  ;;  %v9512_v32 = vpop.xlane.xlu1 %9511  ;;  %v25355_v45 = vld [vmem:[#allocation29_spill] sm:$0xff]  ;;  %v9559_v23 = vsub.f32 %v23054_v22, %v9515_v57 }
 0x99c   : > { %v23244_v62 = vpop.eup %19539 }
 0x99d   : > { %v23246_v41 = vpop.eup %19541  ;;  %v9610_v35 = vmul.f32 1.442695, %v9556_v54  ;;  %v9693_v46 = vsel %vm2839_vm2, %v23244_v62, 0.0 }
 0x99e   : > { %v9687_v20 = vsel %vm2839_vm2, %v23246_v41, 0.0 }
 0x99f   : > { %19549 = vpow2.f32 %v9610_v35  ;;  %9694 = vadd.xlane.f32.xlu1 %v9693_v46  ;;  %9688 = vadd.xlane.f32.xlu0 %v9687_v20  ;;  %v9521_v21 = vpop.xlane.xlu1 %9520  ;;  %v9616_v35 = vmul.f32 1.442695, %v9559_v23  ;;  %v9558_v46 = vsub.f32 %v23057_v24, %v9512_v32  ;;  %v9518_v20 = vpop.xlane.xlu0 %9517 }
 0x9a0   : > { %v23252_v36 = vpop.eup %19543 }
 0x9a1   : > { %v23254_v25 = vpop.eup %19545  ;;  %v9690_v38 = vsel %vm2839_vm2, %v23252_v36, 0.0  ;;  %19551 = vpow2.f32 %v9616_v35 }
 0x9a2   : > { %v9684_v3 = vsel %vm2839_vm2, %v23254_v25, 0.0 }
 0x9a3   : > { %9691 = vadd.xlane.f32.xlu1 %v9690_v38  ;;  %9685 = vadd.xlane.f32.xlu0 %v9684_v3  ;;  %v9527_v54 = vpop.xlane.xlu1 %9526  ;;  %v9561_v38 = vsub.f32 %v23067_v52, %v9521_v21  ;;  %v9614_v3 = vmul.f32 1.442695, %v9558_v46 }
 0x9a5   : > { %v23260_v63 = vpop.eup %19547  ;;  %19553 = vpow2.f32 %v9614_v3 }
 0x9a6   : > { %25352 = vst [vmem:[#allocation142_spill] sm:$0xff] %v23260_v63  ;;  %v9699_v33 = vsel %vm2839_vm2, %v23260_v63, 0.0  ;;  %v9560_v63 = vsub.f32 %v23072_v8, %v9518_v20 }
 0x9a7   : > { %9700 = vadd.xlane.f32.xlu0 %v9699_v33  ;;  %v9563_v33 = vsub.f32 %v23077_v2, %v9527_v54 }
 0x9a8   : > { %v9618_v57 = vmul.f32 1.442695, %v9560_v63 }
 0x9a9   : > { %v23264_v43 = vpop.eup %19549 }
 0x9aa   : > { %25353 = vst [vmem:[#allocation143_spill] sm:$0xff] %v23264_v43  ;;  %v9696_v28 = vsel %vm2839_vm2, %v23264_v43, 0.0  ;;  %v9524_v43 = vpop.xlane.xlu0 %9523 }
 0x9ab   : > { %9697 = vadd.xlane.f32.xlu0 %v9696_v28  ;;  %v9533_v28 = vpop.xlane.xlu1 %9532  ;;  %v9562_v24 = vsub.f32 %v23082_v58, %v9524_v43  ;;  %v23279_v21 = vpop.eup %19551 }
 0x9ac   : > { %v9565_v22 = vsub.f32 %v23087_v49, %v9533_v28  ;;  %25356 = vst [vmem:[#allocation31_spill] sm:$0xff] %v23279_v21  ;;  %v9705_v8 = vsel %vm2839_vm2, %v23279_v21, 0.0 }
 0x9ad   : > { %v9622_v2 = vmul.f32 1.442695, %v9562_v24  ;;  %v25365_v24 = vld [vmem:[#allocation35_spill] sm:$0xff] }
 0x9ae   : > { %v9628_v32 = vmul.f32 1.442695, %v9565_v22  ;;  %v9530_v52 = vpop.xlane.xlu0 %9529  ;;  %v25363_v22 = vld [vmem:[#allocation33_spill] sm:$0xff] }
 0x9af   : > { %v9564_v23 = vsub.f32 %v23090_v17, %v9530_v52  ;;  %v23284_v54 = vpop.eup %19553  ;;  %v25367_v52 = vld [vmem:[#allocation36_spill] sm:$0xff] }
 0x9b0   : > { %v9702_v58 = vsel %vm2839_vm2, %v23284_v54, 0.0 }
 0x9b1   : > { %v9626_v49 = vmul.f32 1.442695, %v9564_v23 }
 0x9b4   : > { %11553 = vrot.lane.b32.xlu1 %v25354_v26, %s19992_s20  ;;  %v9620_v26 = vmul.f32 1.442695, %v9561_v38 }
 0x9b6   : > { %19555 = vpow2.f32 %v9620_v26 }
 0x9c0   : > { %v23286_v63 = vpop.eup %19555 }
 0x9c1   : > { %11551 = vrot.lane.b32.xlu0 %v25355_v45, %s19992_s20  ;;  %v9624_v45 = vmul.f32 1.442695, %v9563_v33  ;;  %25357 = vst [vmem:[#allocation29_spill] sm:$0xff] %v23286_v63  ;;  %v9711_v17 = vsel %vm2839_vm2, %v23286_v63, 0.0 }
 0x9c3   : > { %19557 = vpow2.f32 %v9624_v45 }
 0x9c4   : > { %19559 = vpow2.f32 %v9618_v57  ;;  %v25364_v57 = vld [vmem:[#allocation32_spill] sm:$0xff] }
 0x9c5   : > { %19561 = vpow2.f32 %v9628_v32  ;;  %v25366_v32 = vld [vmem:[#allocation37_spill] sm:$0xff] }
 0x9c6   : > { %19563 = vpow2.f32 %v9622_v2 }
 0x9c7   : > { %19565 = vpow2.f32 %v9626_v49  ;;  %v25369_v49 = vld [vmem:[#allocation42_spill] sm:$0xff] }
 0x9cd   : > { %v23290_v43 = vpop.eup %19557 }
 0x9ce   : > { %25358 = vst [vmem:[#allocation144_spill] sm:$0xff] %v23290_v43  ;;  %v23292_v35 = vpop.eup %19559  ;;  %v9717_v46 = vsel %vm2839_vm2, %v23290_v43, 0.0 }
 0x9cf   : > { %25359 = vst [vmem:[#allocation145_spill] sm:$0xff] %v23292_v35  ;;  %v23298_v20 = vpop.eup %19561  ;;  %v9708_v38 = vsel %vm2839_vm2, %v23292_v35, 0.0 }
 0x9d0   : > { %25360 = vst [vmem:[#allocation146_spill] sm:$0xff] %v23298_v20  ;;  %v9723_v3 = vsel %vm2839_vm2, %v23298_v20, 0.0  ;;  %v23304_v33 = vpop.eup %19563 }
 0x9d1   : > { %25361 = vst [vmem:[#allocation147_spill] sm:$0xff] %v23304_v33  ;;  %v9714_v28 = vsel %vm2839_vm2, %v23304_v33, 0.0  ;;  %v23308_v26 = vpop.eup %19565 }
 0x9d2   : > { %25362 = vst [vmem:[#allocation148_spill] sm:$0xff] %v23308_v26  ;;  %v9720_v45 = vsel %vm2839_vm2, %v23308_v26, 0.0 }
 0x9d8   : > { %9706 = vadd.xlane.f32.xlu1 %v9705_v8  ;;  %v25368_v8 = vld [vmem:[#allocation39_spill] sm:$0xff] }
 0x9dc   : > { %9703 = vadd.xlane.f32.xlu1 %v9702_v58 }
 0x9e0   : > { %9712 = vadd.xlane.f32.xlu1 %v9711_v17  ;;  %9718 = vadd.xlane.f32.xlu0 %v9717_v46  ;;  %v25370_v17 = vld [vmem:[#allocation41_spill] sm:$0xff]  ;;  %v25371_v46 = vld [vmem:[#allocation43_spill] sm:$0xff] }
 0x9e4   : > { %9709 = vadd.xlane.f32.xlu1 %v9708_v38  ;;  %9724 = vadd.xlane.f32.xlu0 %v9723_v3 }
 0x9e8   : > { %9715 = vadd.xlane.f32.xlu1 %v9714_v28  ;;  %v25372_v28 = vld [vmem:[#allocation46_spill] sm:$0xff] }
 0x9ec   : > { %9721 = vadd.xlane.f32.xlu1 %v9720_v45 }
 0x9fa   : > { %18814 = vrot.lane.b32.xlu0 %v25363_v22, %s19992_s20  ;;  %v25373_v22 = vld [vmem:[#allocation44_spill] sm:$0xff] }
 0x9fd   : > { %11642 = vrot.lane.b32.xlu1 %v25364_v57, %s19992_s20 }
 0x9fe   : > { %11644 = vrot.lane.b32.xlu0 %v25365_v24, %s19992_s20 }
 0xa01   : > { %18819 = vrot.lane.b32.xlu1 %v25366_v32, %s19992_s20 }
 0xa02   : > { %11733 = vrot.lane.b32.xlu0 %v25367_v52, %s19992_s20 }
 0xa03   : > { %v9635_v2 = vpop.xlane.xlu1 %9634 }
 0xa04   : > { %19567 = vrcp.f32 %v9635_v2  ;;  %v9632_v23 = vpop.xlane.xlu0 %9631 }
 0xa05   : > { %19569 = vrcp.f32 %v9632_v23  ;;  %11735 = vrot.lane.b32.xlu1 %v25368_v8, %s19992_s20 }
 0xa06   : > { %18824 = vrot.lane.b32.xlu0 %v25369_v49, %s19992_s20  ;;  %v25374_v49 = vld [vmem:[#allocation47_spill] sm:$0xff] }
 0xa08   : > { %v9641_v58 = vpop.xlane.xlu0 %9640 }
 0xa09   : > { %19571 = vrcp.f32 %v9641_v58  ;;  %11824 = vrot.lane.b32.xlu1 %v25370_v17, %s19992_s20 }
 0xa0a   : > { %11826 = vrot.lane.b32.xlu0 %v25371_v46, %s19992_s20  ;;  %v25375_v46 = vld [vmem:[#allocation50_spill] sm:$0xff] }
 0xa0b   : > { %v9647_v38 = vpop.xlane.xlu1 %9646 }
 0xa0c   : > { %19573 = vrcp.f32 %v9647_v38  ;;  %v9638_v3 = vpop.xlane.xlu0 %9637 }
 0xa0d   : > { %19575 = vrcp.f32 %v9638_v3  ;;  %18829 = vrot.lane.b32.xlu1 %v25372_v28, %s19992_s20 }
 0xa0e   : > { %v19568_v45 = vpop.eup %19567  ;;  %11915 = vrot.lane.b32.xlu0 %v25373_v22, %s19992_s20  ;;  %v18727_v22 = vunpack.i.h.bf16 %v23100_v14 }
 0xa0f   : > { %v19570_v57 = vpop.eup %19569  ;;  %v9759_v24 = vmul.f32 %v19568_v45, %v9635_v2  ;;  %v18726_v2 = vunpack.i.l.bf16 %v23100_v14 }
 0xa10   : > { %v9758_v32 = vmul.f32 %v19570_v57, %v9632_v23  ;;  %v9644_v52 = vpop.xlane.xlu1 %9643  ;;  %v25376_v23 = vld [vmem:[#allocation40_spill] sm:$0xff] }
 0xa11   : > { %v9791_v8 = vsub.f32 2.0, %v9759_v24  ;;  %19577 = vrcp.f32 %v9644_v52  ;;  %11917 = vrot.lane.b32.xlu1 %v25374_v49, %s19992_s20  ;;  %v18120_v35 = vpack.c.bf16 %v18727_v22, %v18726_v2  ;;  %v25380_v22 = vld [vmem:[#allocation51_spill] sm:$0xff]  ;;  %v25381_v2 = vld [vmem:[#allocation38_spill] sm:$0xff] }
 0xa12   : > { %v9790_v17 = vsub.f32 2.0, %v9758_v32  ;;  %18834 = vrot.lane.b32.xlu0 %v25375_v46, %s19992_s20  ;;  %v25377_v32 = vld [vmem:[#allocation45_spill] sm:$0xff] }
 0xa13   : > { %v19572_v20 = vpop.eup %19571  ;;  %v9823_v26 = vmul.f32 %v19568_v45, %v9791_v8 }
 0xa14   : > { %v9822_v28 = vmul.f32 %v19570_v57, %v9790_v17  ;;  %v9761_v43 = vmul.f32 %v19572_v20, %v9641_v58  ;;  %v9659_v33 = vpop.xlane.xlu1 %9658  ;;  %v9653_v63 = vpop.xlane.xlu0 %9652 }
 0xa15   : > { %19579 = vrcp.f32 %v9659_v33  ;;  %12006 = vrot.lane.b32.xlu1 %v25376_v23, %s19992_s20  ;;  %v9855_v58 = vmul.f32 %v23154_v27, %v9823_v26  ;;  %v25378_v23 = vld [vmem:[#allocation34_spill] sm:$0xff]  ;;  %v25379_v27 = vld [vmem:[#allocation48_spill] sm:$0xff] }
 0xa16   : > { %v19574_v24 = vpop.eup %19573  ;;  %19581 = vrcp.f32 %v9653_v63  ;;  %12008 = vrot.lane.b32.xlu0 %v25377_v32, %s19992_s20  ;;  %v9854_v49 = vmul.f32 %v23156_v60, %v9822_v28  ;;  %v9793_v57 = vsub.f32 2.0, %v9761_v43 }
 0xa17   : > { %v19576_v45 = vpop.eup %19575  ;;  %v9763_v8 = vmul.f32 %v19574_v24, %v9647_v38  ;;  %v18732_v38 = vunpack.i.h.bf16 %v23106_v53 }
 0xa18   : > { %v9760_v17 = vmul.f32 %v19576_v45, %v9638_v3  ;;  %v9656_v46 = vpop.xlane.xlu1 %9655  ;;  %17212 = vmatprep.mubr.msk.f32.mxu0 %vm2839_vm2, %v9854_v49  ;;  %v9650_v14 = vpop.xlane.xlu0 %9649  ;;  %v9825_v43 = vmul.f32 %v19572_v20, %v9793_v57  ;;  %v18731_v3 = vunpack.i.l.bf16 %v23106_v53 }
 0xa19   : > { %19583 = vrcp.f32 %v9656_v46  ;;  %18839 = vrot.lane.b32.xlu1 %v25378_v23, %s19992_s20  ;;  %17213 = vmatmul.mubr.msk.f32.vlgmr.msra.gmra.mrb[114].mxu0 %vm2839_vm2, %v9855_v58  ;;  %v9795_v26 = vsub.f32 2.0, %v9763_v8 }
 0xa1a   : > { %v9792_v32 = vsub.f32 2.0, %v9760_v17  ;;  %19585 = vrcp.f32 %v9650_v14  ;;  %18115 = vmatpush3.bf16.msra.mxu0 %v22833_v39  ;;  %12097 = vrot.lane.b32.xlu0 %v25379_v27, %s19992_s20  ;;  %v9857_v8 = vmul.f32 %v23164_v19, %v9825_v43 }
 0xa1b   : > { %v19578_v60 = vpop.eup %19577  ;;  %18121 = vmatprep.subr.bf16.mxu0 %v18120_v35  ;;  %v9827_v17 = vmul.f32 %v19574_v24, %v9795_v26 }
 0xa1c   : > { %v9824_v28 = vmul.f32 %v19576_v45, %v9792_v32  ;;  %v9762_v49 = vmul.f32 %v19578_v60, %v9644_v52  ;;  %v9671_v23 = vpop.xlane.xlu1 %9670  ;;  %v9665_v58 = vpop.xlane.xlu0 %9664 }
 0xa1d   : > { %19587 = vrcp.f32 %v9671_v23  ;;  %12099 = vrot.lane.b32.xlu1 %v25380_v22, %s19992_s20  ;;  %v23364_v22 = vpack.c.bf16 %v18732_v38, %v18731_v3 }
 0xa1e   : > { %v9794_v39 = vsub.f32 2.0, %v9762_v49  ;;  %19589 = vrcp.f32 %v9665_v58  ;;  %18844 = vrot.lane.b32.xlu0 %v25381_v2, %s19992_s20  ;;  %v9856_v20 = vmul.f32 %v23172_v0, %v9824_v28  ;;  %v18737_v49 = vunpack.i.h.bf16 %v23102_v34 }
 0xa1f   : > { %v19580_v57 = vpop.eup %19579  ;;  %v18736_v2 = vunpack.i.l.bf16 %v23102_v34 }
 0xa20   : > { %v19582_v53 = vpop.eup %19581  ;;  %v9826_v45 = vmul.f32 %v19578_v60, %v9794_v39  ;;  %v9767_v52 = vmul.f32 %v19580_v57, %v9659_v33  ;;  %v9668_v32 = vpop.xlane.xlu1 %9667  ;;  %17219 = vmatprep.mubr.msk.f32.mxu1 %vm2839_vm2, %v9856_v20  ;;  %v9859_v33 = vmul.f32 %v23170_v6, %v9827_v17 }
 0xa21   : > { %v23362_v27 = vpop.xlane.xlu0 %9661  ;;  %v9765_v21 = vmul.f32 %v19582_v53, %v9653_v63  ;;  %19591 = vrcp.f32 %v9668_v32  ;;  %12188 = vrot.lane.b32.xlu1 %v25242_v12, %s19992_s20  ;;  %17220 = vmatmul.mubr.msk.f32.vlgmr.msra.gmra.mrb[142].mxu1 %vm2839_vm2, %v9857_v8  ;;  %v18747_v8 = vunpack.i.h.bf16 %v23110_v1 }
 0xa22   : > { %19593 = vrcp.f32 %v23362_v27  ;;  %18119 = vmatpush3.bf16.msra.mxu1 %v22837_v48  ;;  %12190 = vrot.lane.b32.xlu0 %v25108_v11, %s19992_s20  ;;  %v9858_v19 = vmul.f32 %v23180_v9, %v9826_v45  ;;  %v9799_v63 = vsub.f32 2.0, %v9767_v52  ;;  %v18128_v11 = vpack.c.bf16 %v18737_v49, %v18736_v2 }
 0xa23   : > { %v19584_v0 = vpop.eup %19583  ;;  %18125 = vmatprep.subr.bf16.mxu1 %v23364_v22  ;;  %v9797_v24 = vsub.f32 2.0, %v9765_v21 }
 0xa24   : > { %v19586_v34 = vpop.eup %19585  ;;  %v9766_v12 = vmul.f32 %v19584_v0, %v9656_v46  ;;  %v9683_v60 = vpop.xlane.xlu1 %9682  ;;  %17226 = vmatprep.mubr.msk.f32.mxu0 %vm2839_vm2, %v9858_v19  ;;  %v9831_v26 = vmul.f32 %v19580_v57, %v9799_v63 }
 0xa25   : > { %v23379_v43 = vpop.xlane.xlu0 %9676  ;;  %v9764_v48 = vmul.f32 %v19586_v34, %v9650_v14  ;;  %19595 = vrcp.f32 %v9683_v60  ;;  %18849 = vrot.lane.b32.xlu1 %v25103_v15, %s19992_s20  ;;  %17227 = vmatmul.mubr.msk.f32.vlgmr.msra.gmra.mrb[116].mxu0 %vm2839_vm2, %v9859_v33  ;;  %v9829_v14 = vmul.f32 %v19582_v53, %v9797_v24 }
 0xa26   : > { %v9798_v6 = vsub.f32 2.0, %v9766_v12  ;;  %19597 = vrcp.f32 %v23379_v43  ;;  %18123 = vmatpush3.bf16.msra.mxu0 %v18120_v35  ;;  %12279 = vrot.lane.b32.xlu0 %v25111_v18, %s19992_s20  ;;  %v18742_v18 = vunpack.i.h.bf16 %v23104_v5  ;;  %v18741_v35 = vunpack.i.l.bf16 %v23104_v5 }
 0xa27   : > { %v19588_v9 = vpop.eup %19587  ;;  %v9796_v21 = vsub.f32 2.0, %v9764_v48  ;;  %18129 = vmatprep.subr.bf16.mxu0 %v18128_v11  ;;  %v9863_v45 = vmul.f32 %v23186_v7, %v9831_v26  ;;  %v9861_v5 = vmul.f32 %v23188_v61, %v9829_v14  ;;  %v18751_v48 = vunpack.i.l.bf16 %v23108_v37  ;;  %v25382_v14 = vld [vmem:[#allocation57_spill] sm:$0xff] }
 0xa28   : > { %v19590_v46 = vpop.eup %19589  ;;  %v9830_v38 = vmul.f32 %v19584_v0, %v9798_v6  ;;  %v9771_v3 = vmul.f32 %v19588_v9, %v9671_v23  ;;  %v23387_v28 = vpop.xlane.xlu1 %9679  ;;  %v18132_v7 = vpack.c.bf16 %v18742_v18, %v18741_v35  ;;  %v18756_v6 = vunpack.i.l.bf16 %v23114_v55 }
 0xa29   : > { %v23389_v15 = vpop.xlane.xlu0 %9673  ;;  %v9828_v39 = vmul.f32 %v19586_v34, %v9796_v21  ;;  %v9769_v20 = vmul.f32 %v19590_v46, %v9665_v58  ;;  %19599 = vrcp.f32 %v23387_v28  ;;  %12281 = vrot.lane.b32.xlu1 %v25105_v44, %s19992_s20  ;;  %v18746_v58 = vunpack.i.l.bf16 %v23110_v1 }
 0xa2a   : > { %19601 = vrcp.f32 %v23389_v15  ;;  %18854 = vrot.lane.b32.xlu0 %v25110_v40, %s19992_s20  ;;  %v9862_v23 = vmul.f32 %v23196_v30, %v9830_v38  ;;  %v9803_v17 = vsub.f32 2.0, %v9771_v3 }
 0xa2b   : > { %v19592_v57 = vpop.eup %19591  ;;  %v9860_v53 = vmul.f32 %v23198_v16, %v9828_v39  ;;  %v9801_v52 = vsub.f32 2.0, %v9769_v20 }
 0xa2c   : > { %v19594_v44 = vpop.eup %19593  ;;  %v9770_v49 = vmul.f32 %v19592_v57, %v9668_v32  ;;  %v23405_v2 = vpop.xlane.xlu1 %9694  ;;  %17240 = vmatprep.mubr.msk.f32.mxu0 %vm2839_vm2, %v9862_v23  ;;  %v9835_v16 = vmul.f32 %v19588_v9, %v9803_v17  ;;  %v25384_v23 = vld [vmem:[#allocation59_spill] sm:$0xff] }
 0xa2d   : > { %v23408_v40 = vpop.xlane.xlu0 %9688  ;;  %v9768_v30 = vmul.f32 %v19594_v44, %v23362_v27  ;;  %19603 = vrcp.f32 %v23405_v2  ;;  %17233 = vmatprep.mubr.msk.f32.mxu1 %vm2839_vm2, %v9860_v53  ;;  %12370 = vrot.lane.b32.xlu1 %v25114_v47, %s19992_s20  ;;  %v18136_v27 = vpack.c.bf16 %v18747_v8, %v18746_v58  ;;  %v9833_v0 = vmul.f32 %v19590_v46, %v9801_v52  ;;  %v25385_v17 = vld [vmem:[#allocation63_spill] sm:$0xff]  ;;  %v25386_v53 = vld [vmem:[#allocation121_spill] sm:$0xff] }
 0xa2e   : > { %v9802_v1 = vsub.f32 2.0, %v9770_v49  ;;  %19605 = vrcp.f32 %v23408_v40  ;;  %17234 = vmatmul.mubr.msk.f32.vlgmr.msra.gmra.mrb[144].mxu1 %vm2839_vm2, %v9861_v5  ;;  %17241 = vmatmul.mubr.msk.f32.vlgmr.msra.gmra.mrb[118].mxu0 %vm2839_vm2, %v9863_v45  ;;  %v9867_v46 = vmul.f32 %v23206_v42, %v9835_v16  ;;  %v18761_v45 = vunpack.i.l.bf16 %v25386_v53  ;;  %v25387_v49 = vld [vmem:[#allocation124_spill] sm:$0xff] }
 0xa2f   : > { %v19596_v61 = vpop.eup %19595  ;;  %v9800_v32 = vsub.f32 2.0, %v9768_v30  ;;  %18127 = vmatpush3.bf16.msra.mxu1 %v23364_v22  ;;  %18131 = vmatpush3.bf16.msra.mxu0 %v18128_v11  ;;  %v18752_v22 = vunpack.i.h.bf16 %v23108_v37  ;;  %v18757_v11 = vunpack.i.h.bf16 %v23114_v55  ;;  %v25383_v55 = vld [vmem:[#allocation60_spill] sm:$0xff]  ;;  %v18766_v30 = vunpack.i.l.bf16 %v25387_v49 }
 0xa30   : > { %v19598_v19 = vpop.eup %19597  ;;  %v9834_v33 = vmul.f32 %v19592_v57, %v9802_v1  ;;  %v9775_v34 = vmul.f32 %v19596_v61, %v9683_v60  ;;  %12372 = vrot.lane.b32.xlu0 %v25117_v10, %s19992_s20  ;;  %18133 = vmatprep.subr.bf16.mxu1 %v18132_v7  ;;  %v9692_v47 = vpop.xlane.xlu1 %9691 }
 0xa31   : > { %v23421_v63 = vpop.xlane.xlu0 %9685  ;;  %v9832_v24 = vmul.f32 %v19594_v44, %v9800_v32  ;;  %v9773_v12 = vmul.f32 %v19598_v19, %v23379_v43  ;;  %18137 = vmatprep.subr.bf16.mxu0 %v18136_v27  ;;  %19607 = vrcp.f32 %v9692_v47  ;;  %18859 = vrot.lane.b32.xlu1 %v25246_v56, %s19992_s20  ;;  %v9865_v56 = vmul.f32 %v23208_v59, %v9833_v0  ;;  %v25389_v0 = vld [vmem:[#allocation66_spill] sm:$0xff] }
 0xa32   : > { %19609 = vrcp.f32 %v23421_v63  ;;  %v9866_v10 = vmul.f32 %v23216_v50, %v9834_v33  ;;  %v9807_v9 = vsub.f32 2.0, %v9775_v34  ;;  %v18140_v59 = vpack.c.bf16 %v18752_v22, %v18751_v48  ;;  %v25390_v22 = vld [vmem:[#allocation67_spill] sm:$0xff] }
 0xa33   : > { %v19600_v60 = vpop.eup %19599  ;;  %v9864_v43 = vmul.f32 %v23218_v29, %v9832_v24  ;;  %v9805_v26 = vsub.f32 2.0, %v9773_v12  ;;  %v18144_v39 = vpack.c.bf16 %v18757_v11, %v18756_v6  ;;  %v18762_v44 = vunpack.i.h.bf16 %v25386_v53  ;;  %v25404_v53 = vld [vmem:[#allocation83_spill] sm:$0xff] }
 0xa34   : > { %v19602_v21 = vpop.eup %19601  ;;  %v9774_v37 = vmul.f32 %v19600_v60, %v23387_v28  ;;  %12461 = vrot.lane.b32.xlu0 %v25382_v14, %s19992_s20  ;;  %17254 = vmatprep.mubr.msk.f32.mxu0 %vm2839_vm2, %v9866_v10  ;;  %v9839_v3 = vmul.f32 %v19596_v61, %v9807_v9  ;;  %v25391_v10 = vld [vmem:[#allocation65_spill] sm:$0xff] }
 0xa35   : > { %v9701_v50 = vpop.xlane.xlu0 %9700  ;;  %v9772_v38 = vmul.f32 %v19602_v21, %v23389_v15  ;;  %17247 = vmatprep.mubr.msk.f32.mxu1 %vm2839_vm2, %v9864_v43  ;;  %12463 = vrot.lane.b32.xlu1 %v25383_v55, %s19992_s20  ;;  %v9837_v15 = vmul.f32 %v19598_v19, %v9805_v26  ;;  %v25388_v19 = vld [vmem:[#allocation62_spill] sm:$0xff]  ;;  %v25394_v55 = vld [vmem:[#allocation73_spill] sm:$0xff] }
 0xa36   : > { %19611 = vrcp.f32 %v9701_v50  ;;  %v9806_v42 = vsub.f32 2.0, %v9774_v37  ;;  %17248 = vmatmul.mubr.msk.f32.vlgmr.msra.gmra.mrb[146].mxu1 %vm2839_vm2, %v9865_v56  ;;  %17255 = vmatmul.mubr.msk.f32.vlgmr.msra.gmra.mrb[120].mxu0 %vm2839_vm2, %v9867_v46  ;;  %v9871_v61 = vmul.f32 %v23226_v13, %v9839_v3  ;;  %v18148_v13 = vpack.c.bf16 %v18762_v44, %v18761_v45  ;;  %v25397_v3 = vld [vmem:[#allocation122_spill] sm:$0xff]  ;;  %v25405_v44 = vld [vmem:[#allocation85_spill] sm:$0xff]  ;;  %v23514_v45 = vpop.permute.xlu1 %11553 }
 0xa37   : > { %v19604_v29 = vpop.eup %19603  ;;  %v9804_v28 = vsub.f32 2.0, %v9772_v38  ;;  %18135 = vmatpush3.bf16.msra.mxu1 %v18132_v7  ;;  %18139 = vmatpush3.bf16.msra.mxu0 %v18136_v27  ;;  %v9869_v16 = vmul.f32 %v23228_v31, %v9837_v15  ;;  %v25399_v15 = vld [vmem:[#allocation143_spill] sm:$0xff] }
 0xa38   : > { %v19606_v20 = vpop.eup %19605  ;;  %v9838_v18 = vmul.f32 %v19600_v60, %v9806_v42  ;;  %v9779_v35 = vmul.f32 %v19604_v29, %v23405_v2  ;;  %12552 = vrot.lane.b32.xlu0 %v25384_v23, %s19992_s20  ;;  %18141 = vmatprep.subr.bf16.mxu1 %v18140_v59  ;;  %v18767_v2 = vunpack.i.h.bf16 %v25387_v49  ;;  %v25392_v60 = vld [vmem:[#allocation119_spill] sm:$0xff] }
 0xa39   : > { %v9698_v57 = vpop.xlane.xlu0 %9697  ;;  %v9836_v8 = vmul.f32 %v19602_v21, %v9804_v28  ;;  %v9777_v58 = vmul.f32 %v19606_v20, %v23408_v40  ;;  %18145 = vmatprep.subr.bf16.mxu0 %v18144_v39  ;;  %12554 = vrot.lane.b32.xlu1 %v25385_v17, %s19992_s20  ;;  %v18772_v11 = vunpack.i.h.bf16 %v25392_v60  ;;  %v18771_v6 = vunpack.i.l.bf16 %v25392_v60  ;;  %v25393_v21 = vld [vmem:[#allocation120_spill] sm:$0xff]  ;;  %v25403_v17 = vld [vmem:[#allocation79_spill] sm:$0xff] }
 0xa3a   : > { %19613 = vrcp.f32 %v9698_v57  ;;  %v9870_v5 = vmul.f32 %v23235_v4, %v9838_v18  ;;  %v9811_v1 = vsub.f32 2.0, %v9779_v35  ;;  %v18777_v46 = vunpack.i.h.bf16 %v25393_v21  ;;  %v25400_v35 = vld [vmem:[#allocation142_spill] sm:$0xff]  ;;  %v25407_v60 = vld [vmem:[#allocation31_spill] sm:$0xff] }
 0xa3b   : > { %v19608_v52 = vpop.eup %19607  ;;  %v9868_v7 = vmul.f32 %v23237_v51, %v9836_v8  ;;  %v9809_v32 = vsub.f32 2.0, %v9777_v58  ;;  %v18776_v56 = vunpack.i.l.bf16 %v25393_v21  ;;  %v18782_v28 = vunpack.i.h.bf16 %v25397_v3  ;;  %v25402_v8 = vld [vmem:[#allocation75_spill] sm:$0xff] }
 0xa3c   : > { %v19610_v40 = vpop.eup %19609  ;;  %v9778_v27 = vmul.f32 %v19608_v52, %v9692_v47  ;;  %12643 = vrot.lane.b32.xlu0 %v25388_v19, %s19992_s20  ;;  %17268 = vmatprep.mubr.msk.f32.mxu0 %vm2839_vm2, %v9870_v5  ;;  %v9843_v33 = vmul.f32 %v19604_v29, %v9811_v1  ;;  %v18152_v47 = vpack.c.bf16 %v18767_v2, %v18766_v30  ;;  %v25396_v29 = vld [vmem:[#allocation77_spill] sm:$0xff] }
 0xa3d   : > { %v9776_v4 = vmul.f32 %v19610_v40, %v23421_v63  ;;  %17261 = vmatprep.mubr.msk.f32.mxu1 %vm2839_vm2, %v9868_v7  ;;  %12645 = vrot.lane.b32.xlu1 %v25389_v0, %s19992_s20  ;;  %v9841_v24 = vmul.f32 %v19606_v20, %v9809_v32  ;;  %v25398_v20 = vld [vmem:[#allocation71_spill] sm:$0xff] }
 0xa3e   : > { %v9810_v51 = vsub.f32 2.0, %v9778_v27  ;;  %17262 = vmatmul.mubr.msk.f32.vlgmr.msra.gmra.mrb[148].mxu1 %vm2839_vm2, %v9869_v16  ;;  %17269 = vmatmul.mubr.msk.f32.vlgmr.msra.gmra.mrb[122].mxu0 %vm2839_vm2, %v9871_v61  ;;  %v9875_v14 = vmul.f32 %v23244_v62, %v9843_v33 }
 0xa3f   : > { %v9808_v34 = vsub.f32 2.0, %v9776_v4  ;;  %18143 = vmatpush3.bf16.msra.mxu1 %v18140_v59  ;;  %18147 = vmatpush3.bf16.msra.mxu0 %v18144_v39  ;;  %v18781_v39 = vunpack.i.l.bf16 %v25397_v3 }
 0xa40   : > { %v19612_v31 = vpop.eup %19611  ;;  %v9842_v12 = vmul.f32 %v19608_v52, %v9810_v51  ;;  %18869 = vrot.lane.b32.xlu0 %v25390_v22, %s19992_s20  ;;  %18149 = vmatprep.subr.bf16.mxu1 %v18148_v13  ;;  %v23516_v52 = vpop.permute.xlu0 %11551 }
 0xa41   : > { %v9781_v63 = vmul.f32 %v19612_v31, %v9701_v50  ;;  %v9840_v48 = vmul.f32 %v19610_v40, %v9808_v34  ;;  %18153 = vmatprep.subr.bf16.mxu0 %v18152_v47  ;;  %18864 = vrot.lane.b32.xlu1 %v25391_v10, %s19992_s20  ;;  %v9873_v50 = vmul.f32 %v23246_v41, %v9841_v24 }
 0xa42   : > { %v9874_v9 = vmul.f32 %v23252_v36, %v9842_v12  ;;  %v25395_v36 = vld [vmem:[#allocation69_spill] sm:$0xff]  ;;  %v23488_v41 = vpack.c.bf16 %v18777_v46, %v18776_v56  ;;  %v23505_v58 = vpack.c.bf16 %v18782_v28, %v18781_v39  ;;  %v25406_v12 = vld [vmem:[#allocation131_spill] sm:$0xff] }
 0xa43   : > { %v9813_v26 = vsub.f32 2.0, %v9781_v63  ;;  %v9872_v37 = vmul.f32 %v23254_v25, %v9840_v48  ;;  %v18156_v25 = vpack.c.bf16 %v18772_v11, %v18771_v6  ;;  %v18787_v63 = vunpack.i.h.bf16 %v25406_v12  ;;  %v25410_v39 = vld [vmem:[#allocation145_spill] sm:$0xff] }
 0xa44   : > { %v19614_v43 = vpop.eup %19613  ;;  %18884 = vrot.lane.b32.xlu0 %v25394_v55, %s19992_s20  ;;  %17282 = vmatprep.mubr.msk.f32.mxu0 %vm2839_vm2, %v9874_v9  ;;  %v18786_v22 = vunpack.i.l.bf16 %v25406_v12 }
 0xa45   : > { %v9780_v38 = vmul.f32 %v19614_v43, %v9698_v57  ;;  %17275 = vmatprep.mubr.msk.f32.mxu1 %vm2839_vm2, %v9872_v37  ;;  %18874 = vrot.lane.b32.xlu1 %v25395_v36, %s19992_s20  ;;  %v9845_v62 = vmul.f32 %v19612_v31, %v9813_v26  ;;  %v25401_v57 = vld [vmem:[#allocation81_spill] sm:$0xff] }
 0xa46   : > { %17276 = vmatmul.mubr.msk.f32.vlgmr.msra.gmra.mrb[150].mxu1 %vm2839_vm2, %v9873_v50  ;;  %17283 = vmatmul.mubr.msk.f32.vlgmr.msra.gmra.mrb[124].mxu0 %vm2839_vm2, %v9875_v14  ;;  %v18168_v26 = vpack.c.bf16 %v18787_v63, %v18786_v22 }
 0xa47   : > { %v9812_v42 = vsub.f32 2.0, %v9780_v38  ;;  %18151 = vmatpush3.bf16.msra.mxu1 %v18148_v13  ;;  %18155 = vmatpush3.bf16.msra.mxu0 %v18152_v47  ;;  %v9877_v23 = vmul.f32 %v25400_v35, %v9845_v62 }
 0xa48   : > { %18894 = vrot.lane.b32.xlu0 %v25396_v29, %s19992_s20  ;;  %18157 = vmatprep.subr.bf16.mxu1 %v18156_v25 }
 0xa49   : > { %v9844_v59 = vmul.f32 %v19614_v43, %v9812_v42  ;;  %18161 = vmatprep.subr.bf16.mxu0 %v23488_v41  ;;  %18879 = vrot.lane.b32.xlu1 %v25398_v20, %s19992_s20 }
 0xa4b   : > { %v9876_v18 = vmul.f32 %v25399_v15, %v9844_v59  ;;  %v25409_v59 = vld [vmem:[#allocation125_spill] sm:$0xff] }
 0xa4c   : > { %18904 = vrot.lane.b32.xlu0 %v25401_v57, %s19992_s20  ;;  %v18792_v29 = vunpack.i.h.bf16 %v25409_v59  ;;  %v18791_v3 = vunpack.i.l.bf16 %v25409_v59  ;;  %v25411_v15 = vld [vmem:[#allocation29_spill] sm:$0xff] }
 0xa4d   : > { %17289 = vmatprep.mubr.msk.f32.mxu1 %vm2839_vm2, %v9876_v18  ;;  %18889 = vrot.lane.b32.xlu1 %v25402_v8, %s19992_s20 }
 0xa4e   : > { %17290 = vmatmul.mubr.msk.f32.vlgmr.msra.gmra.mrb[152].mxu1 %vm2839_vm2, %v9877_v23 }
 0xa4f   : > { %18159 = vmatpush3.bf16.msra.mxu1 %v18156_v25 }
 0xa50   : > { %18165 = vmatprep.subr.bf16.mxu1 %v23505_v58 }
 0xa51   : > { %18899 = vrot.lane.b32.xlu1 %v25403_v17, %s19992_s20 }
 0xa55   : > { %18909 = vrot.lane.b32.xlu1 %v25404_v53, %s19992_s20 }
 0xa59   : > { %18914 = vrot.lane.b32.xlu1 %v25405_v44, %s19992_s20  ;;  %v25412_v44 = vld [vmem:[#allocation133_spill] sm:$0xff] }
 0xa65   : > { %v9707_v5 = vpop.xlane.xlu1 %9706 }
 0xa66   : > { %19615 = vrcp.f32 %v9707_v5 }
 0xa69   : > { %v9704_v49 = vpop.xlane.xlu1 %9703 }
 0xa6a   : > { %19617 = vrcp.f32 %v9704_v49 }
 0xa6d   : > { %v9713_v2 = vpop.xlane.xlu1 %9712  ;;  %v9719_v30 = vpop.xlane.xlu0 %9718 }
 0xa6e   : > { %19619 = vrcp.f32 %v9713_v2 }
 0xa6f   : > { %19621 = vrcp.f32 %v9719_v30 }
 0xa70   : > { %v19616_v1 = vpop.eup %19615 }
 0xa71   : > { %v9783_v7 = vmul.f32 %v19616_v1, %v9707_v5  ;;  %v9710_v40 = vpop.xlane.xlu1 %9709  ;;  %v9725_v61 = vpop.xlane.xlu0 %9724  ;;  %v18797_v5 = vunpack.i.h.bf16 %v25412_v44 }
 0xa72   : > { %19623 = vrcp.f32 %v9710_v40 }
 0xa73   : > { %19625 = vrcp.f32 %v9725_v61  ;;  %v9815_v32 = vsub.f32 2.0, %v9783_v7 }
 0xa74   : > { %v19618_v16 = vpop.eup %19617 }
 0xa75   : > { %v9782_v27 = vmul.f32 %v19618_v16, %v9704_v49  ;;  %v9716_v19 = vpop.xlane.xlu1 %9715  ;;  %v23518_v4 = vpop.permute.xlu0 %18814  ;;  %v9847_v13 = vmul.f32 %v19616_v1, %v9815_v32  ;;  %v18796_v49 = vunpack.i.l.bf16 %v25412_v44  ;;  %v25413_v1 = vld [vmem:[#allocation147_spill] sm:$0xff] }
 0xa76   : > { %19627 = vrcp.f32 %v9716_v19  ;;  %v18816_v59 = vunpack.i.l.bf16 %v23518_v4 }
 0xa77   : > { %v9814_v0 = vsub.f32 2.0, %v9782_v27  ;;  %v9879_v11 = vmul.f32 %v25407_v60, %v9847_v13 }
 0xa78   : > { %v19620_v51 = vpop.eup %19619 }
 0xa79   : > { %v19622_v31 = vpop.eup %19621  ;;  %v9846_v33 = vmul.f32 %v19618_v16, %v9814_v0  ;;  %v9785_v34 = vmul.f32 %v19620_v51, %v9713_v2  ;;  %v9722_v47 = vpop.xlane.xlu1 %9721  ;;  %v18174_v2 = vpack.c.bf16 %v18792_v29, %v18791_v3  ;;  %v18180_v0 = vpack.c.bf16 %v18797_v5, %v18796_v49  ;;  %v25424_v3 = vld [vmem:[#allocation136_spill] sm:$0xff] }
 0xa7a   : > { %v23520_v24 = vpop.permute.xlu0 %11644  ;;  %19629 = vrcp.f32 %v9722_v47  ;;  %v9787_v9 = vmul.f32 %v19622_v31, %v9719_v30 }
 0xa7b   : > { %v9878_v48 = vmul.f32 %v23284_v54, %v9846_v33  ;;  %v9817_v6 = vsub.f32 2.0, %v9785_v34  ;;  %v25417_v33 = vld [vmem:[#allocation148_spill] sm:$0xff] }
 0xa7c   : > { %v19624_v10 = vpop.eup %19623  ;;  %v9819_v50 = vsub.f32 2.0, %v9787_v9 }
 0xa7d   : > { %v19626_v43 = vpop.eup %19625  ;;  %v9784_v21 = vmul.f32 %v19624_v10, %v9710_v40  ;;  %v23526_v46 = vpop.permute.xlu1 %11642  ;;  %17296 = vmatprep.mubr.msk.f32.mxu0 %vm2839_vm2, %v9878_v48  ;;  %v9849_v14 = vmul.f32 %v19620_v51, %v9817_v6  ;;  %v25414_v40 = vld [vmem:[#allocation144_spill] sm:$0xff]  ;;  %v25415_v51 = vld [vmem:[#allocation134_spill] sm:$0xff]  ;;  %v25419_v48 = vld [vmem:[#allocation139_spill] sm:$0xff] }
 0xa7e   : > { %v23529_v56 = vpop.permute.xlu0 %11733  ;;  %17297 = vmatmul.mubr.msk.f32.vlgmr.msra.gmra.mrb[126].mxu0 %vm2839_vm2, %v9879_v11  ;;  %v9789_v38 = vmul.f32 %v19626_v43, %v9725_v61  ;;  %v9851_v35 = vmul.f32 %v19622_v31, %v9819_v50  ;;  %v18801_v13 = vunpack.i.l.bf16 %v25415_v51  ;;  %v25416_v31 = vld [vmem:[#allocation132_spill] sm:$0xff]  ;;  %v18806_v60 = vunpack.i.l.bf16 %v25419_v48  ;;  %v25420_v6 = vld [vmem:[#allocation137_spill] sm:$0xff]  ;;  %v25423_v50 = vld [vmem:[#allocation138_spill] sm:$0xff] }
 0xa7f   : > { %v9816_v37 = vsub.f32 2.0, %v9784_v21  ;;  %18163 = vmatpush3.bf16.msra.mxu0 %v23488_v41  ;;  %v9881_v18 = vmul.f32 %v25411_v15, %v9849_v14 }
 0xa80   : > { %v19628_v54 = vpop.eup %19627  ;;  %18170 = vmatprep.subr.msk.bf16.mxu0 %vm20836_vm1, %v18168_v26  ;;  %v9821_v23 = vsub.f32 2.0, %v9789_v38  ;;  %v9883_v61 = vmul.f32 %v25414_v40, %v9851_v35 }
 0xa81   : > { %v9848_v36 = vmul.f32 %v19624_v10, %v9816_v37  ;;  %v9786_v42 = vmul.f32 %v19628_v54, %v9716_v19  ;;  %v23535_v25 = vpop.permute.xlu1 %18819  ;;  %v18807_v10 = vunpack.i.h.bf16 %v25419_v48  ;;  %v25422_v37 = vld [vmem:[#allocation140_spill] sm:$0xff] }
 0xa82   : > { %v23537_v62 = vpop.permute.xlu0 %18824  ;;  %v9853_v16 = vmul.f32 %v19626_v43, %v9821_v23  ;;  %v18811_v14 = vunpack.i.l.bf16 %v25422_v37  ;;  %v18821_v15 = vunpack.i.l.bf16 %v23535_v25 }
 0xa83   : > { %v9818_v28 = vsub.f32 2.0, %v9786_v42  ;;  %v9880_v41 = vmul.f32 %v25410_v39, %v9848_v36  ;;  %v18192_v21 = vpack.c.bf16 %v18807_v10, %v18806_v60  ;;  %v18817_v42 = vunpack.i.h.bf16 %v23518_v4 }
 0xa84   : > { %v19630_v20 = vpop.eup %19629  ;;  %v18822_v4 = vunpack.i.h.bf16 %v23535_v25  ;;  %v18827_v35 = vunpack.i.h.bf16 %v23537_v62  ;;  %v18826_v23 = vunpack.i.l.bf16 %v23537_v62 }
 0xa85   : > { %v9850_v57 = vmul.f32 %v19628_v54, %v9818_v28  ;;  %v9788_v8 = vmul.f32 %v19630_v20, %v9722_v47  ;;  %v23543_v17 = vpop.permute.xlu1 %11735  ;;  %17303 = vmatprep.mubr.msk.f32.mxu1 %vm2839_vm2, %v9880_v41  ;;  %v25418_v47 = vld [vmem:[#allocation146_spill] sm:$0xff]  ;;  %v18812_v54 = vunpack.i.h.bf16 %v25422_v37  ;;  %v18204_v41 = vpack.c.bf16 %v18817_v42, %v18816_v59 }
 0xa86   : > { %v23546_v53 = vpop.permute.xlu0 %11826  ;;  %17304 = vmatmul.mubr.msk.f32.vlgmr.msra.gmra.mrb[154].mxu1 %vm2839_vm2, %v9881_v18  ;;  %v9885_v12 = vmul.f32 %v25418_v47, %v9853_v16 }
 0xa87   : > { %v9820_v30 = vsub.f32 2.0, %v9788_v8  ;;  %18167 = vmatpush3.bf16.msra.mxu1 %v23505_v58  ;;  %v9882_v7 = vmul.f32 %v25413_v1, %v9850_v57  ;;  %v18802_v58 = vunpack.i.h.bf16 %v25415_v51  ;;  %v18198_v29 = vpack.c.bf16 %v18812_v54, %v18811_v14 }
 0xa88   : > { %18176 = vmatprep.subr.msk.bf16.mxu1 %vm20836_vm1, %v18174_v2  ;;  %v18210_v57 = vpack.c.bf16 %v18822_v4, %v18821_v15  ;;  %v18216_v8 = vpack.c.bf16 %v18827_v35, %v18826_v23 }
 0xa89   : > { %v9852_v32 = vmul.f32 %v19630_v20, %v9820_v30  ;;  %v23556_v27 = vpop.permute.xlu1 %11824  ;;  %17310 = vmatprep.mubr.msk.f32.mxu0 %vm2839_vm2, %v9882_v7  ;;  %v18186_v11 = vpack.c.bf16 %v18802_v58, %v18801_v13  ;;  %v25425_v20 = vld [vmem:[#allocation141_spill] sm:$0xff] }
 0xa8a   : > { %v23559_v19 = vpop.permute.xlu0 %11915  ;;  %17311 = vmatmul.mubr.msk.f32.vlgmr.msra.gmra.mrb[128].mxu0 %vm2839_vm2, %v9883_v61 }
 0xa8b   : > { %18173 = vmatpush3.bf16.xpose.msk.msra.mxu0 %vm20836_vm1, %v18168_v26  ;;  %17324 = vmatprep.mubr.msk.f32.mxu0 %vm1412_vm0, %v25416_v31  ;;  %v9884_v34 = vmul.f32 %v25417_v33, %v9852_v32  ;;  %v25421_v26 = vld [vmem:[#allocation135_spill] sm:$0xff] }
 0xa8c   : > { %18182 = vmatprep.subr.msk.bf16.mxu0 %vm20836_vm1, %v18180_v0 }
 0xa8d   : > { %v18830_v63 = vpop.permute.xlu1 %18829  ;;  %17317 = vmatprep.mubr.msk.f32.mxu1 %vm2839_vm2, %v9884_v34 }
 0xa8e   : > { %v23573_v22 = vpop.permute.xlu0 %18834  ;;  %17318 = vmatmul.mubr.msk.f32.vlgmr.msra.gmra.mrb[156].mxu1 %vm2839_vm2, %v9885_v12  ;;  %v18832_v62 = vunpack.i.h.bf16 %v18830_v63  ;;  %v18831_v44 = vunpack.i.l.bf16 %v18830_v63 }
 0xa8f   : > { %17331 = vmatprep.mubr.msk.f32.mxu1 %vm1412_vm0, %v25420_v6  ;;  %v18837_v5 = vunpack.i.h.bf16 %v23573_v22  ;;  %v18836_v49 = vunpack.i.l.bf16 %v23573_v22 }
 0xa90   : > { %18179 = vmatpush3.bf16.xpose.msk.msra.mxu1 %vm20836_vm1, %v18174_v2  ;;  %v18222_v2 = vpack.c.bf16 %v18832_v62, %v18831_v44 }
 0xa91   : > { %18188 = vmatprep.subr.msk.bf16.mxu1 %vm20836_vm1, %v18186_v11  ;;  %v23584_v9 = vpop.permute.xlu1 %11917  ;;  %v18228_v1 = vpack.c.bf16 %v18837_v5, %v18836_v49 }
 0xa92   : > { %v23586_v43 = vpop.permute.xlu0 %12008  ;;  %17325 = vmatmul.mubr.msk.f32.vlgmr.msra.gmra.mrb[130].mxu0 %vm1412_vm0, %v25421_v26 }
 0xa93   : > { %18185 = vmatpush3.bf16.xpose.msk.msra.mxu0 %vm20836_vm1, %v18180_v0  ;;  %17338 = vmatprep.mubr.msk.f32.mxu0 %vm1412_vm0, %v25423_v50 }
 0xa94   : > { %18194 = vmatprep.subr.msk.bf16.mxu0 %vm20836_vm1, %v18192_v21 }
 0xa95   : > { %v12007_v38 = vpop.permute.xlu1 %12006 }
 0xa96   : > { %v12098_v36 = vpop.permute.xlu0 %12097 }
 0xa97   : > { %17332 = vmatmul.mubr.msk.f32.vlgmr.msra.gmra.mrb[158].mxu1 %vm1412_vm0, %v25424_v3 }
 0xa98   : > { %18191 = vmatpush3.bf16.xpose.msk.msra.mxu1 %vm20836_vm1, %v18186_v11  ;;  %17345 = vmatprep.mubr.msk.f32.mxu1 %vm1412_vm0, %v23516_v52 }
 0xa99   : > { %18200 = vmatprep.subr.msk.bf16.mxu1 %vm20836_vm1, %v18198_v29  ;;  %v18840_v28 = vpop.permute.xlu1 %18839 }
 0xa9a   : > { %v18845_v39 = vpop.permute.xlu0 %18844  ;;  %17339 = vmatmul.mubr.msk.f32.vlgmr.msra.gmra.mrb[132].mxu0 %vm1412_vm0, %v25425_v20  ;;  %v18842_v7 = vunpack.i.h.bf16 %v18840_v28  ;;  %v18841_v40 = vunpack.i.l.bf16 %v18840_v28 }
 0xa9b   : > { %18197 = vmatpush3.bf16.xpose.msk.msra.mxu0 %vm20836_vm1, %v18192_v21  ;;  %17352 = vmatprep.mubr.msk.f32.mxu0 %vm1412_vm0, %v23526_v46  ;;  %v18847_v61 = vunpack.i.h.bf16 %v18845_v39  ;;  %v18846_v16 = vunpack.i.l.bf16 %v18845_v39 }
 0xa9c   : > { %18206 = vmatprep.subr.msk.bf16.mxu0 %vm20836_vm1, %v18204_v41 }
 0xa9d   : > { %v12100_v52 = vpop.permute.xlu1 %12099 }
 0xa9e   : > { %v23618_v18 = vpop.permute.xlu0 %12190 }
 0xa9f   : > { %17346 = vmatmul.mubr.msk.f32.vlgmr.msra.gmra.mrb[160].mxu1 %vm1412_vm0, %v23514_v45 }
 0xaa0   : > { %18203 = vmatpush3.bf16.xpose.msk.msra.mxu1 %vm20836_vm1, %v18198_v29  ;;  %17359 = vmatprep.mubr.msk.f32.mxu1 %vm1412_vm0, %v23529_v56 }
 0xaa1   : > { %18212 = vmatprep.subr.msk.bf16.mxu1 %vm20836_vm1, %v18210_v57  ;;  %v12189_v46 = vpop.permute.xlu1 %12188 }
 0xaa2   : > { %v12280_v25 = vpop.permute.xlu0 %12279  ;;  %17353 = vmatmul.mubr.msk.f32.vlgmr.msra.gmra.mrb[134].mxu0 %vm1412_vm0, %v23520_v24 }
 0xaa3   : > { %18209 = vmatpush3.bf16.xpose.msk.msra.mxu0 %vm20836_vm1, %v18204_v41  ;;  %17366 = vmatprep.mubr.msk.f32.mxu0 %vm1412_vm0, %v23556_v27  ;;  %v18234_v27 = vpack.c.bf16 %v18842_v7, %v18841_v40 }
 0xaa4   : > { %18218 = vmatprep.subr.msk.bf16.mxu0 %vm20836_vm1, %v18216_v8 }
 0xaa5   : > { %v18850_v45 = vpop.permute.xlu1 %18849 }
 0xaa6   : > { %v18855_v56 = vpop.permute.xlu0 %18854  ;;  %v18852_v0 = vunpack.i.h.bf16 %v18850_v45  ;;  %v18851_v51 = vunpack.i.l.bf16 %v18850_v45 }
 0xaa7   : > { %17360 = vmatmul.mubr.msk.f32.vlgmr.msra.gmra.mrb[162].mxu1 %vm1412_vm0, %v23543_v17  ;;  %v18857_v31 = vunpack.i.h.bf16 %v18855_v56  ;;  %v18856_v33 = vunpack.i.l.bf16 %v18855_v56 }
 0xaa8   : > { %18215 = vmatpush3.bf16.xpose.msk.msra.mxu1 %vm20836_vm1, %v18210_v57  ;;  %17373 = vmatprep.mubr.msk.f32.mxu1 %vm1412_vm0, %v23559_v19  ;;  %v18240_v19 = vpack.c.bf16 %v18847_v61, %v18846_v16  ;;  %v18246_v34 = vpack.c.bf16 %v18852_v0, %v18851_v51 }
 0xaa9   : > { %18224 = vmatprep.subr.msk.bf16.mxu1 %vm20836_vm1, %v18222_v2  ;;  %v12282_v24 = vpop.permute.xlu1 %12281  ;;  %v18252_v12 = vpack.c.bf16 %v18857_v31, %v18856_v33 }
 0xaaa   : > { %v12373_v30 = vpop.permute.xlu0 %12372  ;;  %17367 = vmatmul.mubr.msk.f32.vlgmr.msra.gmra.mrb[136].mxu0 %vm1412_vm0, %v23546_v53 }
 0xaab   : > { %18221 = vmatpush3.bf16.xpose.msk.msra.mxu0 %vm20836_vm1, %v18216_v8  ;;  %17380 = vmatprep.mubr.msk.f32.mxu0 %vm1412_vm0, %v12007_v38 }
 0xaac   : > { %18230 = vmatprep.subr.msk.bf16.mxu0 %vm20836_vm1, %v18228_v1 }
 0xaad   : > { %v12371_v17 = vpop.permute.xlu1 %12370 }
 0xaae   : > { %v12462_v32 = vpop.permute.xlu0 %12461 }
 0xaaf   : > { %17374 = vmatmul.mubr.msk.f32.vlgmr.msra.gmra.mrb[164].mxu1 %vm1412_vm0, %v23584_v9 }
 0xab0   : > { %18227 = vmatpush3.bf16.xpose.msk.msra.mxu1 %vm20836_vm1, %v18222_v2  ;;  %17387 = vmatprep.mubr.msk.f32.mxu1 %vm1412_vm0, %v12098_v36 }
 0xab1   : > { %18236 = vmatprep.subr.msk.bf16.mxu1 %vm20836_vm1, %v18234_v27  ;;  %v18860_v53 = vpop.permute.xlu1 %18859 }
 0xab2   : > { %17381 = vmatmul.mubr.msk.f32.vlgmr.msra.gmra.mrb[138].mxu0 %vm1412_vm0, %v23586_v43  ;;  %v12553_v58 = vpop.permute.xlu0 %12552  ;;  %v18862_v22 = vunpack.i.h.bf16 %v18860_v53  ;;  %v18861_v48 = vunpack.i.l.bf16 %v18860_v53 }
 0xab3   : > { %18233 = vmatpush3.bf16.xpose.msk.msra.mxu0 %vm20836_vm1, %v18228_v1  ;;  %17394 = vmatprep.mubr.msk.f32.mxu0 %vm1412_vm0, %v12189_v46 }
 0xab4   : > { %18242 = vmatprep.subr.msk.bf16.mxu0 %vm20836_vm1, %v18240_v19  ;;  %v18258_v60 = vpack.c.bf16 %v18862_v22, %v18861_v48 }
 0xab5   : > { %v12464_v13 = vpop.permute.xlu1 %12463 }
 0xab6   : > { %v12644_v63 = vpop.permute.xlu0 %12643 }
 0xab7   : > { %17388 = vmatmul.mubr.msk.f32.vlgmr.msra.gmra.mrb[166].mxu1 %vm1412_vm0, %v12100_v52 }
 0xab8   : > { %18239 = vmatpush3.bf16.xpose.msk.msra.mxu1 %vm20836_vm1, %v18234_v27  ;;  %17401 = vmatprep.mubr.msk.f32.mxu1 %vm1412_vm0, %v12280_v25 }
 0xab9   : > { %18248 = vmatprep.subr.msk.bf16.mxu1 %vm20836_vm1, %v18246_v34  ;;  %v12555_v47 = vpop.permute.xlu1 %12554 }
 0xaba   : > { %17395 = vmatmul.mubr.msk.f32.vlgmr.msra.gmra.mrb[140].mxu0 %vm1412_vm0, %v23618_v18  ;;  %v18870_v11 = vpop.permute.xlu0 %18869 }
 0xabb   : > { %18245 = vmatpush3.bf16.xpose.msk.msra.mxu0 %vm20836_vm1, %v18240_v19  ;;  %17408 = vmatprep.mubr.msk.f32.mxu0 %vm1412_vm0, %v12371_v17  ;;  %v18872_v21 = vunpack.i.h.bf16 %v18870_v11  ;;  %v18871_v26 = vunpack.i.l.bf16 %v18870_v11  ;;  %v23800_v11 = vld [vmem:[#allocation7 + $0x38] sm:$0xff] }
 0xabc   : > { %18254 = vmatprep.subr.msk.bf16.mxu0 %vm20836_vm1, %v18252_v12 }
 0xabd   : > { %v12646_v10 = vpop.permute.xlu1 %12645  ;;  %v18268_v38 = vpack.c.bf16 %v18872_v21, %v18871_v26 }
 0xabf   : > { %17402 = vmatmul.mubr.msk.f32.vlgmr.msra.gmra.mrb[168].mxu1 %vm1412_vm0, %v12282_v24 }
 0xac0   : > { %18251 = vmatpush3.bf16.xpose.msk.msra.mxu1 %vm20836_vm1, %v18246_v34  ;;  %17415 = vmatprep.mubr.msk.f32.mxu1 %vm1412_vm0, %v12462_v32 }
 0xac1   : > { %18260 = vmatprep.subr.msk.bf16.mxu1 %vm20836_vm1, %v18258_v60  ;;  %v18865_v6 = vpop.permute.xlu1 %18864 }
 0xac2   : > { %v18867_v9 = vunpack.i.h.bf16 %v18865_v6  ;;  %v18866_v43 = vunpack.i.l.bf16 %v18865_v6  ;;  %17409 = vmatmul.mubr.msk.f32.vlgmr.msra.gmra.mrb[142].mxu0 %vm1412_vm0, %v12373_v30  ;;  %v23802_v6 = vld [vmem:[#allocation7 + $0x30] sm:$0xff] }
 0xac3   : > { %18257 = vmatpush3.bf16.xpose.msk.msra.mxu0 %vm20836_vm1, %v18252_v12  ;;  %17422 = vmatprep.mubr.msk.f32.mxu0 %vm1412_vm0, %v12553_v58 }
 0xac4   : > { %v18264_v37 = vpack.c.bf16 %v18867_v9, %v18866_v43 }
 0xac5   : > { %v18875_v54 = vpop.permute.xlu1 %18874 }
 0xac6   : > { %v18877_v14 = vunpack.i.h.bf16 %v18875_v54  ;;  %v18876_v50 = vunpack.i.l.bf16 %v18875_v54  ;;  %18265 = vmatprep.subr.bf16.mxu0 %v18264_v37 }
 0xac7   : > { %17416 = vmatmul.mubr.msk.f32.vlgmr.msra.gmra.mrb[170].mxu1 %vm1412_vm0, %v12464_v13 }
 0xac8   : > { %18263 = vmatpush3.bf16.xpose.msk.msra.mxu1 %vm20836_vm1, %v18258_v60  ;;  %17429 = vmatprep.mubr.msk.f32.mxu1 %vm1412_vm0, %v12644_v63  ;;  %v23696_v36 = vpack.c.bf16 %v18877_v14, %v18876_v50 }
 0xac9   : > { %18269 = vmatprep.subr.bf16.mxu1 %v18268_v38  ;;  %v18880_v42 = vpop.permute.xlu1 %18879 }
 0xaca   : > { %17423 = vmatmul.mubr.msk.f32.vlgmr.msra.gmra.mrb[144].mxu0 %vm1412_vm0, %v12555_v47  ;;  %v18882_v59 = vunpack.i.h.bf16 %v18880_v42  ;;  %v18881_v29 = vunpack.i.l.bf16 %v18880_v42 }
 0xacb   : > { %18267 = vmatpush3.bf16.msra.mxu0 %v18264_v37 }
 0xacc   : > { %18273 = vmatprep.subr.bf16.mxu0 %v23696_v36  ;;  %v23701_v3 = vpack.c.bf16 %v18882_v59, %v18881_v29 }
 0xace   : > { %25426 = vst [vmem:[#allocation33_spill] sm:$0xff] %v23701_v3 }
 0xacf   : > { %17430 = vmatmul.mubr.msk.f32.vlgmr.msra.gmra.mrb[172].mxu1 %vm1412_vm0, %v12646_v10 }
 0xad0   : > { %18271 = vmatpush3.bf16.msra.mxu1 %v18268_v38 }
 0xad1   : > { %18277 = vmatprep.subr.bf16.mxu1 %v23701_v3 }
 0xaec   : > { %v23704_v55 = vpop.f32.mrb[114].mxu0 }
 0xaed   : > { %v23706_v28 = vpop.f32.mrb[115].mxu0 }
 0xaf4   : > { %v23710_v41 = vpop.f32.mrb[142].mxu1 }
 0xaf5   : > { %v23712_v20 = vpop.f32.mrb[143].mxu1 }
 0xaf8   : > { %v23716_v15 = vpop.f32.mrb[116].mxu0 }
 0xaf9   : > { %v23718_v52 = vpop.f32.mrb[117].mxu0 }
 0xb01   : > { %v23722_v35 = vpop.f32.mrb[144].mxu1  ;;  %v23724_v23 = vpop.f32.mrb[118].mxu0 }
 0xb02   : > { %v23726_v57 = vpop.f32.mrb[145].mxu1  ;;  %v23728_v46 = vpop.f32.mrb[119].mxu0 }
 0xb09   : > { %v23734_v62 = vpop.f32.mrb[146].mxu1  ;;  %v23736_v44 = vpop.f32.mrb[120].mxu0 }
 0xb0a   : > { %25427 = vst [vmem:[#allocation32_spill] sm:$0xff] %v23736_v44  ;;  %v23738_v45 = vpop.f32.mrb[147].mxu1  ;;  %v23740_v56 = vpop.f32.mrb[121].mxu0 }
 0xb0b   : > { %25428 = vst [vmem:[#allocation35_spill] sm:$0xff] %v23740_v56 }
 0xb11   : > { %v23746_v2 = vpop.f32.mrb[148].mxu1  ;;  %v23748_v24 = vpop.f32.mrb[122].mxu0 }
 0xb12   : > { %25429 = vst [vmem:[#allocation37_spill] sm:$0xff] %v23748_v24  ;;  %v23750_v30 = vpop.f32.mrb[149].mxu1  ;;  %v23752_v1 = vpop.f32.mrb[123].mxu0 }
 0xb13   : > { %25430 = vst [vmem:[#allocation36_spill] sm:$0xff] %v23752_v1 }
 0xb19   : > { %v23758_v17 = vpop.f32.mrb[150].mxu1  ;;  %v23760_v61 = vpop.f32.mrb[124].mxu0 }
 0xb1a   : > { %25431 = vst [vmem:[#allocation39_spill] sm:$0xff] %v23758_v17  ;;  %25432 = vst [vmem:[#allocation42_spill] sm:$0xff] %v23760_v61  ;;  %v23762_v16 = vpop.f32.mrb[151].mxu1  ;;  %v23764_v32 = vpop.f32.mrb[125].mxu0 }
 0xb1b   : > { %25433 = vst [vmem:[#allocation41_spill] sm:$0xff] %v23762_v16  ;;  %25434 = vst [vmem:[#allocation43_spill] sm:$0xff] %v23764_v32 }
 0xb21   : > { %v23770_v19 = vpop.f32.mrb[152].mxu1 }
 0xb22   : > { %25435 = vst [vmem:[#allocation46_spill] sm:$0xff] %v23770_v19  ;;  %v23772_v0 = vpop.f32.mrb[153].mxu1 }
 0xb23   : > { %25436 = vst [vmem:[#allocation44_spill] sm:$0xff] %v23772_v0 }
 0xb51   : > { %v23776_v58 = vpop.f32.mrb[126].mxu0 }
 0xb52   : > { %25437 = vst [vmem:[#allocation47_spill] sm:$0xff] %v23776_v58  ;;  %v23778_v13 = vpop.f32.mrb[127].mxu0 }
 0xb53   : > { %25438 = vst [vmem:[#allocation50_spill] sm:$0xff] %v23778_v13 }
 0xb59   : > { %v23782_v33 = vpop.f32.mrb[154].mxu1 }
 0xb5a   : > { %25439 = vst [vmem:[#allocation40_spill] sm:$0xff] %v23782_v33  ;;  %v23784_v34 = vpop.f32.mrb[155].mxu1 }
 0xb5b   : > { %25440 = vst [vmem:[#allocation45_spill] sm:$0xff] %v23784_v34 }
 0xb5d   : > { %v23788_v12 = vpop.f32.mrb[128].mxu0 }
 0xb5e   : > { %25441 = vst [vmem:[#allocation34_spill] sm:$0xff] %v23788_v12  ;;  %v23790_v63 = vpop.f32.mrb[129].mxu0 }
 0xb5f   : > { %25442 = vst [vmem:[#allocation48_spill] sm:$0xff] %v23790_v63 }
 0xb61   : > { %v23794_v48 = vpop.f32.mrb[156].mxu1 }
 0xb62   : > { %25443 = vst [vmem:[#allocation51_spill] sm:$0xff] %v23794_v48  ;;  %v23796_v10 = vpop.f32.mrb[157].mxu1 }
 0xb63   : > { %25444 = vst [vmem:[#allocation38_spill] sm:$0xff] %v23796_v10 }
 0xb65   : > { %v17326_v9 = vpop.f32.mrb[130].mxu0 }
 0xb66   : > { %v23805_v43 = vadd.f32 %v17326_v9, %v23800_v11  ;;  %v11360_v21 = vpop.f32.mrb[131].mxu0 }
 0xb67   : > { %v23808_v26 = vadd.f32 %v23802_v6, %v11360_v21 }
 0xb68   : > { %v12772_v37 = vsel %vm2839_vm2, %v23805_v43, -inf }
 0xb69   : > { %12773 = vmax.xlane.f32.xlu1 %v12772_v37  ;;  %v12769_v54 = vsel %vm2839_vm2, %v23808_v26, -inf }
 0xb6a   : > { %12770 = vmax.xlane.f32.xlu0 %v12769_v54  ;;  %v17333_v14 = vpop.f32.mrb[158].mxu1 }
 0xb6b   : > { %v23815_v50 = vadd.f32 %v17333_v14, %v23800_v11  ;;  %v11451_v38 = vpop.f32.mrb[159].mxu1 }
 0xb6c   : > { %v23818_v42 = vadd.f32 %v23802_v6, %v11451_v38 }
 0xb6d   : > { %v17340_v59 = vpop.f32.mrb[132].mxu0  ;;  %v12778_v29 = vsel %vm2839_vm2, %v23815_v50, -inf }
 0xb6e   : > { %v23823_v9 = vadd.f32 %v17340_v59, %v23800_v11  ;;  %v11542_v21 = vpop.f32.mrb[133].mxu0  ;;  %12779 = vmax.xlane.f32.xlu0 %v12778_v29  ;;  %v12775_v14 = vsel %vm2839_vm2, %v23818_v42, -inf }
 0xb6f   : > { %v23828_v54 = vadd.f32 %v23802_v6, %v11542_v21 }
 0xb70   : > { %v12784_v37 = vsel %vm2839_vm2, %v23823_v9, -inf }
 0xb71   : > { %12785 = vmax.xlane.f32.xlu1 %v12784_v37  ;;  %v12781_v47 = vsel %vm2839_vm2, %v23828_v54, -inf }
 0xb72   : > { %12776 = vmax.xlane.f32.xlu0 %v12775_v14  ;;  %v17347_v38 = vpop.f32.mrb[160].mxu1 }
 0xb73   : > { %v23833_v60 = vadd.f32 %v17347_v38, %v23800_v11  ;;  %v11633_v22 = vpop.f32.mrb[161].mxu1 }
 0xb74   : > { %v23836_v59 = vadd.f32 %v23802_v6, %v11633_v22 }
 0xb75   : > { %v17354_v29 = vpop.f32.mrb[134].mxu0  ;;  %v12790_v21 = vsel %vm2839_vm2, %v23833_v60, -inf }
 0xb76   : > { %v23843_v37 = vadd.f32 %v17354_v29, %v23800_v11  ;;  %12782 = vmax.xlane.f32.xlu0 %v12781_v47  ;;  %12791 = vmax.xlane.f32.xlu1 %v12790_v21  ;;  %v11724_v14 = vpop.f32.mrb[135].mxu0  ;;  %v12787_v22 = vsel %vm2839_vm2, %v23836_v59, -inf }
 0xb77   : > { %v23848_v31 = vadd.f32 %v23802_v6, %v11724_v14 }
 0xb78   : > { %v12796_v38 = vsel %vm2839_vm2, %v23843_v37, -inf }
 0xb79   : > { %v12793_v27 = vsel %vm2839_vm2, %v23848_v31, -inf }
 0xb7a   : > { %12788 = vmax.xlane.f32.xlu0 %v12787_v22  ;;  %12797 = vmax.xlane.f32.xlu1 %v12796_v38  ;;  %v17361_v51 = vpop.f32.mrb[162].mxu1 }
 0xb7b   : > { %v23853_v53 = vadd.f32 %v17361_v51, %v23800_v11  ;;  %v11815_v29 = vpop.f32.mrb[163].mxu1 }
 0xb7c   : > { %v23856_v47 = vadd.f32 %v23802_v6, %v11815_v29 }
 0xb7d   : > { %v17368_v21 = vpop.f32.mrb[136].mxu0  ;;  %v12802_v14 = vsel %vm2839_vm2, %v23853_v53, -inf }
 0xb7e   : > { %v23863_v40 = vadd.f32 %v17368_v21, %v23800_v11  ;;  %12794 = vmax.xlane.f32.xlu0 %v12793_v27  ;;  %12803 = vmax.xlane.f32.xlu1 %v12802_v14  ;;  %v11906_v38 = vpop.f32.mrb[137].mxu0  ;;  %v12799_v29 = vsel %vm2839_vm2, %v23856_v47, -inf }
 0xb7f   : > { %v23868_v22 = vadd.f32 %v23802_v6, %v11906_v38 }
 0xb80   : > { %v12808_v51 = vsel %vm2839_vm2, %v23863_v40, -inf }
 0xb81   : > { %v12805_v38 = vsel %vm2839_vm2, %v23868_v22, -inf }
 0xb82   : > { %12800 = vmax.xlane.f32.xlu0 %v12799_v29  ;;  %v17375_v49 = vpop.f32.mrb[164].mxu1  ;;  %12809 = vmax.xlane.f32.xlu1 %v12808_v51 }
 0xb83   : > { %v23873_v8 = vadd.f32 %v17375_v49, %v23800_v11  ;;  %v11997_v21 = vpop.f32.mrb[165].mxu1 }
 0xb84   : > { %v23876_v27 = vadd.f32 %v23802_v6, %v11997_v21 }
 0xb85   : > { %v17382_v14 = vpop.f32.mrb[138].mxu0  ;;  %v12814_v18 = vsel %vm2839_vm2, %v23873_v8, -inf }
 0xb86   : > { %v23883_v39 = vadd.f32 %v17382_v14, %v23800_v11  ;;  %12815 = vmax.xlane.f32.xlu1 %v12814_v18  ;;  %12806 = vmax.xlane.f32.xlu0 %v12805_v38  ;;  %v12088_v51 = vpop.f32.mrb[139].mxu0  ;;  %v12811_v21 = vsel %vm2839_vm2, %v23876_v27, -inf }
 0xb87   : > { %v23888_v29 = vadd.f32 %v23802_v6, %v12088_v51 }
 0xb88   : > { %v12820_v49 = vsel %vm2839_vm2, %v23883_v39, -inf }
 0xb89   : > { %v12817_v51 = vsel %vm2839_vm2, %v23888_v29, -inf }
 0xb8a   : > { %v17389_v7 = vpop.f32.mrb[166].mxu1  ;;  %12812 = vmax.xlane.f32.xlu0 %v12811_v21  ;;  %12821 = vmax.xlane.f32.xlu1 %v12820_v49 }
 0xb8b   : > { %v23893_v5 = vadd.f32 %v17389_v7, %v23800_v11  ;;  %v12179_v14 = vpop.f32.mrb[167].mxu1 }
 0xb8c   : > { %v23896_v18 = vadd.f32 %v23802_v6, %v12179_v14 }
 0xb8d   : > { %v17396_v38 = vpop.f32.mrb[140].mxu0  ;;  %v12826_v25 = vsel %vm2839_vm2, %v23893_v5, -inf }
 0xb8e   : > { %v23903_v4 = vadd.f32 %v17396_v38, %v23800_v11  ;;  %12827 = vmax.xlane.f32.xlu1 %v12826_v25  ;;  %12818 = vmax.xlane.f32.xlu0 %v12817_v51  ;;  %v12270_v49 = vpop.f32.mrb[141].mxu0  ;;  %v12823_v14 = vsel %vm2839_vm2, %v23896_v18, -inf }
 0xb8f   : > { %v23908_v21 = vadd.f32 %v23802_v6, %v12270_v49 }
 0xb90   : > { %v12832_v7 = vsel %vm2839_vm2, %v23903_v4, -inf }
 0xb91   : > { %v12829_v49 = vsel %vm2839_vm2, %v23908_v21, -inf }
 0xb92   : > { %v17403_v10 = vpop.f32.mrb[168].mxu1  ;;  %12824 = vmax.xlane.f32.xlu0 %v12823_v14  ;;  %12833 = vmax.xlane.f32.xlu1 %v12832_v7 }
 0xb93   : > { %v23913_v48 = vadd.f32 %v17403_v10, %v23800_v11  ;;  %v12361_v38 = vpop.f32.mrb[169].mxu1 }
 0xb94   : > { %v23916_v25 = vadd.f32 %v23802_v6, %v12361_v38 }
 0xb95   : > { %v17410_v51 = vpop.f32.mrb[142].mxu0  ;;  %v12838_v63 = vsel %vm2839_vm2, %v23913_v48, -inf }
 0xb96   : > { %v23923_v12 = vadd.f32 %v17410_v51, %v23800_v11  ;;  %12839 = vmax.xlane.f32.xlu1 %v12838_v63  ;;  %12830 = vmax.xlane.f32.xlu0 %v12829_v49  ;;  %v12452_v7 = vpop.f32.mrb[143].mxu0  ;;  %v12835_v38 = vsel %vm2839_vm2, %v23916_v25, -inf }
 0xb97   : > { %v23928_v14 = vadd.f32 %v23802_v6, %v12452_v7 }
 0xb98   : > { %v12844_v10 = vsel %vm2839_vm2, %v23923_v12, -inf }
 0xb99   : > { %v12841_v7 = vsel %vm2839_vm2, %v23928_v14, -inf }
 0xb9a   : > { %v17417_v34 = vpop.f32.mrb[170].mxu1  ;;  %12836 = vmax.xlane.f32.xlu0 %v12835_v38  ;;  %12845 = vmax.xlane.f32.xlu1 %v12844_v10 }
 0xb9b   : > { %v23933_v33 = vadd.f32 %v17417_v34, %v23800_v11  ;;  %v12543_v51 = vpop.f32.mrb[171].mxu1 }
 0xb9c   : > { %v23936_v63 = vadd.f32 %v23802_v6, %v12543_v51 }
 0xb9d   : > { %v17424_v49 = vpop.f32.mrb[144].mxu0  ;;  %v12850_v13 = vsel %vm2839_vm2, %v23933_v33, -inf }
 0xb9e   : > { %v23943_v58 = vadd.f32 %v17424_v49, %v23800_v11  ;;  %12851 = vmax.xlane.f32.xlu1 %v12850_v13  ;;  %12842 = vmax.xlane.f32.xlu0 %v12841_v7  ;;  %v12634_v10 = vpop.f32.mrb[145].mxu0  ;;  %v12847_v51 = vsel %vm2839_vm2, %v23936_v63, -inf }
 0xb9f   : > { %v23948_v38 = vadd.f32 %v23802_v6, %v12634_v10 }
 0xba0   : > { %v12856_v34 = vsel %vm2839_vm2, %v23943_v58, -inf }
 0xba1   : > { %v12853_v10 = vsel %vm2839_vm2, %v23948_v38, -inf }
 0xba2   : > { %v17431_v0 = vpop.f32.mrb[172].mxu1  ;;  %12848 = vmax.xlane.f32.xlu0 %v12847_v51  ;;  %12857 = vmax.xlane.f32.xlu1 %v12856_v34  ;;  %v23964_v34 = vpop.permute.xlu1 %18889 }
 0xba3   : > { %v23953_v19 = vadd.f32 %v17431_v0, %v23800_v11  ;;  %v12725_v49 = vpop.f32.mrb[173].mxu1  ;;  %v23968_v11 = vpop.permute.xlu0 %18884 }
 0xba4   : > { %v23956_v13 = vadd.f32 %v23802_v6, %v12725_v49 }
 0xba5   : > { %v12862_v7 = vsel %vm2839_vm2, %v23953_v19, -inf }
 0xba6   : > { %12863 = vmax.xlane.f32.xlu1 %v12862_v7  ;;  %12854 = vmax.xlane.f32.xlu0 %v12853_v10  ;;  %v12859_v32 = vsel %vm2839_vm2, %v23956_v13, -inf  ;;  %v23966_v0 = vpop.permute.xlu1 %18899 }
 0xba7   : > { %25445 = vst [vmem:[#allocation57_spill] sm:$0xff] %v23966_v0  ;;  %v23972_v51 = vpop.permute.xlu0 %18894 }
 0xbaa   : > { %12860 = vmax.xlane.f32.xlu0 %v12859_v32  ;;  %v23970_v6 = vpop.permute.xlu1 %18909 }
 0xbab   : > { %25446 = vst [vmem:[#allocation60_spill] sm:$0xff] %v23970_v6  ;;  %v23976_v61 = vpop.permute.xlu0 %18904 }
 0xbac   : > { %25448 = vst [vmem:[#allocation63_spill] sm:$0xff] %v23976_v61 }
 0xbae   : > { %v23974_v49 = vpop.permute.xlu1 %18914 }
 0xbaf   : > { %25447 = vst [vmem:[#allocation59_spill] sm:$0xff] %v23974_v49 }
 0xbf6   : > { %v12774_v7 = vpop.xlane.xlu1 %12773 }
 0xbf7   : > { %v12866_v10 = vsub.f32 %v23805_v43, %v12774_v7  ;;  %v12771_v16 = vpop.xlane.xlu0 %12770 }
 0xbf8   : > { %v12865_v32 = vsub.f32 %v23808_v26, %v12771_v16 }
 0xbf9   : > { %v12899_v17 = vmul.f32 1.442695, %v12866_v10 }
 0xbfa   : > { %v12897_v1 = vmul.f32 1.442695, %v12865_v32 }
 0xbfb   : > { %19631 = vpow2.f32 %v12899_v17  ;;  %v12780_v24 = vpop.xlane.xlu0 %12779 }
 0xbfc   : > { %19633 = vpow2.f32 %v12897_v1  ;;  %v12868_v0 = vsub.f32 %v23815_v50, %v12780_v24 }
 0xbfe   : > { %v12903_v6 = vmul.f32 1.442695, %v12868_v0  ;;  %v12786_v3 = vpop.xlane.xlu1 %12785 }
 0xbff   : > { %v12870_v56 = vsub.f32 %v23823_v9, %v12786_v3  ;;  %v12777_v49 = vpop.xlane.xlu0 %12776 }
 0xc00   : > { %19635 = vpow2.f32 %v12903_v6  ;;  %v12867_v61 = vsub.f32 %v23818_v42, %v12777_v49 }
 0xc01   : > { %v12907_v44 = vmul.f32 1.442695, %v12870_v56 }
 0xc02   : > { %v12901_v43 = vmul.f32 1.442695, %v12867_v61 }
 0xc03   : > { %19637 = vpow2.f32 %v12907_v44  ;;  %v12792_v7 = vpop.xlane.xlu1 %12791  ;;  %v12783_v16 = vpop.xlane.xlu0 %12782 }
 0xc04   : > { %19639 = vpow2.f32 %v12901_v43  ;;  %v12872_v17 = vsub.f32 %v23833_v60, %v12792_v7  ;;  %v12869_v1 = vsub.f32 %v23828_v54, %v12783_v16 }
 0xc05   : > { %v23985_v26 = vpop.eup %19631 }
 0xc06   : > { %v23987_v24 = vpop.eup %19633  ;;  %v12911_v50 = vmul.f32 1.442695, %v12872_v17  ;;  %v12905_v3 = vmul.f32 1.442695, %v12869_v1  ;;  %v12964_v9 = vsel %vm2839_vm2, %v23985_v26, 0.0 }
 0xc07   : > { %v12798_v42 = vpop.xlane.xlu1 %12797  ;;  %v12789_v56 = vpop.xlane.xlu0 %12788  ;;  %12965 = vadd.xlane.f32.xlu1 %v12964_v9  ;;  %v12961_v44 = vsel %vm2839_vm2, %v23987_v24, 0.0 }
 0xc08   : > { %19641 = vpow2.f32 %v12911_v50  ;;  %v12874_v61 = vsub.f32 %v23843_v37, %v12798_v42  ;;  %v12871_v60 = vsub.f32 %v23836_v59, %v12789_v56  ;;  %12962 = vadd.xlane.f32.xlu0 %v12961_v44 }
 0xc09   : > { %19643 = vpow2.f32 %v12905_v3 }
 0xc0a   : > { %v23995_v54 = vpop.eup %19635  ;;  %v12915_v0 = vmul.f32 1.442695, %v12874_v61  ;;  %v12909_v6 = vmul.f32 1.442695, %v12871_v60 }
 0xc0b   : > { %v12804_v49 = vpop.xlane.xlu1 %12803  ;;  %v12795_v10 = vpop.xlane.xlu0 %12794  ;;  %v12970_v32 = vsel %vm2839_vm2, %v23995_v54, 0.0 }
 0xc0c   : > { %19645 = vpow2.f32 %v12915_v0  ;;  %v12876_v43 = vsub.f32 %v23853_v53, %v12804_v49  ;;  %v12873_v7 = vsub.f32 %v23848_v31, %v12795_v10  ;;  %12971 = vadd.xlane.f32.xlu1 %v12970_v32 }
 0xc0d   : > { %v24001_v37 = vpop.eup %19637  ;;  %19647 = vpow2.f32 %v12909_v6 }
 0xc0e   : > { %v24003_v59 = vpop.eup %19639  ;;  %v12919_v16 = vmul.f32 1.442695, %v12876_v43  ;;  %v12913_v17 = vmul.f32 1.442695, %v12873_v7  ;;  %v12976_v1 = vsel %vm2839_vm2, %v24001_v37, 0.0 }
 0xc0f   : > { %v12801_v50 = vpop.xlane.xlu0 %12800  ;;  %v12810_v3 = vpop.xlane.xlu1 %12809  ;;  %v12967_v9 = vsel %vm2839_vm2, %v24003_v59, 0.0 }
 0xc10   : > { %19649 = vpow2.f32 %v12919_v16  ;;  %v12875_v53 = vsub.f32 %v23856_v47, %v12801_v50  ;;  %v12878_v31 = vsub.f32 %v23863_v40, %v12810_v3  ;;  %12977 = vadd.xlane.f32.xlu1 %v12976_v1  ;;  %12968 = vadd.xlane.f32.xlu0 %v12967_v9 }
 0xc11   : > { %19651 = vpow2.f32 %v12913_v17 }
 0xc12   : > { %v24011_v42 = vpop.eup %19641  ;;  %v12917_v56 = vmul.f32 1.442695, %v12875_v53  ;;  %v12923_v44 = vmul.f32 1.442695, %v12878_v31 }
 0xc13   : > { %v24013_v61 = vpop.eup %19643  ;;  %v12816_v60 = vpop.xlane.xlu1 %12815  ;;  %v12982_v6 = vsel %vm2839_vm2, %v24011_v42, 0.0 }
 0xc14   : > { %v12807_v0 = vpop.xlane.xlu0 %12806  ;;  %19653 = vpow2.f32 %v12917_v56  ;;  %v12880_v49 = vsub.f32 %v23873_v8, %v12816_v60  ;;  %12983 = vadd.xlane.f32.xlu1 %v12982_v6  ;;  %v12973_v40 = vsel %vm2839_vm2, %v24013_v61, 0.0 }
 0xc15   : > { %v12877_v47 = vsub.f32 %v23868_v22, %v12807_v0  ;;  %19655 = vpow2.f32 %v12923_v44  ;;  %12974 = vadd.xlane.f32.xlu0 %v12973_v40 }
 0xc16   : > { %v24021_v10 = vpop.eup %19645  ;;  %v12927_v7 = vmul.f32 1.442695, %v12880_v49 }
 0xc17   : > { %v12921_v32 = vmul.f32 1.442695, %v12877_v47  ;;  %v24023_v43 = vpop.eup %19647  ;;  %v12822_v17 = vpop.xlane.xlu1 %12821  ;;  %v12988_v1 = vsel %vm2839_vm2, %v24021_v10, 0.0 }
 0xc18   : > { %v12813_v16 = vpop.xlane.xlu0 %12812  ;;  %v12882_v22 = vsub.f32 %v23883_v39, %v12822_v17  ;;  %12989 = vadd.xlane.f32.xlu1 %v12988_v1  ;;  %v12979_v50 = vsel %vm2839_vm2, %v24023_v43, 0.0 }
 0xc19   : > { %v12879_v8 = vsub.f32 %v23876_v27, %v12813_v16  ;;  %19657 = vpow2.f32 %v12921_v32  ;;  %12980 = vadd.xlane.f32.xlu0 %v12979_v50 }
 0xc1a   : > { %v24031_v3 = vpop.eup %19649  ;;  %v12931_v9 = vmul.f32 1.442695, %v12882_v22  ;;  %19659 = vpow2.f32 %v12927_v7 }
 0xc1b   : > { %v24033_v53 = vpop.eup %19651  ;;  %v12925_v31 = vmul.f32 1.442695, %v12879_v8  ;;  %v12828_v56 = vpop.xlane.xlu1 %12827  ;;  %v12994_v27 = vsel %vm2839_vm2, %v24031_v3, 0.0 }
 0xc1c   : > { %v12819_v44 = vpop.xlane.xlu0 %12818  ;;  %12995 = vadd.xlane.f32.xlu1 %v12994_v27  ;;  %v12985_v60 = vsel %vm2839_vm2, %v24033_v53, 0.0  ;;  %19661 = vpow2.f32 %v12931_v9  ;;  %v12884_v49 = vsub.f32 %v23893_v5, %v12828_v56 }
 0xc1d   : > { %v12881_v39 = vsub.f32 %v23888_v29, %v12819_v44  ;;  %12986 = vadd.xlane.f32.xlu0 %v12985_v60  ;;  %19663 = vpow2.f32 %v12925_v31 }
 0xc1e   : > { %v24040_v0 = vpop.eup %19653  ;;  %v12935_v17 = vmul.f32 1.442695, %v12884_v49 }
 0xc1f   : > { %v24042_v6 = vpop.eup %19655  ;;  %v12929_v47 = vmul.f32 1.442695, %v12881_v39  ;;  %v12834_v32 = vpop.xlane.xlu1 %12833  ;;  %v12991_v7 = vsel %vm2839_vm2, %v24040_v0, 0.0 }
 0xc20   : > { %v12825_v40 = vpop.xlane.xlu0 %12824  ;;  %v13000_v29 = vsel %vm2839_vm2, %v24042_v6, 0.0  ;;  %v12886_v56 = vsub.f32 %v23903_v4, %v12834_v32 }
 0xc21   : > { %13001 = vadd.xlane.f32.xlu1 %v13000_v29  ;;  %12992 = vadd.xlane.f32.xlu0 %v12991_v7  ;;  %19665 = vpow2.f32 %v12929_v47  ;;  %v12883_v1 = vsub.f32 %v23896_v18, %v12825_v40 }
 0xc22   : > { %19667 = vpow2.f32 %v12935_v17  ;;  %v12939_v40 = vmul.f32 1.442695, %v12886_v56 }
 0xc23   : > { %v24049_v16 = vpop.eup %19657  ;;  %v12840_v22 = vpop.xlane.xlu1 %12839  ;;  %v12933_v31 = vmul.f32 1.442695, %v12883_v1 }
 0xc24   : > { %v12831_v8 = vpop.xlane.xlu0 %12830  ;;  %v12997_v5 = vsel %vm2839_vm2, %v24049_v16, 0.0  ;;  %v24054_v50 = vpop.eup %19659  ;;  %v12888_v1 = vsub.f32 %v23913_v48, %v12840_v22 }
 0xc25   : > { %12998 = vadd.xlane.f32.xlu0 %v12997_v5  ;;  %v13006_v39 = vsel %vm2839_vm2, %v24054_v50, 0.0  ;;  %19669 = vpow2.f32 %v12933_v31  ;;  %v12885_v7 = vsub.f32 %v23908_v21, %v12831_v8 }
 0xc26   : > { %v24056_v9 = vpop.eup %19661 }
 0xc27   : > { %v13012_v18 = vsel %vm2839_vm2, %v24056_v9, 0.0  ;;  %v24064_v60 = vpop.eup %19663  ;;  %v12846_v47 = vpop.xlane.xlu1 %12845  ;;  %v12937_v5 = vmul.f32 1.442695, %v12885_v7 }
 0xc28   : > { %v12837_v44 = vpop.xlane.xlu0 %12836  ;;  %13013 = vadd.xlane.f32.xlu1 %v13012_v18  ;;  %v13003_v32 = vsel %vm2839_vm2, %v24064_v60, 0.0  ;;  %v12890_v18 = vsub.f32 %v23923_v12, %v12846_v47 }
 0xc29   : > { %v12887_v27 = vsub.f32 %v23916_v25, %v12837_v44  ;;  %13007 = vadd.xlane.f32.xlu0 %v13006_v39 }
 0xc2b   : > { %v12941_v49 = vmul.f32 1.442695, %v12887_v27  ;;  %v24070_v29 = vpop.eup %19665  ;;  %v12852_v31 = vpop.xlane.xlu1 %12851  ;;  %v12943_v27 = vmul.f32 1.442695, %v12888_v1 }
 0xc2c   : > { %v12843_v4 = vpop.xlane.xlu0 %12842  ;;  %v13009_v21 = vsel %vm2839_vm2, %v24070_v29, 0.0  ;;  %v24076_v8 = vpop.eup %19667 }
 0xc2d   : > { %19671 = vpow2.f32 %v12941_v49  ;;  %v12889_v25 = vsub.f32 %v23928_v14, %v12843_v4  ;;  %13004 = vadd.xlane.f32.xlu0 %v13003_v32  ;;  %v13018_v22 = vsel %vm2839_vm2, %v24076_v8, 0.0  ;;  %v12947_v4 = vmul.f32 1.442695, %v12890_v18 }
 0xc2e   : > { %19673 = vpow2.f32 %v12939_v40 }
 0xc2f   : > { %v12945_v17 = vmul.f32 1.442695, %v12889_v25  ;;  %v12858_v40 = vpop.xlane.xlu1 %12857  ;;  %v12892_v25 = vsub.f32 %v23933_v33, %v12852_v31 }
 0xc30   : > { %v12849_v44 = vpop.xlane.xlu0 %12848  ;;  %v12894_v1 = vsub.f32 %v23943_v58, %v12858_v40 }
 0xc31   : > { %v12891_v56 = vsub.f32 %v23936_v63, %v12849_v44  ;;  %19675 = vpow2.f32 %v12945_v17  ;;  %13010 = vadd.xlane.f32.xlu0 %v13009_v21  ;;  %v24082_v63 = vpop.eup %19669  ;;  %v12951_v17 = vmul.f32 1.442695, %v12892_v25 }
 0xc32   : > { %19677 = vpow2.f32 %v12937_v5  ;;  %v12955_v21 = vmul.f32 1.442695, %v12894_v1 }
 0xc33   : > { %v12949_v14 = vmul.f32 1.442695, %v12891_v56  ;;  %v12864_v5 = vpop.xlane.xlu1 %12863 }
 0xc34   : > { %v12855_v39 = vpop.xlane.xlu0 %12854 }
 0xc35   : > { %19679 = vpow2.f32 %v12949_v14  ;;  %v12893_v48 = vsub.f32 %v23948_v38, %v12855_v39  ;;  %13019 = vadd.xlane.f32.xlu0 %v13018_v22  ;;  %v13015_v38 = vsel %vm2839_vm2, %v24082_v63, 0.0  ;;  %v12896_v14 = vsub.f32 %v23953_v19, %v12864_v5  ;;  %v25449_v5 = vld [vmem:[#allocation89_spill] sm:$0xff] }
 0xc36   : > { %19681 = vpow2.f32 %v12943_v27 }
 0xc37   : > { %v24084_v49 = vpop.eup %19671  ;;  %v12953_v7 = vmul.f32 1.442695, %v12893_v48  ;;  %v12959_v48 = vmul.f32 1.442695, %v12896_v14  ;;  %v25452_v14 = vld [vmem:[#allocation87_spill] sm:$0xff] }
 0xc38   : > { %v13027_v12 = vsel %vm2839_vm2, %v24084_v49, 0.0  ;;  %v24091_v47 = vpop.eup %19673 }
 0xc39   : > { %13028 = vadd.xlane.f32.xlu1 %v13027_v12  ;;  %19683 = vpow2.f32 %v12953_v7  ;;  %13016 = vadd.xlane.f32.xlu0 %v13015_v38  ;;  %v13024_v44 = vsel %vm2839_vm2, %v24091_v47, 0.0 }
 0xc3a   : > { %19685 = vpow2.f32 %v12947_v4 }
 0xc3b   : > { %v24093_v32 = vpop.eup %19675  ;;  %19687 = vpow2.f32 %v12951_v17 }
 0xc3c   : > { %v13033_v33 = vsel %vm2839_vm2, %v24093_v32, 0.0  ;;  %v24100_v31 = vpop.eup %19677  ;;  %19689 = vpow2.f32 %v12955_v21  ;;  %v12861_v21 = vpop.xlane.xlu0 %12860 }
 0xc3d   : > { %13034 = vadd.xlane.f32.xlu1 %v13033_v33  ;;  %13025 = vadd.xlane.f32.xlu0 %v13024_v44  ;;  %v13021_v27 = vsel %vm2839_vm2, %v24100_v31, 0.0  ;;  %19691 = vpow2.f32 %v12959_v48  ;;  %v25450_v33 = vld [vmem:[#allocation91_spill] sm:$0xff]  ;;  %v25451_v44 = vld [vmem:[#allocation93_spill] sm:$0xff] }
 0xc3f   : > { %v24102_v56 = vpop.eup %19679 }
 0xc40   : > { %v13039_v58 = vsel %vm2839_vm2, %v24102_v56, 0.0  ;;  %v24109_v18 = vpop.eup %19681 }
 0xc41   : > { %13040 = vadd.xlane.f32.xlu1 %v13039_v58  ;;  %13022 = vadd.xlane.f32.xlu0 %v13021_v27  ;;  %v13030_v22 = vsel %vm2839_vm2, %v24109_v18, 0.0  ;;  %v12895_v58 = vsub.f32 %v23956_v13, %v12861_v21  ;;  %v25453_v27 = vpack.i.bf16 %v23710_v41, %v23712_v20  ;;  %v25459_v13 = vld [vmem:[#allocation18_spill] sm:$0xff]  ;;  %v25461_v41 = vpack.i.bf16 %v23734_v62, %v23738_v45  ;;  %v25466_v21 = vld [vmem:[#allocation95_spill] sm:$0xff]  ;;  %v25467_v45 = vld [vmem:[#allocation49_spill] sm:$0xff] }
 0xc43   : > { %v24111_v39 = vpop.eup %19683  ;;  %v12957_v48 = vmul.f32 1.442695, %v12895_v58  ;;  %v25468_v58 = vld [vmem:[#allocation107_spill] sm:$0xff] }
 0xc44   : > { %v13045_v19 = vsel %vm2839_vm2, %v24111_v39, 0.0  ;;  %v24117_v40 = vpop.eup %19685 }
 0xc45   : > { %13031 = vadd.xlane.f32.xlu0 %v13030_v22  ;;  %13046 = vadd.xlane.f32.xlu1 %v13045_v19  ;;  %v13036_v7 = vsel %vm2839_vm2, %v24117_v40, 0.0  ;;  %v24121_v4 = vpop.eup %19687  ;;  %v25454_v22 = vld [vmem:[#allocation108_spill] sm:$0xff]  ;;  %v25455_v19 = vld [vmem:[#allocation111_spill] sm:$0xff]  ;;  %19693 = vpow2.f32 %v12957_v48 }
 0xc46   : > { %v13042_v25 = vsel %vm2839_vm2, %v24121_v4, 0.0  ;;  %v24125_v12 = vpop.eup %19689 }
 0xc47   : > { %v13048_v38 = vsel %vm2839_vm2, %v24125_v12, 0.0  ;;  %v24129_v17 = vpop.eup %19691 }
 0xc48   : > { %v13054_v1 = vsel %vm2839_vm2, %v24129_v17, 0.0 }
 0xc49   : > { %13037 = vadd.xlane.f32.xlu0 %v13036_v7  ;;  %v25456_v7 = vpack.i.bf16 %v25454_v22, %v25455_v19  ;;  %v25470_v22 = vpack.i.bf16 %v23704_v55, %v23706_v28  ;;  %v25474_v55 = vpack.i.bf16 %v23716_v15, %v23718_v52 }
 0xc4d   : > { %13043 = vadd.xlane.f32.xlu0 %v13042_v25  ;;  %v25457_v25 = vpack.i.bf16 %v23722_v35, %v23726_v57  ;;  %v25463_v35 = vld [vmem:[#allocation20_spill] sm:$0xff] }
 0xc51   : > { %13049 = vadd.xlane.f32.xlu0 %v13048_v38  ;;  %v25458_v38 = vld [vmem:[#allocation113_spill] sm:$0xff] }
 0xc55   : > { %13055 = vadd.xlane.f32.xlu0 %v13054_v1  ;;  %v25460_v1 = vpack.i.bf16 %v25458_v38, %v25459_v13 }
 0xc56   : > { %18924 = vrot.lane.b32.xlu1 %v25449_v5, %s19992_s20  ;;  %v24158_v5 = vpop.eup %19693 }
 0xc57   : > { %v13051_v20 = vsel %vm2839_vm2, %v24158_v5, 0.0 }
 0xc5a   : > { %18929 = vrot.lane.b32.xlu1 %v25450_v33, %s19992_s20  ;;  %v25462_v33 = vld [vmem:[#allocation25_spill] sm:$0xff] }
 0xc5b   : > { %v25464_v57 = vpack.i.bf16 %v25462_v33, %v25463_v35 }
 0xc5e   : > { %18934 = vrot.lane.b32.xlu1 %v25451_v44, %s19992_s20  ;;  %v25465_v44 = vpack.i.bf16 %v23746_v2, %v23750_v30 }
 0xc6b   : > { %18919 = vrot.lane.b32.xlu0 %v25452_v14, %s19992_s20 }
 0xc6f   : > { %18959 = vrot.lane.b32.xlu0 %v25453_v27, %s19991_s10  ;;  %v25469_v27 = vpack.i.bf16 %v25467_v45, %v25468_v58 }
 0xc73   : > { %18964 = vrot.lane.b32.xlu0 %v25456_v7, %s19992_s20  ;;  %v25471_v7 = vld [vmem:[#allocation109_spill] sm:$0xff] }
 0xc77   : > { %18979 = vrot.lane.b32.xlu0 %v25457_v25, %s19991_s10  ;;  %v25472_v25 = vld [vmem:[#allocation64_spill] sm:$0xff] }
 0xc78   : > { %v25473_v38 = vpack.i.bf16 %v25471_v7, %v25472_v25  ;;  %v25475_v7 = vld [vmem:[#allocation110_spill] sm:$0xff]  ;;  %v25476_v25 = vld [vmem:[#allocation112_spill] sm:$0xff] }
 0xc7b   : > { %18984 = vrot.lane.b32.xlu0 %v25460_v1, %s19992_s20 }
 0xc7f   : > { %18999 = vrot.lane.b32.xlu0 %v25461_v41, %s19991_s10 }
 0xc82   : > { %13052 = vadd.xlane.f32.xlu1 %v13051_v20 }
 0xc83   : > { %19004 = vrot.lane.b32.xlu0 %v25464_v57, %s19992_s20 }
 0xc87   : > { %19019 = vrot.lane.b32.xlu0 %v25465_v44, %s19991_s10 }
 0xc93   : > { %18939 = vrot.lane.b32.xlu1 %v25466_v21, %s19992_s20 }
 0xc94   : > { %v12966_v14 = vpop.xlane.xlu1 %12965 }
 0xc95   : > { %19695 = vrcp.f32 %v12966_v14  ;;  %v12963_v62 = vpop.xlane.xlu0 %12962 }
 0xc96   : > { %19697 = vrcp.f32 %v12963_v62 }
 0xc97   : > { %18944 = vrot.lane.b32.xlu1 %v25469_v27, %s19992_s20  ;;  %v18887_v27 = vunpack.i.h.bf16 %v23968_v11 }
 0xc99   : > { %v12972_v48 = vpop.xlane.xlu1 %12971 }
 0xc9a   : > { %19699 = vrcp.f32 %v12972_v48 }
 0xc9b   : > { %18949 = vrot.lane.b32.xlu1 %v25470_v22, %s19991_s10 }
 0xc9d   : > { %v12978_v2 = vpop.xlane.xlu1 %12977  ;;  %v12969_v30 = vpop.xlane.xlu0 %12968 }
 0xc9e   : > { %19701 = vrcp.f32 %v12978_v2 }
 0xc9f   : > { %v19696_v19 = vpop.eup %19695  ;;  %19703 = vrcp.f32 %v12969_v30  ;;  %18954 = vrot.lane.b32.xlu1 %v25473_v38, %s19992_s20  ;;  %v25477_v38 = vpack.i.bf16 %v25475_v7, %v25476_v25 }
 0xca0   : > { %v19698_v13 = vpop.eup %19697  ;;  %v13090_v1 = vmul.f32 %v19696_v19, %v12966_v14  ;;  %v18886_v14 = vunpack.i.l.bf16 %v23968_v11 }
 0xca1   : > { %v13089_v41 = vmul.f32 %v19698_v13, %v12963_v62  ;;  %v12984_v20 = vpop.xlane.xlu1 %12983 }
 0xca2   : > { %v13122_v33 = vsub.f32 2.0, %v13090_v1  ;;  %19705 = vrcp.f32 %v12984_v20  ;;  %v12975_v35 = vpop.xlane.xlu0 %12974 }
 0xca3   : > { %v13121_v57 = vsub.f32 2.0, %v13089_v41  ;;  %19707 = vrcp.f32 %v12975_v35  ;;  %18969 = vrot.lane.b32.xlu1 %v25474_v55, %s19991_s10 }
 0xca4   : > { %v19700_v28 = vpop.eup %19699  ;;  %v13154_v44 = vmul.f32 %v19696_v19, %v13122_v33  ;;  %v25478_v33 = vpack.i.bf16 %v23724_v23, %v23728_v46  ;;  %v25479_v23 = vld [vmem:[#allocation22_spill] sm:$0xff]  ;;  %v25480_v46 = vld [vmem:[#allocation17_spill] sm:$0xff] }
 0xca5   : > { %v13153_v21 = vmul.f32 %v19698_v13, %v13121_v57  ;;  %v13092_v45 = vmul.f32 %v19700_v28, %v12972_v48  ;;  %v12990_v58 = vpop.xlane.xlu1 %12989 }
 0xca6   : > { %19709 = vrcp.f32 %v12990_v58  ;;  %v12981_v62 = vpop.xlane.xlu0 %12980  ;;  %v13186_v52 = vmul.f32 %v23985_v26, %v13154_v44 }
 0xca7   : > { %v13185_v22 = vmul.f32 %v23987_v24, %v13153_v21  ;;  %19711 = vrcp.f32 %v12981_v62  ;;  %18974 = vrot.lane.b32.xlu1 %v25477_v38, %s19992_s20  ;;  %v13124_v48 = vsub.f32 2.0, %v13092_v45  ;;  %v18280_v24 = vpack.c.bf16 %v18887_v27, %v18886_v14 }
 0xca8   : > { %v19702_v15 = vpop.eup %19701  ;;  %v18892_v27 = vunpack.i.h.bf16 %v23964_v34  ;;  %v18891_v14 = vunpack.i.l.bf16 %v23964_v34 }
 0xca9   : > { %v19704_v19 = vpop.eup %19703  ;;  %v13094_v13 = vmul.f32 %v19702_v15, %v12978_v2  ;;  %v12996_v1 = vpop.xlane.xlu1 %12995  ;;  %17436 = vmatprep.mubr.msk.f32.mxu0 %vm2839_vm2, %v13185_v22  ;;  %v13156_v55 = vmul.f32 %v19700_v28, %v13124_v48 }
 0xcaa   : > { %v13091_v11 = vmul.f32 %v19704_v19, %v12969_v30  ;;  %19713 = vrcp.f32 %v12996_v1  ;;  %v12987_v41 = vpop.xlane.xlu0 %12986  ;;  %17437 = vmatmul.mubr.msk.f32.vlgmr.msra.gmra.mrb[146].mxu0 %vm2839_vm2, %v13186_v52 }
 0xcab   : > { %19715 = vrcp.f32 %v12987_v41  ;;  %18989 = vrot.lane.b32.xlu1 %v25478_v33, %s19991_s10  ;;  %18275 = vmatpush3.bf16.msra.mxu0 %v23696_v36  ;;  %v13126_v44 = vsub.f32 2.0, %v13094_v13  ;;  %v25481_v36 = vpack.i.bf16 %v25479_v23, %v25480_v46  ;;  %v18897_v33 = vunpack.i.h.bf16 %v23972_v51 }
 0xcac   : > { %v19706_v26 = vpop.eup %19705  ;;  %v13123_v57 = vsub.f32 2.0, %v13091_v11  ;;  %18281 = vmatprep.subr.bf16.mxu0 %v18280_v24 }
 0xcad   : > { %v19708_v2 = vpop.eup %19707  ;;  %v13096_v30 = vmul.f32 %v19706_v26, %v12984_v20  ;;  %v13158_v52 = vmul.f32 %v19702_v15, %v13126_v44 }
 0xcae   : > { %v13155_v21 = vmul.f32 %v19704_v19, %v13123_v57  ;;  %v13093_v45 = vmul.f32 %v19708_v2, %v12975_v35  ;;  %v13002_v22 = vpop.xlane.xlu1 %13001  ;;  %v12993_v7 = vpop.xlane.xlu0 %12992  ;;  %v13188_v35 = vmul.f32 %v23995_v54, %v13156_v55  ;;  %v18896_v57 = vunpack.i.l.bf16 %v23972_v51 }
 0xcaf   : > { %19717 = vrcp.f32 %v13002_v22  ;;  %18994 = vrot.lane.b32.xlu1 %v25481_v36, %s19992_s20  ;;  %v13128_v19 = vsub.f32 2.0, %v13096_v30  ;;  %v18284_v54 = vpack.c.bf16 %v18892_v27, %v18891_v14  ;;  %v13190_v44 = vmul.f32 %v24001_v37, %v13158_v52  ;;  %v25486_v14 = vld [vmem:[#allocation57_spill] sm:$0xff]  ;;  %v25488_v37 = vld [vmem:[#allocation23_spill] sm:$0xff] }
 0xcb0   : > { %v19710_v25 = vpop.eup %19709  ;;  %v13187_v38 = vmul.f32 %v24003_v59, %v13155_v21  ;;  %v13125_v28 = vsub.f32 2.0, %v13093_v45  ;;  %19719 = vrcp.f32 %v12993_v7  ;;  %v25482_v59 = vld [vmem:[#allocation32_spill] sm:$0xff]  ;;  %v25483_v21 = vld [vmem:[#allocation35_spill] sm:$0xff] }
 0xcb1   : > { %v19712_v20 = vpop.eup %19711  ;;  %v13098_v48 = vmul.f32 %v19710_v25, %v12990_v58  ;;  %v25484_v45 = vpack.i.bf16 %v25482_v59, %v25483_v21  ;;  %v13160_v30 = vmul.f32 %v19706_v26, %v13128_v19 }
 0xcb2   : > { %v13157_v13 = vmul.f32 %v19708_v2, %v13125_v28  ;;  %v13095_v11 = vmul.f32 %v19712_v20, %v12981_v62  ;;  %17443 = vmatprep.mubr.msk.f32.mxu1 %vm2839_vm2, %v13187_v38  ;;  %v12999_v34 = vpop.xlane.xlu0 %12998  ;;  %v25485_v2 = vld [vmem:[#allocation33_spill] sm:$0xff]  ;;  %v18902_v28 = vunpack.i.h.bf16 %v25486_v14 }
 0xcb3   : > { %19721 = vrcp.f32 %v12999_v34  ;;  %19009 = vrot.lane.b32.xlu1 %v25484_v45, %s19991_s10  ;;  %17444 = vmatmul.mubr.msk.f32.vlgmr.msra.gmra.mrb[174].mxu1 %vm2839_vm2, %v13188_v35  ;;  %v13130_v51 = vsub.f32 2.0, %v13098_v48  ;;  %v25487_v35 = vld [vmem:[#allocation26_spill] sm:$0xff]  ;;  %v13192_v19 = vmul.f32 %v24011_v42, %v13160_v30 }
 0xcb4   : > { %v19714_v15 = vpop.eup %19713  ;;  %v13189_v58 = vmul.f32 %v24013_v61, %v13157_v13  ;;  %v13127_v62 = vsub.f32 2.0, %v13095_v11  ;;  %18279 = vmatpush3.bf16.msra.mxu1 %v25485_v2  ;;  %v18901_v61 = vunpack.i.l.bf16 %v25486_v14  ;;  %v25489_v26 = vpack.i.bf16 %v25487_v35, %v25488_v37  ;;  %v25490_v11 = vld [vmem:[#allocation63_spill] sm:$0xff]  ;;  %v25494_v14 = vld [vmem:[#allocation60_spill] sm:$0xff] }
 0xcb5   : > { %v19716_v55 = vpop.eup %19715  ;;  %18285 = vmatprep.subr.bf16.mxu1 %v18284_v54  ;;  %v13100_v46 = vmul.f32 %v19714_v15, %v12996_v1  ;;  %v24226_v38 = vpop.xlane.xlu1 %13013  ;;  %v18288_v1 = vpack.c.bf16 %v18897_v33, %v18896_v57  ;;  %v13162_v48 = vmul.f32 %v19710_v25, %v13130_v51  ;;  %v18907_v59 = vunpack.i.h.bf16 %v25490_v11  ;;  %v25492_v57 = vld [vmem:[#allocation36_spill] sm:$0xff] }
 0xcb6   : > { %v13159_v23 = vmul.f32 %v19712_v20, %v13127_v62  ;;  %v13097_v36 = vmul.f32 %v19716_v55, %v12987_v41  ;;  %17450 = vmatprep.mubr.msk.f32.mxu0 %vm2839_vm2, %v13189_v58  ;;  %v13008_v27 = vpop.xlane.xlu0 %13007  ;;  %19723 = vrcp.f32 %v24226_v38  ;;  %v18906_v33 = vunpack.i.l.bf16 %v25490_v11 }
 0xcb7   : > { %19014 = vrot.lane.b32.xlu1 %v25489_v26, %s19992_s20  ;;  %17451 = vmatmul.mubr.msk.f32.vlgmr.msra.gmra.mrb[148].mxu0 %vm2839_vm2, %v13190_v44  ;;  %19725 = vrcp.f32 %v13008_v27  ;;  %v13132_v21 = vsub.f32 2.0, %v13100_v46  ;;  %v18292_v42 = vpack.c.bf16 %v18902_v28, %v18901_v61  ;;  %v18912_v28 = vunpack.i.h.bf16 %v25494_v14 }
 0xcb8   : > { %v13191_v41 = vmul.f32 %v24023_v43, %v13159_v23  ;;  %v13129_v20 = vsub.f32 2.0, %v13097_v36  ;;  %18283 = vmatpush3.bf16.msra.mxu0 %v18280_v24  ;;  %v25491_v24 = vld [vmem:[#allocation37_spill] sm:$0xff]  ;;  %v18296_v36 = vpack.c.bf16 %v18907_v59, %v18906_v33 }
 0xcb9   : > { %v19718_v52 = vpop.eup %19717  ;;  %18289 = vmatprep.subr.bf16.mxu0 %v18288_v1  ;;  %v25493_v2 = vpack.i.bf16 %v25491_v24, %v25492_v57  ;;  %v13164_v51 = vmul.f32 %v19714_v15, %v13132_v21 }
 0xcba   : > { %v19720_v13 = vpop.eup %19719  ;;  %v13161_v45 = vmul.f32 %v19716_v55, %v13129_v20  ;;  %v13102_v58 = vmul.f32 %v19718_v52, %v13002_v22  ;;  %17457 = vmatprep.mubr.msk.f32.mxu1 %vm2839_vm2, %v13191_v41  ;;  %v13005_v62 = vpop.xlane.xlu0 %13004  ;;  %v13194_v22 = vmul.f32 %v24021_v10, %v13162_v48  ;;  %v25495_v41 = vld [vmem:[#allocation59_spill] sm:$0xff] }
 0xcbb   : > { %v13099_v43 = vmul.f32 %v19720_v13, %v12993_v7  ;;  %19727 = vrcp.f32 %v13005_v62  ;;  %19034 = vrot.lane.b32.xlu1 %v25493_v2, %s19991_s10  ;;  %17458 = vmatmul.mubr.msk.f32.vlgmr.msra.gmra.mrb[176].mxu1 %vm2839_vm2, %v13192_v19  ;;  %v13196_v15 = vmul.f32 %v24031_v3, %v13164_v51  ;;  %v18917_v20 = vunpack.i.h.bf16 %v25495_v41 }
 0xcbc   : > { %v13193_v25 = vmul.f32 %v24033_v53, %v13161_v45  ;;  %18287 = vmatpush3.bf16.msra.mxu1 %v18284_v54  ;;  %v13134_v44 = vsub.f32 2.0, %v13102_v58  ;;  %v18911_v53 = vunpack.i.l.bf16 %v25494_v14  ;;  %v18916_v19 = vunpack.i.l.bf16 %v25495_v41 }
 0xcbd   : > { %v19722_v55 = vpop.eup %19721  ;;  %v13131_v30 = vsub.f32 2.0, %v13099_v43  ;;  %18293 = vmatprep.subr.bf16.mxu1 %v18292_v42 }
 0xcbe   : > { %v13101_v7 = vmul.f32 %v19722_v55, %v12999_v34  ;;  %17464 = vmatprep.mubr.msk.f32.mxu0 %vm2839_vm2, %v13193_v25  ;;  %v13011_v23 = vpop.xlane.xlu0 %13010  ;;  %v13166_v61 = vmul.f32 %v19718_v52, %v13134_v44  ;;  %v18300_v52 = vpack.c.bf16 %v18912_v28, %v18911_v53 }
 0xcbf   : > { %v13163_v46 = vmul.f32 %v19720_v13, %v13131_v30  ;;  %19729 = vrcp.f32 %v13011_v23  ;;  %17465 = vmatmul.mubr.msk.f32.vlgmr.msra.gmra.mrb[150].mxu0 %vm2839_vm2, %v13194_v22 }
 0xcc0   : > { %v13133_v54 = vsub.f32 2.0, %v13101_v7  ;;  %18291 = vmatpush3.bf16.msra.mxu0 %v18288_v1  ;;  %v19724_v10 = vpop.eup %19723  ;;  %v13198_v13 = vmul.f32 %v24042_v6, %v13166_v61 }
 0xcc1   : > { %v13195_v35 = vmul.f32 %v24040_v0, %v13163_v46  ;;  %18297 = vmatprep.subr.bf16.mxu0 %v18296_v36  ;;  %v19726_v34 = vpop.eup %19725  ;;  %v13106_v3 = vmul.f32 %v19724_v10, %v24226_v38 }
 0xcc2   : > { %v13165_v37 = vmul.f32 %v19722_v55, %v13133_v54  ;;  %v13020_v26 = vpop.xlane.xlu0 %13019  ;;  %v13104_v48 = vmul.f32 %v19726_v34, %v13008_v27 }
 0xcc3   : > { %17471 = vmatprep.mubr.msk.f32.mxu1 %vm2839_vm2, %v13195_v35  ;;  %19731 = vrcp.f32 %v13020_v26  ;;  %v13138_v33 = vsub.f32 2.0, %v13106_v3 }
 0xcc4   : > { %v13197_v1 = vmul.f32 %v24049_v16, %v13165_v37  ;;  %17472 = vmatmul.mubr.msk.f32.vlgmr.msra.gmra.mrb[178].mxu1 %vm2839_vm2, %v13196_v15  ;;  %v13136_v11 = vsub.f32 2.0, %v13104_v48  ;;  %v18304_v16 = vpack.c.bf16 %v18917_v20, %v18916_v19 }
 0xcc5   : > { %v19728_v0 = vpop.eup %19727  ;;  %18295 = vmatpush3.bf16.msra.mxu1 %v18292_v42  ;;  %v13170_v25 = vmul.f32 %v19724_v10, %v13138_v33 }
 0xcc6   : > { %v13029_v59 = vpop.xlane.xlu1 %13028  ;;  %v13103_v21 = vmul.f32 %v19728_v0, %v13005_v62  ;;  %18301 = vmatprep.subr.bf16.mxu1 %v18300_v52  ;;  %17478 = vmatprep.mubr.msk.f32.mxu0 %vm2839_vm2, %v13197_v1  ;;  %v13017_v27 = vpop.xlane.xlu0 %13016  ;;  %v13168_v6 = vmul.f32 %v19726_v34, %v13136_v11 }
 0xcc7   : > { %19733 = vrcp.f32 %v13029_v59  ;;  %17479 = vmatmul.mubr.msk.f32.vlgmr.msra.gmra.mrb[152].mxu0 %vm2839_vm2, %v13198_v13  ;;  %v13202_v46 = vmul.f32 %v24056_v9, %v13170_v25 }
 0xcc8   : > { %19735 = vrcp.f32 %v13017_v27  ;;  %v13135_v45 = vsub.f32 2.0, %v13103_v21  ;;  %18299 = vmatpush3.bf16.msra.mxu0 %v18296_v36  ;;  %v13200_v55 = vmul.f32 %v24054_v50, %v13168_v6 }
 0xcc9   : > { %v19730_v58 = vpop.eup %19729  ;;  %18305 = vmatprep.subr.bf16.mxu0 %v18304_v16 }
 0xcca   : > { %v13167_v38 = vmul.f32 %v19728_v0, %v13135_v45  ;;  %v13105_v43 = vmul.f32 %v19730_v58, %v13011_v23  ;;  %v13035_v24 = vpop.xlane.xlu1 %13034  ;;  %v13026_v57 = vpop.xlane.xlu0 %13025 }
 0xccb   : > { %19737 = vrcp.f32 %v13035_v24 }
 0xccc   : > { %v13199_v62 = vmul.f32 %v24064_v60, %v13167_v38  ;;  %v13137_v2 = vsub.f32 2.0, %v13105_v43  ;;  %19739 = vrcp.f32 %v13026_v57 }
 0xccd   : > { %v19732_v42 = vpop.eup %19731 }
 0xcce   : > { %v13169_v22 = vmul.f32 %v19730_v58, %v13137_v2  ;;  %v13108_v44 = vmul.f32 %v19732_v42, %v13020_v26  ;;  %v24266_v30 = vpop.xlane.xlu1 %13040  ;;  %17485 = vmatprep.mubr.msk.f32.mxu1 %vm2839_vm2, %v13199_v62  ;;  %v13023_v51 = vpop.xlane.xlu0 %13022 }
 0xccf   : > { %17486 = vmatmul.mubr.msk.f32.vlgmr.msra.gmra.mrb[180].mxu1 %vm2839_vm2, %v13200_v55  ;;  %19741 = vrcp.f32 %v13023_v51 }
 0xcd0   : > { %v13201_v23 = vmul.f32 %v24070_v29, %v13169_v22  ;;  %18303 = vmatpush3.bf16.msra.mxu1 %v18300_v52  ;;  %v13140_v36 = vsub.f32 2.0, %v13108_v44 }
 0xcd1   : > { %v19734_v7 = vpop.eup %19733 }
 0xcd2   : > { %v19736_v60 = vpop.eup %19735  ;;  %v13111_v14 = vmul.f32 %v19734_v7, %v13029_v59  ;;  %v13047_v28 = vpop.xlane.xlu1 %13046  ;;  %17492 = vmatprep.mubr.msk.f32.mxu0 %vm2839_vm2, %v13201_v23  ;;  %v13172_v61 = vmul.f32 %v19732_v42, %v13140_v36 }
 0xcd3   : > { %v13107_v50 = vmul.f32 %v19736_v60, %v13017_v27  ;;  %v13032_v53 = vpop.xlane.xlu0 %13031  ;;  %19743 = vrcp.f32 %v13047_v28  ;;  %17493 = vmatmul.mubr.msk.f32.vlgmr.msra.gmra.mrb[154].mxu0 %vm2839_vm2, %v13202_v46 }
 0xcd4   : > { %v13143_v54 = vsub.f32 2.0, %v13111_v14  ;;  %19745 = vrcp.f32 %v24266_v30  ;;  %18307 = vmatpush3.bf16.msra.mxu0 %v18304_v16  ;;  %v13204_v1 = vmul.f32 %v24076_v8, %v13172_v61 }
 0xcd5   : > { %v13139_v10 = vsub.f32 2.0, %v13107_v50  ;;  %v19738_v29 = vpop.eup %19737  ;;  %19747 = vrcp.f32 %v13032_v53 }
 0xcd6   : > { %v19740_v35 = vpop.eup %19739  ;;  %v13175_v9 = vmul.f32 %v19734_v7, %v13143_v54  ;;  %v18925_v15 = vpop.permute.xlu1 %18924  ;;  %v13113_v26 = vmul.f32 %v19738_v29, %v13035_v24 }
 0xcd7   : > { %v13171_v34 = vmul.f32 %v19736_v60, %v13139_v10  ;;  %v13038_v37 = vpop.xlane.xlu0 %13037  ;;  %v13110_v41 = vmul.f32 %v19740_v35, %v13026_v57  ;;  %v18927_v20 = vunpack.i.h.bf16 %v18925_v15  ;;  %v18926_v19 = vunpack.i.l.bf16 %v18925_v15 }
 0xcd8   : > { %19749 = vrcp.f32 %v13038_v37  ;;  %v13207_v13 = vmul.f32 %v24084_v49, %v13175_v9  ;;  %v13145_v21 = vsub.f32 2.0, %v13113_v26 }
 0xcd9   : > { %v13203_v48 = vmul.f32 %v24082_v63, %v13171_v34  ;;  %v18312_v52 = vpack.c.bf16 %v18927_v20, %v18926_v19  ;;  %v19742_v0 = vpop.eup %19741  ;;  %v13142_v3 = vsub.f32 2.0, %v13110_v41 }
 0xcda   : > { %v18930_v11 = vpop.permute.xlu1 %18929  ;;  %v13109_v27 = vmul.f32 %v19742_v0, %v13023_v51  ;;  %v13177_v38 = vmul.f32 %v19738_v29, %v13145_v21 }
 0xcdb   : > { %17499 = vmatprep.mubr.msk.f32.mxu1 %vm2839_vm2, %v13203_v48  ;;  %v13044_v59 = vpop.xlane.xlu0 %13043  ;;  %18313 = vmatprep.subr.bf16.mxu0 %v18312_v52  ;;  %v13174_v45 = vmul.f32 %v19740_v35, %v13142_v3  ;;  %v18931_v54 = vunpack.i.l.bf16 %v18930_v11 }
 0xcdc   : > { %17500 = vmatmul.mubr.msk.f32.vlgmr.msra.gmra.mrb[182].mxu1 %vm2839_vm2, %v13204_v1  ;;  %19751 = vrcp.f32 %v13044_v59  ;;  %v13141_v16 = vsub.f32 2.0, %v13109_v27  ;;  %v13209_v7 = vmul.f32 %v24093_v32, %v13177_v38  ;;  %v18932_v32 = vunpack.i.h.bf16 %v18930_v11 }
 0xcdd   : > { %17513 = vmatprep.mubr.msk.f32.mxu1 %vm2839_vm2, %v13207_v13  ;;  %v19744_v63 = vpop.eup %19743  ;;  %v13206_v25 = vmul.f32 %v24091_v47, %v13174_v45  ;;  %v15091_v45 = vld [vmem:[#allocation8] sm:$0xff] }
 0xcde   : > { %v19746_v8 = vpop.eup %19745  ;;  %v13117_v58 = vmul.f32 %v19744_v63, %v13047_v28  ;;  %v18935_v33 = vpop.permute.xlu1 %18934  ;;  %v13173_v43 = vmul.f32 %v19742_v0, %v13141_v16  ;;  %v18316_v26 = vpack.c.bf16 %v18932_v32, %v18931_v54 }
 0xcdf   : > { %v13050_v49 = vpop.xlane.xlu0 %13049  ;;  %v19748_v6 = vpop.eup %19747  ;;  %v18937_v24 = vunpack.i.h.bf16 %v18935_v33  ;;  %v18936_v57 = vunpack.i.l.bf16 %v18935_v33  ;;  %v13115_v62 = vmul.f32 %v19746_v8, %v24266_v30  ;;  %v15093_v33 = vld [vmem:[#allocation8 + $0x10] sm:$0xff] }
 0xce0   : > { %19753 = vrcp.f32 %v13050_v49  ;;  %v13205_v2 = vmul.f32 %v24100_v31, %v13173_v43  ;;  %v13149_v55 = vsub.f32 2.0, %v13117_v58  ;;  %v13112_v22 = vmul.f32 %v19748_v6, %v13032_v53  ;;  %v15092_v58 = vld [vmem:[#allocation8 + $0x8] sm:$0xff]  ;;  %v15095_v43 = vld [vmem:[#allocation8 + $0x20] sm:$0xff] }
 0xce1   : > { %v18320_v44 = vpack.c.bf16 %v18937_v24, %v18936_v57  ;;  %v13147_v31 = vsub.f32 2.0, %v13115_v62  ;;  %v15096_v24 = vld [vmem:[#allocation8 + $0x28] sm:$0xff]  ;;  %v15097_v62 = vld [vmem:[#allocation8 + $0x30] sm:$0xff] }
 0xce2   : > { %v19750_v42 = vpop.eup %19749  ;;  %17506 = vmatprep.mubr.msk.f32.mxu0 %vm2839_vm2, %v13205_v2  ;;  %v13181_v46 = vmul.f32 %v19744_v63, %v13149_v55  ;;  %v13144_v36 = vsub.f32 2.0, %v13112_v22  ;;  %v18336_v57 = vpack.c.bf16 %v15096_v24, %v15095_v43  ;;  %v15099_v2 = vld [vmem:[#allocation8 + $0x40] sm:$0xff]  ;;  %v15101_v55 = vld [vmem:[#allocation8 + $0x50] sm:$0xff]  ;;  %v15102_v22 = vld [vmem:[#allocation8 + $0x58] sm:$0xff] }
 0xce3   : > { %v13056_v51 = vpop.xlane.xlu0 %13055  ;;  %v13114_v23 = vmul.f32 %v19750_v42, %v13038_v37  ;;  %17507 = vmatmul.mubr.msk.f32.vlgmr.msra.gmra.mrb[156].mxu0 %vm2839_vm2, %v13206_v25  ;;  %v13179_v15 = vmul.f32 %v19746_v8, %v13147_v31 }
 0xce4   : > { %18315 = vmatpush3.bf16.msra.mxu0 %v18312_v52  ;;  %17520 = vmatprep.mubr.msk.f32.mxu0 %vm2839_vm2, %v13209_v7  ;;  %v13213_v35 = vmul.f32 %v24111_v39, %v13181_v46  ;;  %v13176_v9 = vmul.f32 %v19748_v6, %v13144_v36  ;;  %19755 = vrcp.f32 %v13056_v51  ;;  %v15094_v6 = vld [vmem:[#allocation8 + $0x18] sm:$0xff]  ;;  %v15104_v7 = vld [vmem:[#allocation8 + $0x68] sm:$0xff] }
 0xce5   : > { %v13146_v60 = vsub.f32 2.0, %v13114_v23  ;;  %18321 = vmatprep.subr.bf16.mxu0 %v18320_v44  ;;  %v13211_v19 = vmul.f32 %v24102_v56, %v13179_v15  ;;  %v18332_v38 = vpack.c.bf16 %v15094_v6, %v15093_v33 }
 0xce6   : > { %v19752_v30 = vpop.eup %19751  ;;  %v13208_v20 = vmul.f32 %v24109_v18, %v13176_v9  ;;  %v25500_v9 = vld [vmem:[#allocation30_spill] sm:$0xff] }
 0xce7   : > { %v18920_v47 = vpop.permute.xlu0 %18919  ;;  %v13178_v14 = vmul.f32 %v19750_v42, %v13146_v60  ;;  %v13116_v50 = vmul.f32 %v19752_v30, %v13044_v59  ;;  %v15100_v42 = vld [vmem:[#allocation8 + $0x48] sm:$0xff]  ;;  %v15105_v60 = vld [vmem:[#allocation8 + $0x70] sm:$0xff] }
 0xce8   : > { %v18922_v28 = vunpack.i.h.bf16 %v18920_v47  ;;  %v18921_v53 = vunpack.i.l.bf16 %v18920_v47  ;;  %v18344_v25 = vpack.c.bf16 %v15100_v42, %v15099_v2  ;;  %v25521_v2 = vld [vmem:[#allocation129_spill] sm:$0xff] }
 0xce9   : > { %v13210_v10 = vmul.f32 %v24117_v40, %v13178_v14  ;;  %v13148_v34 = vsub.f32 2.0, %v13116_v50  ;;  %v25496_v14 = vld [vmem:[#allocation21_spill] sm:$0xff]  ;;  %v25497_v50 = vld [vmem:[#allocation27_spill] sm:$0xff] }
 0xcea   : > { %v18308_v29 = vpack.c.bf16 %v18922_v28, %v18921_v53  ;;  %v19754_v61 = vpop.eup %19753  ;;  %v25498_v28 = vpack.i.bf16 %v25496_v14, %v25497_v50 }
 0xceb   : > { %v13118_v37 = vmul.f32 %v19754_v61, %v13050_v49  ;;  %17521 = vmatmul.mubr.msk.f32.vlgmr.msra.gmra.mrb[158].mxu0 %vm2839_vm2, %v13210_v10  ;;  %v13180_v40 = vmul.f32 %v19752_v30, %v13148_v34  ;;  %v18328_v49 = vpack.c.bf16 %v15092_v58, %v15091_v45  ;;  %v15106_v30 = vld [vmem:[#allocation8 + $0x78] sm:$0xff] }
 0xcec   : > { %18309 = vmatprep.subr.bf16.mxu1 %v18308_v29  ;;  %18323 = vmatpush3.bf16.msra.mxu0 %v18320_v44  ;;  %v18348_v44 = vpack.c.bf16 %v15102_v22, %v15101_v55  ;;  %v18356_v31 = vpack.c.bf16 %v15106_v30, %v15105_v60  ;;  %v25515_v45 = vld [vmem:[#allocation44_spill] sm:$0xff] }
 0xced   : > { %17534 = vmatprep.mubr.msk.f32.mxu0 %vm2839_vm2, %v13213_v35  ;;  %v13150_v41 = vsub.f32 2.0, %v13118_v37  ;;  %18311 = vmatpush3.bf16.msra.mxu1 %v18308_v29  ;;  %v13212_v1 = vmul.f32 %v24121_v4, %v13180_v40  ;;  %v25499_v35 = vld [vmem:[#allocation24_spill] sm:$0xff] }
 0xcee   : > { %18317 = vmatprep.subr.bf16.mxu1 %v18316_v26  ;;  %v19756_v52 = vpop.eup %19755  ;;  %18329 = vmatprep.subr.bf16.mxu0 %v18328_v49  ;;  %v25501_v34 = vpack.i.bf16 %v25499_v35, %v25500_v9 }
 0xcef   : > { %v13182_v39 = vmul.f32 %v19754_v61, %v13150_v41  ;;  %v13120_v3 = vmul.f32 %v19756_v52, %v13056_v51  ;;  %v15103_v51 = vld [vmem:[#allocation8 + $0x60] sm:$0xff]  ;;  %v25502_v41 = vld [vmem:[#allocation39_spill] sm:$0xff] }
 0xcf0   : > { %17514 = vmatmul.mubr.msk.f32.vlgmr.msra.gmra.mrb[184].mxu1 %vm2839_vm2, %v13208_v20  ;;  %v18352_v23 = vpack.c.bf16 %v15104_v7, %v15103_v51  ;;  %v25503_v20 = vld [vmem:[#allocation41_spill] sm:$0xff]  ;;  %v25524_v51 = vld [vmem:[#allocation118_spill] sm:$0xff] }
 0xcf1   : > { %v13214_v48 = vmul.f32 %v24125_v12, %v13182_v39  ;;  %18319 = vmatpush3.bf16.msra.mxu1 %v18316_v26  ;;  %17527 = vmatprep.mubr.msk.f32.mxu1 %vm2839_vm2, %v13211_v19  ;;  %v13152_v59 = vsub.f32 2.0, %v13120_v3  ;;  %v25504_v40 = vpack.i.bf16 %v25502_v41, %v25503_v20  ;;  %v25508_v3 = vld [vmem:[#allocation28_spill] sm:$0xff]  ;;  %v18960_v20 = vpop.permute.xlu0 %18959 }
 0xcf3   : > { %17535 = vmatmul.mubr.msk.f32.vlgmr.msra.gmra.mrb[160].mxu0 %vm2839_vm2, %v13214_v48  ;;  %v13184_v4 = vmul.f32 %v19756_v52, %v13152_v59 }
 0xcf4   : > { %17528 = vmatmul.mubr.msk.f32.vlgmr.msra.gmra.mrb[186].mxu1 %vm2839_vm2, %v13212_v1  ;;  %18331 = vmatpush3.bf16.msra.mxu0 %v18328_v49  ;;  %v25505_v1 = vld [vmem:[#allocation42_spill] sm:$0xff] }
 0xcf5   : > { %v13216_v8 = vmul.f32 %v24129_v17, %v13184_v4  ;;  %18333 = vmatprep.subr.bf16.mxu0 %v18332_v38  ;;  %v25511_v4 = vld [vmem:[#allocation114_spill] sm:$0xff] }
 0xcf8   : > { %18335 = vmatpush3.bf16.msra.mxu0 %v18332_v38 }
 0xcf9   : > { %18337 = vmatprep.subr.bf16.mxu0 %v18336_v57 }
 0xcfc   : > { %18339 = vmatpush3.bf16.msra.mxu0 %v18336_v57  ;;  %v25517_v57 = vld [vmem:[#allocation47_spill] sm:$0xff] }
 0xd0f   : > { %v13053_v18 = vpop.xlane.xlu1 %13052 }
 0xd10   : > { %19757 = vrcp.f32 %v13053_v18 }
 0xd13   : > { %v18940_v0 = vpop.permute.xlu1 %18939 }
 0xd14   : > { %v18942_v56 = vunpack.i.h.bf16 %v18940_v0  ;;  %v18941_v13 = vunpack.i.l.bf16 %v18940_v0 }
 0xd16   : > { %v18324_v11 = vpack.c.bf16 %v18942_v56, %v18941_v13 }
 0xd18   : > { %18325 = vmatprep.subr.bf16.mxu1 %v18324_v11 }
 0xd19   : > { %18327 = vmatpush3.bf16.msra.mxu1 %v18324_v11  ;;  %v25509_v11 = vld [vmem:[#allocation115_spill] sm:$0xff] }
 0xd1a   : > { %v19758_v12 = vpop.eup %19757 }
 0xd1b   : > { %v13119_v21 = vmul.f32 %v19758_v12, %v13053_v18  ;;  %v25506_v18 = vld [vmem:[#allocation43_spill] sm:$0xff] }
 0xd1c   : > { %v25507_v52 = vpack.i.bf16 %v25505_v1, %v25506_v18  ;;  %v25535_v1 = vld [vmem:[#allocation51_spill] sm:$0xff]  ;;  %v25536_v18 = vld [vmem:[#allocation38_spill] sm:$0xff] }
 0xd1d   : > { %v13151_v27 = vsub.f32 2.0, %v13119_v21 }
 0xd1f   : > { %v13183_v63 = vmul.f32 %v19758_v12, %v13151_v27  ;;  %v25510_v12 = vpack.i.bf16 %v25508_v3, %v25509_v11 }
 0xd21   : > { %v13215_v16 = vmul.f32 %v24158_v5, %v13183_v63  ;;  %v15098_v5 = vld [vmem:[#allocation8 + $0x38] sm:$0xff]  ;;  %v25512_v63 = vld [vmem:[#allocation126_spill] sm:$0xff] }
 0xd22   : > { %v18340_v17 = vpack.c.bf16 %v15098_v5, %v15097_v62  ;;  %v25518_v62 = vld [vmem:[#allocation50_spill] sm:$0xff] }
 0xd23   : > { %17541 = vmatprep.mubr.msk.f32.mxu1 %vm2839_vm2, %v13215_v16  ;;  %v25513_v16 = vpack.i.bf16 %v25511_v4, %v25512_v63  ;;  %v25519_v5 = vpack.i.bf16 %v25517_v57, %v25518_v62 }
 0xd24   : > { %17542 = vmatmul.mubr.msk.f32.vlgmr.msra.gmra.mrb[188].mxu1 %vm2839_vm2, %v13216_v8  ;;  %18341 = vmatprep.subr.bf16.mxu0 %v18340_v17  ;;  %v25514_v8 = vld [vmem:[#allocation46_spill] sm:$0xff] }
 0xd25   : > { %18343 = vmatpush3.bf16.msra.mxu0 %v18340_v17  ;;  %v25516_v58 = vpack.i.bf16 %v25514_v8, %v25515_v45  ;;  %v25520_v17 = vld [vmem:[#allocation117_spill] sm:$0xff] }
 0xd26   : > { %18345 = vmatprep.subr.bf16.mxu0 %v18344_v25  ;;  %v25522_v42 = vpack.i.bf16 %v25520_v17, %v25521_v2  ;;  %v25542_v17 = vld [vmem:[#allocation72_spill] sm:$0xff] }
 0xd29   : > { %18347 = vmatpush3.bf16.msra.mxu0 %v18344_v25 }
 0xd2a   : > { %18349 = vmatprep.subr.bf16.mxu0 %v18348_v44 }
 0xd2d   : > { %18351 = vmatpush3.bf16.msra.mxu0 %v18348_v44  ;;  %v25523_v44 = vld [vmem:[#allocation127_spill] sm:$0xff] }
 0xd2e   : > { %18353 = vmatprep.subr.bf16.mxu0 %v18352_v23  ;;  %v25525_v7 = vpack.i.bf16 %v25523_v44, %v25524_v51 }
 0xd31   : > { %18355 = vmatpush3.bf16.msra.mxu0 %v18352_v23 }
 0xd32   : > { %18357 = vmatprep.subr.bf16.mxu0 %v18356_v31 }
 0xd35   : > { %18359 = vmatpush3.bf16.msra.mxu0 %v18356_v31 }
 0xd7d   : > { %v17438_v46 = vpop.f32.mrb[146].mxu0 }
 0xd7e   : > { %v13295_v36 = vpop.f32.mrb[147].mxu0 }
 0xd7f   : > { %v19023_v47 = vpack.i.bf16 %v17438_v46, %v13295_v36  ;;  %v25526_v46 = vld [vmem:[#allocation40_spill] sm:$0xff]  ;;  %v25527_v36 = vld [vmem:[#allocation45_spill] sm:$0xff] }
 0xd81   : > { %19024 = vrot.lane.b32.xlu0 %v19023_v47, %s19990_s27  ;;  %v25528_v47 = vpack.i.bf16 %v25526_v46, %v25527_v36  ;;  %v25544_v36 = vld [vmem:[#allocation55_spill] sm:$0xff] }
 0xd85   : > { %19029 = vrot.lane.b32.xlu0 %v25498_v28, %s19992_s20  ;;  %v18945_v28 = vpop.permute.xlu1 %18944 }
 0xd86   : > { %v17445_v53 = vpop.f32.mrb[174].mxu1 }
 0xd87   : > { %v13382_v32 = vpop.f32.mrb[175].mxu1 }
 0xd88   : > { %v19038_v54 = vpack.i.bf16 %v17445_v53, %v13382_v32 }
 0xd8a   : > { %19039 = vrot.lane.b32.xlu1 %v19038_v54, %s19990_s27  ;;  %v17452_v10 = vpop.f32.mrb[148].mxu0 }
 0xd8b   : > { %v13469_v29 = vpop.f32.mrb[149].mxu0 }
 0xd8c   : > { %v19048_v61 = vpack.i.bf16 %v17452_v10, %v13469_v29  ;;  %v25529_v29 = vld [vmem:[#allocation116_spill] sm:$0xff] }
 0xd8e   : > { %19044 = vrot.lane.b32.xlu1 %v25501_v34, %s19992_s20  ;;  %19049 = vrot.lane.b32.xlu0 %v19048_v61, %s19990_s27  ;;  %v17459_v15 = vpop.f32.mrb[176].mxu1  ;;  %v25530_v61 = vld [vmem:[#allocation130_spill] sm:$0xff] }
 0xd8f   : > { %v13556_v37 = vpop.f32.mrb[177].mxu1  ;;  %v25531_v35 = vpack.i.bf16 %v25529_v29, %v25530_v61 }
 0xd90   : > { %v19058_v26 = vpack.i.bf16 %v17459_v15, %v13556_v37  ;;  %v18950_v15 = vpop.permute.xlu1 %18949 }
 0xd92   : > { %19054 = vrot.lane.b32.xlu0 %v25504_v40, %s19991_s10  ;;  %19059 = vrot.lane.b32.xlu1 %v19058_v26, %s19990_s27  ;;  %v17466_v19 = vpop.f32.mrb[150].mxu0  ;;  %v25532_v40 = vld [vmem:[#allocation34_spill] sm:$0xff] }
 0xd93   : > { %v13643_v39 = vpop.f32.mrb[151].mxu0 }
 0xd94   : > { %v19063_v48 = vpack.i.bf16 %v17466_v19, %v13643_v39  ;;  %v25533_v19 = vld [vmem:[#allocation48_spill] sm:$0xff] }
 0xd95   : > { %v25534_v39 = vpack.i.bf16 %v25532_v40, %v25533_v19 }
 0xd96   : > { %19074 = vrot.lane.b32.xlu1 %v25507_v52, %s19991_s10  ;;  %19064 = vrot.lane.b32.xlu0 %v19063_v48, %s19990_s27  ;;  %v18955_v48 = vpop.permute.xlu1 %18954  ;;  %v25537_v52 = vpack.i.bf16 %v25535_v1, %v25536_v18  ;;  %v25546_v18 = vld [vmem:[#allocation58_spill] sm:$0xff] }
 0xd97   : > { %v17473_v0 = vpop.f32.mrb[178].mxu1  ;;  %v18957_v44 = vunpack.i.h.bf16 %v18955_v48  ;;  %v18956_v51 = vunpack.i.l.bf16 %v18955_v48  ;;  %v25545_v48 = vld [vmem:[#allocation70_spill] sm:$0xff] }
 0xd98   : > { %v13730_v56 = vpop.f32.mrb[179].mxu1 }
 0xd99   : > { %v19078_v13 = vpack.i.bf16 %v17473_v0, %v13730_v56  ;;  %v24375_v0 = vpop.permute.xlu0 %18964  ;;  %v25538_v56 = vld [vmem:[#allocation128_spill] sm:$0xff] }
 0xd9a   : > { %19069 = vrot.lane.b32.xlu0 %v25510_v12, %s19992_s20  ;;  %v17480_v59 = vpop.f32.mrb[152].mxu0  ;;  %v24381_v11 = vpop.permute.xlu1 %18969 }
 0xd9b   : > { %19079 = vrot.lane.b32.xlu1 %v19078_v13, %s19990_s27  ;;  %v13817_v21 = vpop.f32.mrb[153].mxu0  ;;  %v25539_v13 = vld [vmem:[#allocation123_spill] sm:$0xff]  ;;  %v18972_v61 = vunpack.i.h.bf16 %v24381_v11 }
 0xd9c   : > { %v19088_v27 = vpack.i.bf16 %v17480_v59, %v13817_v21  ;;  %v25540_v3 = vpack.i.bf16 %v25538_v56, %v25539_v13 }
 0xd9d   : > { %v24383_v12 = vpop.permute.xlu0 %18979 }
 0xd9e   : > { %19089 = vrot.lane.b32.xlu0 %v19088_v27, %s19990_s27  ;;  %v24385_v59 = vpop.permute.xlu1 %18974 }
 0xd9f   : > { %19084 = vrot.lane.b32.xlu1 %v25513_v16, %s19992_s20 }
 0xda1   : > { %v24387_v21 = vpop.permute.xlu0 %18984 }
 0xda2   : > { %19094 = vrot.lane.b32.xlu0 %v25516_v58, %s19991_s10  ;;  %v17487_v33 = vpop.f32.mrb[180].mxu1  ;;  %v24389_v27 = vpop.permute.xlu1 %18989  ;;  %v18947_v58 = vunpack.i.h.bf16 %v18945_v28 }
 0xda3   : > { %v13904_v49 = vpop.f32.mrb[181].mxu1 }
 0xda4   : > { %v19098_v6 = vpack.i.bf16 %v17487_v33, %v13904_v49  ;;  %v18946_v33 = vunpack.i.l.bf16 %v18945_v28  ;;  %v18952_v49 = vunpack.i.h.bf16 %v18950_v15 }
 0xda5   : > { %v24391_v4 = vpop.permute.xlu0 %18999 }
 0xda6   : > { %19099 = vrot.lane.b32.xlu1 %v19098_v6, %s19990_s27  ;;  %v17494_v38 = vpop.f32.mrb[154].mxu0  ;;  %v24393_v63 = vpop.permute.xlu1 %18994  ;;  %v18951_v6 = vunpack.i.l.bf16 %v18950_v15  ;;  %v14993_v2 = vsel %vm1412_vm0, %v25542_v17, %v18946_v33  ;;  %v18977_v15 = vunpack.i.h.bf16 %v24385_v59 }
 0xda7   : > { %v13991_v43 = vpop.f32.mrb[155].mxu0 }
 0xda8   : > { %v19103_v24 = vpack.i.bf16 %v17494_v38, %v13991_v43 }
 0xda9   : > { %v24395_v16 = vpop.permute.xlu0 %19004 }
 0xdaa   : > { %19114 = vrot.lane.b32.xlu1 %v25519_v5, %s19991_s10  ;;  %19104 = vrot.lane.b32.xlu0 %v19103_v24, %s19990_s27  ;;  %v24397_v8 = vpop.permute.xlu1 %19009  ;;  %v25541_v24 = vld [vmem:[#allocation68_spill] sm:$0xff] }
 0xdab   : > { %v14994_v57 = vsel %vm1412_vm0, %v25541_v24, %v18947_v58  ;;  %v25548_v58 = vld [vmem:[#allocation74_spill] sm:$0xff] }
 0xdac   : > { %v15000_v33 = vsel %vm1412_vm0, %v25548_v58, %v18977_v15 }
 0xdad   : > { %v24399_v45 = vpop.permute.xlu0 %19019 }
 0xdae   : > { %19109 = vrot.lane.b32.xlu0 %v25522_v42, %s19992_s20  ;;  %v24401_v38 = vpop.permute.xlu1 %19014  ;;  %v15026_v42 = vsel %vm15025_vm3, %v14993_v2, %v18951_v6  ;;  %v18981_v6 = vunpack.i.l.bf16 %v24383_v12  ;;  %v18992_v2 = vunpack.i.h.bf16 %v24389_v27 }
 0xdaf   : > { %v17501_v25 = vpop.f32.mrb[182].mxu1 }
 0xdb0   : > { %v14078_v55 = vpop.f32.mrb[183].mxu1 }
 0xdb1   : > { %v19118_v22 = vpack.i.bf16 %v17501_v25, %v14078_v55  ;;  %v15027_v25 = vsel %vm15025_vm3, %v14994_v57, %v18952_v49  ;;  %v18982_v49 = vunpack.i.h.bf16 %v24383_v12  ;;  %v18987_v57 = vunpack.i.h.bf16 %v24387_v21 }
 0xdb3   : > { %19119 = vrot.lane.b32.xlu1 %v19118_v22, %s19990_s27 }
 0xdb6   : > { %v17508_v23 = vpop.f32.mrb[156].mxu0 }
 0xdb7   : > { %19124 = vrot.lane.b32.xlu1 %v25525_v7, %s19992_s20  ;;  %v14165_v60 = vpop.f32.mrb[157].mxu0 }
 0xdb8   : > { %v19128_v30 = vpack.i.bf16 %v17508_v23, %v14165_v60  ;;  %v24411_v23 = vpop.permute.xlu1 %19034 }
 0xdba   : > { %19129 = vrot.lane.b32.xlu0 %v19128_v30, %s19990_s27 }
 0xdbe   : > { %v17522_v31 = vpop.f32.mrb[158].mxu0  ;;  %19134 = vrot.lane.b32.xlu0 %v25528_v47, %s19991_s10  ;;  %v14996_v47 = vsel %vm1412_vm0, %v25544_v36, %v18957_v44  ;;  %v18997_v44 = vunpack.i.h.bf16 %v24393_v63 }
 0xdbf   : > { %v14339_v14 = vpop.f32.mrb[159].mxu0 }
 0xdc0   : > { %v19143_v50 = vpack.i.bf16 %v17522_v31, %v14339_v14  ;;  %v25543_v31 = vld [vmem:[#allocation76_spill] sm:$0xff]  ;;  %v18962_v14 = vunpack.i.h.bf16 %v18960_v20 }
 0xdc1   : > { %v14995_v46 = vsel %vm1412_vm0, %v25543_v31, %v18956_v51  ;;  %v18996_v51 = vunpack.i.l.bf16 %v24393_v63 }
 0xdc2   : > { %19144 = vrot.lane.b32.xlu0 %v19143_v50, %s19990_s27  ;;  %v18961_v50 = vunpack.i.l.bf16 %v18960_v20 }
 0xdc3   : > { %v17515_v53 = vpop.f32.mrb[184].mxu1 }
 0xdc4   : > { %v14252_v32 = vpop.f32.mrb[185].mxu1 }
 0xdc5   : > { %v19138_v54 = vpack.i.bf16 %v17515_v53, %v14252_v32  ;;  %v18967_v32 = vunpack.i.h.bf16 %v24375_v0 }
 0xdc6   : > { %v17536_v10 = vpop.f32.mrb[160].mxu0  ;;  %19149 = vrot.lane.b32.xlu0 %v25531_v35, %s19992_s20  ;;  %v18971_v35 = vunpack.i.l.bf16 %v24381_v11  ;;  %v25547_v11 = vld [vmem:[#allocation52_spill] sm:$0xff] }
 0xdc7   : > { %v14513_v9 = vpop.f32.mrb[161].mxu0  ;;  %19139 = vrot.lane.b32.xlu1 %v19138_v54, %s19990_s27  ;;  %v17529_v34 = vpop.f32.mrb[186].mxu1  ;;  %v18966_v54 = vunpack.i.l.bf16 %v24375_v0 }
 0xdc8   : > { %v19168_v37 = vpack.i.bf16 %v17536_v10, %v14513_v9  ;;  %v14426_v26 = vpop.f32.mrb[187].mxu1  ;;  %v15028_v9 = vsel %vm15025_vm3, %v14995_v46, %v18961_v50  ;;  %v25550_v46 = vld [vmem:[#allocation53_spill] sm:$0xff] }
 0xdc9   : > { %v19158_v41 = vpack.i.bf16 %v17529_v34, %v14426_v26  ;;  %v15029_v34 = vsel %vm15025_vm3, %v14996_v47, %v18962_v14  ;;  %v14997_v1 = vsel %vm1412_vm0, %v25545_v48, %v18966_v54  ;;  %v15002_v36 = vsel %vm1412_vm0, %v25550_v46, %v18987_v57  ;;  %v25555_v57 = vld [vmem:[#allocation86_spill] sm:$0xff] }
 0xdca   : > { %19169 = vrot.lane.b32.xlu0 %v19168_v37, %s19990_s27  ;;  %v18976_v37 = vunpack.i.l.bf16 %v24385_v59  ;;  %v15030_v0 = vsel %vm15025_vm3, %v14997_v1, %v18971_v35  ;;  %v15035_v14 = vsel %vm15025_vm3, %v15002_v36, %v18992_v2  ;;  %v19001_v35 = vunpack.i.l.bf16 %v24391_v4 }
 0xdcb   : > { %19154 = vrot.lane.b32.xlu1 %v25534_v39, %s19991_s10  ;;  %v19021_v2 = vunpack.i.l.bf16 %v24399_v45 }
 0xdcc   : > { %v14999_v59 = vsel %vm1412_vm0, %v25547_v11, %v18976_v37  ;;  %v19012_v37 = vunpack.i.h.bf16 %v24397_v8  ;;  %v19017_v11 = vunpack.i.h.bf16 %v24401_v38 }
 0xdce   : > { %19174 = vrot.lane.b32.xlu0 %v25537_v52, %s19991_s10  ;;  %v14998_v52 = vsel %vm1412_vm0, %v25546_v18, %v18967_v32  ;;  %v25551_v32 = vld [vmem:[#allocation56_spill] sm:$0xff] }
 0xdcf   : > { %19159 = vrot.lane.b32.xlu1 %v19158_v41, %s19990_s27  ;;  %v15031_v56 = vsel %vm15025_vm3, %v14998_v52, %v18972_v61  ;;  %v15003_v54 = vsel %vm1412_vm0, %v25551_v32, %v18996_v51  ;;  %v19002_v61 = vunpack.i.h.bf16 %v24391_v4 }
 0xdd3   : > { %19164 = vrot.lane.b32.xlu1 %v25540_v3, %s19992_s20 }
 0xdf3   : > { %v19025_v43 = vpop.permute.xlu0 %19024 }
 0xdf4   : > { %v19027_v62 = vunpack.i.h.bf16 %v19025_v43  ;;  %v19026_v5 = vunpack.i.l.bf16 %v19025_v43 }
 0xdf6   : > { %v15059_v55 = vsel %vm15058_vm4, %v15026_v42, %v19026_v5  ;;  %v15060_v22 = vsel %vm15058_vm4, %v15027_v25, %v19027_v62  ;;  %v18986_v62 = vunpack.i.l.bf16 %v24387_v21  ;;  %v18991_v42 = vunpack.i.l.bf16 %v24389_v27  ;;  %v25549_v27 = vld [vmem:[#allocation61_spill] sm:$0xff] }
 0xdf7   : > { %v17543_v7 = vpop.f32.mrb[188].mxu1  ;;  %17576 = vmatprep.mubr.f32.mxu0 %v15059_v55  ;;  %v24418_v28 = vpop.permute.xlu0 %19029  ;;  %v15032_v25 = vsel %vm15025_vm3, %v14999_v59, %v18981_v6  ;;  %v15033_v55 = vsel %vm15025_vm3, %v15000_v33, %v18982_v49  ;;  %v19016_v59 = vunpack.i.l.bf16 %v24401_v38  ;;  %v19022_v38 = vunpack.i.h.bf16 %v24399_v45 }
 0xdf8   : > { %v14600_v60 = vpop.f32.mrb[189].mxu1  ;;  %17577 = vmatmul.mubr.f32.vlgmr.msra.gmra.mrb[162].mxu0 %v15060_v22  ;;  %v15001_v31 = vsel %vm1412_vm0, %v25549_v27, %v18986_v62  ;;  %v19032_v6 = vunpack.i.h.bf16 %v24418_v28  ;;  %v19037_v45 = vunpack.i.h.bf16 %v24411_v23 }
 0xdf9   : > { %v19178_v30 = vpack.i.bf16 %v17543_v7, %v14600_v60  ;;  %v15034_v47 = vsel %vm15025_vm3, %v15001_v31, %v18991_v42  ;;  %v15007_v62 = vsel %vm1412_vm0, %v25555_v57, %v19016_v59  ;;  %v19036_v31 = vunpack.i.l.bf16 %v24411_v23 }
 0xdfb   : > { %19179 = vrot.lane.b32.xlu1 %v19178_v30, %s19990_s27 }
 0xdfc   : > { %v19040_v53 = vpop.permute.xlu1 %19039 }
 0xdfd   : > { %v19042_v10 = vunpack.i.h.bf16 %v19040_v53  ;;  %v19041_v29 = vunpack.i.l.bf16 %v19040_v53 }
 0xdff   : > { %v15061_v26 = vsel %vm15058_vm4, %v15028_v9, %v19041_v29  ;;  %v15062_v41 = vsel %vm15058_vm4, %v15029_v34, %v19042_v10  ;;  %v25552_v10 = vld [vmem:[#allocation54_spill] sm:$0xff]  ;;  %v19007_v9 = vunpack.i.h.bf16 %v24395_v16  ;;  %v19006_v34 = vunpack.i.l.bf16 %v24395_v16 }
 0xe00   : > { %v24430_v20 = vpop.permute.xlu1 %19044  ;;  %v19050_v40 = vpop.permute.xlu0 %19049  ;;  %17579 = vmatprep.mubr.f32.mxu0 %v15061_v26  ;;  %v15004_v29 = vsel %vm1412_vm0, %v25552_v10, %v18997_v44  ;;  %v19011_v26 = vunpack.i.l.bf16 %v24397_v8  ;;  %v25553_v16 = vld [vmem:[#allocation78_spill] sm:$0xff] }
 0xe01   : > { %v19052_v19 = vunpack.i.h.bf16 %v19050_v40  ;;  %v19051_v39 = vunpack.i.l.bf16 %v19050_v40  ;;  %17580 = vmatmul.mubr.f32.gmra.mrb[164].mxu0 %v15062_v41  ;;  %v19047_v10 = vunpack.i.h.bf16 %v24430_v20  ;;  %v19046_v23 = vunpack.i.l.bf16 %v24430_v20 }
 0xe03   : > { %v15063_v13 = vsel %vm15058_vm4, %v15030_v0, %v19051_v39  ;;  %v15064_v3 = vsel %vm15058_vm4, %v15031_v56, %v19052_v19  ;;  %v15036_v19 = vsel %vm15025_vm3, %v15003_v54, %v19001_v35  ;;  %v15037_v39 = vsel %vm15025_vm3, %v15004_v29, %v19002_v61  ;;  %v25554_v56 = vld [vmem:[#allocation80_spill] sm:$0xff] }
 0xe04   : > { %v19060_v43 = vpop.permute.xlu1 %19059  ;;  %v24446_v24 = vpop.permute.xlu0 %19054  ;;  %17582 = vmatprep.mubr.f32.mxu0 %v15063_v13  ;;  %v15005_v0 = vsel %vm1412_vm0, %v25553_v16, %v19006_v34  ;;  %v15006_v8 = vsel %vm1412_vm0, %v25554_v56, %v19007_v9 }
 0xe05   : > { %v19062_v5 = vunpack.i.h.bf16 %v19060_v43  ;;  %v19061_v17 = vunpack.i.l.bf16 %v19060_v43  ;;  %17583 = vmatmul.mubr.f32.gmra.mrb[166].mxu0 %v15064_v3  ;;  %v15038_v13 = vsel %vm15025_vm3, %v15005_v0, %v19011_v26  ;;  %v15039_v3 = vsel %vm15025_vm3, %v15006_v8, %v19012_v37  ;;  %v25560_v26 = vld [vmem:[#allocation90_spill] sm:$0xff] }
 0xe06   : > { %v19031_v43 = vunpack.i.l.bf16 %v24418_v28  ;;  %v19057_v29 = vunpack.i.h.bf16 %v24446_v24  ;;  %v19056_v61 = vunpack.i.l.bf16 %v24446_v24 }
 0xe07   : > { %v15065_v12 = vsel %vm15058_vm4, %v15032_v25, %v19061_v17  ;;  %v15066_v22 = vsel %vm15058_vm4, %v15033_v55, %v19062_v5  ;;  %v25556_v5 = vld [vmem:[#allocation82_spill] sm:$0xff] }
 0xe08   : > { %v24458_v21 = vpop.permute.xlu1 %19074  ;;  %v19065_v7 = vpop.permute.xlu0 %19064  ;;  %17585 = vmatprep.mubr.f32.mxu0 %v15065_v12  ;;  %v15008_v17 = vsel %vm1412_vm0, %v25556_v5, %v19017_v11 }
 0xe09   : > { %v19067_v60 = vunpack.i.h.bf16 %v19065_v7  ;;  %v19066_v30 = vunpack.i.l.bf16 %v19065_v7  ;;  %17586 = vmatmul.mubr.f32.gmra.mrb[168].mxu0 %v15066_v22  ;;  %v15040_v22 = vsel %vm15025_vm3, %v15007_v62, %v19021_v2  ;;  %v15041_v44 = vsel %vm15025_vm3, %v15008_v17, %v19022_v38  ;;  %v25557_v7 = vld [vmem:[#allocation88_spill] sm:$0xff] }
 0xe0a   : > { %v19077_v0 = vunpack.i.h.bf16 %v24458_v21  ;;  %v19076_v56 = vunpack.i.l.bf16 %v24458_v21 }
 0xe0b   : > { %v15067_v50 = vsel %vm15058_vm4, %v15034_v47, %v19066_v30  ;;  %v15068_v63 = vsel %vm15058_vm4, %v15035_v14, %v19067_v60  ;;  %v15009_v60 = vsel %vm1412_vm0, %v25557_v7, %v19031_v43  ;;  %v25558_v30 = vld [vmem:[#allocation84_spill] sm:$0xff] }
 0xe0c   : > { %v24468_v53 = vpop.permute.xlu0 %19069  ;;  %17588 = vmatprep.mubr.f32.mxu0 %v15067_v50  ;;  %v15010_v27 = vsel %vm1412_vm0, %v25558_v30, %v19032_v6  ;;  %v15042_v14 = vsel %vm15025_vm3, %v15009_v60, %v19036_v31 }
 0xe0d   : > { %v19080_v15 = vpop.permute.xlu1 %19079  ;;  %17589 = vmatmul.mubr.f32.gmra.mrb[170].mxu0 %v15068_v63  ;;  %v15043_v50 = vsel %vm15025_vm3, %v15010_v27, %v19037_v45  ;;  %v19071_v24 = vunpack.i.l.bf16 %v24468_v53 }
 0xe0e   : > { %v19082_v41 = vunpack.i.h.bf16 %v19080_v15  ;;  %v19081_v40 = vunpack.i.l.bf16 %v19080_v15  ;;  %v25559_v15 = vld [vmem:[#allocation94_spill] sm:$0xff] }
 0xe0f   : > { %v15011_v37 = vsel %vm1412_vm0, %v25559_v15, %v19046_v23 }
 0xe10   : > { %v19090_v48 = vpop.permute.xlu0 %19089  ;;  %v15069_v1 = vsel %vm15058_vm4, %v15036_v19, %v19081_v40  ;;  %v15070_v4 = vsel %vm15058_vm4, %v15037_v39, %v19082_v41  ;;  %v15012_v41 = vsel %vm1412_vm0, %v25560_v26, %v19047_v10  ;;  %v15044_v40 = vsel %vm15025_vm3, %v15011_v37, %v19056_v61  ;;  %v25567_v37 = vld [vmem:[#allocation101_spill] sm:$0xff] }
 0xe11   : > { %v19092_v18 = vunpack.i.h.bf16 %v19090_v48  ;;  %v19091_v52 = vunpack.i.l.bf16 %v19090_v48  ;;  %17591 = vmatprep.mubr.f32.mxu0 %v15069_v1  ;;  %v24494_v49 = vpop.permute.xlu1 %19084  ;;  %v15045_v19 = vsel %vm15025_vm3, %v15012_v41, %v19057_v29  ;;  %v19072_v48 = vunpack.i.h.bf16 %v24468_v53 }
 0xe12   : > { %17592 = vmatmul.mubr.f32.gmra.mrb[172].mxu0 %v15070_v4  ;;  %v25561_v4 = vld [vmem:[#allocation99_spill] sm:$0xff]  ;;  %v19087_v6 = vunpack.i.h.bf16 %v24494_v49  ;;  %v19086_v43 = vunpack.i.l.bf16 %v24494_v49  ;;  %v25565_v49 = vld [vmem:[#allocation96_spill] sm:$0xff] }
 0xe13   : > { %v15071_v58 = vsel %vm15058_vm4, %v15038_v13, %v19091_v52  ;;  %v15072_v33 = vsel %vm15058_vm4, %v15039_v3, %v19092_v18  ;;  %v15013_v18 = vsel %vm1412_vm0, %v25561_v4, %v19071_v24  ;;  %v25562_v52 = vld [vmem:[#allocation92_spill] sm:$0xff] }
 0xe14   : > { %17594 = vmatprep.mubr.f32.mxu0 %v15071_v58  ;;  %v24504_v42 = vpop.permute.xlu0 %19094  ;;  %v15014_v16 = vsel %vm1412_vm0, %v25562_v52, %v19072_v48  ;;  %v15046_v11 = vsel %vm15025_vm3, %v15013_v18, %v19076_v56 }
 0xe15   : > { %v15047_v53 = vsel %vm15025_vm3, %v15014_v16, %v19077_v0  ;;  %v19097_v5 = vunpack.i.h.bf16 %v24504_v42  ;;  %v19096_v17 = vunpack.i.l.bf16 %v24504_v42 }
 0xe16   : > { %17595 = vmatmul.mubr.f32.gmra.mrb[174].mxu0 %v15072_v33 }
 0xe18   : > { %v19100_v25 = vpop.permute.xlu1 %19099 }
 0xe19   : > { %v19102_v55 = vunpack.i.h.bf16 %v19100_v25  ;;  %v19101_v12 = vunpack.i.l.bf16 %v19100_v25 }
 0xe1b   : > { %v15073_v28 = vsel %vm15058_vm4, %v15040_v22, %v19101_v12  ;;  %v15074_v51 = vsel %vm15058_vm4, %v15041_v44, %v19102_v55  ;;  %v25563_v55 = vld [vmem:[#allocation104_spill] sm:$0xff]  ;;  %v25564_v22 = vld [vmem:[#allocation102_spill] sm:$0xff] }
 0xe1c   : > { %v19105_v46 = vpop.permute.xlu0 %19104  ;;  %17597 = vmatprep.mubr.f32.mxu0 %v15073_v28  ;;  %v24520_v54 = vpop.permute.xlu1 %19114  ;;  %v15015_v12 = vsel %vm1412_vm0, %v25563_v55, %v19086_v43  ;;  %v15016_v44 = vsel %vm1412_vm0, %v25564_v22, %v19087_v6 }
 0xe1d   : > { %v19107_v36 = vunpack.i.h.bf16 %v19105_v46  ;;  %v19106_v47 = vunpack.i.l.bf16 %v19105_v46  ;;  %17598 = vmatmul.mubr.f32.gmra.mrb[176].mxu0 %v15074_v51  ;;  %v19116_v30 = vunpack.i.l.bf16 %v24520_v54  ;;  %v15048_v27 = vsel %vm15025_vm3, %v15015_v12, %v19096_v17 }
 0xe1e   : > { %v15049_v42 = vsel %vm15025_vm3, %v15016_v44, %v19097_v5  ;;  %v19117_v23 = vunpack.i.h.bf16 %v24520_v54  ;;  %v25572_v5 = vld [vmem:[#allocation98_spill] sm:$0xff] }
 0xe1f   : > { %v15075_v63 = vsel %vm15058_vm4, %v15042_v14, %v19106_v47  ;;  %v15076_v32 = vsel %vm15058_vm4, %v15043_v50, %v19107_v36  ;;  %v25566_v36 = vld [vmem:[#allocation97_spill] sm:$0xff] }
 0xe20   : > { %17600 = vmatprep.mubr.f32.mxu0 %v15075_v63  ;;  %v19110_v1 = vpop.permute.xlu0 %19109 }
 0xe21   : > { %17601 = vmatmul.mubr.f32.gmra.mrb[178].mxu0 %v15076_v32  ;;  %v19111_v62 = vunpack.i.l.bf16 %v19110_v1  ;;  %v19112_v38 = vunpack.i.h.bf16 %v19110_v1 }
 0xe23   : > { %v15017_v60 = vsel %vm1412_vm0, %v25565_v49, %v19111_v62  ;;  %v15018_v47 = vsel %vm1412_vm0, %v25566_v36, %v19112_v38  ;;  %v24595_v49 = vld [vmem:[%s24755_s7] ss:$0 sm:$0xff] }
 0xe24   : > { %v15050_v10 = vsel %vm15025_vm3, %v15017_v60, %v19116_v30  ;;  %v15051_v15 = vsel %vm15025_vm3, %v15018_v47, %v19117_v23  ;;  %v19759_v60 = vld [vmem:[%s20246_s3 + $0x8] sm:$0xff]  ;;  %v19761_v47 = vld [vmem:[%s20246_s3 + $0x18] sm:$0xff] }
 0xe25   : > { %v19120_v35 = vpop.permute.xlu1 %19119 }
 0xe26   : > { %v19122_v9 = vunpack.i.h.bf16 %v19120_v35  ;;  %v19121_v34 = vunpack.i.l.bf16 %v19120_v35 }
 0xe28   : > { %v15077_v20 = vsel %vm15058_vm4, %v15044_v40, %v19121_v34  ;;  %v15078_v39 = vsel %vm15058_vm4, %v15045_v19, %v19122_v9 }
 0xe29   : > { %17603 = vmatprep.mubr.f32.mxu0 %v15077_v20  ;;  %v19125_v57 = vpop.permute.xlu1 %19124  ;;  %v25568_v20 = vld [vmem:[#allocation105_spill] sm:$0xff] }
 0xe2a   : > { %17604 = vmatmul.mubr.f32.gmra.mrb[180].mxu0 %v15078_v39  ;;  %v19126_v45 = vunpack.i.l.bf16 %v19125_v57  ;;  %v19127_v14 = vunpack.i.h.bf16 %v19125_v57  ;;  %v25569_v39 = vld [vmem:[#allocation103_spill] sm:$0xff] }
 0xe2c   : > { %v19130_v8 = vpop.permute.xlu0 %19129  ;;  %v15019_v26 = vsel %vm1412_vm0, %v25567_v37, %v19126_v45  ;;  %v15020_v54 = vsel %vm1412_vm0, %v25568_v20, %v19127_v14 }
 0xe2d   : > { %v19132_v13 = vunpack.i.h.bf16 %v19130_v8  ;;  %v19131_v3 = vunpack.i.l.bf16 %v19130_v8 }
 0xe2f   : > { %v15079_v59 = vsel %vm15058_vm4, %v15046_v11, %v19131_v3  ;;  %v15080_v58 = vsel %vm15058_vm4, %v15047_v53, %v19132_v13  ;;  %v25570_v3 = vld [vmem:[#allocation100_spill] sm:$0xff] }
 0xe30   : > { %v19135_v33 = vpop.permute.xlu0 %19134  ;;  %17606 = vmatprep.mubr.f32.mxu0 %v15079_v59 }
 0xe31   : > { %17607 = vmatmul.mubr.f32.gmra.mrb[182].mxu0 %v15080_v58  ;;  %v19137_v61 = vunpack.i.h.bf16 %v19135_v33  ;;  %v19136_v35 = vunpack.i.l.bf16 %v19135_v33 }
 0xe33   : > { %v15052_v52 = vsel %vm15025_vm3, %v15019_v26, %v19136_v35  ;;  %v15053_v16 = vsel %vm15025_vm3, %v15020_v54, %v19137_v61  ;;  %v19763_v61 = vld [vmem:[%s20246_s3 + $0x28] sm:$0xff]  ;;  %v19766_v54 = vld [vmem:[%s20246_s3 + $0x30] sm:$0xff] }
 0xe34   : > { %v19145_v21 = vpop.permute.xlu0 %19144 }
 0xe35   : > { %v19146_v28 = vunpack.i.l.bf16 %v19145_v21  ;;  %v19147_v50 = vunpack.i.h.bf16 %v19145_v21  ;;  %v25571_v21 = vld [vmem:[#allocation106_spill] sm:$0xff] }
 0xe37   : > { %v15083_v29 = vsel %vm15058_vm4, %v15050_v10, %v19146_v28  ;;  %v15084_v19 = vsel %vm15058_vm4, %v15051_v15, %v19147_v50 }
 0xe38   : > { %v19150_v2 = vpop.permute.xlu0 %19149 }
 0xe39   : > { %v19140_v25 = vpop.permute.xlu1 %19139  ;;  %v19151_v63 = vunpack.i.l.bf16 %v19150_v2  ;;  %v19152_v41 = vunpack.i.h.bf16 %v19150_v2 }
 0xe3a   : > { %v19142_v51 = vunpack.i.h.bf16 %v19140_v25  ;;  %v19141_v7 = vunpack.i.l.bf16 %v19140_v25 }
 0xe3b   : > { %v15021_v48 = vsel %vm1412_vm0, %v25569_v39, %v19151_v63  ;;  %v15022_v11 = vsel %vm1412_vm0, %v25570_v3, %v19152_v41  ;;  %v19762_v63 = vld [vmem:[%s20246_s3 + $0x10] sm:$0xff]  ;;  %v19769_v3 = vld [vmem:[%s20246_s3 + $0x58] sm:$0xff] }
 0xe3c   : > { %v15081_v31 = vsel %vm15058_vm4, %v15048_v27, %v19141_v7  ;;  %v15082_v46 = vsel %vm15058_vm4, %v15049_v42, %v19142_v51  ;;  %v19170_v9 = vpop.permute.xlu0 %19169  ;;  %v19760_v42 = vld [vmem:[%s20246_s3] sm:$0xff] }
 0xe3d   : > { %v19155_v32 = vpop.permute.xlu1 %19154  ;;  %17609 = vmatprep.mubr.f32.mxu0 %v15081_v31  ;;  %v19171_v24 = vunpack.i.l.bf16 %v19170_v9  ;;  %v19172_v13 = vunpack.i.h.bf16 %v19170_v9 }
 0xe3e   : > { %17610 = vmatmul.mubr.f32.gmra.mrb[184].mxu0 %v15082_v46  ;;  %v19156_v34 = vunpack.i.l.bf16 %v19155_v32  ;;  %v19157_v1 = vunpack.i.h.bf16 %v19155_v32 }
 0xe3f   : > { %17612 = vmatprep.mubr.f32.mxu0 %v15083_v29 }
 0xe40   : > { %v15054_v0 = vsel %vm15025_vm3, %v15021_v48, %v19156_v34  ;;  %v15055_v59 = vsel %vm15025_vm3, %v15022_v11, %v19157_v1  ;;  %v19175_v57 = vpop.permute.xlu0 %19174  ;;  %v19764_v34 = vld [vmem:[%s20246_s3 + $0x20] sm:$0xff] }
 0xe41   : > { %v19160_v40 = vpop.permute.xlu1 %19159  ;;  %v15087_v53 = vsel %vm15058_vm4, %v15054_v0, %v19171_v24  ;;  %v15088_v58 = vsel %vm15058_vm4, %v15055_v59, %v19172_v13  ;;  %v19177_v38 = vunpack.i.h.bf16 %v19175_v57  ;;  %v19176_v2 = vunpack.i.l.bf16 %v19175_v57  ;;  %v19770_v59 = vld [vmem:[%s20246_s3 + $0x50] sm:$0xff]  ;;  %v19771_v57 = vld [vmem:[%s20246_s3 + $0x68] sm:$0xff] }
 0xe42   : > { %v19162_v4 = vunpack.i.h.bf16 %v19160_v40  ;;  %v19161_v18 = vunpack.i.l.bf16 %v19160_v40  ;;  %17613 = vmatmul.mubr.f32.gmra.mrb[186].mxu0 %v15084_v19  ;;  %v19765_v40 = vld [vmem:[%s20246_s3 + $0x38] sm:$0xff] }
 0xe44   : > { %v15085_v56 = vsel %vm15058_vm4, %v15052_v52, %v19161_v18  ;;  %v15086_v8 = vsel %vm15058_vm4, %v15053_v16, %v19162_v4  ;;  %v19767_v4 = vld [vmem:[%s20246_s3 + $0x48] sm:$0xff]  ;;  %v19768_v16 = vld [vmem:[%s20246_s3 + $0x40] sm:$0xff] }
 0xe45   : > { %17615 = vmatprep.mubr.f32.mxu0 %v15085_v56  ;;  %v19165_v33 = vpop.permute.xlu1 %19164 }
 0xe46   : > { %17616 = vmatmul.mubr.f32.gmra.mrb[188].mxu0 %v15086_v8  ;;  %v19167_v6 = vunpack.i.h.bf16 %v19165_v33  ;;  %v19166_v43 = vunpack.i.l.bf16 %v19165_v33 }
 0xe47   : > { %17618 = vmatprep.mubr.f32.mxu0 %v15087_v53 }
 0xe48   : > { %v15023_v62 = vsel %vm1412_vm0, %v25571_v21, %v19166_v43  ;;  %v15024_v17 = vsel %vm1412_vm0, %v25572_v5, %v19167_v6  ;;  %v19772_v5 = vld [vmem:[%s20246_s3 + $0x60] sm:$0xff] }
 0xe49   : > { %v15056_v22 = vsel %vm15025_vm3, %v15023_v62, %v19176_v2  ;;  %v15057_v44 = vsel %vm15025_vm3, %v15024_v17, %v19177_v38 }
 0xe4a   : > { %17619 = vmatmul.mubr.f32.gmra.mrb[190].mxu0 %v15088_v58 }
 0xe6d   : > { %v19180_v25 = vpop.permute.xlu1 %19179 }
 0xe6e   : > { %v19182_v55 = vunpack.i.h.bf16 %v19180_v25  ;;  %v19181_v12 = vunpack.i.l.bf16 %v19180_v25 }
 0xe70   : > { %v15089_v28 = vsel %vm15058_vm4, %v15056_v22, %v19181_v12  ;;  %v15090_v51 = vsel %vm15058_vm4, %v15057_v44, %v19182_v55  ;;  %v19773_v55 = vld [vmem:[%s20246_s3 + $0x78] sm:$0xff]  ;;  %v19774_v44 = vld [vmem:[%s20246_s3 + $0x70] sm:$0xff] }
 0xe71   : > { %17621 = vmatprep.mubr.f32.mxu0 %v15089_v28 }
 0xe72   : > { %17622 = vmatmul.mubr.f32.gmra.mrb[192].mxu0 %v15090_v51 }
 0xecb   : > { %v17578_v7 = vpop.f32.mrb[162].mxu0 }
 0xecc   : > { %v15333_v30 = vadd.f32 %v19759_v60, %v17578_v7  ;;  %v15173_v27 = vpop.f32.mrb[163].mxu0 }
 0xecd   : > { %v15332_v45 = vadd.f32 %v19760_v42, %v15173_v27 }
 0xece   : > { %v15372_v31 = vadd.f32 %v24595_v49, %v15333_v30  ;;  %v19775_v30 = vld [vmem:[%s20246_s3 + $0x88] sm:$0xff] }
 0xecf   : > { %v15371_v46 = vadd.f32 %v24595_v49, %v15332_v45  ;;  %v19776_v45 = vld [vmem:[%s20246_s3 + $0x80] sm:$0xff] }
 0xed0   : > { %15404 = vst [vmem:[%s24603_s23 + $0x8] sm:$0xff] %v15372_v31 }
 0xed1   : > { %15403 = vst [vmem:[%s24603_s23] sm:$0xff] %v15371_v46 }
 0xed4   : > { %v17581_v36 = vpop.f32.mrb[164].mxu0 }
 0xed5   : > { %v15335_v14 = vadd.f32 %v19761_v47, %v17581_v36  ;;  %v15183_v50 = vpop.f32.mrb[165].mxu0 }
 0xed6   : > { %v15334_v32 = vadd.f32 %v19762_v63, %v15183_v50 }
 0xed7   : > { %v15374_v10 = vadd.f32 %v24595_v49, %v15335_v14  ;;  %v19777_v14 = vld [vmem:[%s20246_s3 + $0x98] sm:$0xff] }
 0xed8   : > { %v15373_v23 = vadd.f32 %v24595_v49, %v15334_v32  ;;  %v17584_v29 = vpop.f32.mrb[166].mxu0  ;;  %v19778_v32 = vld [vmem:[%s20246_s3 + $0x90] sm:$0xff] }
 0xed9   : > { %15406 = vst [vmem:[%s24603_s23 + $0x18] sm:$0xff] %v15374_v10  ;;  %v15337_v35 = vadd.f32 %v19763_v61, %v17584_v29  ;;  %v15193_v9 = vpop.f32.mrb[167].mxu0 }
 0xeda   : > { %15405 = vst [vmem:[%s24603_s23 + $0x10] sm:$0xff] %v15373_v23  ;;  %v15336_v15 = vadd.f32 %v19764_v34, %v15193_v9 }
 0xedb   : > { %v15376_v37 = vadd.f32 %v24595_v49, %v15337_v35  ;;  %v19779_v35 = vld [vmem:[%s20246_s3 + $0xa8] sm:$0xff] }
 0xedc   : > { %v15375_v26 = vadd.f32 %v24595_v49, %v15336_v15  ;;  %v17587_v41 = vpop.f32.mrb[168].mxu0  ;;  %v19780_v15 = vld [vmem:[%s20246_s3 + $0xa0] sm:$0xff] }
 0xedd   : > { %15408 = vst [vmem:[%s24603_s23 + $0x28] sm:$0xff] %v15376_v37  ;;  %v15339_v19 = vadd.f32 %v19765_v40, %v17587_v41  ;;  %v15203_v20 = vpop.f32.mrb[169].mxu0 }
 0xede   : > { %15407 = vst [vmem:[%s24603_s23 + $0x20] sm:$0xff] %v15375_v26  ;;  %v15338_v39 = vadd.f32 %v19766_v54, %v15203_v20 }
 0xedf   : > { %v15378_v48 = vadd.f32 %v24595_v49, %v15339_v19  ;;  %v19781_v19 = vld [vmem:[%s20246_s3 + $0xb8] sm:$0xff] }
 0xee0   : > { %v15377_v24 = vadd.f32 %v24595_v49, %v15338_v39  ;;  %v17590_v1 = vpop.f32.mrb[170].mxu0  ;;  %v19782_v39 = vld [vmem:[%s20246_s3 + $0xb0] sm:$0xff] }
 0xee1   : > { %15410 = vst [vmem:[%s24603_s23 + $0x38] sm:$0xff] %v15378_v48  ;;  %v15341_v18 = vadd.f32 %v19767_v4, %v17590_v1  ;;  %v15213_v52 = vpop.f32.mrb[171].mxu0 }
 0xee2   : > { %15409 = vst [vmem:[%s24603_s23 + $0x30] sm:$0xff] %v15377_v24  ;;  %v15340_v0 = vadd.f32 %v19768_v16, %v15213_v52 }
 0xee3   : > { %v15380_v56 = vadd.f32 %v24595_v49, %v15341_v18  ;;  %v19783_v18 = vld [vmem:[%s20246_s3 + $0xc8] sm:$0xff] }
 0xee4   : > { %v15379_v8 = vadd.f32 %v24595_v49, %v15340_v0  ;;  %v19784_v0 = vld [vmem:[%s20246_s3 + $0xc0] sm:$0xff] }
 0xee5   : > { %15412 = vst [vmem:[%s24603_s23 + $0x48] sm:$0xff] %v15380_v56  ;;  %v17593_v13 = vpop.f32.mrb[172].mxu0 }
 0xee6   : > { %15411 = vst [vmem:[%s24603_s23 + $0x40] sm:$0xff] %v15379_v8  ;;  %v15343_v11 = vadd.f32 %v19769_v3, %v17593_v13  ;;  %v15223_v53 = vpop.f32.mrb[173].mxu0 }
 0xee7   : > { %v15342_v58 = vadd.f32 %v19770_v59, %v15223_v53 }
 0xee8   : > { %v15382_v33 = vadd.f32 %v24595_v49, %v15343_v11  ;;  %v19785_v11 = vld [vmem:[%s20246_s3 + $0xd8] sm:$0xff] }
 0xee9   : > { %v15381_v6 = vadd.f32 %v24595_v49, %v15342_v58  ;;  %v17596_v43 = vpop.f32.mrb[174].mxu0  ;;  %v19786_v58 = vld [vmem:[%s20246_s3 + $0xd0] sm:$0xff] }
 0xeea   : > { %15414 = vst [vmem:[%s24603_s23 + $0x58] sm:$0xff] %v15382_v33  ;;  %v15345_v21 = vadd.f32 %v19771_v57, %v17596_v43  ;;  %v15233_v62 = vpop.f32.mrb[175].mxu0 }
 0xeeb   : > { %15413 = vst [vmem:[%s24603_s23 + $0x50] sm:$0xff] %v15381_v6  ;;  %v15344_v17 = vadd.f32 %v19772_v5, %v15233_v62 }
 0xeec   : > { %v15384_v38 = vadd.f32 %v24595_v49, %v15345_v21  ;;  %v19787_v21 = vld [vmem:[%s20246_s3 + $0xe8] sm:$0xff] }
 0xeed   : > { %v15383_v2 = vadd.f32 %v24595_v49, %v15344_v17  ;;  %v19788_v17 = vld [vmem:[%s20246_s3 + $0xe0] sm:$0xff] }
 0xeee   : > { %15416 = vst [vmem:[%s24603_s23 + $0x68] sm:$0xff] %v15384_v38 }
 0xeef   : > { %15415 = vst [vmem:[%s24603_s23 + $0x60] sm:$0xff] %v15383_v2 }
 0xef0   : > { %v17599_v25 = vpop.f32.mrb[176].mxu0 }
 0xef1   : > { %v15347_v12 = vadd.f32 %v19773_v55, %v17599_v25  ;;  %v15243_v22 = vpop.f32.mrb[177].mxu0 }
 0xef2   : > { %v15346_v28 = vadd.f32 %v19774_v44, %v15243_v22 }
 0xef3   : > { %v15386_v51 = vadd.f32 %v24595_v49, %v15347_v12  ;;  %v19789_v12 = vld [vmem:[%s20246_s3 + $0xf8] sm:$0xff] }
 0xef4   : > { %v15385_v7 = vadd.f32 %v24595_v49, %v15346_v28  ;;  %v17602_v60 = vpop.f32.mrb[178].mxu0  ;;  %v19790_v28 = vld [vmem:[%s20246_s3 + $0xf0] sm:$0xff]  ;;  %s19993_s3 = smov [#allocation10]  }
 0xef5   : > { %15418 = vst [vmem:[%s24603_s23 + $0x78] sm:$0xff] %v15386_v51  ;;  %v15349_v27 = vadd.f32 %v19775_v30, %v17602_v60  ;;  %v15253_v42 = vpop.f32.mrb[179].mxu0  ;;  %s19909_s21 = sshll.u32 %s19993_s3, 4  ;;  %s19910_s21 = int_to_ptr.vmem [resolvable:$false] %s19909_s21 }
 0xef6   : > { %15417 = vst [vmem:[%s24603_s23 + $0x70] sm:$0xff] %v15385_v7  ;;  %v15348_v31 = vadd.f32 %v19776_v45, %v15253_v42  ;;  %s19911_s18 = scalar_lea.vmem %s19910_s21, 8192  ;;  %p19912_p12 = scmp.lt.s32.totalorder %s24701_s26, %s19910_s21 }
 0xef7   : > { %v15388_v46 = vadd.f32 %v24595_v49, %v15349_v27  ;;  %p19913_p2 = scmp.lt.s32.totalorder %s19911_s18, %s19905_s12 }
 0xef8   : > { %v15387_v36 = vadd.f32 %v24595_v49, %v15348_v31 }
 0xef9   : > { %15420 = vst [vmem:[%s24603_s23 + $0x88] sm:$0xff] %v15388_v46  ;;  %p19914_p1 = por %p19913_p2, %p19912_p12 }
 0xefa   : > { %15419 = vst [vmem:[%s24603_s23 + $0x80] sm:$0xff] %v15387_v36 }
 0xefb   : > { %p19915_p4 = pnand %p19914_p1, %p19908_p7 }
 0xefd   : > { %v17605_v47 = vpop.f32.mrb[180].mxu0 }
 0xefe   : > { %v15351_v50 = vadd.f32 %v19777_v14, %v17605_v47  ;;  %v15263_v63 = vpop.f32.mrb[181].mxu0 }
 0xeff   : > { %v15350_v10 = vadd.f32 %v19778_v32, %v15263_v63 }
 0xf00   : > { %v15390_v23 = vadd.f32 %v24595_v49, %v15351_v50 }
 0xf01   : > { %v15389_v29 = vadd.f32 %v24595_v49, %v15350_v10 }
 0xf02   : > { %15422 = vst [vmem:[%s24603_s23 + $0x98] sm:$0xff] %v15390_v23 }
 0xf03   : > { %15421 = vst [vmem:[%s24603_s23 + $0x90] sm:$0xff] %v15389_v29 }
 0xf04   : > { %v17608_v61 = vpop.f32.mrb[182].mxu0 }
 0xf05   : > { %v15353_v9 = vadd.f32 %v19779_v35, %v17608_v61  ;;  %v15273_v34 = vpop.f32.mrb[183].mxu0 }
 0xf06   : > { %v15352_v37 = vadd.f32 %v19780_v15, %v15273_v34 }
 0xf07   : > { %v15392_v26 = vadd.f32 %v24595_v49, %v15353_v9 }
 0xf08   : > { %v15391_v41 = vadd.f32 %v24595_v49, %v15352_v37 }
 0xf09   : > { %15424 = vst [vmem:[%s24603_s23 + $0xa8] sm:$0xff] %v15392_v26 }
 0xf0a   : > { %15423 = vst [vmem:[%s24603_s23 + $0xa0] sm:$0xff] %v15391_v41 }
 0xf11   : > { %v17611_v40 = vpop.f32.mrb[184].mxu0 }
 0xf12   : > { %v15355_v20 = vadd.f32 %v19781_v19, %v17611_v40  ;;  %v15283_v54 = vpop.f32.mrb[185].mxu0 }
 0xf13   : > { %v15354_v48 = vadd.f32 %v19782_v39, %v15283_v54 }
 0xf14   : > { %v15394_v24 = vadd.f32 %v24595_v49, %v15355_v20 }
 0xf15   : > { %v15393_v1 = vadd.f32 %v24595_v49, %v15354_v48  ;;  %v17614_v4 = vpop.f32.mrb[186].mxu0 }
 0xf16   : > { %15426 = vst [vmem:[%s24603_s23 + $0xb8] sm:$0xff] %v15394_v24  ;;  %v15357_v52 = vadd.f32 %v19783_v18, %v17614_v4  ;;  %v15293_v16 = vpop.f32.mrb[187].mxu0 }
 0xf17   : > { %15425 = vst [vmem:[%s24603_s23 + $0xb0] sm:$0xff] %v15393_v1  ;;  %v15356_v56 = vadd.f32 %v19784_v0, %v15293_v16 }
 0xf18   : > { %v15396_v8 = vadd.f32 %v24595_v49, %v15357_v52 }
 0xf19   : > { %v15395_v13 = vadd.f32 %v24595_v49, %v15356_v56  ;;  %v17617_v3 = vpop.f32.mrb[188].mxu0 }
 0xf1a   : > { %15428 = vst [vmem:[%s24603_s23 + $0xc8] sm:$0xff] %v15396_v8  ;;  %v15359_v53 = vadd.f32 %v19785_v11, %v17617_v3  ;;  %v15303_v59 = vpop.f32.mrb[189].mxu0 }
 0xf1b   : > { %15427 = vst [vmem:[%s24603_s23 + $0xc0] sm:$0xff] %v15395_v13  ;;  %v15358_v33 = vadd.f32 %v19786_v58, %v15303_v59 }
 0xf1c   : > { %v15398_v6 = vadd.f32 %v24595_v49, %v15359_v53 }
 0xf1d   : > { %v15397_v43 = vadd.f32 %v24595_v49, %v15358_v33  ;;  %v17620_v57 = vpop.f32.mrb[190].mxu0 }
 0xf1e   : > { %15430 = vst [vmem:[%s24603_s23 + $0xd8] sm:$0xff] %v15398_v6  ;;  %v15361_v62 = vadd.f32 %v19787_v21, %v17620_v57  ;;  %v15313_v5 = vpop.f32.mrb[191].mxu0 }
 0xf1f   : > { %15429 = vst [vmem:[%s24603_s23 + $0xd0] sm:$0xff] %v15397_v43  ;;  %v15360_v38 = vadd.f32 %v19788_v17, %v15313_v5 }
 0xf20   : > { %v15400_v2 = vadd.f32 %v24595_v49, %v15361_v62 }
 0xf21   : > { %v15399_v25 = vadd.f32 %v24595_v49, %v15360_v38 }
 0xf22   : > { %15432 = vst [vmem:[%s24603_s23 + $0xe8] sm:$0xff] %v15400_v2 }
 0xf23   : > { %15431 = vst [vmem:[%s24603_s23 + $0xe0] sm:$0xff] %v15399_v25 }
 0xf45   : > { %v17623_v55 = vpop.f32.mrb[192].mxu0 }
 0xf46   : > { %v15363_v22 = vadd.f32 %v19789_v12, %v17623_v55  ;;  %v15323_v44 = vpop.f32.mrb[193].mxu0 }
 0xf47   : > { %v15362_v51 = vadd.f32 %v19790_v28, %v15323_v44 }
 0xf48   : > { %v15402_v7 = vadd.f32 %v24595_v49, %v15363_v22 }
 0xf49   : > { %v15401_v60 = vadd.f32 %v24595_v49, %v15362_v51 }
 0xf4a   : > { %15434 = vst [vmem:[%s24603_s23 + $0xf8] sm:$0xff] %v15402_v7 }
 0xf4b   : > { %15433 = vst [vmem:[%s24603_s23 + $0xf0] sm:$0xff] %v15401_v60 }
 0xf4c   : > { %19918 = shalt.err (!%p19915_p4)
}
 0xf4d   : > { %s19919_s27 = scalar_lea.hbm %s24699_s14, 4096  ;;  %s19923_s15 = scalar_lea.hbm %s24756_s8, 8192 }
 0xf4e   : > { %p19920_p9 = scmp.ne.s32.totalorder %s24699_s14, %s19919_s27  ;;  %p19924_p8 = scmp.lt.u32.totalorder %s24699_s14, %s24756_s8 }
 0xf4f   : > { %p19925_p13 = scmp.lt.u32.totalorder %s19923_s15, %s19919_s27  ;;  %p19927_p10 = scmp.lt.u32.totalorder %s19919_s27, %s24699_s14 }
 0xf50   : > { %p19921_p0 = pnand %p19920_p9, %p20189_p5 }
 0xf51   : > { %p19926_p6 = por %p19925_p13, %p19924_p8 }
 0xf52   : > { %p19922_p11 = pneg %p19921_p0 }
 0xf53   : > { %p19928_p3 = por %p19927_p10, %p19926_p6 }
 0xf55   : > { %p19929_p7 = pnand %p19928_p3, %p19922_p11 }
 0xf57   : > { %19932 = shalt.err (!%p19929_p7)
}
 0xf58   : > { %s19994_s25 = smov 128   ;;  %s19995_s11 = smov 8  }
 0xf59   : > { %18390 = dma.vmem_to_hbm [thread:$0]  (%p20189_p5), %s24701_s26, 4096, %s24699_s14, %s15436_s9, %s19994_s25, %s19994_s25, %s19995_s11  }
 0xf5a PF: > { %s25573_s13 = sld [smem:[#allocation15_spill]]  ;;  %s25574_s12 = sld [smem:[#allocation16_spill]] }
 0xf5b   : > { %p25576_p2 = scmp.ge.s32.totalorder %s19979_s30, 2 }
 0xf60   : > { %s15464_s3 = sand.u32 1, %s25573_s13   ;;  %p25575_p12 = scmp.ne.s32.totalorder %s25574_s12, 0 }
 0xf61   : > { %s15465_s21 = scalar_lea.sflag [#allocation4], %s15464_s3 }
 0xf62   : > { %p18407_p1 = pnand %p25576_p2, %p25575_p12 }
 0xf64   : > { %19962 = dma.done.wait (!%p18407_p1), %s15465_s21, 4096  }
 0xf65   : > { %19964 = vsyncadd (!%p18407_p1), %s15465_s21, 4294963200  ;;  %p23_p4 = scmp.ge.s32.totalorder %s20154_s22, 4   ;;  %s25577_s27 = smov %s19971_s28 }
 0xf66   : > { %s25578_s28 = smov %s19975_s29  ;;  %s25579_s29 = smov %s20185_s17 }
 0xf67   : > { %s25580_s30 = smov %s20154_s22  ;;  %25 = sbr.rel (!%p23_p4) target bundleno = 9 (0x9), region = 112 }
 0xf6e   :  { %15470 = vsyncpa [#allocation3], 1 }
 0xf6f   :  { %15472 = vsyncpa [#allocation3 + $0x1], 1 }
 0xf70   :  { %15473 = vsyncpa [#allocation6], 1 }
 0xf71   :  { %15474 = vsyncpa [#allocation9], 1 }
 0xf72   :  { %15475 = vsyncpa [#allocation4], 1 }
 0xf73   :  { %15477 = vsyncpa [#allocation4 + $0x1], 1 }

</bundles_post_ra>
